<compile_context>
chip_gen: v5e
topology: v5e:2x2
jax: 0.10.0
libtpu: 0.0.40
codegen_flags: <defaults>
</compile_context>

<pallas_src>
import functools

import jax
import jax.numpy as jnp
from jax import lax
from jax.experimental import pallas as pl
from jax.experimental.pallas import tpu as pltpu


# ---------------------------------------------------------------------------
# Kernels
# ---------------------------------------------------------------------------

def mlp_kernel_bf16(x_ref, w1_ref, b1_ref, w2_ref, b2_ref, w3_ref, b3_ref, o_ref):
    """v6e/v7x path: bf16 elementwise (bias+ReLU fused with downcast), layer 3 on MXU."""
    xb = x_ref[...].astype(jnp.bfloat16)                       # (bt, in)
    # Layer 1: contract last dims of (h1, in) and (bt, in) -> (h1, bt); f32 MXU acc.
    h1 = lax.dot_general(w1_ref[...], xb, (((1,), (1,)), ((), ())),
                         preferred_element_type=jnp.float32)
    h1 = jnp.maximum(h1.astype(jnp.bfloat16) + b1_ref[...], 0)  # bf16 VALU
    # Layer 2: (h2, h1) @ (h1, bt) -> (h2, bt).
    h2 = jnp.dot(w2_ref[...], h1, preferred_element_type=jnp.float32)
    h2 = jnp.maximum(h2.astype(jnp.bfloat16) + b2_ref[...], 0)  # bf16 VALU
    # Layer 3 on the (otherwise idle) MXU: (8, h2) @ (h2, bt) -> (8, bt); row 0 is W3.
    o3 = jnp.dot(w3_ref[...], h2, preferred_element_type=jnp.float32)
    o_ref[...] = (o3[0:1, :] + b3_ref[...]).astype(o_ref.dtype)


def mlp_kernel_f32vpu(x_ref, w1_ref, b1_ref, w2_ref, b2_ref, w3t_ref, b3_ref, o_ref):
    """v5e path: f32 VPU elementwise, layer 3 as VPU multiply + XLU reduce (MXU-bound chip)."""
    xb = x_ref[...].astype(jnp.bfloat16)                       # (bt, in)
    h1 = lax.dot_general(w1_ref[...], xb, (((1,), (1,)), ((), ())),
                         preferred_element_type=jnp.float32)    # (h1, bt)
    h1 = jnp.maximum(h1 + b1_ref[...], 0.0)                     # f32 VPU
    h2 = jnp.dot(w2_ref[...], h1.astype(jnp.bfloat16),
                 preferred_element_type=jnp.float32)            # (h2, bt)
    h2 = jnp.maximum(h2 + b2_ref[...], 0.0)                     # f32 VPU
    out = jnp.sum(h2 * w3t_ref[...], axis=0, keepdims=True) + b3_ref[...]
    o_ref[...] = out.astype(o_ref.dtype)


# ---------------------------------------------------------------------------
# Wrapper
# ---------------------------------------------------------------------------

def _round_up(n, m):
    return ((n + m - 1) // m) * m


def _has_bf16_valu():
    """v6e/v7x have bf16 VALU; v2..v5 do not (keep the f32 VPU path there)."""
    try:
        kind = jax.devices()[0].device_kind.lower()
    except Exception:
        return True
    return not any(tag in kind for tag in ("v2", "v3", "v4", "v5"))


def _choose_batch_tile(B, batch_tile):
    """Multiple of 128; big enough to amortize step overhead; >=2 tiles when possible."""
    B128 = _round_up(max(B, 1), 128)
    bt = min(_round_up(batch_tile, 128), B128)
    if bt >= B128 and B128 >= 256:
        # Keep at least 2 grid steps so both v7x TensorCores get a batch tile.
        bt = _round_up((B128 + 1) // 2, 128)
    return bt


def prepare_params(params, *, use_bf16_elementwise):
    """One-time conversion of PyTorch-layout f32 params to kernel layout/dtypes.

    params: (w1 (1024,in), b1 (1024,), w2 (512,1024), b2 (512,), w3 (1,512), b3 (1,))
    """
    w1, b1, w2, b2, w3, b3 = params
    h1_dim, _ = w1.shape
    h2_dim = w2.shape[0]
    out_dim = w3.shape[0]
    assert out_dim == 1, "kernel specialised for the module default output_dim=1"
    # TODO(synk): for output_dim > 1, generalise the last layer to a full MXU dot.

    w1b = jnp.asarray(w1, jnp.bfloat16)                         # MXU LHS, (out,in) as-is
    w2b = jnp.asarray(w2, jnp.bfloat16)
    b3c = jnp.asarray(b3, jnp.float32).reshape(1, 1)
    if use_bf16_elementwise:
        b1c = jnp.asarray(b1, jnp.bfloat16).reshape(h1_dim, 1)
        b2c = jnp.asarray(b2, jnp.bfloat16).reshape(h2_dim, 1)
        # Pad W3 (1, h2) to an (8, h2) MXU LHS; rows 1..7 are zero and ignored.
        w3c = jnp.zeros((8, h2_dim), jnp.bfloat16).at[0].set(
            jnp.asarray(w3, jnp.bfloat16).reshape(h2_dim))
    else:
        b1c = jnp.asarray(b1, jnp.float32).reshape(h1_dim, 1)
        b2c = jnp.asarray(b2, jnp.float32).reshape(h2_dim, 1)
        w3c = jnp.asarray(w3, jnp.float32).reshape(1, h2_dim).T  # (h2, 1) column
    return (w1b, b1c, w2b, b2c, w3c, b3c)


@functools.partial(jax.jit, static_argnames=("batch_tile", "use_bf16_elementwise"))
def material_property_mlp(x, kparams, *, batch_tile=1024, use_bf16_elementwise=True):
    """x: (B, input_dim) float32 -> (B, 1) float32.  kparams from prepare_params()."""
    w1b, b1c, w2b, b2c, w3c, b3c = kparams
    B, in_dim = x.shape
    h1_dim = w1b.shape[0]
    h2_dim = w2b.shape[0]
    out_dim = 1

    bt = _choose_batch_tile(B, batch_tile)
    B_pad = _round_up(B, bt)

    x = x.astype(jnp.float32)
    if B_pad != B:
        x = jnp.pad(x, ((0, B_pad - B), (0, 0)))                # only a batch zero-pad

    grid = (B_pad // bt,)
    kernel = mlp_kernel_bf16 if use_bf16_elementwise else mlp_kernel_f32vpu

    flops = 2 * B_pad * (in_dim * h1_dim + h1_dim * h2_dim + h2_dim * out_dim)
    bytes_accessed = (x.size * 4 + w1b.size * 2 + w2b.size * 2
                      + b1c.size * b1c.dtype.itemsize + b2c.size * b2c.dtype.itemsize
                      + w3c.size * w3c.dtype.itemsize + b3c.size * 4
                      + B_pad * out_dim * 4)

    out = pl.pallas_call(
        kernel,
        out_shape=jax.ShapeDtypeStruct((1, B_pad), jnp.float32),
        grid_spec=pltpu.PrefetchScalarGridSpec(
            num_scalar_prefetch=0,
            grid=grid,
            in_specs=[
                pl.BlockSpec((bt, in_dim),     lambda i: (i, 0)),   # x tile, natural layout
                pl.BlockSpec((h1_dim, in_dim), lambda i: (0, 0)),   # W1 (resident, bf16)
                pl.BlockSpec((h1_dim, 1),      lambda i: (0, 0)),   # b1
                pl.BlockSpec((h2_dim, h1_dim), lambda i: (0, 0)),   # W2 (resident, bf16)
                pl.BlockSpec((h2_dim, 1),      lambda i: (0, 0)),   # b2
                pl.BlockSpec(w3c.shape,        lambda i: (0, 0)),   # W3 (padded LHS / column)
                pl.BlockSpec((1, 1),           lambda i: (0, 0)),   # b3
            ],
            out_specs=pl.BlockSpec((1, bt), lambda i: (0, i)),      # lane-dense output row
        ),
        compiler_params=pltpu.CompilerParams(
            dimension_semantics=("parallel",),     # batch tiles shard across TCs on v7x
            vmem_limit_bytes=(48 * 1024 * 1024) if bt >= 512 else None,
        ),
        cost_estimate=pl.CostEstimate(flops=flops, transcendentals=0,
                                      bytes_accessed=bytes_accessed),
    )(x, w1b, b1c, w2b, b2c, w3c, b3c)

    return out[0, :B].reshape(B, out_dim)


# ---------------------------------------------------------------------------
# Reference / init / demo
# ---------------------------------------------------------------------------

def init_params(key, input_dim, output_dim=1):
    """Deterministic init matching PyTorch nn.Linear: weight (out, in), bias (out,)."""
    dims = [(1024, input_dim), (512, 1024), (output_dim, 512)]
    params = []
    for out_f, in_f in dims:
        key, kw, kb = jax.random.split(key, 3)
        bound = float(in_f) ** -0.5
        w = jax.random.uniform(kw, (out_f, in_f), jnp.float32, -bound, bound)
        b = jax.random.uniform(kb, (out_f,), jnp.float32, -bound, bound)
        params += [w, b]
    return tuple(params)


def reference_mlp(x, params):
    """Pure-JAX f32 reference with PyTorch weight layout."""
    w1, b1, w2, b2, w3, b3 = params
    h1 = jnp.maximum(x @ w1.T + b1, 0.0)
    h2 = jnp.maximum(h1 @ w2.T + b2, 0.0)
    return h2 @ w3.T + b3


if __name__ == "__main__":
    key = jax.random.PRNGKey(0)
    kx, kp = jax.random.split(key)

    batch, input_dim, output_dim = 8, 32, 1
    x = jax.random.normal(kx, (batch, input_dim), jnp.float32)
    params = init_params(kp, input_dim, output_dim)

    use_bf16 = _has_bf16_valu()                 # v6e/v7x -> True, v5e and older -> False
    kparams = prepare_params(params, use_bf16_elementwise=use_bf16)

    out = material_property_mlp(x, kparams, use_bf16_elementwise=use_bf16)
    out = jax.block_until_ready(out)

    ref = reference_mlp(x, params)
    assert out.shape == (batch, output_dim)
    # bf16 MXU operands (and bf16 bias/ReLU on v6e/v7x) -> small drift vs f32 reference.
    max_diff = jnp.max(jnp.abs(out - ref))
    tol = 3e-2 * (1.0 + jnp.max(jnp.abs(ref)))  # scale-aware, robust near zero
    assert max_diff <= tol, f"mismatch vs reference: {max_diff} (tol {tol})"

    print("KERNEL_OK")
</pallas_src>

<mosaic_0001>
module attributes {stable_mosaic.version = 11 : i64} {
  func.func @mlp_kernel_bf16(%arg0: i32, %arg1: memref<128x32xf32, #tpu.memory_space<vmem>>, %arg2: memref<1024x32xbf16, #tpu.memory_space<vmem>>, %arg3: memref<1024x1xbf16, #tpu.memory_space<vmem>>, %arg4: memref<512x1024xbf16, #tpu.memory_space<vmem>>, %arg5: memref<512x1xbf16, #tpu.memory_space<vmem>>, %arg6: memref<8x512xbf16, #tpu.memory_space<vmem>>, %arg7: memref<1x1xf32, #tpu.memory_space<vmem>>, %arg8: memref<1x128xf32, #tpu.memory_space<vmem>>) attributes {dimension_semantics = [#tpu.dimension_semantics<parallel>], iteration_bounds = array<i64: 1>, scalar_prefetch = 0 : i64, scratch_operands = 0 : i64, tpu.core_type = #tpu.core_type<tc>, window_params = [{transform_indices = @transform_0, window_bounds = array<i64: 128, 32>}, {pipeline_mode = #tpu.pipeline_mode<synchronous>, transform_indices = @transform_1, window_bounds = array<i64: 1024, 32>}, {pipeline_mode = #tpu.pipeline_mode<synchronous>, transform_indices = @transform_2, window_bounds = array<i64: 1024, 1>}, {pipeline_mode = #tpu.pipeline_mode<synchronous>, transform_indices = @transform_3, window_bounds = array<i64: 512, 1024>}, {pipeline_mode = #tpu.pipeline_mode<synchronous>, transform_indices = @transform_4, window_bounds = array<i64: 512, 1>}, {pipeline_mode = #tpu.pipeline_mode<synchronous>, transform_indices = @transform_5, window_bounds = array<i64: 8, 512>}, {pipeline_mode = #tpu.pipeline_mode<synchronous>, transform_indices = @transform_6, window_bounds = array<i64: 1, 1>}, {transform_indices = @transform_7, window_bounds = array<i64: 1, 128>}]} {
    %c0 = arith.constant 0 : index
    %c0_0 = arith.constant 0 : index
    %0 = vector.load %arg1[%c0, %c0_0] : memref<128x32xf32, #tpu.memory_space<vmem>>, vector<128x32xf32>
    %1 = arith.truncf %0 : vector<128x32xf32> to vector<128x32xbf16>
    %c0_1 = arith.constant 0 : index
    %c0_2 = arith.constant 0 : index
    %2 = vector.load %arg2[%c0_1, %c0_2] : memref<1024x32xbf16, #tpu.memory_space<vmem>>, vector<1024x32xbf16>
    %cst = arith.constant dense<0.000000e+00> : vector<1024x128xf32>
    %3 = tpu.matmul %2, %1, %cst {dimension_numbers = #tpu.dot_dimension_numbers<[1], [1], [0], [0], [0, 0, 1, 0], [], []>} : vector<1024x32xbf16>, vector<128x32xbf16>, vector<1024x128xf32> -> vector<1024x128xf32>
    %4 = arith.truncf %3 : vector<1024x128xf32> to vector<1024x128xbf16>
    %c0_3 = arith.constant 0 : index
    %c0_4 = arith.constant 0 : index
    %5 = vector.load %arg3[%c0_3, %c0_4] : memref<1024x1xbf16, #tpu.memory_space<vmem>>, vector<1024x1xbf16>
    %6 = vector.broadcast %5 : vector<1024x1xbf16> to vector<1024x128xbf16>
    %7 = arith.addf %4, %6 : vector<1024x128xbf16>
    %cst_5 = arith.constant 0.000000e+00 : bf16
    %8 = vector.broadcast %cst_5 : bf16 to vector<1024x128xbf16>
    %9 = arith.maximumf %7, %8 : vector<1024x128xbf16>
    %c0_6 = arith.constant 0 : index
    %c0_7 = arith.constant 0 : index
    %10 = vector.load %arg4[%c0_6, %c0_7] : memref<512x1024xbf16, #tpu.memory_space<vmem>>, vector<512x1024xbf16>
    %cst_8 = arith.constant dense<0.000000e+00> : vector<512x128xf32>
    %11 = tpu.matmul %10, %9, %cst_8 {dimension_numbers = #tpu.dot_dimension_numbers<[1], [0], [0], [1], [0, 0, 1, 1], [], []>} : vector<512x1024xbf16>, vector<1024x128xbf16>, vector<512x128xf32> -> vector<512x128xf32>
    %12 = arith.truncf %11 : vector<512x128xf32> to vector<512x128xbf16>
    %c0_9 = arith.constant 0 : index
    %c0_10 = arith.constant 0 : index
    %13 = vector.load %arg5[%c0_9, %c0_10] : memref<512x1xbf16, #tpu.memory_space<vmem>>, vector<512x1xbf16>
    %14 = vector.broadcast %13 : vector<512x1xbf16> to vector<512x128xbf16>
    %15 = arith.addf %12, %14 : vector<512x128xbf16>
    %cst_11 = arith.constant 0.000000e+00 : bf16
    %16 = vector.broadcast %cst_11 : bf16 to vector<512x128xbf16>
    %17 = arith.maximumf %15, %16 : vector<512x128xbf16>
    %c0_12 = arith.constant 0 : index
    %c0_13 = arith.constant 0 : index
    %18 = vector.load %arg6[%c0_12, %c0_13] : memref<8x512xbf16, #tpu.memory_space<vmem>>, vector<8x512xbf16>
    %cst_14 = arith.constant dense<0.000000e+00> : vector<8x128xf32>
    %19 = tpu.matmul %18, %17, %cst_14 {dimension_numbers = #tpu.dot_dimension_numbers<[1], [0], [0], [1], [0, 0, 1, 1], [], []>} : vector<8x512xbf16>, vector<512x128xbf16>, vector<8x128xf32> -> vector<8x128xf32>
    %20 = vector.extract_strided_slice %19 {offsets = [0, 0], sizes = [1, 128], strides = [1, 1]} : vector<8x128xf32> to vector<1x128xf32>
    %c0_15 = arith.constant 0 : index
    %c0_16 = arith.constant 0 : index
    %21 = vector.load %arg7[%c0_15, %c0_16] : memref<1x1xf32, #tpu.memory_space<vmem>>, vector<1x1xf32>
    %22 = vector.broadcast %21 : vector<1x1xf32> to vector<1x128xf32>
    %23 = arith.addf %20, %22 : vector<1x128xf32>
    %c0_17 = arith.constant 0 : index
    %c0_18 = arith.constant 0 : index
    %24 = vector.load %arg8[%c0_17, %c0_18] : memref<1x128xf32, #tpu.memory_space<vmem>>, vector<1x128xf32>
    tpu.vector_store %arg8[%c0_17, %c0_18], %23 {strides = array<i32>} : memref<1x128xf32, #tpu.memory_space<vmem>>, vector<1x128xf32>,
    return
  }
  func.func @transform_0(%arg0: i32) -> (i32, i32) {
    %c0_i32 = arith.constant 0 : i32
    %c0_i32_0 = arith.constant 0 : i32
    return %arg0, %c0_i32 : i32, i32
  }
  func.func @transform_1(%arg0: i32) -> (i32, i32) {
    %c0_i32 = arith.constant 0 : i32
    %c0_i32_0 = arith.constant 0 : i32
    %c0_i32_1 = arith.constant 0 : i32
    return %c0_i32, %c0_i32_0 : i32, i32
  }
  func.func @transform_2(%arg0: i32) -> (i32, i32) {
    %c0_i32 = arith.constant 0 : i32
    %c0_i32_0 = arith.constant 0 : i32
    %c0_i32_1 = arith.constant 0 : i32
    return %c0_i32, %c0_i32_0 : i32, i32
  }
  func.func @transform_3(%arg0: i32) -> (i32, i32) {
    %c0_i32 = arith.constant 0 : i32
    %c0_i32_0 = arith.constant 0 : i32
    %c0_i32_1 = arith.constant 0 : i32
    return %c0_i32, %c0_i32_0 : i32, i32
  }
  func.func @transform_4(%arg0: i32) -> (i32, i32) {
    %c0_i32 = arith.constant 0 : i32
    %c0_i32_0 = arith.constant 0 : i32
    %c0_i32_1 = arith.constant 0 : i32
    return %c0_i32, %c0_i32_0 : i32, i32
  }
  func.func @transform_5(%arg0: i32) -> (i32, i32) {
    %c0_i32 = arith.constant 0 : i32
    %c0_i32_0 = arith.constant 0 : i32
    %c0_i32_1 = arith.constant 0 : i32
    return %c0_i32, %c0_i32_0 : i32, i32
  }
  func.func @transform_6(%arg0: i32) -> (i32, i32) {
    %c0_i32 = arith.constant 0 : i32
    %c0_i32_0 = arith.constant 0 : i32
    %c0_i32_1 = arith.constant 0 : i32
    return %c0_i32, %c0_i32_0 : i32, i32
  }
  func.func @transform_7(%arg0: i32) -> (i32, i32) {
    %c0_i32 = arith.constant 0 : i32
    %c0_i32_0 = arith.constant 0 : i32
    return %c0_i32, %arg0 : i32, i32
  }
}

</mosaic_0001>

<bundles_post_ra>
// kernel: material_property_mlp.1
= control target key start
LH: loop header
LB: loop body
LE: loop exit
PB: predicated region body
PF: predicated region fallthrough
CT: control target
= control target key end

     0   :  { %s12203_s0 = inlined_call_operand.vmem [shape: f32[128,32], index: 0, kind: input, shape index: {}]   ;;  %s12204_s1 = inlined_call_operand.vmem [shape: bf16[1024,32], index: 1, kind: input, shape index: {}]   ;;  %s12205_s2 = inlined_call_operand.vmem [shape: bf16[1024,1], index: 2, kind: input, shape index: {}]   ;;  %s12206_s3 = inlined_call_operand.hbm [shape: bf16[512,1024], index: 3, kind: input, shape index: {}]   ;;  %s12207_s4 = inlined_call_operand.vmem [shape: bf16[512,1], index: 4, kind: input, shape index: {}]   ;;  %s12208_s5 = inlined_call_operand.vmem [shape: bf16[8,512], index: 5, kind: input, shape index: {}]   ;;  %s12209_s6 = inlined_call_operand.<no memory space> [shape: f32[1,1], index: 6, kind: input, shape index: {}]   ;;  %s12210_s7 = inlined_call_operand.vmem [shape: f32[1,128], index: 7, kind: output, shape index: {}]  }
   0x1   :  { %v12_v0 = vstv %s12209_s6 }
   0x2   :  { %13 = vst [vmem:[#allocation2] sm:$0x1] %v12_v0 }
   0x3   :  { %14 = vsyncpa [#allocation4], 0  ;;  %s25_s28 = sshll.u32 %s12206_s3, 4  ;;  %s9106_s29 = smov [#allocation3]   ;;  %s26_s28 = int_to_ptr.hbm [resolvable:$true] %s25_s28 }
   0x4   :  { %s27_s30 = sshll.u32 %s9106_s29, 4  ;;  %s9107_s8 = smov 512   ;;  %s28_s30 = int_to_ptr.vmem [resolvable:$true] %s27_s30 }
   0x5   :  { %s9108_s9 = smov 32  }
   0x6   :  { %33 = dma.hbm_to_vmem [thread:$0]  %s26_s28, 32768, %s28_s30, [#allocation4], %s9107_s8, %s9107_s8, %s9108_s9  }
   0x7   :  { %9104 = dma.done.wait [#allocation4], 32768  }
   0x8   :  { %9105 = vsyncadd [#allocation4], 4294934528  ;;  %v9109_v1 = vmov 0   ;;  %v1220_v2 = vld [vmem:[%s12205_s2 + $0x78] sm:$0xf]  ;;  %v58_v3 = vld [vmem:[%s12203_s0 + $0x70] sm:$0xff] }
   0x9   :  { %9077 = vset.pattern.permute.xlu0 %v9109_v1  ;;  %9078 = vset.pattern.permute.xlu1 %v9109_v1  ;;  %v59_v4 = vld [vmem:[%s12203_s0 + $0x78] sm:$0xff]  ;;  %vm516_vm0 = vcmask 261120   ;;  %v56_v7 = vld [vmem:[%s12203_s0 + $0x60] sm:$0xff]  ;;  %v57_v8 = vld [vmem:[%s12203_s0 + $0x68] sm:$0xff] }
   0xa   :  { %9079 = vset.pattern.permute.xlu2 %v9109_v1  ;;  %1590 = vperm.xlu0 %9077, %v1220_v2   ;;  %v67_v5 = vpack.c.bf16 %v59_v4, %v58_v3  ;;  %v1204_v6 = vld [vmem:[%s12205_s2 + $0x38] sm:$0xf]  ;;  %v66_v10 = vpack.c.bf16 %v57_v8, %v56_v7  ;;  %v1221_v11 = vld [vmem:[%s12205_s2 + $0x7c] sm:$0xf]  ;;  %v1218_v13 = vld [vmem:[%s12205_s2 + $0x70] sm:$0xf] }
   0xb   :  { %1446 = vperm.xlu1 %9078, %v1204_v6   ;;  %v1205_v12 = vld [vmem:[%s12205_s2 + $0x3c] sm:$0xf]  ;;  %1572 = vperm.xlu2 %9079, %v1218_v13   ;;  %v54_v15 = vld [vmem:[%s12203_s0 + $0x50] sm:$0xff]  ;;  %v52_v22 = vld [vmem:[%s12203_s0 + $0x40] sm:$0xff] }
   0xc   :  { %v731_v9 = vsel %vm516_vm0, %v67_v5, 0  ;;  %v728_v14 = vsel %vm516_vm0, %v66_v10, 0  ;;  %v55_v16 = vld [vmem:[%s12203_s0 + $0x58] sm:$0xff]  ;;  %v1219_v18 = vld [vmem:[%s12205_s2 + $0x74] sm:$0xf]  ;;  %v53_v23 = vld [vmem:[%s12203_s0 + $0x48] sm:$0xff] }
   0xd   :  { %733 = vmatpush.bf16.xpose.msra.mxu0 %v731_v9  ;;  %v65_v17 = vpack.c.bf16 %v55_v16, %v54_v15  ;;  %v1202_v19 = vld [vmem:[%s12205_s2 + $0x30] sm:$0xf]  ;;  %v1203_v20 = vld [vmem:[%s12205_s2 + $0x34] sm:$0xf]  ;;  %v64_v24 = vpack.c.bf16 %v53_v23, %v52_v22  ;;  %v1216_v25 = vld [vmem:[%s12205_s2 + $0x68] sm:$0xf] }
   0xe   :  { %v1217_v26 = vld [vmem:[%s12205_s2 + $0x6c] sm:$0xf]  ;;  %v1200_v27 = vld [vmem:[%s12205_s2 + $0x28] sm:$0xf]  ;;  %v50_v29 = vld [vmem:[%s12203_s0 + $0x30] sm:$0xff] }
   0xf   :  { %v725_v21 = vsel %vm516_vm0, %v65_v17, 0  ;;  %v722_v28 = vsel %vm516_vm0, %v64_v24, 0  ;;  %v51_v30 = vld [vmem:[%s12203_s0 + $0x38] sm:$0xff]  ;;  %v1201_v32 = vld [vmem:[%s12205_s2 + $0x2c] sm:$0xf]  ;;  %v48_v36 = vld [vmem:[%s12203_s0 + $0x20] sm:$0xff] }
  0x10   :  { %v63_v31 = vpack.c.bf16 %v51_v30, %v50_v29  ;;  %v1214_v33 = vld [vmem:[%s12205_s2 + $0x60] sm:$0xf]  ;;  %v1215_v34 = vld [vmem:[%s12205_s2 + $0x64] sm:$0xf]  ;;  %v49_v37 = vld [vmem:[%s12203_s0 + $0x28] sm:$0xff] }
  0x11   :  { %v62_v38 = vpack.c.bf16 %v49_v37, %v48_v36  ;;  %v1198_v39 = vld [vmem:[%s12205_s2 + $0x20] sm:$0xf]  ;;  %v1199_v40 = vld [vmem:[%s12205_s2 + $0x24] sm:$0xf]  ;;  %v1212_v41 = vld [vmem:[%s12205_s2 + $0x58] sm:$0xf] }
  0x12   :  { %1599 = vperm.xlu0 %9077, %v1221_v11   ;;  %v719_v35 = vsel %vm516_vm0, %v63_v31, 0  ;;  %v46_v43 = vld [vmem:[%s12203_s0 + $0x10] sm:$0xff]  ;;  %v47_v44 = vld [vmem:[%s12203_s0 + $0x18] sm:$0xff]  ;;  %v44_v50 = vld [vmem:[%s12203_s0] sm:$0xff] }
  0x13   :  { %1455 = vperm.xlu1 %9078, %v1205_v12   ;;  %1581 = vperm.xlu2 %9079, %v1219_v18   ;;  %v716_v42 = vsel %vm516_vm0, %v62_v38, 0  ;;  %v61_v45 = vpack.c.bf16 %v47_v44, %v46_v43  ;;  %v1213_v46 = vld [vmem:[%s12205_s2 + $0x5c] sm:$0xf]  ;;  %v1196_v47 = vld [vmem:[%s12205_s2 + $0x18] sm:$0xf]  ;;  %v45_v51 = vld [vmem:[%s12203_s0 + $0x8] sm:$0xff] }
  0x14   :  { %v1197_v48 = vld [vmem:[%s12205_s2 + $0x1c] sm:$0xf]  ;;  %v60_v52 = vpack.c.bf16 %v45_v51, %v44_v50  ;;  %v1210_v53 = vld [vmem:[%s12205_s2 + $0x50] sm:$0xf]  ;;  %v1211_v54 = vld [vmem:[%s12205_s2 + $0x54] sm:$0xf] }
  0x15   :  { %734 = vmatpush.bf16.xpose.msra.mxu0 %v728_v14  ;;  %v713_v49 = vsel %vm516_vm0, %v61_v45, 0  ;;  %v1194_v55 = vld [vmem:[%s12205_s2 + $0x10] sm:$0xf]  ;;  %v1195_v57 = vld [vmem:[%s12205_s2 + $0x14] sm:$0xf]  ;;  %v8736_v59 = vld [vmem:[%s12204_s1] sm:$0xff] }
  0x16   :  { %v710_v56 = vsel %vm516_vm0, %v60_v52, 0  ;;  %v1208_v58 = vld [vmem:[%s12205_s2 + $0x48] sm:$0xf]  ;;  %v1209_v60 = vld [vmem:[%s12205_s2 + $0x4c] sm:$0xf]  ;;  %v8738_v9 = vld [vmem:[%s12204_s1 + $0x10] sm:$0xff] }
  0x17   :  { %v1192_v61 = vld [vmem:[%s12205_s2 + $0x8] sm:$0xf]  ;;  %v1193_v62 = vld [vmem:[%s12205_s2 + $0xc] sm:$0xf]  ;;  %v1206_v63 = vld [vmem:[%s12205_s2 + $0x40] sm:$0xf] }
  0x18   :  { %v1207_v0 = vld [vmem:[%s12205_s2 + $0x44] sm:$0xf]  ;;  %v1190_v1 = vld [vmem:[%s12205_s2] sm:$0xf]  ;;  %v8737_v2 = vld [vmem:[%s12204_s1 + $0x8] sm:$0xff] }
  0x19   :  { %v1191_v3 = vld [vmem:[%s12205_s2 + $0x4] sm:$0xf]  ;;  %v1236_v4 = vld [vmem:[%s12205_s2 + $0xb8] sm:$0xf]  ;;  %v1237_v5 = vld [vmem:[%s12205_s2 + $0xbc] sm:$0xf] }
  0x1a   :  { %1428 = vperm.xlu0 %9077, %v1202_v19   ;;  %v1234_v6 = vld [vmem:[%s12205_s2 + $0xb0] sm:$0xf]  ;;  %v1235_v7 = vld [vmem:[%s12205_s2 + $0xb4] sm:$0xf]  ;;  %v1268_v8 = vld [vmem:[%s12205_s2 + $0x138] sm:$0xf] }
  0x1b   :  { %1437 = vperm.xlu1 %9078, %v1203_v20   ;;  %1554 = vperm.xlu2 %9079, %v1216_v25   ;;  %v1269_v10 = vld [vmem:[%s12205_s2 + $0x13c] sm:$0xf]  ;;  %v1232_v11 = vld [vmem:[%s12205_s2 + $0xa8] sm:$0xf]  ;;  %v1233_v12 = vld [vmem:[%s12205_s2 + $0xac] sm:$0xf] }
  0x1c   :  { %v1252_v13 = vld [vmem:[%s12205_s2 + $0xf8] sm:$0xf]  ;;  %v1253_v14 = vld [vmem:[%s12205_s2 + $0xfc] sm:$0xf]  ;;  %v1266_v15 = vld [vmem:[%s12205_s2 + $0x130] sm:$0xf] }
  0x1d   :  { %735 = vmatpush.bf16.xpose.msra.mxu0 %v725_v21  ;;  %v8739_v16 = vld [vmem:[%s12204_s1 + $0x18] sm:$0xff]  ;;  %v1267_v17 = vld [vmem:[%s12205_s2 + $0x134] sm:$0xf]  ;;  %v1230_v20 = vld [vmem:[%s12205_s2 + $0xa0] sm:$0xf] }
  0x1e   :  { %v1231_v21 = vld [vmem:[%s12205_s2 + $0xa4] sm:$0xf]  ;;  %v1250_v22 = vld [vmem:[%s12205_s2 + $0xf0] sm:$0xf]  ;;  %v1251_v25 = vld [vmem:[%s12205_s2 + $0xf4] sm:$0xf] }
  0x1f   :  { %v1249_v38 = vld [vmem:[%s12205_s2 + $0xec] sm:$0xf]  ;;  %v1226_v44 = vld [vmem:[%s12205_s2 + $0x90] sm:$0xf]  ;;  %v1247_v50 = vld [vmem:[%s12205_s2 + $0xe4] sm:$0xf] }
  0x20   :  { %v1260_v51 = vld [vmem:[%s12205_s2 + $0x118] sm:$0xf]  ;;  %v8742_v52 = vld [vmem:[%s12204_s1 + $0x30] sm:$0xff] }
  0x22   :  { %1563 = vperm.xlu0 %9077, %v1217_v26   ;;  %v1264_v26 = vld [vmem:[%s12205_s2 + $0x128] sm:$0xf] }
  0x23   :  { %1410 = vperm.xlu1 %9078, %v1200_v27   ;;  %1419 = vperm.xlu2 %9079, %v1201_v32   ;;  %v8740_v27 = vld [vmem:[%s12204_s1 + $0x20] sm:$0xff]  ;;  %v1228_v32 = vld [vmem:[%s12205_s2 + $0x98] sm:$0xf] }
  0x25   :  { %736 = vmatpush.bf16.xpose.msra.mxu0 %v722_v28  ;;  %v1265_v28 = vld [vmem:[%s12205_s2 + $0x12c] sm:$0xf] }
  0x2a   :  { %1536 = vperm.xlu0 %9077, %v1214_v33   ;;  %v1229_v33 = vld [vmem:[%s12205_s2 + $0x9c] sm:$0xf] }
  0x2b   :  { %1545 = vperm.xlu1 %9078, %v1215_v34   ;;  %1392 = vperm.xlu2 %9079, %v1198_v39   ;;  %v1248_v34 = vld [vmem:[%s12205_s2 + $0xe8] sm:$0xf]  ;;  %v1262_v39 = vld [vmem:[%s12205_s2 + $0x120] sm:$0xf] }
  0x2d   :  { %737 = vmatpush.bf16.xpose.msra.mxu0 %v719_v35 }
  0x32   :  { %1401 = vperm.xlu0 %9077, %v1199_v40   ;;  %v8741_v40 = vld [vmem:[%s12204_s1 + $0x28] sm:$0xff] }
  0x33   :  { %1518 = vperm.xlu1 %9078, %v1212_v41   ;;  %1527 = vperm.xlu2 %9079, %v1213_v46   ;;  %v1263_v41 = vld [vmem:[%s12205_s2 + $0x124] sm:$0xf]  ;;  %v1227_v46 = vld [vmem:[%s12205_s2 + $0x94] sm:$0xf] }
  0x35   :  { %738 = vmatpush.bf16.xpose.msra.mxu0 %v716_v42 }
  0x3a   :  { %1374 = vperm.xlu0 %9077, %v1196_v47   ;;  %v1246_v47 = vld [vmem:[%s12205_s2 + $0xe0] sm:$0xf] }
  0x3b   :  { %1383 = vperm.xlu1 %9078, %v1197_v48   ;;  %1500 = vperm.xlu2 %9079, %v1210_v53   ;;  %v1261_v53 = vld [vmem:[%s12205_s2 + $0x11c] sm:$0xf] }
  0x3d   :  { %739 = vmatpush.bf16.xpose.msra.mxu0 %v713_v49 }
  0x42   :  { %1509 = vperm.xlu0 %9077, %v1211_v54  }
  0x43   :  { %1356 = vperm.xlu1 %9078, %v1194_v55   ;;  %1365 = vperm.xlu2 %9079, %v1195_v57   ;;  %v1224_v57 = vld [vmem:[%s12205_s2 + $0x88] sm:$0xf] }
  0x45   :  { %740 = vmatpush.bf16.xpose.msra.mxu0 %v710_v56 }
  0x4a   :  { %1482 = vperm.xlu0 %9077, %v1208_v58   ;;  %v1225_v58 = vld [vmem:[%s12205_s2 + $0x8c] sm:$0xf] }
  0x4b   :  { %1491 = vperm.xlu1 %9078, %v1209_v60   ;;  %1338 = vperm.xlu2 %9079, %v1192_v61  }
  0x4c   :  { %7648 = vmatmul.msk.bf16.vlgmr.msra.gmra.mxu0 %vm516_vm0, %v8736_v59  ;;  %v1244_v59 = vld [vmem:[%s12205_s2 + $0xd8] sm:$0xf] }
  0x52   :  { %1347 = vperm.xlu0 %9077, %v1193_v62  }
  0x53   :  { %1464 = vperm.xlu1 %9078, %v1206_v63   ;;  %1473 = vperm.xlu2 %9079, %v1207_v0   ;;  %v1245_v63 = vld [vmem:[%s12205_s2 + $0xdc] sm:$0xf]  ;;  %v1258_v0 = vld [vmem:[%s12205_s2 + $0x110] sm:$0xf] }
  0x5a   :  { %1320 = vperm.xlu0 %9077, %v1190_v1   ;;  %v8743_v1 = vld [vmem:[%s12204_s1 + $0x38] sm:$0xff] }
  0x5b   :  { %1329 = vperm.xlu1 %9078, %v1191_v3   ;;  %1734 = vperm.xlu2 %9079, %v1236_v4  }
  0x5c   :  { %7649 = vmatmul.msk.bf16.gmra.mxu0 %vm516_vm0, %v8737_v2  ;;  %v1259_v2 = vld [vmem:[%s12205_s2 + $0x114] sm:$0xf] }
  0x62   :  { %1743 = vperm.xlu0 %9077, %v1237_v5  }
  0x63   :  { %1716 = vperm.xlu1 %9078, %v1234_v6   ;;  %1725 = vperm.xlu2 %9079, %v1235_v7   ;;  %v1222_v6 = vld [vmem:[%s12205_s2 + $0x80] sm:$0xf]  ;;  %v1223_v7 = vld [vmem:[%s12205_s2 + $0x84] sm:$0xf] }
  0x65   :  { %v9390_v29 = vpop.permute.xlu2 %1572 }
  0x6a   :  { %2022 = vperm.xlu0 %9077, %v1268_v8   ;;  %v1242_v8 = vld [vmem:[%s12205_s2 + $0xd0] sm:$0xf] }
  0x6b   :  { %2031 = vperm.xlu1 %9078, %v1269_v10   ;;  %1698 = vperm.xlu2 %9079, %v1232_v11   ;;  %v9110_v10 = vmov 839922192  }
  0x6c   :  { %7650 = vmatmul.msk.bf16.gmra.mxu0 %vm516_vm0, %v8738_v9  ;;  %v1324_v11 = vunpack.c.l.s4 %v9110_v10  ;;  %v1284_v10 = vld [vmem:[%s12205_s2 + $0x178] sm:$0xf] }
  0x6d   :  { %v9410_v37 = vpop.permute.xlu2 %1581 }
  0x72   :  { %1707 = vperm.xlu0 %9077, %v1233_v12  }
  0x73   :  { %1878 = vperm.xlu1 %9078, %v1252_v13   ;;  %1887 = vperm.xlu2 %9079, %v1253_v14   ;;  %v1243_v13 = vld [vmem:[%s12205_s2 + $0xd4] sm:$0xf] }
  0x75   :  { %v9432_v45 = vpop.permute.xlu2 %1554 }
  0x7a   :  { %2004 = vperm.xlu0 %9077, %v1266_v15   ;;  %v1256_v15 = vld [vmem:[%s12205_s2 + $0x108] sm:$0xf] }
  0x7b   :  { %2013 = vperm.xlu1 %9078, %v1267_v17   ;;  %1680 = vperm.xlu2 %9079, %v1230_v20   ;;  %v1257_v17 = vld [vmem:[%s12205_s2 + $0x10c] sm:$0xf]  ;;  %v9522_v20 = vunpack.c.0.s8 %v1324_v11  ;;  %v1285_v11 = vld [vmem:[%s12205_s2 + $0x17c] sm:$0xf] }
  0x7c   :  { %v9360_v18 = vpop.permute.xlu0 %1590  ;;  %7651 = vmatmul.msk.bf16.gmra.mxu0 %vm516_vm0, %v8739_v16  ;;  %v8744_v16 = vld [vmem:[%s12204_s1 + $0x40] sm:$0xff] }
  0x7d   :  { %v9363_v19 = vpop.permute.xlu1 %1446  ;;  %v9456_v54 = vpop.permute.xlu2 %1419  ;;  %12213 = vst [vmem:[#allocation6_spill] sm:$0xff] %v9522_v20 }
  0x82   :  { %1689 = vperm.xlu0 %9077, %v1231_v21  }
  0x83   :  { %1860 = vperm.xlu1 %9078, %v1250_v22   ;;  %1869 = vperm.xlu2 %9079, %v1251_v25  }
  0x84   :  { %v9374_v23 = vpop.permute.xlu0 %1599 }
  0x85   :  { %v9376_v24 = vpop.permute.xlu1 %1455  ;;  %v9472_v60 = vpop.permute.xlu2 %1392 }
  0x8a   :  { %1986 = vperm.xlu0 %9077, %v1264_v26  }
  0x8b   :  { %1995 = vperm.xlu1 %9078, %v1265_v28   ;;  %1662 = vperm.xlu2 %9079, %v1228_v32   ;;  %v1240_v32 = vld [vmem:[%s12205_s2 + $0xc8] sm:$0xf] }
  0x8c   :  { %v9392_v30 = vpop.permute.xlu0 %1428  ;;  %7652 = vmatmul.msk.bf16.gmra.mxu0 %vm516_vm0, %v8740_v27 }
  0x8d   :  { %v9395_v31 = vpop.permute.xlu1 %1437  ;;  %v9493_v4 = vpop.permute.xlu2 %1527 }
  0x92   :  { %1671 = vperm.xlu0 %9077, %v1229_v33   ;;  %v1241_v33 = vld [vmem:[%s12205_s2 + $0xcc] sm:$0xf] }
  0x93   :  { %1842 = vperm.xlu1 %9078, %v1248_v34   ;;  %1851 = vperm.xlu2 %9079, %v1249_v38   ;;  %v1254_v38 = vld [vmem:[%s12205_s2 + $0x100] sm:$0xf] }
  0x94   :  { %v9406_v35 = vpop.permute.xlu0 %1563 }
  0x95   :  { %v9408_v36 = vpop.permute.xlu1 %1410  ;;  %v9511_v14 = vpop.permute.xlu2 %1500 }
  0x9a   :  { %1968 = vperm.xlu0 %9077, %v1262_v39  }
  0x9b   :  { %1977 = vperm.xlu1 %9078, %v1263_v41   ;;  %1644 = vperm.xlu2 %9079, %v1226_v44  }
  0x9c   :  { %v9424_v42 = vpop.permute.xlu0 %1536  ;;  %7653 = vmatmul.msk.bf16.gmra.mxu0 %vm516_vm0, %v8741_v40 }
  0x9d   :  { %v9427_v43 = vpop.permute.xlu1 %1545  ;;  %v9536_v39 = vpop.permute.xlu2 %1365 }
  0xa2   :  { %1653 = vperm.xlu0 %9077, %v1227_v46  }
  0xa3   :  { %1824 = vperm.xlu1 %9078, %v1246_v47   ;;  %1833 = vperm.xlu2 %9079, %v1247_v50  }
  0xa4   :  { %v9440_v48 = vpop.permute.xlu0 %1401 }
  0xa5   :  { %v9442_v49 = vpop.permute.xlu1 %1518 }
  0xaa   :  { %1950 = vperm.xlu0 %9077, %v1260_v51   ;;  %v1255_v51 = vld [vmem:[%s12205_s2 + $0x104] sm:$0xf] }
  0xab   :  { %1959 = vperm.xlu1 %9078, %v1261_v53   ;;  %1626 = vperm.xlu2 %9079, %v1224_v57   ;;  %v1238_v53 = vld [vmem:[%s12205_s2 + $0xc0] sm:$0xf]  ;;  %v8745_v57 = vld [vmem:[%s12204_s1 + $0x48] sm:$0xff] }
  0xac   :  { %v9458_v55 = vpop.permute.xlu0 %1374  ;;  %7654 = vmatmul.msk.bf16.gmra.mxu0 %vm516_vm0, %v8742_v52 }
  0xad   :  { %v9461_v56 = vpop.permute.xlu1 %1383 }
  0xb2   :  { %1635 = vperm.xlu0 %9077, %v1225_v58   ;;  %v1239_v58 = vld [vmem:[%s12205_s2 + $0xc4] sm:$0xf] }
  0xb3   :  { %1806 = vperm.xlu1 %9078, %v1244_v59   ;;  %1815 = vperm.xlu2 %9079, %v1245_v63  }
  0xb4   :  { %v9474_v61 = vpop.permute.xlu0 %1509 }
  0xb5   :  { %v9476_v62 = vpop.permute.xlu1 %1356 }
  0xba   :  { %1932 = vperm.xlu0 %9077, %v1258_v0  }
  0xbb   :  { %1941 = vperm.xlu1 %9078, %v1259_v2   ;;  %1608 = vperm.xlu2 %9079, %v1222_v6   ;;  %v1339_v2 = vpop.permute.xlu2 %1338 }
  0xbc   :  { %v9490_v3 = vpop.permute.xlu0 %1482  ;;  %7655 = vmatmul.msk.bf16.gmra.mxu0 %vm516_vm0, %v8743_v1  ;;  %v1344_v6 = vperm.slane %v1339_v2, %v9522_v20  ;;  %v1301_v2 = vld [vmem:[%s12205_s2 + $0x1bc] sm:$0xf] }
  0xbd   :  { %v9495_v5 = vpop.permute.xlu1 %1491 }
  0xc2   :  { %1617 = vperm.xlu0 %9077, %v1223_v7  }
  0xc3   :  { %1788 = vperm.xlu1 %9078, %v1242_v8   ;;  %1797 = vperm.xlu2 %9079, %v1243_v13   ;;  %v2600_v13 = vunpack.c.l.bf16 %v1344_v6  ;;  %v1314_v6 = vld [vmem:[%s12205_s2 + $0x1f0] sm:$0xf] }
  0xc4   :  { %v1348_v9 = vpop.permute.xlu0 %1347 }
  0xc5   :  { %v9506_v12 = vpop.permute.xlu1 %1464  ;;  %v1353_v8 = vperm.slane %v1348_v9, %v9522_v20 }
  0xc9   :  { %v742_v21 = vpop.f32.mrf.mxu0 }
  0xca   :  { %1914 = vperm.xlu0 %9077, %v1256_v15   ;;  %v1062_v27 = vpack.c.bf16 %v742_v21, %v742_v21  ;;  %v2601_v21 = vunpack.c.l.bf16 %v1353_v8 }
  0xcb   :  { %1923 = vperm.xlu1 %9078, %v1257_v17   ;;  %1770 = vperm.xlu2 %9079, %v1240_v32   ;;  %v8746_v32 = vld [vmem:[%s12204_s1 + $0x50] sm:$0xff] }
  0xcc   :  { %v1321_v22 = vpop.permute.xlu0 %1320  ;;  %7656 = vmatmul.msk.bf16.gmra.mxu0 %vm516_vm0, %v8744_v16  ;;  %v2470_v41 = vunpack.c.l.bf16 %v1062_v27  ;;  %v1282_v16 = vld [vmem:[%s12205_s2 + $0x170] sm:$0xf]  ;;  %v1283_v27 = vld [vmem:[%s12205_s2 + $0x174] sm:$0xf] }
  0xcd   :  { %v1326_v25 = vperm.slane %v1321_v22, %v9522_v20  ;;  %v1330_v26 = vpop.permute.xlu1 %1329 }
  0xce   :  { %v1335_v28 = vperm.slane %v1330_v26, %v9522_v20 }
  0xcf   :  { %v2598_v34 = vunpack.c.l.bf16 %v1326_v25 }
  0xd0   :  { %v2599_v44 = vunpack.c.l.bf16 %v1335_v28  ;;  %v1316_v28 = vld [vmem:[%s12205_s2 + $0x1f8] sm:$0xf] }
  0xd1   :  { %v744_v40 = vpop.f32.mrf.mxu0  ;;  %v2726_v50 = vadd.f32 %v2598_v34, %v2470_v41 }
  0xd2   :  { %v1063_v46 = vpack.c.bf16 %v744_v40, %v744_v40  ;;  %1779 = vperm.xlu0 %9077, %v1241_v33   ;;  %v1317_v33 = vld [vmem:[%s12205_s2 + $0x1fc] sm:$0xf] }
  0xd3   :  { %1896 = vperm.xlu1 %9078, %v1254_v38   ;;  %v3110_v59 = vmax.f32 %v2726_v50, 0.0  ;;  %1905 = vperm.xlu2 %9079, %v1255_v51   ;;  %v1280_v50 = vld [vmem:[%s12205_s2 + $0x168] sm:$0xf]  ;;  %v1281_v51 = vld [vmem:[%s12205_s2 + $0x16c] sm:$0xf] }
  0xd4   :  { %v2471_v47 = vunpack.c.l.bf16 %v1063_v46 }
  0xd6   :  { %v2727_v52 = vadd.f32 %v2599_v44, %v2471_v47  ;;  %v1362_v44 = vperm.slane %v9476_v62, %v9522_v20  ;;  %v1371_v47 = vperm.slane %v9536_v39, %v9522_v20  ;;  %v1300_v62 = vld [vmem:[%s12205_s2 + $0x1b8] sm:$0xf] }
  0xd8   :  { %v3111_v63 = vmax.f32 %v2727_v52, 0.0  ;;  %v2602_v52 = vunpack.c.l.bf16 %v1362_v44  ;;  %v8748_v44 = vld [vmem:[%s12204_s1 + $0x60] sm:$0xff] }
  0xd9   :  { %v747_v0 = vpop.f32.mrf.mxu0 }
  0xda   :  { %1752 = vperm.xlu0 %9077, %v1238_v53   ;;  %v9550_v1 = vpack.c.bf16 %v3111_v63, %v3110_v59  ;;  %v1064_v7 = vpack.c.bf16 %v747_v0, %v747_v0 }
  0xdb   :  { %1761 = vperm.xlu1 %9078, %v1239_v58   ;;  %2166 = vperm.xlu2 %9079, %v1284_v10   ;;  %v2603_v58 = vunpack.c.l.bf16 %v1371_v47 }
  0xdc   :  { %7657 = vmatmul.msk.bf16.gmra.mxu0 %vm516_vm0, %v8745_v57  ;;  %v2472_v15 = vunpack.c.l.bf16 %v1064_v7  ;;  %v8747_v7 = vld [vmem:[%s12204_s1 + $0x58] sm:$0xff] }
  0xde   :  { %v2728_v9 = vadd.f32 %v2600_v13, %v2472_v15 }
  0xe0   :  { %v3112_v34 = vmax.f32 %v2728_v9, 0.0  ;;  %v1279_v9 = vld [vmem:[%s12205_s2 + $0x164] sm:$0xf] }
  0xe1   :  { %v749_v17 = vpop.f32.mrf.mxu0 }
  0xe2   :  { %v1065_v22 = vpack.c.bf16 %v749_v17, %v749_v17  ;;  %2175 = vperm.xlu0 %9077, %v1285_v11   ;;  %v1315_v11 = vld [vmem:[%s12205_s2 + $0x1f4] sm:$0xf] }
  0xe3   :  { %2148 = vperm.xlu1 %9078, %v1282_v16   ;;  %2157 = vperm.xlu2 %9079, %v1283_v27   ;;  %v1380_v16 = vperm.slane %v9458_v55, %v9522_v20  ;;  %v1298_v55 = vld [vmem:[%s12205_s2 + $0x1b0] sm:$0xf] }
  0xe4   :  { %v2473_v25 = vunpack.c.l.bf16 %v1065_v22  ;;  %v1278_v22 = vld [vmem:[%s12205_s2 + $0x160] sm:$0xf] }
  0xe6   :  { %v2729_v26 = vadd.f32 %v2601_v21, %v2473_v25  ;;  %v1389_v21 = vperm.slane %v9461_v56, %v9522_v20  ;;  %v2604_v25 = vunpack.c.l.bf16 %v1380_v16  ;;  %v8750_v16 = vld [vmem:[%s12204_s1 + $0x70] sm:$0xff] }
  0xe8   :  { %v3113_v38 = vmax.f32 %v2729_v26, 0.0 }
  0xe9   :  { %v752_v40 = vpop.f32.mrf.mxu0 }
  0xea   :  { %2454 = vperm.xlu0 %9077, %v1316_v28   ;;  %v9576_v41 = vpack.c.bf16 %v3113_v38, %v3112_v34  ;;  %v1066_v46 = vpack.c.bf16 %v752_v40, %v752_v40  ;;  %v2605_v28 = vunpack.c.l.bf16 %v1389_v21  ;;  %v1299_v38 = vld [vmem:[%s12205_s2 + $0x1b4] sm:$0xf]  ;;  %v1312_v40 = vld [vmem:[%s12205_s2 + $0x1e8] sm:$0xf] }
  0xeb   :  { %2463 = vperm.xlu1 %9078, %v1317_v33   ;;  %2130 = vperm.xlu2 %9079, %v1280_v50   ;;  %v1313_v50 = vld [vmem:[%s12205_s2 + $0x1ec] sm:$0xf] }
  0xec   :  { %7658 = vmatmul.msk.bf16.gmra.mxu0 %vm516_vm0, %v8746_v32  ;;  %v2474_v53 = vunpack.c.l.bf16 %v1066_v46 }
  0xee   :  { %v2730_v39 = vadd.f32 %v2602_v52, %v2474_v53  ;;  %v1276_v53 = vld [vmem:[%s12205_s2 + $0x158] sm:$0xf] }
  0xf0   :  { %v3114_v8 = vmax.f32 %v2730_v39, 0.0  ;;  %v1310_v39 = vld [vmem:[%s12205_s2 + $0x1e0] sm:$0xf] }
  0xf1   :  { %v754_v57 = vpop.f32.mrf.mxu0 }
  0xf2   :  { %v1067_v59 = vpack.c.bf16 %v754_v57, %v754_v57  ;;  %2139 = vperm.xlu0 %9077, %v1281_v51   ;;  %v1296_v57 = vld [vmem:[%s12205_s2 + $0x1a8] sm:$0xf] }
  0xf3   :  { %2310 = vperm.xlu1 %9078, %v1300_v62   ;;  %2319 = vperm.xlu2 %9079, %v1301_v2   ;;  %v1277_v62 = vld [vmem:[%s12205_s2 + $0x15c] sm:$0xf] }
  0xf4   :  { %v2475_v63 = vunpack.c.l.bf16 %v1067_v59  ;;  %v1297_v59 = vld [vmem:[%s12205_s2 + $0x1ac] sm:$0xf] }
  0xf6   :  { %v2731_v0 = vadd.f32 %v2603_v58, %v2475_v63  ;;  %v8749_v63 = vld [vmem:[%s12204_s1 + $0x68] sm:$0xff] }
  0xf8   :  { %v3115_v10 = vmax.f32 %v2731_v0, 0.0  ;;  %v1311_v0 = vld [vmem:[%s12205_s2 + $0x1e4] sm:$0xf] }
  0xf9   :  { %v757_v13 = vpop.f32.mrf.mxu0 }
  0xfa   :  { %2436 = vperm.xlu0 %9077, %v1314_v6   ;;  %v9604_v15 = vpack.c.bf16 %v3115_v10, %v3114_v8  ;;  %v1068_v17 = vpack.c.bf16 %v757_v13, %v757_v13  ;;  %v1274_v6 = vld [vmem:[%s12205_s2 + $0x150] sm:$0xf]  ;;  %v1294_v8 = vld [vmem:[%s12205_s2 + $0x1a0] sm:$0xf]  ;;  %v1308_v13 = vld [vmem:[%s12205_s2 + $0x1d8] sm:$0xf] }
  0xfb   :  { %2445 = vperm.xlu1 %9078, %v1315_v11   ;;  %2112 = vperm.xlu2 %9079, %v1278_v22   ;;  %v1295_v11 = vld [vmem:[%s12205_s2 + $0x1a4] sm:$0xf]  ;;  %v1272_v22 = vld [vmem:[%s12205_s2 + $0x148] sm:$0xf] }
  0xfc   :  { %7659 = vmatmul.msk.bf16.gmra.mxu0 %vm516_vm0, %v8747_v7  ;;  %v2476_v26 = vunpack.c.l.bf16 %v1068_v17  ;;  %v1275_v7 = vld [vmem:[%s12205_s2 + $0x154] sm:$0xf]  ;;  %v1309_v17 = vld [vmem:[%s12205_s2 + $0x1dc] sm:$0xf] }
  0xfe   :  { %v2732_v56 = vadd.f32 %v2604_v25, %v2476_v26  ;;  %v1292_v25 = vld [vmem:[%s12205_s2 + $0x198] sm:$0xf] }
 0x100   :  { %v3116_v46 = vmax.f32 %v2732_v56, 0.0 }
 0x101   :  { %v759_v27 = vpop.f32.mrf.mxu0 }
 0x102   :  { %v1069_v32 = vpack.c.bf16 %v759_v27, %v759_v27  ;;  %2121 = vperm.xlu0 %9077, %v1279_v9   ;;  %v1273_v9 = vld [vmem:[%s12205_s2 + $0x14c] sm:$0xf]  ;;  %v1306_v27 = vld [vmem:[%s12205_s2 + $0x1d0] sm:$0xf] }
 0x103   :  { %2292 = vperm.xlu1 %9078, %v1298_v55   ;;  %2301 = vperm.xlu2 %9079, %v1299_v38   ;;  %v1293_v55 = vld [vmem:[%s12205_s2 + $0x19c] sm:$0xf]  ;;  %v1461_v38 = vperm.slane %v9376_v24, %v9522_v20  ;;  %v1290_v24 = vld [vmem:[%s12205_s2 + $0x190] sm:$0xf] }
 0x104   :  { %v2477_v33 = vunpack.c.l.bf16 %v1069_v32  ;;  %v1307_v32 = vld [vmem:[%s12205_s2 + $0x1d4] sm:$0xf] }
 0x106   :  { %v2733_v34 = vadd.f32 %v2605_v28, %v2477_v33  ;;  %v8751_v28 = vld [vmem:[%s12204_s1 + $0x78] sm:$0xff]  ;;  %v1452_v33 = vperm.slane %v9363_v19, %v9522_v20  ;;  %v1271_v19 = vld [vmem:[%s12205_s2 + $0x144] sm:$0xf] }
 0x108   :  { %v3117_v47 = vmax.f32 %v2733_v34, 0.0 }
 0x109   :  { %v9632_v51 = vpop.f32.mrf.mxu0 }
 0x10a   :  { %v9634_v52 = vpack.c.bf16 %v3117_v47, %v3116_v46  ;;  %2418 = vperm.xlu0 %9077, %v1312_v40   ;;  %v1443_v40 = vperm.slane %v9395_v31, %v9522_v20  ;;  %v1270_v46 = vld [vmem:[%s12205_s2 + $0x140] sm:$0xf]  ;;  %v1434_v47 = vperm.slane %v9392_v30, %v9522_v20  ;;  %v2613_v31 = vunpack.c.l.bf16 %v1461_v38 }
 0x10b   :  { %2427 = vperm.xlu1 %9078, %v1313_v50   ;;  %2094 = vperm.xlu2 %9079, %v1276_v53   ;;  %v2612_v50 = vunpack.c.l.bf16 %v1452_v33 }
 0x10c   :  { %7660 = vmatmul.msk.bf16.gmra.mxu0 %vm516_vm0, %v8748_v44 }
 0x111   :  { %v9646_v58 = vpop.f32.mrf.mxu0 }
 0x112   :  { %2103 = vperm.xlu0 %9077, %v1277_v62  }
 0x113   :  { %2274 = vperm.xlu1 %9078, %v1296_v57   ;;  %2283 = vperm.xlu2 %9079, %v1297_v59   ;;  %v1425_v57 = vperm.slane %v9456_v54, %v9522_v20  ;;  %v1407_v54 = vperm.slane %v9440_v48, %v9522_v20  ;;  %v1304_v48 = vld [vmem:[%s12205_s2 + $0x1c8] sm:$0xf] }
 0x119   :  { %v9660_v2 = vpop.f32.mrf.mxu0 }
 0x11a   :  { %2400 = vperm.xlu0 %9077, %v1310_v39   ;;  %v2611_v39 = vunpack.c.l.bf16 %v1443_v40 }
 0x11b   :  { %2409 = vperm.xlu1 %9078, %v1311_v0   ;;  %2076 = vperm.xlu2 %9079, %v1274_v6   ;;  %v2610_v6 = vunpack.c.l.bf16 %v1434_v47 }
 0x11c   :  { %7661 = vmatmul.msk.bf16.gmra.mxu0 %vm516_vm0, %v8749_v63 }
 0x121   :  { %v769_v10 = vpop.f32.mrf.mxu0 }
 0x122   :  { %2085 = vperm.xlu0 %9077, %v1275_v7   ;;  %v1073_v63 = vpack.c.bf16 %v769_v10, %v769_v10  ;;  %v1416_v7 = vperm.slane %v9408_v36, %v9522_v20  ;;  %v1071_v10 = vpack.c.bf16 %v9646_v58, %v9646_v58  ;;  %v1291_v36 = vld [vmem:[%s12205_s2 + $0x194] sm:$0xf] }
 0x123   :  { %2256 = vperm.xlu1 %9078, %v1294_v8   ;;  %2265 = vperm.xlu2 %9079, %v1295_v11   ;;  %v1072_v8 = vpack.c.bf16 %v9660_v2, %v9660_v2  ;;  %v1398_v2 = vperm.slane %v9472_v60, %v9522_v20  ;;  %v2607_v60 = vunpack.c.l.bf16 %v1407_v54 }
 0x129   :  { %v772_v21 = vpop.f32.mrf.mxu0 }
 0x12a   :  { %2382 = vperm.xlu0 %9077, %v1308_v13   ;;  %v1074_v53 = vpack.c.bf16 %v772_v21, %v772_v21  ;;  %v2481_v21 = vunpack.c.l.bf16 %v1073_v63 }
 0x12b   :  { %2391 = vperm.xlu1 %9078, %v1309_v17   ;;  %2058 = vperm.xlu2 %9079, %v1272_v22   ;;  %v2609_v17 = vunpack.c.l.bf16 %v1425_v57 }
 0x12c   :  { %7662 = vmatmul.msk.bf16.gmra.mxu0 %vm516_vm0, %v8750_v16  ;;  %v2482_v11 = vunpack.c.l.bf16 %v1074_v53 }
 0x12d   :  { %v2737_v40 = vadd.f32 %v2609_v17, %v2481_v21 }
 0x12e   :  { %v2738_v58 = vadd.f32 %v2610_v6, %v2482_v11 }
 0x12f   :  { %v3121_v57 = vmax.f32 %v2737_v40, 0.0  ;;  %v9795_v40 = vpop.permute.xlu0 %1743 }
 0x130   :  { %v3122_v53 = vmax.f32 %v2738_v58, 0.0 }
 0x131   :  { %v774_v26 = vpop.f32.mrf.mxu0 }
 0x132   :  { %2067 = vperm.xlu0 %9077, %v1273_v9   ;;  %v1075_v44 = vpack.c.bf16 %v774_v26, %v774_v26  ;;  %v1070_v26 = vpack.c.bf16 %v9632_v51, %v9632_v51  ;;  %v2479_v51 = vunpack.c.l.bf16 %v1071_v10 }
 0x133   :  { %2238 = vperm.xlu1 %9078, %v1292_v25   ;;  %2247 = vperm.xlu2 %9079, %v1293_v55   ;;  %v2608_v25 = vunpack.c.l.bf16 %v1416_v7  ;;  %v2480_v55 = vunpack.c.l.bf16 %v1072_v8  ;;  %v1302_v7 = vld [vmem:[%s12205_s2 + $0x1c0] sm:$0xf] }
 0x134   :  { %v2483_v30 = vunpack.c.l.bf16 %v1075_v44  ;;  %v2606_v44 = vunpack.c.l.bf16 %v1398_v2  ;;  %v2478_v47 = vunpack.c.l.bf16 %v1070_v26  ;;  %v8753_v2 = vld [vmem:[%s12204_s1 + $0x88] sm:$0xff]  ;;  %v1287_v26 = vld [vmem:[%s12205_s2 + $0x184] sm:$0xf] }
 0x136   :  { %v2739_v9 = vadd.f32 %v2611_v39, %v2483_v30  ;;  %v1288_v39 = vld [vmem:[%s12205_s2 + $0x188] sm:$0xf]  ;;  %v2734_v30 = vadd.f32 %v2606_v44, %v2478_v47  ;;  %v7714_v47 = vld [vmem:[#allocation3] sm:$0xf] }
 0x138   :  { %v3123_v38 = vmax.f32 %v2739_v9, 0.0  ;;  %v3118_v21 = vmax.f32 %v2734_v30, 0.0  ;;  %v1303_v9 = vld [vmem:[%s12205_s2 + $0x1c4] sm:$0xf] }
 0x139   :  { %v777_v56 = vpop.f32.mrf.mxu0 }
 0x13a   :  { %2364 = vperm.xlu0 %9077, %v1306_v27   ;;  %v1076_v34 = vpack.c.bf16 %v777_v56, %v777_v56  ;;  %v8752_v27 = vld [vmem:[%s12204_s1 + $0x80] sm:$0xff]  ;;  %v1305_v56 = vld [vmem:[%s12205_s2 + $0x1cc] sm:$0xf] }
 0x13b   :  { %2373 = vperm.xlu1 %9078, %v1307_v32   ;;  %2040 = vperm.xlu2 %9079, %v1270_v46   ;;  %v1470_v46 = vperm.slane %v9506_v12, %v9522_v20  ;;  %v1289_v12 = vld [vmem:[%s12205_s2 + $0x18c] sm:$0xf] }
 0x13c   :  { %7663 = vmatmul.msk.bf16.gmra.mxu0 %vm516_vm0, %v8751_v28  ;;  %v2484_v62 = vunpack.c.l.bf16 %v1076_v34 }
 0x13d   :  { %v2614_v63 = vunpack.c.l.bf16 %v1470_v46 }
 0x13e   :  { %v2740_v13 = vadd.f32 %v2612_v50, %v2484_v62  ;;  %v1474_v62 = vpop.permute.xlu2 %1473 }
 0x140   :  { %v3124_v28 = vmax.f32 %v2740_v13, 0.0 }
 0x141   :  { %v779_v59 = vpop.f32.mrf.mxu0 }
 0x142   :  { %v1077_v0 = vpack.c.bf16 %v779_v59, %v779_v59  ;;  %2049 = vperm.xlu0 %9077, %v1271_v19   ;;  %v2736_v19 = vadd.f32 %v2608_v25, %v2480_v55  ;;  %v2735_v59 = vadd.f32 %v2607_v60, %v2479_v51  ;;  %v1286_v25 = vld [vmem:[%s12205_s2 + $0x180] sm:$0xf] }
 0x143   :  { %2220 = vperm.xlu1 %9078, %v1290_v24   ;;  %2229 = vperm.xlu2 %9079, %v1291_v36   ;;  %v1479_v24 = vperm.slane %v1474_v62, %v9522_v20  ;;  %v6254_v60 = vld [vmem:[%s12207_s4] sm:$0xf]  ;;  %v6258_v62 = vld [vmem:[%s12207_s4 + $0x10] sm:$0xf] }
 0x144   :  { %v2485_v16 = vunpack.c.l.bf16 %v1077_v0  ;;  %v3120_v6 = vmax.f32 %v2736_v19, 0.0  ;;  %v3119_v54 = vmax.f32 %v2735_v59, 0.0  ;;  %v8804_v19 = vld [vmem:[#allocation3 + $0x1c] sm:$0xf0] }
 0x145   :  { %v2615_v11 = vunpack.c.l.bf16 %v1479_v24  ;;  %v7715_v24 = vor.u32 %v8804_v19, %v7714_v47  ;;  %v6267_v19 = vld [vmem:[%s12207_s4 + $0x34] sm:$0xf] }
 0x146   :  { %v2741_v22 = vadd.f32 %v2613_v31, %v2485_v16  ;;  %v3244_v31 = vpack.c.bf16 %v3123_v38, %v3122_v53  ;;  %v3243_v16 = vpack.c.bf16 %v3121_v57, %v3120_v6  ;;  %v9822_v6 = vpop.permute.xlu0 %2022 }
 0x148   :  { %v3125_v32 = vmax.f32 %v2741_v22, 0.0  ;;  %v3242_v22 = vpack.c.bf16 %v3119_v54, %v3118_v21 }
 0x149   :  { %v782_v33 = vpop.f32.mrf.mxu0 }
 0x14a   :  { %v3245_v34 = vpack.c.bf16 %v3125_v32, %v3124_v28  ;;  %2346 = vperm.xlu0 %9077, %v1304_v48   ;;  %v1078_v50 = vpack.c.bf16 %v782_v33, %v782_v33  ;;  %v1488_v28 = vperm.slane %v9490_v3, %v9522_v20  ;;  %v6255_v33 = vld [vmem:[%s12207_s4 + $0x4] sm:$0xf] }
 0x14b   :  { %2355 = vperm.xlu1 %9078, %v1305_v56   ;;  %2202 = vperm.xlu2 %9079, %v1288_v39   ;;  %v1497_v56 = vperm.slane %v9495_v5, %v9522_v20 }
 0x14c   :  { %7664 = vmatmul.msk.bf16.gmra.mxu0 %vm516_vm0, %v8752_v27  ;;  %4838 = vmatpush.bf16.msra.mxu1 %v3245_v34  ;;  %v2486_v0 = vunpack.c.l.bf16 %v1078_v50  ;;  %v2616_v51 = vunpack.c.l.bf16 %v1488_v28  ;;  %v9799_v50 = vpop.permute.xlu2 %1734  ;;  %v8755_v28 = vld [vmem:[%s12204_s1 + $0x98] sm:$0xff] }
 0x14d   :  { %9056 = vmatpush.bf16.msra.mxu3 %v3245_v34  ;;  %v6256_v34 = vld [vmem:[%s12207_s4 + $0x8] sm:$0xf]  ;;  %v2617_v5 = vunpack.c.l.bf16 %v1497_v56 }
 0x14e   :  { %v2742_v17 = vadd.f32 %v2614_v63, %v2486_v0  ;;  %v1506_v63 = vperm.slane %v9511_v14, %v9522_v20  ;;  %v1515_v0 = vperm.slane %v9474_v61, %v9522_v20  ;;  %v6262_v61 = vld [vmem:[%s12207_s4 + $0x20] sm:$0xf] }
 0x150   :  { %4839 = vmatpush.bf16.msra.mxu1 %v3244_v31  ;;  %v3126_v48 = vmax.f32 %v2742_v17, 0.0  ;;  %v2618_v14 = vunpack.c.l.bf16 %v1506_v63  ;;  %v8820_v63 = vld [vmem:[#allocation3 + $0x9c] sm:$0xf0] }
 0x151   :  { %9057 = vmatpush.bf16.msra.mxu3 %v3244_v31  ;;  %v784_v8 = vpop.f32.mrf.mxu0  ;;  %v8754_v31 = vld [vmem:[%s12204_s1 + $0x90] sm:$0xff] }
 0x152   :  { %v1079_v13 = vpack.c.bf16 %v784_v8, %v784_v8  ;;  %2211 = vperm.xlu0 %9077, %v1289_v12   ;;  %v6260_v8 = vld [vmem:[%s12207_s4 + $0x18] sm:$0xf] }
 0x153   :  { %2328 = vperm.xlu1 %9078, %v1302_v7   ;;  %2337 = vperm.xlu2 %9079, %v1303_v9   ;;  %v8290_v7 = vld [vmem:[#allocation3 + $0x480] sm:$0xf] }
 0x154   :  { %v2487_v10 = vunpack.c.l.bf16 %v1079_v13  ;;  %4840 = vmatpush.bf16.msra.mxu1 %v3243_v16  ;;  %v6261_v13 = vld [vmem:[%s12207_s4 + $0x1c] sm:$0xf] }
 0x155   :  { %9058 = vmatpush.bf16.msra.mxu3 %v3243_v16  ;;  %v9830_v16 = vpop.permute.xlu2 %1725 }
 0x156   :  { %v2743_v36 = vadd.f32 %v2615_v11, %v2487_v10  ;;  %v2619_v10 = vunpack.c.l.bf16 %v1515_v0  ;;  %v6269_v0 = vld [vmem:[%s12207_s4 + $0x3c] sm:$0xf] }
 0x158   :  { %4841 = vmatpush.bf16.msra.mxu1 %v3242_v22  ;;  %v3127_v55 = vmax.f32 %v2743_v36, 0.0  ;;  %v7746_v36 = vld [vmem:[#allocation3 + $0x40] sm:$0xf] }
 0x159   :  { %9059 = vmatpush.bf16.msra.mxu3 %v3242_v22  ;;  %v787_v58 = vpop.f32.mrf.mxu0 }
 0x15a   :  { %2184 = vperm.xlu0 %9077, %v1286_v25   ;;  %v9775_v27 = vpack.c.bf16 %v3127_v55, %v3126_v48  ;;  %v1080_v32 = vpack.c.bf16 %v787_v58, %v787_v58  ;;  %v8812_v25 = vld [vmem:[#allocation3 + $0x5c] sm:$0xf0]  ;;  %v6264_v48 = vld [vmem:[%s12207_s4 + $0x28] sm:$0xf]  ;;  %v9841_v58 = vpop.permute.xlu0 %1707 }
 0x15b   :  { %2193 = vperm.xlu1 %9078, %v1287_v26   ;;  %6320 = vperm.xlu2 %9079, %v6254_v60   ;;  %v6263_v26 = vld [vmem:[%s12207_s4 + $0x24] sm:$0xf]  ;;  %v7747_v55 = vor.u32 %v8812_v25, %v7746_v36  ;;  %v6265_v60 = vld [vmem:[%s12207_s4 + $0x2c] sm:$0xf] }
 0x15c   :  { %7665 = vmatmul.msk.bf16.gmra.mxu0 %vm516_vm0, %v8753_v2  ;;  %4842 = vmatpush.bf16.msra.mxu1 %v9634_v52  ;;  %v2488_v3 = vunpack.c.l.bf16 %v1080_v32  ;;  %v6273_v25 = vld [vmem:[%s12207_s4 + $0x4c] sm:$0xf] }
 0x15d   :  { %9060 = vmatpush.bf16.msra.mxu3 %v9634_v52 }
 0x15e   :  { %v2744_v44 = vadd.f32 %v2616_v51, %v2488_v3  ;;  %v9849_v51 = vpop.permute.xlu2 %1698 }
 0x160   :  { %4843 = vmatpush.bf16.msra.mxu1 %v9604_v15  ;;  %v3128_v57 = vmax.f32 %v2744_v44, 0.0  ;;  %v8956_v44 = vld [vmem:[#allocation3 + $0x4dc] sm:$0xf0] }
 0x161   :  { %9061 = vmatpush.bf16.msra.mxu3 %v9604_v15  ;;  %v789_v52 = vpop.f32.mrf.mxu0  ;;  %v6257_v15 = vld [vmem:[%s12207_s4 + $0xc] sm:$0xf] }
 0x162   :  { %v1081_v38 = vpack.c.bf16 %v789_v52, %v789_v52  ;;  %6329 = vperm.xlu0 %9077, %v6255_v33  }
 0x163   :  { %6338 = vperm.xlu1 %9078, %v6256_v34   ;;  %6347 = vperm.xlu2 %9079, %v6257_v15   ;;  %v1524_v34 = vperm.slane %v9442_v49, %v9522_v20  ;;  %v6268_v49 = vld [vmem:[%s12207_s4 + $0x38] sm:$0xf] }
 0x164   :  { %v2489_v46 = vunpack.c.l.bf16 %v1081_v38  ;;  %4844 = vmatpush.bf16.msra.mxu1 %v9576_v41  ;;  %v8322_v38 = vld [vmem:[#allocation3 + $0x4c0] sm:$0xf] }
 0x165   :  { %9062 = vmatpush.bf16.msra.mxu3 %v9576_v41  ;;  %v6259_v41 = vld [vmem:[%s12207_s4 + $0x14] sm:$0xf]  ;;  %v8323_v47 = vor.u32 %v8956_v44, %v8322_v38  ;;  %v8386_v38 = vld [vmem:[#allocation3 + $0x540] sm:$0xf] }
 0x166   :  { %v2745_v53 = vadd.f32 %v2617_v5, %v2489_v46  ;;  %v1533_v5 = vperm.slane %v9493_v4, %v9522_v20  ;;  %v6266_v46 = vld [vmem:[%s12207_s4 + $0x30] sm:$0xf]  ;;  %v8972_v44 = vld [vmem:[#allocation3 + $0x55c] sm:$0xf0] }
 0x168   :  { %4845 = vmatpush.bf16.msra.mxu1 %v9550_v1  ;;  %v3129_v59 = vmax.f32 %v2745_v53, 0.0  ;;  %v2620_v53 = vunpack.c.l.bf16 %v1524_v34  ;;  %v2621_v4 = vunpack.c.l.bf16 %v1533_v5  ;;  %v8757_v34 = vld [vmem:[%s12204_s1 + $0xa8] sm:$0xff] }
 0x169   :  { %9063 = vmatpush.bf16.msra.mxu3 %v9550_v1  ;;  %v792_v39 = vpop.f32.mrf.mxu0  ;;  %v8948_v1 = vld [vmem:[#allocation3 + $0x49c] sm:$0xf0] }
 0x16a   :  { %6356 = vperm.xlu0 %9077, %v6258_v62   ;;  %v9815_v12 = vpack.c.bf16 %v3129_v59, %v3128_v57  ;;  %v1082_v30 = vpack.c.bf16 %v792_v39, %v792_v39  ;;  %v8291_v11 = vor.u32 %v8948_v1, %v8290_v7  ;;  %v7778_v39 = vld [vmem:[#allocation3 + $0x80] sm:$0xf] }
 0x16b   :  { %4846 = vmatmul.bf16.vlgmr.msra.gmra.mxu1 %v7715_v24  ;;  %6365 = vperm.xlu1 %9078, %v6259_v41   ;;  %v9867_v24 = vpop.permute.xlu0 %2004  ;;  %v9869_v41 = vpop.permute.xlu2 %1887  ;;  %v6270_v7 = vld [vmem:[%s12207_s4 + $0x40] sm:$0xf]  ;;  %v7779_v1 = vor.u32 %v8820_v63, %v7778_v39  ;;  %v8758_v63 = vld [vmem:[%s12204_s1 + $0xb0] sm:$0xff] }
 0x16c   :  { %7666 = vmatmul.msk.bf16.gmra.mxu0 %vm516_vm0, %v8754_v31  ;;  %v2490_v54 = vunpack.c.l.bf16 %v1082_v30  ;;  %4936 = vmatmul.bf16.vlgmr.msra.gmra.mxu3 %v8291_v11 }
 0x16d   :  { %6374 = vperm.xlu2 %9079, %v6260_v8   ;;  %v8756_v8 = vld [vmem:[%s12204_s1 + $0xa0] sm:$0xff] }
 0x16e   :  { %v2746_v22 = vadd.f32 %v2618_v14, %v2490_v54  ;;  %v6271_v14 = vld [vmem:[%s12207_s4 + $0x44] sm:$0xf] }
 0x170   :  { %v3130_v32 = vmax.f32 %v2746_v22, 0.0  ;;  %v8964_v22 = vld [vmem:[#allocation3 + $0x51c] sm:$0xf0] }
 0x171   :  { %v794_v17 = vpop.f32.mrf.mxu0 }
 0x172   :  { %v1083_v21 = vpack.c.bf16 %v794_v17, %v794_v17  ;;  %6383 = vperm.xlu0 %9077, %v6261_v13  }
 0x173   :  { %6392 = vperm.xlu1 %9078, %v6262_v61   ;;  %v9887_v17 = vpop.permute.xlu0 %1689 }
 0x174   :  { %v2491_v9 = vunpack.c.l.bf16 %v1083_v21  ;;  %v8354_v21 = vld [vmem:[#allocation3 + $0x500] sm:$0xf] }
 0x175   :  { %6401 = vperm.xlu2 %9079, %v6263_v26   ;;  %v8355_v36 = vor.u32 %v8964_v22, %v8354_v21  ;;  %v6281_v21 = vld [vmem:[%s12207_s4 + $0x6c] sm:$0xf]  ;;  %v6300_v22 = vld [vmem:[%s12207_s4 + $0xb8] sm:$0xf] }
 0x176   :  { %v2747_v2 = vadd.f32 %v2619_v10, %v2491_v9  ;;  %v9890_v10 = vpop.permute.xlu2 %1680  ;;  %v6272_v9 = vld [vmem:[%s12207_s4 + $0x48] sm:$0xf] }
 0x178   :  { %v3131_v56 = vmax.f32 %v2747_v2, 0.0  ;;  %v6274_v2 = vld [vmem:[%s12207_s4 + $0x50] sm:$0xf] }
 0x179   :  { %v797_v33 = vpop.f32.mrf.mxu0 }
 0x17a   :  { %6410 = vperm.xlu0 %9077, %v6264_v48   ;;  %v9851_v3 = vpack.c.bf16 %v3131_v56, %v3130_v32  ;;  %v1084_v52 = vpack.c.bf16 %v797_v33, %v797_v33  ;;  %v7810_v48 = vld [vmem:[#allocation3 + $0xc0] sm:$0xf]  ;;  %v6275_v32 = vld [vmem:[%s12207_s4 + $0x54] sm:$0xf]  ;;  %v6276_v56 = vld [vmem:[%s12207_s4 + $0x58] sm:$0xf] }
 0x17b   :  { %4851 = vmatmul.bf16.gmra.mxu1 %v7747_v55  ;;  %6419 = vperm.xlu1 %9078, %v6265_v60   ;;  %v8828_v55 = vld [vmem:[#allocation3 + $0xdc] sm:$0xf0] }
 0x17c   :  { %7667 = vmatmul.msk.bf16.gmra.mxu0 %vm516_vm0, %v8755_v28  ;;  %v2492_v15 = vunpack.c.l.bf16 %v1084_v52  ;;  %4941 = vmatmul.bf16.gmra.mxu3 %v8323_v47  ;;  %v9903_v28 = vpop.permute.xlu0 %1986  ;;  %v7811_v60 = vor.u32 %v8828_v55, %v7810_v48  ;;  %v6277_v52 = vld [vmem:[%s12207_s4 + $0x5c] sm:$0xf]  ;;  %v8387_v47 = vor.u32 %v8972_v44, %v8386_v38  ;;  %v1596_v44 = vperm.slane %v9360_v18, %v9522_v20 }
 0x17d   :  { %6428 = vperm.xlu2 %9079, %v6266_v46   ;;  %v6278_v46 = vld [vmem:[%s12207_s4 + $0x60] sm:$0xf]  ;;  %v6301_v55 = vld [vmem:[%s12207_s4 + $0xbc] sm:$0xf]  ;;  %v1578_v18 = vperm.slane %v9390_v29, %v9522_v20 }
 0x17e   :  { %v2748_v57 = vadd.f32 %v2620_v53, %v2492_v15  ;;  %v9911_v33 = vpop.permute.xlu2 %1869  ;;  %v6280_v15 = vld [vmem:[%s12207_s4 + $0x68] sm:$0xf] }
 0x180   :  { %v3132_v11 = vmax.f32 %v2748_v57, 0.0  ;;  %v6284_v57 = vld [vmem:[%s12207_s4 + $0x78] sm:$0xf] }
 0x181   :  { %v799_v62 = vpop.f32.mrf.mxu0 }
 0x182   :  { %v1085_v31 = vpack.c.bf16 %v799_v62, %v799_v62  ;;  %6437 = vperm.xlu0 %9077, %v6267_v19   ;;  %v6279_v19 = vld [vmem:[%s12207_s4 + $0x64] sm:$0xf] }
 0x183   :  { %6446 = vperm.xlu1 %9078, %v6268_v49  }
 0x184   :  { %v2493_v59 = vunpack.c.l.bf16 %v1085_v31  ;;  %v9928_v53 = vpop.permute.xlu0 %1671  ;;  %v8836_v31 = vld [vmem:[#allocation3 + $0x11c] sm:$0xf0] }
 0x185   :  { %6455 = vperm.xlu2 %9079, %v6269_v0  }
 0x186   :  { %v2749_v30 = vadd.f32 %v2621_v4, %v2493_v59  ;;  %v9935_v62 = vpop.permute.xlu2 %1662  ;;  %v7842_v4 = vld [vmem:[#allocation3 + $0x100] sm:$0xf]  ;;  %v6285_v59 = vld [vmem:[%s12207_s4 + $0x7c] sm:$0xf] }
 0x187   :  { %v7843_v39 = vor.u32 %v8836_v31, %v7842_v4  ;;  %v8450_v31 = vld [vmem:[#allocation3 + $0x5c0] sm:$0xf] }
 0x188   :  { %v3133_v13 = vmax.f32 %v2749_v30, 0.0  ;;  %v6282_v30 = vld [vmem:[%s12207_s4 + $0x70] sm:$0xf] }
 0x189   :  { %v9883_v54 = vpop.f32.mrf.mxu0 }
 0x18a   :  { %v9885_v61 = vpack.c.bf16 %v3133_v13, %v3132_v11  ;;  %6464 = vperm.xlu0 %9077, %v6270_v7   ;;  %v8980_v11 = vld [vmem:[#allocation3 + $0x59c] sm:$0xf0]  ;;  %v6283_v13 = vld [vmem:[%s12207_s4 + $0x74] sm:$0xf] }
 0x18b   :  { %4856 = vmatmul.bf16.gmra.mxu1 %v7779_v1  ;;  %6473 = vperm.xlu1 %9078, %v6271_v14  }
 0x18c   :  { %7668 = vmatmul.msk.bf16.gmra.mxu0 %vm516_vm0, %v8756_v8  ;;  %4946 = vmatmul.bf16.gmra.mxu3 %v8355_v36  ;;  %v9951_v7 = vpop.permute.xlu0 %1968  ;;  %v8418_v8 = vld [vmem:[#allocation3 + $0x580] sm:$0xf] }
 0x18d   :  { %6482 = vperm.xlu2 %9079, %v6272_v9   ;;  %v8419_v14 = vor.u32 %v8980_v11, %v8418_v8  ;;  %v6296_v11 = vld [vmem:[%s12207_s4 + $0xa8] sm:$0xf] }
 0x18e   :  { %v9953_v1 = vpop.permute.xlu2 %1851 }
 0x191   :  { %v9901_v26 = vpop.f32.mrf.mxu0 }
 0x192   :  { %6491 = vperm.xlu0 %9077, %v6273_v25   ;;  %v7874_v25 = vld [vmem:[#allocation3 + $0x140] sm:$0xf] }
 0x193   :  { %6500 = vperm.xlu1 %9078, %v6274_v2   ;;  %v8844_v2 = vld [vmem:[#allocation3 + $0x15c] sm:$0xf0] }
 0x194   :  { %v9965_v36 = vpop.permute.xlu0 %1653 }
 0x195   :  { %6509 = vperm.xlu2 %9079, %v6275_v32   ;;  %v6298_v32 = vld [vmem:[%s12207_s4 + $0xb0] sm:$0xf] }
 0x196   :  { %v9967_v48 = vpop.permute.xlu2 %1644 }
 0x199   :  { %v9919_v5 = vpop.f32.mrf.mxu0 }
 0x19a   :  { %6518 = vperm.xlu0 %9077, %v6276_v56   ;;  %v7875_v56 = vor.u32 %v8844_v2, %v7874_v25  ;;  %v1560_v2 = vperm.slane %v9432_v45, %v9522_v20 }
 0x19b   :  { %4861 = vmatmul.bf16.gmra.mxu1 %v7811_v60  ;;  %6527 = vperm.xlu1 %9078, %v6277_v52   ;;  %v8759_v60 = vld [vmem:[%s12204_s1 + $0xb8] sm:$0xff]  ;;  %v9981_v52 = vpop.permute.xlu1 %1716 }
 0x19c   :  { %7669 = vmatmul.msk.bf16.gmra.mxu0 %vm516_vm0, %v8757_v34  ;;  %4951 = vmatmul.bf16.gmra.mxu3 %v8387_v47  ;;  %v6299_v34 = vld [vmem:[%s12207_s4 + $0xb4] sm:$0xf]  ;;  %v1587_v47 = vperm.slane %v9410_v37, %v9522_v20  ;;  %v6317_v37 = vld [vmem:[%s12207_s4 + $0xfc] sm:$0xf] }
 0x19d   :  { %6536 = vperm.xlu2 %9079, %v6278_v46  }
 0x19e   :  { %v2627_v29 = vunpack.c.l.bf16 %v1587_v47 }
 0x1a1   :  { %v9933_v49 = vpop.f32.mrf.mxu0 }
 0x1a2   :  { %6545 = vperm.xlu0 %9077, %v6279_v19   ;;  %v1605_v19 = vperm.slane %v9374_v23, %v9522_v20 }
 0x1a3   :  { %6554 = vperm.xlu1 %9078, %v6280_v15   ;;  %v9990_v15 = vpop.permute.xlu0 %1950 }
 0x1a5   :  { %6590 = vperm.xlu2 %9079, %v6284_v57   ;;  %v8988_v57 = vld [vmem:[#allocation3 + $0x5dc] sm:$0xf0] }
 0x1a9   :  { %v9949_v0 = vpop.f32.mrf.mxu0 }
 0x1aa   :  { %6599 = vperm.xlu0 %9077, %v6285_v59   ;;  %v6316_v59 = vld [vmem:[%s12207_s4 + $0xf8] sm:$0xf]  ;;  %v1090_v23 = vpack.c.bf16 %v9949_v0, %v9949_v0  ;;  %v2626_v0 = vunpack.c.l.bf16 %v1578_v18 }
 0x1ab   :  { %4866 = vmatmul.bf16.gmra.mxu1 %v7843_v39  ;;  %6572 = vperm.xlu1 %9078, %v6282_v30   ;;  %v8451_v39 = vor.u32 %v8988_v57, %v8450_v31  ;;  %v10000_v30 = vpop.permute.xlu2 %1833  ;;  %v2624_v31 = vunpack.c.l.bf16 %v1560_v2  ;;  %v1086_v57 = vpack.c.bf16 %v9883_v54, %v9883_v54 }
 0x1ac   :  { %7670 = vmatmul.msk.bf16.gmra.mxu0 %vm516_vm0, %v8758_v63  ;;  %4956 = vmatmul.bf16.gmra.mxu3 %v8419_v14  ;;  %v2628_v63 = vunpack.c.l.bf16 %v1596_v44 }
 0x1ad   :  { %6581 = vperm.xlu2 %9079, %v6283_v13   ;;  %v1569_v13 = vperm.slane %v9406_v35, %v9522_v20  ;;  %v1088_v35 = vpack.c.bf16 %v9919_v5, %v9919_v5  ;;  %v1542_v5 = vperm.slane %v9424_v42, %v9522_v20  ;;  %v6315_v42 = vld [vmem:[%s12207_s4 + $0xf4] sm:$0xf] }
 0x1af   :  { %v2625_v44 = vunpack.c.l.bf16 %v1569_v13  ;;  %v2496_v18 = vunpack.c.l.bf16 %v1088_v35 }
 0x1b1   :  { %v814_v9 = vpop.f32.mrf.mxu0 }
 0x1b2   :  { %6563 = vperm.xlu0 %9077, %v6281_v21   ;;  %v1091_v4 = vpack.c.bf16 %v814_v9, %v814_v9  ;;  %v2629_v21 = vunpack.c.l.bf16 %v1605_v19 }
 0x1b3   :  { %6734 = vperm.xlu1 %9078, %v6300_v22   ;;  %v1089_v22 = vpack.c.bf16 %v9933_v49, %v9933_v49  ;;  %v1551_v49 = vperm.slane %v9427_v43, %v9522_v20  ;;  %v6314_v43 = vld [vmem:[%s12207_s4 + $0xf0] sm:$0xf] }
 0x1b4   :  { %v2499_v9 = vunpack.c.l.bf16 %v1091_v4  ;;  %v6297_v4 = vld [vmem:[%s12207_s4 + $0xac] sm:$0xf] }
 0x1b5   :  { %6743 = vperm.xlu2 %9079, %v6301_v55   ;;  %v10013_v55 = vpop.permute.xlu1 %2031  ;;  %v2497_v47 = vunpack.c.l.bf16 %v1089_v22  ;;  %v2623_v54 = vunpack.c.l.bf16 %v1551_v49  ;;  %v2622_v22 = vunpack.c.l.bf16 %v1542_v5  ;;  %v6294_v49 = vld [vmem:[%s12207_s4 + $0xa0] sm:$0xf] }
 0x1b6   :  { %v2755_v19 = vadd.f32 %v2627_v29, %v2499_v9  ;;  %v2494_v9 = vunpack.c.l.bf16 %v1086_v57 }
 0x1b9   :  { %v817_v38 = vpop.f32.mrf.mxu0 }
 0x1ba   :  { %6716 = vperm.xlu0 %9077, %v6298_v32   ;;  %v1092_v46 = vpack.c.bf16 %v817_v38, %v817_v38  ;;  %v2498_v32 = vunpack.c.l.bf16 %v1090_v23  ;;  %v8852_v38 = vld [vmem:[#allocation3 + $0x19c] sm:$0xf0] }
 0x1bb   :  { %4871 = vmatmul.bf16.gmra.mxu1 %v7875_v56  ;;  %6725 = vperm.xlu1 %9078, %v6299_v34   ;;  %v7906_v34 = vld [vmem:[#allocation3 + $0x180] sm:$0xf] }
 0x1bc   :  { %7671 = vmatmul.msk.bf16.gmra.mxu0 %vm516_vm0, %v8759_v60  ;;  %v2500_v8 = vunpack.c.l.bf16 %v1092_v46  ;;  %4961 = vmatmul.bf16.gmra.mxu3 %v8451_v39  ;;  %v1087_v46 = vpack.c.bf16 %v9901_v26, %v9901_v26  ;;  %v10031_v26 = vpop.permute.xlu0 %1635  ;;  %v2754_v39 = vadd.f32 %v2626_v0, %v2498_v32 }
 0x1bd   :  { %6878 = vperm.xlu2 %9079, %v6316_v59   ;;  %v7907_v59 = vor.u32 %v8852_v38, %v7906_v34  ;;  %v10044_v2 = vpop.permute.xlu1 %1878  ;;  %v8996_v34 = vld [vmem:[#allocation3 + $0x61c] sm:$0xf0] }
 0x1be   :  { %v2756_v56 = vadd.f32 %v2628_v63, %v2500_v8  ;;  %v2495_v13 = vunpack.c.l.bf16 %v1087_v46  ;;  %v3138_v0 = vmax.f32 %v2754_v39, 0.0  ;;  %v2750_v46 = vadd.f32 %v2622_v22, %v2494_v9 }
 0x1c0   :  { %v3140_v63 = vmax.f32 %v2756_v56, 0.0  ;;  %v2751_v56 = vadd.f32 %v2623_v54, %v2495_v13  ;;  %v6293_v54 = vld [vmem:[%s12207_s4 + $0x9c] sm:$0xf] }
 0x1c1   :  { %v819_v14 = vpop.f32.mrf.mxu0 }
 0x1c2   :  { %v1093_v25 = vpack.c.bf16 %v819_v14, %v819_v14  ;;  %6887 = vperm.xlu0 %9077, %v6317_v37   ;;  %v8760_v37 = vld [vmem:[%s12204_s1 + $0xc0] sm:$0xff]  ;;  %v3139_v14 = vmax.f32 %v2755_v19, 0.0 }
 0x1c3   :  { %6698 = vperm.xlu1 %9078, %v6296_v11   ;;  %v10041_v11 = vpop.permute.xlu2 %1626 }
 0x1c4   :  { %v2501_v60 = vunpack.c.l.bf16 %v1093_v25  ;;  %v2752_v25 = vadd.f32 %v2624_v31, %v2496_v18  ;;  %v3252_v35 = vpack.c.bf16 %v3139_v14, %v3138_v0  ;;  %v3135_v31 = vmax.f32 %v2751_v56, 0.0  ;;  %v8860_v18 = vld [vmem:[#allocation3 + $0x1dc] sm:$0xf0] }
 0x1c5   :  { %6707 = vperm.xlu2 %9079, %v6297_v4   ;;  %v10055_v4 = vpop.permute.xlu0 %1932  ;;  %v9004_v0 = vld [vmem:[#allocation3 + $0x65c] sm:$0xf0] }
 0x1c6   :  { %v2757_v45 = vadd.f32 %v2629_v21, %v2501_v60  ;;  %v2753_v21 = vadd.f32 %v2625_v44, %v2497_v47  ;;  %v8482_v60 = vld [vmem:[#allocation3 + $0x600] sm:$0xf]  ;;  %v3136_v47 = vmax.f32 %v2752_v25, 0.0 }
 0x1c7   :  { %v8483_v38 = vor.u32 %v8996_v34, %v8482_v60  ;;  %v6295_v44 = vld [vmem:[%s12207_s4 + $0xa4] sm:$0xf] }
 0x1c8   :  { %v3141_v23 = vmax.f32 %v2757_v45, 0.0  ;;  %v3137_v32 = vmax.f32 %v2753_v21, 0.0  ;;  %v6312_v45 = vld [vmem:[%s12207_s4 + $0xe8] sm:$0xf]  ;;  %v8514_v25 = vld [vmem:[#allocation3 + $0x640] sm:$0xf] }
 0x1c9   :  { %v10039_v8 = vpop.f32.mrf.mxu0  ;;  %v8515_v56 = vor.u32 %v9004_v0, %v8514_v25  ;;  %v6311_v60 = vld [vmem:[%s12207_s4 + $0xe4] sm:$0xf]  ;;  %v6291_v25 = vld [vmem:[%s12207_s4 + $0x94] sm:$0xf] }
 0x1ca   :  { %v3253_v29 = vpack.c.bf16 %v3141_v23, %v3140_v63  ;;  %6860 = vperm.xlu0 %9077, %v6314_v43   ;;  %v3251_v5 = vpack.c.bf16 %v3137_v32, %v3136_v47  ;;  %v3134_v43 = vmax.f32 %v2750_v46, 0.0  ;;  %v6292_v63 = vld [vmem:[%s12207_s4 + $0x98] sm:$0xf]  ;;  %v1094_v32 = vpack.c.bf16 %v10039_v8, %v10039_v8 }
 0x1cb   :  { %4876 = vmatmul.bf16.gmra.mxu1 %v7907_v59  ;;  %6869 = vperm.xlu1 %9078, %v6315_v42   ;;  %v10057_v57 = vpop.permute.xlu2 %1815  ;;  %v7938_v59 = vld [vmem:[#allocation3 + $0x1c0] sm:$0xf]  ;;  %v8761_v42 = vld [vmem:[%s12204_s1 + $0xc8] sm:$0xff]  ;;  %v1641_v47 = vperm.slane %v10031_v26, %v9522_v20 }
 0x1cc   :  { %7672 = vmatmul.msk.bf16.gmra.mxu0 %vm516_vm0, %v8760_v37  ;;  %9064 = vmatpush.bf16.msra.mxu2 %v3253_v29  ;;  %v3250_v39 = vpack.c.bf16 %v3135_v31, %v3134_v43  ;;  %v10059_v37 = vpop.permute.xlu1 %2013  ;;  %v7939_v23 = vor.u32 %v8860_v18, %v7938_v59  ;;  %v6310_v31 = vld [vmem:[%s12207_s4 + $0xe0] sm:$0xf] }
 0x1cd   :  { %5007 = vmatpush.bf16.msrb.mxu0 %v3253_v29  ;;  %4966 = vmatmul.bf16.gmra.mxu3 %v8483_v38  ;;  %v6313_v29 = vld [vmem:[%s12207_s4 + $0xec] sm:$0xf]  ;;  %v1618_v14 = vpop.permute.xlu0 %1617  ;;  %v1632_v38 = vperm.slane %v10041_v11, %v9522_v20  ;;  %v7970_v11 = vld [vmem:[#allocation3 + $0x200] sm:$0xf] }
 0x1ce   :  { %6680 = vperm.xlu2 %9079, %v6294_v49   ;;  %v1623_v21 = vperm.slane %v1618_v14, %v9522_v20  ;;  %v8868_v43 = vld [vmem:[#allocation3 + $0x21c] sm:$0xf0] }
 0x1cf   :  { %v2632_v59 = vunpack.c.l.bf16 %v1632_v38  ;;  %v8546_v38 = vld [vmem:[#allocation3 + $0x680] sm:$0xf] }
 0x1d0   :  { %9065 = vmatpush.bf16.msra.mxu2 %v3252_v35 }
 0x1d1   :  { %5008 = vmatpush.bf16.msrb.mxu0 %v3252_v35  ;;  %v824_v19 = vpop.f32.mrf.mxu0 }
 0x1d2   :  { %6689 = vperm.xlu0 %9077, %v6295_v44   ;;  %v1095_v22 = vpack.c.bf16 %v824_v19, %v824_v19  ;;  %v2631_v44 = vunpack.c.l.bf16 %v1623_v21  ;;  %v2502_v19 = vunpack.c.l.bf16 %v1094_v32 }
 0x1d3   :  { %6842 = vperm.xlu1 %9078, %v6312_v45   ;;  %v1609_v9 = vpop.permute.xlu2 %1608 }
 0x1d4   :  { %9066 = vmatpush.bf16.msra.mxu2 %v3251_v5  ;;  %v1614_v35 = vperm.slane %v1609_v9, %v9522_v20  ;;  %v10087_v34 = vpop.permute.xlu1 %1860  ;;  %v2503_v49 = vunpack.c.l.bf16 %v1095_v22 }
 0x1d5   :  { %5009 = vmatpush.bf16.msrb.mxu0 %v3251_v5 }
 0x1d6   :  { %6851 = vperm.xlu2 %9079, %v6313_v29   ;;  %v2630_v45 = vunpack.c.l.bf16 %v1614_v35  ;;  %v2759_v18 = vadd.f32 %v2631_v44, %v2503_v49  ;;  %v1650_v35 = vperm.slane %v9967_v48, %v9522_v20  ;;  %v9012_v44 = vld [vmem:[#allocation3 + $0x69c] sm:$0xf0] }
 0x1d7   :  { %v8547_v49 = vor.u32 %v9012_v44, %v8546_v38 }
 0x1d8   :  { %9067 = vmatpush.bf16.msra.mxu2 %v3250_v39  ;;  %v2758_v26 = vadd.f32 %v2630_v45, %v2502_v19  ;;  %v3143_v21 = vmax.f32 %v2759_v18, 0.0  ;;  %v2634_v48 = vunpack.c.l.bf16 %v1650_v35  ;;  %v6306_v19 = vld [vmem:[%s12207_s4 + $0xd0] sm:$0xf]  ;;  %v8002_v18 = vld [vmem:[#allocation3 + $0x240] sm:$0xf] }
 0x1d9   :  { %5010 = vmatpush.bf16.msrb.mxu0 %v3250_v39  ;;  %v827_v13 = vpop.f32.mrf.mxu0  ;;  %v2633_v39 = vunpack.c.l.bf16 %v1641_v47 }
 0x1da   :  { %6662 = vperm.xlu0 %9077, %v6292_v63   ;;  %v1096_v46 = vpack.c.bf16 %v827_v13, %v827_v13  ;;  %v3142_v0 = vmax.f32 %v2758_v26, 0.0 }
 0x1db   :  { %4881 = vmatmul.bf16.gmra.mxu1 %v7939_v23  ;;  %6671 = vperm.xlu1 %9078, %v6293_v54   ;;  %v6308_v23 = vld [vmem:[%s12207_s4 + $0xd8] sm:$0xf]  ;;  %v8762_v54 = vld [vmem:[%s12204_s1 + $0xd0] sm:$0xff] }
 0x1dc   :  { %7673 = vmatmul.msk.bf16.gmra.mxu0 %vm516_vm0, %v8761_v42  ;;  %9068 = vmatpush.bf16.msra.mxu2 %v9885_v61  ;;  %v7971_v42 = vor.u32 %v8868_v43, %v7970_v11  ;;  %v10112_v22 = vpop.permute.xlu1 %1995  ;;  %v6288_v11 = vld [vmem:[%s12207_s4 + $0x88] sm:$0xf] }
 0x1dd   :  { %5011 = vmatpush.bf16.msrb.mxu0 %v9885_v61  ;;  %v6290_v61 = vld [vmem:[%s12207_s4 + $0x90] sm:$0xf]  ;;  %4971 = vmatmul.bf16.gmra.mxu3 %v8515_v56 }
 0x1de   :  { %6824 = vperm.xlu2 %9079, %v6310_v31  }
 0x1e0   :  { %9069 = vmatpush.bf16.msra.mxu2 %v9851_v3 }
 0x1e1   :  { %5012 = vmatpush.bf16.msrb.mxu0 %v9851_v3  ;;  %v829_v8 = vpop.f32.mrf.mxu0  ;;  %v2504_v3 = vunpack.c.l.bf16 %v1096_v46  ;;  %v6289_v46 = vld [vmem:[%s12207_s4 + $0x8c] sm:$0xf] }
 0x1e2   :  { %6833 = vperm.xlu0 %9077, %v6311_v60   ;;  %v1097_v5 = vpack.c.bf16 %v829_v8, %v829_v8  ;;  %v10120_v60 = vpack.c.bf16 %v3143_v21, %v3142_v0  ;;  %v6287_v21 = vld [vmem:[%s12207_s4 + $0x84] sm:$0xf]  ;;  %v6307_v0 = vld [vmem:[%s12207_s4 + $0xd4] sm:$0xf] }
 0x1e3   :  { %6644 = vperm.xlu1 %9078, %v6290_v61   ;;  %v2760_v29 = vadd.f32 %v2632_v59, %v2504_v3  ;;  %v1659_v61 = vperm.slane %v9965_v36, %v9522_v20 }
 0x1e4   :  { %9070 = vmatpush.bf16.msra.mxu2 %v9815_v12  ;;  %v2505_v63 = vunpack.c.l.bf16 %v1097_v5  ;;  %v10139_v26 = vpop.permute.xlu1 %1842 }
 0x1e5   :  { %5013 = vmatpush.bf16.msrb.mxu0 %v9815_v12  ;;  %v6309_v12 = vld [vmem:[%s12207_s4 + $0xdc] sm:$0xf]  ;;  %v2635_v36 = vunpack.c.l.bf16 %v1659_v61  ;;  %v9020_v61 = vld [vmem:[#allocation3 + $0x6dc] sm:$0xf0] }
 0x1e6   :  { %v2761_v9 = vadd.f32 %v2633_v39, %v2505_v63  ;;  %6653 = vperm.xlu2 %9079, %v6291_v25   ;;  %v8876_v39 = vld [vmem:[#allocation3 + $0x25c] sm:$0xf0] }
 0x1e8   :  { %9071 = vmatpush.bf16.msra.mxu2 %v9775_v27  ;;  %v10106_v13 = vpop.f32.mrf.mxu1  ;;  %v3145_v56 = vmax.f32 %v2761_v9, 0.0 }
 0x1e9   :  { %12214 = vst [vmem:[#allocation7_spill] sm:$0xff] %v10106_v13  ;;  %5014 = vmatpush.bf16.msrb.mxu0 %v9775_v27  ;;  %v832_v14 = vpop.f32.mrf.mxu0  ;;  %v3144_v27 = vmax.f32 %v2760_v29, 0.0 }
 0x1ea   :  { %6806 = vperm.xlu0 %9077, %v6308_v23   ;;  %v1098_v32 = vpack.c.bf16 %v832_v14, %v832_v14  ;;  %v6286_v23 = vld [vmem:[%s12207_s4 + $0x80] sm:$0xf] }
 0x1eb   :  { %4886 = vmatmul.bf16.gmra.mxu1 %v7971_v42  ;;  %6815 = vperm.xlu1 %9078, %v6309_v12   ;;  %v10127_v8 = vpack.c.bf16 %v3145_v56, %v3144_v27  ;;  %v8003_v42 = vor.u32 %v8876_v39, %v8002_v18  ;;  %v1668_v27 = vperm.slane %v9935_v62, %v9522_v20  ;;  %v8578_v56 = vld [vmem:[#allocation3 + $0x6c0] sm:$0xf] }
 0x1ec   :  { %7674 = vmatmul.msk.bf16.gmra.mxu0 %vm516_vm0, %v8762_v54  ;;  %v2506_v47 = vunpack.c.l.bf16 %v1098_v32  ;;  %v8763_v54 = vld [vmem:[%s12204_s1 + $0xd8] sm:$0xff]  ;;  %v10162_v38 = vpop.permute.xlu1 %1977  ;;  %v8579_v44 = vor.u32 %v9020_v61, %v8578_v56  ;;  %v6302_v62 = vld [vmem:[%s12207_s4 + $0xc0] sm:$0xf] }
 0x1ed   :  { %4976 = vmatmul.bf16.gmra.mxu3 %v8547_v49  ;;  %v6305_v49 = vld [vmem:[%s12207_s4 + $0xcc] sm:$0xf]  ;;  %v8034_v18 = vld [vmem:[#allocation3 + $0x280] sm:$0xf] }
 0x1ee   :  { %v2762_v43 = vadd.f32 %v2634_v48, %v2506_v47  ;;  %6626 = vperm.xlu2 %9079, %v6288_v11   ;;  %v8884_v39 = vld [vmem:[#allocation3 + $0x29c] sm:$0xf0] }
 0x1ef   :  { %v10137_v3 = vpop.f32.mrf.mxu3  ;;  %v8610_v61 = vld [vmem:[#allocation3 + $0x700] sm:$0xf] }
 0x1f0   :  { %v10129_v45 = vpop.f32.mrf.mxu1  ;;  %v3146_v29 = vmax.f32 %v2762_v43, 0.0 }
 0x1f1   :  { %12215 = vst [vmem:[#allocation8_spill] sm:$0xff] %v10129_v45  ;;  %v834_v5 = vpop.f32.mrf.mxu0 }
 0x1f2   :  { %v1099_v31 = vpack.c.bf16 %v834_v5, %v834_v5  ;;  %6635 = vperm.xlu0 %9077, %v6289_v46   ;;  %v1677_v46 = vperm.slane %v9928_v53, %v9522_v20  ;;  %v2636_v5 = vunpack.c.l.bf16 %v1668_v27  ;;  %v6303_v27 = vld [vmem:[%s12207_s4 + $0xc4] sm:$0xf] }
 0x1f3   :  { %6788 = vperm.xlu1 %9078, %v6306_v19  }
 0x1f4   :  { %v2507_v59 = vunpack.c.l.bf16 %v1099_v31  ;;  %v6304_v31 = vld [vmem:[%s12207_s4 + $0xc8] sm:$0xf]  ;;  %v2637_v11 = vunpack.c.l.bf16 %v1677_v46 }
 0x1f6   :  { %v2763_v63 = vadd.f32 %v2635_v36, %v2507_v59  ;;  %6797 = vperm.xlu2 %9079, %v6307_v0  }
 0x1f7   :  { %v10158_v32 = vpop.f32.mrf.mxu3 }
 0x1f8   :  { %v10147_v12 = vpop.f32.mrf.mxu1  ;;  %v3147_v14 = vmax.f32 %v2763_v63, 0.0 }
 0x1f9   :  { %12216 = vst [vmem:[#allocation9_spill] sm:$0xff] %v10147_v12  ;;  %v837_v9 = vpop.f32.mrf.mxu0 }
 0x1fa   :  { %6608 = vperm.xlu0 %9077, %v6286_v23   ;;  %v10152_v25 = vpack.c.bf16 %v3147_v14, %v3146_v29  ;;  %v1100_v35 = vpack.c.bf16 %v837_v9, %v837_v9  ;;  %v7378_v23 = vld [vmem:[#allocation2] sm:$0x1]  ;;  %v10184_v9 = vpop.permute.xlu1 %1824 }
 0x1fb   :  { %4891 = vmatmul.bf16.gmra.mxu1 %v8003_v42  ;;  %6617 = vperm.xlu1 %9078, %v6287_v21   ;;  %v8035_v42 = vor.u32 %v8884_v39, %v8034_v18 }
 0x1fc   :  { %7675 = vmatmul.msk.bf16.gmra.mxu0 %vm516_vm0, %v8763_v54  ;;  %v2508_v48 = vunpack.c.l.bf16 %v1100_v35  ;;  %v8764_v54 = vld [vmem:[%s12204_s1 + $0xe0] sm:$0xff] }
 0x1fd   :  { %4981 = vmatmul.bf16.gmra.mxu3 %v8579_v44  ;;  %v9028_v44 = vld [vmem:[#allocation3 + $0x71c] sm:$0xf0] }
 0x1fe   :  { %v2764_v43 = vadd.f32 %v2636_v5, %v2508_v48  ;;  %6770 = vperm.xlu2 %9079, %v6304_v31   ;;  %v8066_v5 = vld [vmem:[#allocation3 + $0x2c0] sm:$0xf] }
 0x1ff   :  { %v10177_v59 = vpop.f32.mrf.mxu3 }
 0x200   :  { %v10169_v47 = vpop.f32.mrf.mxu1  ;;  %12218 = vst [vmem:[#allocation11_spill] sm:$0xff] %v10177_v59  ;;  %v3148_v29 = vmax.f32 %v2764_v43, 0.0 }
 0x201   :  { %12217 = vst [vmem:[#allocation10_spill] sm:$0xff] %v10169_v47  ;;  %v839_v19 = vpop.f32.mrf.mxu0  ;;  %v8196_v47 = vld [vmem:[#allocation3 + $0x3e0] sm:$0xf0] }
 0x202   :  { %v1101_v36 = vpack.c.bf16 %v839_v19, %v839_v19  ;;  %6779 = vperm.xlu0 %9077, %v6305_v49   ;;  %v8611_v49 = vor.u32 %v9028_v44, %v8610_v61 }
 0x203   :  { %6752 = vperm.xlu1 %9078, %v6302_v62   ;;  %v10200_v62 = vpop.permute.xlu1 %1959 }
 0x204   :  { %v2509_v53 = vunpack.c.l.bf16 %v1101_v36  ;;  %v8892_v36 = vld [vmem:[#allocation3 + $0x2dc] sm:$0xf0] }
 0x205   :  { %v8067_v31 = vor.u32 %v8892_v36, %v8066_v5  ;;  %v8900_v5 = vld [vmem:[#allocation3 + $0x31c] sm:$0xf0] }
 0x206   :  { %v2765_v63 = vadd.f32 %v2637_v11, %v2509_v53  ;;  %6761 = vperm.xlu2 %9079, %v6303_v27   ;;  %v8765_v11 = vld [vmem:[%s12204_s1 + $0xe8] sm:$0xff] }
 0x207   :  { %v10194_v56 = vpop.f32.mrf.mxu3  ;;  %v8164_v27 = vld [vmem:[#allocation3 + $0x3a0] sm:$0xf0] }
 0x208   :  { %v3149_v14 = vmax.f32 %v2765_v63, 0.0  ;;  %v10182_v21 = vpop.f32.mrf.mxu1  ;;  %12220 = vst [vmem:[#allocation13_spill] sm:$0xff] %v10194_v56  ;;  %v8642_v63 = vld [vmem:[#allocation3 + $0x740] sm:$0xf] }
 0x209   :  { %12219 = vst [vmem:[#allocation12_spill] sm:$0xff] %v10182_v21  ;;  %v10186_v0 = vpop.f32.mrf.mxu0  ;;  %v8908_v21 = vld [vmem:[#allocation3 + $0x35c] sm:$0xf0] }
 0x20a   :  { %v10188_v35 = vpack.c.bf16 %v3149_v14, %v3148_v29  ;;  %7381 = vperm.xlu0 %9077, %v7378_v23   ;;  %v9036_v23 = vld [vmem:[#allocation3 + $0x75c] sm:$0xf0]  ;;  %v8912_v14 = vld [vmem:[#allocation3 + $0x384] sm:$0xf] }
 0x20b   :  { %4896 = vmatmul.bf16.gmra.mxu1 %v8035_v42  ;;  %v10214_v39 = vpop.permute.xlu1 %1806  ;;  %v8643_v42 = vor.u32 %v9036_v23, %v8642_v63  ;;  %v8167_v44 = vor.u32 %v8912_v14, %v8164_v27  ;;  %v9044_v14 = vld [vmem:[#allocation3 + $0x79c] sm:$0xf0] }
 0x20c   :  { %7676 = vmatmul.msk.bf16.gmra.mxu0 %vm516_vm0, %v8764_v54 }
 0x20d   :  { %4986 = vmatmul.bf16.gmra.mxu3 %v8611_v49  ;;  %v8098_v49 = vld [vmem:[#allocation3 + $0x300] sm:$0xf]  ;;  %5085 = vmatmul.bf16.vlgmr.msra.gmra.mxu2 %v8167_v44 }
 0x20f   :  { %v10202_v19 = vpop.f32.mrf.mxu3 }
 0x210   :  { %v10196_v46 = vpop.f32.mrf.mxu1  ;;  %12222 = vst [vmem:[#allocation15_spill] sm:$0xff] %v10202_v19 }
 0x211   :  { %12221 = vst [vmem:[#allocation14_spill] sm:$0xff] %v10196_v46  ;;  %v10198_v48 = vpop.f32.mrf.mxu0 }
 0x213   :  { %v10222_v36 = vpop.permute.xlu1 %1941 }
 0x217   :  { %v10212_v18 = vpop.f32.mrf.mxu3 }
 0x218   :  { %v10207_v43 = vpop.f32.mrf.mxu1  ;;  %12224 = vst [vmem:[#allocation17_spill] sm:$0xff] %v10212_v18  ;;  %v9052_v18 = vld [vmem:[#allocation3 + $0x7dc] sm:$0xf0] }
 0x219   :  { %12223 = vst [vmem:[#allocation16_spill] sm:$0xff] %v10207_v43  ;;  %v10209_v53 = vpop.f32.mrf.mxu0  ;;  %v8130_v43 = vld [vmem:[#allocation3 + $0x340] sm:$0xf] }
 0x21b   :  { %4901 = vmatmul.bf16.gmra.mxu1 %v8067_v31  ;;  %v8099_v31 = vor.u32 %v8900_v5, %v8098_v49  ;;  %v10234_v44 = vpop.permute.xlu1 %1788 }
 0x21c   :  { %7677 = vmatmul.msk.bf16.gmra.mxu0 %vm516_vm0, %v8765_v11  ;;  %v8766_v11 = vld [vmem:[%s12204_s1 + $0xf0] sm:$0xff] }
 0x21d   :  { %4991 = vmatmul.bf16.gmra.mxu3 %v8643_v42 }
 0x21f   :  { %v10220_v61 = vpop.f32.mrf.mxu3 }
 0x220   :  { %v10216_v54 = vpop.f32.mrf.mxu1  ;;  %12226 = vst [vmem:[#allocation19_spill] sm:$0xff] %v10220_v61 }
 0x221   :  { %12225 = vst [vmem:[#allocation18_spill] sm:$0xff] %v10216_v54  ;;  %v10218_v29 = vpop.f32.mrf.mxu0  ;;  %v8674_v54 = vld [vmem:[#allocation3 + $0x780] sm:$0xf] }
 0x222   :  { %v8675_v27 = vor.u32 %v9044_v14, %v8674_v54  ;;  %v10243_v54 = vpop.permute.xlu0 %1914 }
 0x223   :  { %v10245_v45 = vpop.permute.xlu1 %1923 }
 0x227   :  { %v10230_v42 = vpop.f32.mrf.mxu3 }
 0x228   :  { %v10227_v63 = vpop.f32.mrf.mxu1  ;;  %12228 = vst [vmem:[#allocation21_spill] sm:$0xff] %v10230_v42  ;;  %v8706_v42 = vld [vmem:[#allocation3 + $0x7c0] sm:$0xf] }
 0x229   :  { %12227 = vst [vmem:[#allocation20_spill] sm:$0xff] %v10227_v63  ;;  %v852_v23 = vpop.f32.mrf.mxu0  ;;  %v8131_v63 = vor.u32 %v8908_v21, %v8130_v43  ;;  %v1740_v43 = vperm.slane %v9799_v50, %v9522_v20 }
 0x22b   :  { %4906 = vmatmul.bf16.gmra.mxu1 %v8099_v31  ;;  %v8767_v31 = vld [vmem:[%s12204_s1 + $0xf8] sm:$0xff]  ;;  %v2644_v50 = vunpack.c.l.bf16 %v1740_v43  ;;  %v8162_v43 = vld [vmem:[#allocation3 + $0x380] sm:$0xf] }
 0x22c   :  { %7678 = vmatmul.msk.bf16.gmra.mxu0 %vm516_vm0, %v8766_v11  ;;  %v8920_v11 = vld [vmem:[#allocation3 + $0x3c4] sm:$0xf] }
 0x22d   :  { %4996 = vmatmul.bf16.gmra.mxu3 %v8675_v27 }
 0x22f   :  { %v10236_v5 = vpop.f32.mrf.mxu3 }
 0x230   :  { %v10232_v46 = vpop.f32.mrf.mxu1  ;;  %12230 = vst [vmem:[#allocation23_spill] sm:$0xff] %v10236_v5 }
 0x231   :  { %12229 = vst [vmem:[#allocation22_spill] sm:$0xff] %v10232_v46  ;;  %v854_v49 = vpop.f32.mrf.mxu0  ;;  %v8199_v46 = vor.u32 %v8920_v11, %v8196_v47  ;;  %v1731_v47 = vperm.slane %v9830_v16, %v9522_v20  ;;  %v8707_v11 = vor.u32 %v9052_v18, %v8706_v42  ;;  %v1713_v16 = vperm.slane %v9841_v58, %v9522_v20  ;;  %v10264_v18 = vpop.permute.xlu0 %1779 }
 0x232   :  { %v1107_v13 = vpack.c.bf16 %v854_v49, %v854_v49  ;;  %v1105_v49 = vpack.c.bf16 %v10218_v29, %v10218_v29  ;;  %v1103_v58 = vpack.c.bf16 %v10198_v48, %v10198_v48 }
 0x233   :  { %5090 = vmatmul.bf16.gmra.mxu2 %v8199_v46  ;;  %v1106_v46 = vpack.c.bf16 %v852_v23, %v852_v23  ;;  %v2643_v19 = vunpack.c.l.bf16 %v1731_v47  ;;  %v1104_v23 = vpack.c.bf16 %v10209_v53, %v10209_v53  ;;  %v2641_v53 = vunpack.c.l.bf16 %v1713_v16 }
 0x234   :  { %v2515_v5 = vunpack.c.l.bf16 %v1107_v13  ;;  %v1704_v13 = vperm.slane %v9849_v51, %v9522_v20  ;;  %v8768_v51 = vld [vmem:[%s12204_s1 + $0x100] sm:$0xff] }
 0x235   :  { %v2514_v42 = vunpack.c.l.bf16 %v1106_v46  ;;  %v1102_v46 = vpack.c.bf16 %v10186_v0, %v10186_v0 }
 0x236   :  { %v2771_v56 = vadd.f32 %v2643_v19, %v2515_v5  ;;  %v1686_v19 = vperm.slane %v9890_v10, %v9522_v20 }
 0x237   :  { %v10248_v21 = vpop.f32.mrf.mxu3 }
 0x238   :  { %v10241_v12 = vpop.f32.mrf.mxu1  ;;  %12232 = vst [vmem:[#allocation25_spill] sm:$0xff] %v10248_v21  ;;  %v3155_v16 = vmax.f32 %v2771_v56, 0.0  ;;  %v8928_v56 = vld [vmem:[#allocation3 + $0x404] sm:$0xf] }
 0x239   :  { %12231 = vst [vmem:[#allocation24_spill] sm:$0xff] %v10241_v12  ;;  %v857_v14 = vpop.f32.mrf.mxu0  ;;  %v1749_v12 = vperm.slane %v9795_v40, %v9522_v20 }
 0x23a   :  { %v1108_v27 = vpack.c.bf16 %v857_v14, %v857_v14 }
 0x23b   :  { %4911 = vmatmul.bf16.gmra.mxu1 %v8131_v63  ;;  %v2645_v40 = vunpack.c.l.bf16 %v1749_v12  ;;  %v10272_v12 = vpop.permute.xlu1 %1896 }
 0x23c   :  { %7679 = vmatmul.msk.bf16.gmra.mxu0 %vm516_vm0, %v8767_v31  ;;  %v2516_v63 = vunpack.c.l.bf16 %v1108_v27  ;;  %v1722_v31 = vperm.slane %v9981_v52, %v9522_v20 }
 0x23d   :  { %5001 = vmatmul.bf16.gmra.mxu3 %v8707_v11 }
 0x23e   :  { %v2772_v52 = vadd.f32 %v2644_v50, %v2516_v63  ;;  %v2642_v29 = vunpack.c.l.bf16 %v1722_v31  ;;  %v2512_v31 = vunpack.c.l.bf16 %v1104_v23  ;;  %v2510_v23 = vunpack.c.l.bf16 %v1102_v46 }
 0x23f   :  { %v10268_v11 = vpop.f32.mrf.mxu3 }
 0x240   :  { %v10256_v14 = vpop.f32.mrf.mxu1  ;;  %12234 = vst [vmem:[#allocation27_spill] sm:$0xff] %v10268_v11  ;;  %v2770_v50 = vadd.f32 %v2642_v29, %v2514_v42  ;;  %v3156_v11 = vmax.f32 %v2772_v52, 0.0  ;;  %v2638_v29 = vunpack.c.l.bf16 %v1686_v19 }
 0x241   :  { %12233 = vst [vmem:[#allocation26_spill] sm:$0xff] %v10256_v14  ;;  %v859_v21 = vpop.f32.mrf.mxu0  ;;  %v8916_v14 = vld [vmem:[#allocation3 + $0x39c] sm:$0xf0] }
 0x242   :  { %v1109_v61 = vpack.c.bf16 %v859_v21, %v859_v21  ;;  %v2513_v21 = vunpack.c.l.bf16 %v1105_v49  ;;  %v8163_v63 = vor.u32 %v8916_v14, %v8162_v43  ;;  %v2640_v49 = vunpack.c.l.bf16 %v1704_v13  ;;  %v1753_v13 = vpop.permute.xlu0 %1752 }
 0x243   :  { %v3154_v52 = vmax.f32 %v2770_v50, 0.0  ;;  %v1758_v10 = vperm.slane %v1753_v13, %v9522_v20  ;;  %v2766_v46 = vadd.f32 %v2638_v29, %v2510_v23  ;;  %v8194_v23 = vld [vmem:[#allocation3 + $0x3c0] sm:$0xf] }
 0x244   :  { %v2517_v27 = vunpack.c.l.bf16 %v1109_v61  ;;  %v1695_v61 = vperm.slane %v9887_v17, %v9522_v20  ;;  %v2511_v17 = vunpack.c.l.bf16 %v1103_v58  ;;  %v2769_v0 = vadd.f32 %v2641_v53, %v2513_v21  ;;  %v1762_v21 = vpop.permute.xlu1 %1761 }
 0x245   :  { %v2768_v42 = vadd.f32 %v2640_v49, %v2512_v31  ;;  %v2646_v49 = vunpack.c.l.bf16 %v1758_v10  ;;  %v8769_v10 = vld [vmem:[%s12204_s1 + $0x108] sm:$0xff] }
 0x246   :  { %v2773_v47 = vadd.f32 %v2645_v40, %v2517_v27  ;;  %v2639_v14 = vunpack.c.l.bf16 %v1695_v61  ;;  %v3153_v58 = vmax.f32 %v2769_v0, 0.0  ;;  %v1767_v61 = vperm.slane %v1762_v21, %v9522_v20 }
 0x247   :  { %v10288_v43 = vpop.f32.mrf.mxu3  ;;  %v3152_v31 = vmax.f32 %v2768_v42, 0.0 }
 0x248   :  { %v3157_v59 = vmax.f32 %v2773_v47, 0.0  ;;  %v10283_v48 = vpop.f32.mrf.mxu1  ;;  %12236 = vst [vmem:[#allocation29_spill] sm:$0xff] %v10288_v43  ;;  %v3260_v47 = vpack.c.bf16 %v3155_v16, %v3154_v52  ;;  %v10294_v16 = vpop.permute.xlu2 %1797  ;;  %v3150_v52 = vmax.f32 %v2766_v46, 0.0 }
 0x249   :  { %12235 = vst [vmem:[#allocation28_spill] sm:$0xff] %v10283_v48  ;;  %v862_v5 = vpop.f32.mrf.mxu0 }
 0x24a   :  { %v3261_v40 = vpack.c.bf16 %v3157_v59, %v3156_v11  ;;  %v1110_v27 = vpack.c.bf16 %v862_v5, %v862_v5  ;;  %v2767_v59 = vadd.f32 %v2639_v14, %v2511_v17  ;;  %v8228_v11 = vld [vmem:[#allocation3 + $0x420] sm:$0xf0]  ;;  %v3259_v5 = vpack.c.bf16 %v3153_v58, %v3152_v31 }
 0x24b   :  { %4916 = vmatmul.bf16.gmra.mxu1 %v8163_v63  ;;  %v8231_v53 = vor.u32 %v8928_v56, %v8228_v11  ;;  %v2647_v17 = vunpack.c.l.bf16 %v1767_v61  ;;  %v8936_v31 = vld [vmem:[#allocation3 + $0x444] sm:$0xf] }
 0x24c   :  { %7680 = vmatmul.msk.bf16.gmra.mxu0 %vm516_vm0, %v8768_v51  ;;  %5176 = vmatpush.bf16.msrb.mxu3 %v3261_v40  ;;  %v2518_v63 = vunpack.c.l.bf16 %v1110_v27  ;;  %v3151_v40 = vmax.f32 %v2767_v59, 0.0  ;;  %v8924_v27 = vld [vmem:[#allocation3 + $0x3dc] sm:$0xf0] }
 0x24d   :  { %5095 = vmatmul.bf16.gmra.mxu2 %v8231_v53 }
 0x24e   :  { %v2774_v0 = vadd.f32 %v2646_v49, %v2518_v63  ;;  %v3258_v42 = vpack.c.bf16 %v3151_v40, %v3150_v52 }
 0x250   :  { %5177 = vmatpush.bf16.msrb.mxu3 %v3260_v47  ;;  %v10292_v50 = vpop.f32.mrf.mxu1  ;;  %v10296_v13 = vpop.f32.mrf.mxu3  ;;  %v8195_v47 = vor.u32 %v8924_v27, %v8194_v23  ;;  %v3158_v59 = vmax.f32 %v2774_v0, 0.0 }
 0x251   :  { %12237 = vst [vmem:[#allocation30_spill] sm:$0xff] %v10292_v50  ;;  %v864_v51 = vpop.f32.mrf.mxu0  ;;  %v1771_v46 = vpop.permute.xlu2 %1770  ;;  %v8845_v50 = vld [vmem:[#allocation3 + $0x164] sm:$0xf0] }
 0x252   :  { %v1111_v19 = vpack.c.bf16 %v864_v51, %v864_v51  ;;  %12238 = vst [vmem:[#allocation31_spill] sm:$0xff] %v10296_v13  ;;  %v1776_v63 = vperm.slane %v1771_v46, %v9522_v20  ;;  %v8260_v51 = vld [vmem:[#allocation3 + $0x460] sm:$0xf0] }
 0x253   :  { %v8263_v49 = vor.u32 %v8936_v31, %v8260_v51 }
 0x254   :  { %v2519_v14 = vunpack.c.l.bf16 %v1111_v19  ;;  %5178 = vmatpush.bf16.msrb.mxu3 %v3259_v5  ;;  %v1785_v19 = vperm.slane %v10264_v18, %v9522_v20  ;;  %v2648_v0 = vunpack.c.l.bf16 %v1776_v63  ;;  %v8932_v18 = vld [vmem:[#allocation3 + $0x41c] sm:$0xf0] }
 0x256   :  { %v2775_v29 = vadd.f32 %v2647_v17, %v2519_v14  ;;  %v7722_v14 = vld [vmem:[#allocation3 + $0x8] sm:$0xf]  ;;  %v2649_v52 = vunpack.c.l.bf16 %v1785_v19  ;;  %v8292_v19 = vld [vmem:[#allocation3 + $0x4a0] sm:$0xf0] }
 0x258   :  { %5179 = vmatpush.bf16.msrb.mxu3 %v3258_v42  ;;  %v10301_v58 = vpop.f32.mrf.mxu1  ;;  %v3159_v56 = vmax.f32 %v2775_v29, 0.0  ;;  %v10307_v61 = vpop.f32.mrf.mxu3  ;;  %v8805_v42 = vld [vmem:[#allocation3 + $0x24] sm:$0xf0] }
 0x259   :  { %12239 = vst [vmem:[#allocation32_spill] sm:$0xff] %v10301_v58  ;;  %v867_v11 = vpop.f32.mrf.mxu0  ;;  %v7882_v58 = vld [vmem:[#allocation3 + $0x148] sm:$0xf] }
 0x25a   :  { %v10303_v21 = vpack.c.bf16 %v3159_v56, %v3158_v59  ;;  %v1112_v53 = vpack.c.bf16 %v867_v11, %v867_v11  ;;  %12240 = vst [vmem:[#allocation33_spill] sm:$0xff] %v10307_v61  ;;  %v7723_v59 = vor.u32 %v8805_v42, %v7722_v14  ;;  %v8770_v56 = vld [vmem:[%s12204_s1 + $0x110] sm:$0xff] }
 0x25b   :  { %4921 = vmatmul.bf16.gmra.mxu1 %v8195_v47  ;;  %v8226_v47 = vld [vmem:[#allocation3 + $0x400] sm:$0xf] }
 0x25c   :  { %7681 = vmatmul.msk.bf16.gmra.mxu0 %vm516_vm0, %v8769_v10  ;;  %5180 = vmatpush.bf16.msrb.mxu3 %v10188_v35  ;;  %v2520_v5 = vunpack.c.l.bf16 %v1112_v53 }
 0x25d   :  { %5100 = vmatmul.bf16.gmra.mxu2 %v8263_v49  ;;  %v8944_v49 = vld [vmem:[#allocation3 + $0x484] sm:$0xf] }
 0x25e   :  { %v2776_v23 = vadd.f32 %v2648_v0, %v2520_v5  ;;  %v8295_v5 = vor.u32 %v8944_v49, %v8292_v19 }
 0x260   :  { %5181 = vmatpush.bf16.msrb.mxu3 %v10152_v25  ;;  %v10313_v40 = vpop.f32.mrf.mxu1  ;;  %v10316_v29 = vpop.f32.mrf.mxu3  ;;  %v8227_v25 = vor.u32 %v8932_v18, %v8226_v47  ;;  %v3160_v53 = vmax.f32 %v2776_v23, 0.0 }
 0x261   :  { %12241 = vst [vmem:[#allocation34_spill] sm:$0xff] %v10313_v40  ;;  %v869_v17 = vpop.f32.mrf.mxu0 }
 0x262   :  { %v1113_v35 = vpack.c.bf16 %v869_v17, %v869_v17  ;;  %12242 = vst [vmem:[#allocation35_spill] sm:$0xff] %v10316_v29  ;;  %v1803_v17 = vperm.slane %v10294_v16, %v9522_v20  ;;  %v8771_v16 = vld [vmem:[%s12204_s1 + $0x118] sm:$0xff] }
 0x264   :  { %v2521_v27 = vunpack.c.l.bf16 %v1113_v35  ;;  %5182 = vmatpush.bf16.msrb.mxu3 %v10127_v8  ;;  %v2651_v42 = vunpack.c.l.bf16 %v1803_v17  ;;  %v1812_v17 = vperm.slane %v10214_v39, %v9522_v20  ;;  %v8821_v39 = vld [vmem:[#allocation3 + $0xa4] sm:$0xf0] }
 0x266   :  { %v2777_v10 = vadd.f32 %v2649_v52, %v2521_v27  ;;  %v7754_v27 = vld [vmem:[#allocation3 + $0x48] sm:$0xf] }
 0x268   :  { %5183 = vmatpush.bf16.msrb.mxu3 %v10120_v60  ;;  %v10322_v11 = vpop.f32.mrf.mxu1  ;;  %v3161_v46 = vmax.f32 %v2777_v10, 0.0  ;;  %v10327_v51 = vpop.f32.mrf.mxu3  ;;  %v1794_v60 = vperm.slane %v10234_v44, %v9522_v20  ;;  %v8813_v10 = vld [vmem:[#allocation3 + $0x64] sm:$0xf0]  ;;  %v8940_v44 = vld [vmem:[#allocation3 + $0x45c] sm:$0xf0] }
 0x269   :  { %12243 = vst [vmem:[#allocation36_spill] sm:$0xff] %v10322_v11  ;;  %v872_v63 = vpop.f32.mrf.mxu0  ;;  %v1866_v11 = vperm.slane %v10087_v34, %v9522_v20 }
 0x26a   :  { %v10324_v8 = vpack.c.bf16 %v3161_v46, %v3160_v53  ;;  %v1114_v31 = vpack.c.bf16 %v872_v63, %v872_v63  ;;  %12244 = vst [vmem:[#allocation37_spill] sm:$0xff] %v10327_v51  ;;  %v2650_v52 = vunpack.c.l.bf16 %v1794_v60  ;;  %v7755_v53 = vor.u32 %v8813_v10, %v7754_v27  ;;  %v8853_v51 = vld [vmem:[#allocation3 + $0x1a4] sm:$0xf0] }
 0x26b   :  { %5184 = vmatmul.bf16.vlgmr.msrb.gmra.mxu3 %v7723_v59  ;;  %4926 = vmatmul.bf16.gmra.mxu1 %v8227_v25  ;;  %v8258_v59 = vld [vmem:[#allocation3 + $0x440] sm:$0xf]  ;;  %v2652_v10 = vunpack.c.l.bf16 %v1812_v17  ;;  %v2658_v34 = vunpack.c.l.bf16 %v1866_v11 }
 0x26c   :  { %7682 = vmatmul.msk.bf16.gmra.mxu0 %vm516_vm0, %v8770_v56  ;;  %v2522_v0 = vunpack.c.l.bf16 %v1114_v31  ;;  %v8259_v46 = vor.u32 %v8940_v44, %v8258_v59 }
 0x26d   :  { %5105 = vmatmul.bf16.gmra.mxu2 %v8295_v5 }
 0x26e   :  { %v2778_v47 = vadd.f32 %v2650_v52, %v2522_v0  ;;  %v8952_v0 = vld [vmem:[#allocation3 + $0x4c4] sm:$0xf] }
 0x270   :  { %v10333_v35 = vpop.f32.mrf.mxu1  ;;  %v10335_v25 = vpop.f32.mrf.mxu3  ;;  %v3162_v31 = vmax.f32 %v2778_v47, 0.0 }
 0x271   :  { %12245 = vst [vmem:[#allocation38_spill] sm:$0xff] %v10333_v35  ;;  %v874_v14 = vpop.f32.mrf.mxu0 }
 0x272   :  { %v1115_v23 = vpack.c.bf16 %v874_v14, %v874_v14  ;;  %12246 = vst [vmem:[#allocation39_spill] sm:$0xff] %v10335_v25  ;;  %v8324_v14 = vld [vmem:[#allocation3 + $0x4e0] sm:$0xf0] }
 0x273   :  { %v8327_v52 = vor.u32 %v8952_v0, %v8324_v14 }
 0x274   :  { %v2523_v18 = vunpack.c.l.bf16 %v1115_v23  ;;  %v1821_v23 = vperm.slane %v10057_v57, %v9522_v20  ;;  %v8772_v57 = vld [vmem:[%s12204_s1 + $0x120] sm:$0xff] }
 0x276   :  { %v2779_v56 = vadd.f32 %v2651_v42, %v2523_v18  ;;  %v2653_v44 = vunpack.c.l.bf16 %v1821_v23  ;;  %v8356_v23 = vld [vmem:[#allocation3 + $0x520] sm:$0xf0] }
 0x278   :  { %v10340_v63 = vpop.f32.mrf.mxu1  ;;  %v3163_v60 = vmax.f32 %v2779_v56, 0.0  ;;  %v10349_v42 = vpop.f32.mrf.mxu3 }
 0x279   :  { %12247 = vst [vmem:[#allocation40_spill] sm:$0xff] %v10340_v63  ;;  %v877_v49 = vpop.f32.mrf.mxu0  ;;  %v8452_v63 = vld [vmem:[#allocation3 + $0x5e0] sm:$0xf0] }
 0x27a   :  { %v10342_v19 = vpack.c.bf16 %v3163_v60, %v3162_v31  ;;  %v1116_v5 = vpack.c.bf16 %v877_v49, %v877_v49  ;;  %12248 = vst [vmem:[#allocation41_spill] sm:$0xff] %v10349_v42 }
 0x27b   :  { %5189 = vmatmul.bf16.gmra.mxu3 %v7755_v53  ;;  %4931 = vmatmul.bf16.gmra.mxu1 %v8259_v46  ;;  %v7786_v46 = vld [vmem:[#allocation3 + $0x88] sm:$0xf] }
 0x27c   :  { %7683 = vmatmul.msk.bf16.gmra.mxu0 %vm516_vm0, %v8771_v16  ;;  %v2524_v27 = vunpack.c.l.bf16 %v1116_v5  ;;  %v7787_v31 = vor.u32 %v8821_v39, %v7786_v46  ;;  %v8773_v46 = vld [vmem:[%s12204_s1 + $0x128] sm:$0xff] }
 0x27d   :  { %5110 = vmatmul.bf16.gmra.mxu2 %v8327_v52  ;;  %v8960_v52 = vld [vmem:[#allocation3 + $0x504] sm:$0xf] }
 0x27e   :  { %v2780_v56 = vadd.f32 %v2652_v10, %v2524_v27  ;;  %v8359_v27 = vor.u32 %v8960_v52, %v8356_v23 }
 0x280   :  { %v10351_v47 = vpop.f32.mrf.mxu1  ;;  %v3164_v60 = vmax.f32 %v2780_v56, 0.0  ;;  %v10360_v14 = vpop.f32.mrf.mxu3 }
 0x281   :  { %12249 = vst [vmem:[#allocation42_spill] sm:$0xff] %v10351_v47  ;;  %v879_v18 = vpop.f32.mrf.mxu0  ;;  %v8984_v47 = vld [vmem:[#allocation3 + $0x5c4] sm:$0xf] }
 0x282   :  { %v1117_v59 = vpack.c.bf16 %v879_v18, %v879_v18  ;;  %12251 = vst [vmem:[#allocation44_spill] sm:$0xff] %v10360_v14 }
 0x284   :  { %v2525_v53 = vunpack.c.l.bf16 %v1117_v59  ;;  %v7818_v59 = vld [vmem:[#allocation3 + $0xc8] sm:$0xf] }
 0x286   :  { %v2781_v16 = vadd.f32 %v2653_v44, %v2525_v53  ;;  %v8829_v44 = vld [vmem:[#allocation3 + $0xe4] sm:$0xf0] }
 0x287   :  { %v7819_v53 = vor.u32 %v8829_v44, %v7818_v59  ;;  %v8837_v59 = vld [vmem:[#allocation3 + $0x124] sm:$0xf0] }
 0x288   :  { %v3165_v49 = vmax.f32 %v2781_v16, 0.0  ;;  %v10356_v5 = vpop.f32.mrf.mxu1  ;;  %v10369_v56 = vpop.f32.mrf.mxu3 }
 0x289   :  { %12250 = vst [vmem:[#allocation43_spill] sm:$0xff] %v10356_v5  ;;  %v10358_v0 = vpop.f32.mrf.mxu0 }
 0x28a   :  { %v10362_v17 = vpack.c.bf16 %v3165_v49, %v3164_v60  ;;  %12253 = vst [vmem:[#allocation46_spill] sm:$0xff] %v10369_v56  ;;  %v8388_v60 = vld [vmem:[#allocation3 + $0x560] sm:$0xf0] }
 0x28b   :  { %5194 = vmatmul.bf16.gmra.mxu3 %v7787_v31 }
 0x28c   :  { %7684 = vmatmul.msk.bf16.gmra.mxu0 %vm516_vm0, %v8772_v57  ;;  %v8968_v57 = vld [vmem:[#allocation3 + $0x544] sm:$0xf] }
 0x28d   :  { %5115 = vmatmul.bf16.gmra.mxu2 %v8359_v27  ;;  %v8391_v49 = vor.u32 %v8968_v57, %v8388_v60  ;;  %v7850_v27 = vld [vmem:[#allocation3 + $0x108] sm:$0xf]  ;;  %v8976_v57 = vld [vmem:[#allocation3 + $0x584] sm:$0xf] }
 0x28e   :  { %v7851_v44 = vor.u32 %v8837_v59, %v7850_v27  ;;  %v8420_v60 = vld [vmem:[#allocation3 + $0x5a0] sm:$0xf0] }
 0x290   :  { %v10365_v18 = vpop.f32.mrf.mxu1  ;;  %v10379_v31 = vpop.f32.mrf.mxu3 }
 0x291   :  { %12252 = vst [vmem:[#allocation45_spill] sm:$0xff] %v10365_v18  ;;  %v10367_v10 = vpop.f32.mrf.mxu0 }
 0x292   :  { %12255 = vst [vmem:[#allocation48_spill] sm:$0xff] %v10379_v31 }
 0x298   :  { %v10374_v39 = vpop.f32.mrf.mxu1  ;;  %v10386_v18 = vpop.f32.mrf.mxu3 }
 0x299   :  { %12254 = vst [vmem:[#allocation47_spill] sm:$0xff] %v10374_v39  ;;  %v10376_v16 = vpop.f32.mrf.mxu0  ;;  %v8774_v39 = vld [vmem:[%s12204_s1 + $0x130] sm:$0xff] }
 0x29a   :  { %12257 = vst [vmem:[#allocation50_spill] sm:$0xff] %v10386_v18 }
 0x29b   :  { %5199 = vmatmul.bf16.gmra.mxu3 %v7819_v53 }
 0x29c   :  { %7685 = vmatmul.msk.bf16.gmra.mxu0 %vm516_vm0, %v8773_v46 }
 0x29d   :  { %5120 = vmatmul.bf16.gmra.mxu2 %v8391_v49  ;;  %v8423_v49 = vor.u32 %v8976_v57, %v8420_v60 }
 0x2a0   :  { %v10381_v52 = vpop.f32.mrf.mxu1  ;;  %v10395_v59 = vpop.f32.mrf.mxu3 }
 0x2a1   :  { %12256 = vst [vmem:[#allocation49_spill] sm:$0xff] %v10381_v52  ;;  %v889_v23 = vpop.f32.mrf.mxu0  ;;  %v10391_v52 = vpop.f32.mrf.mxu2 }
 0x2a2   :  { %12260 = vst [vmem:[#allocation53_spill] sm:$0xff] %v10395_v59 }
 0x2a8   :  { %v10388_v53 = vpop.f32.mrf.mxu1  ;;  %v10405_v60 = vpop.f32.mrf.mxu3 }
 0x2a9   :  { %12258 = vst [vmem:[#allocation51_spill] sm:$0xff] %v10388_v53  ;;  %v892_v46 = vpop.f32.mrf.mxu0  ;;  %v10397_v48 = vpop.f32.mrf.mxu2  ;;  %v7883_v53 = vor.u32 %v8845_v50, %v7882_v58  ;;  %v1893_v50 = vperm.slane %v9869_v41, %v9522_v20  ;;  %v1875_v58 = vperm.slane %v9911_v33, %v9522_v20  ;;  %v1857_v33 = vperm.slane %v9953_v1, %v9522_v20 }
 0x2aa   :  { %12262 = vst [vmem:[#allocation55_spill] sm:$0xff] %v10405_v60  ;;  %v1122_v35 = vpack.c.bf16 %v892_v46, %v892_v46  ;;  %v1121_v60 = vpack.c.bf16 %v889_v23, %v889_v23 }
 0x2ab   :  { %5204 = vmatmul.bf16.gmra.mxu3 %v7851_v44  ;;  %v2661_v41 = vunpack.c.l.bf16 %v1893_v50  ;;  %v2659_v42 = vunpack.c.l.bf16 %v1875_v58  ;;  %v2657_v58 = vunpack.c.l.bf16 %v1857_v33 }
 0x2ac   :  { %7686 = vmatmul.msk.bf16.gmra.mxu0 %vm516_vm0, %v8774_v39  ;;  %v8775_v39 = vld [vmem:[%s12204_s1 + $0x138] sm:$0xff]  ;;  %v2529_v23 = vunpack.c.l.bf16 %v1121_v60 }
 0x2ad   :  { %5125 = vmatmul.bf16.gmra.mxu2 %v8423_v49  ;;  %v1884_v49 = vperm.slane %v10044_v2, %v9522_v20 }
 0x2b0   :  { %v10393_v40 = vpop.f32.mrf.mxu1  ;;  %v10427_v50 = vpop.f32.mrf.mxu3 }
 0x2b1   :  { %12259 = vst [vmem:[#allocation52_spill] sm:$0xff] %v10393_v40  ;;  %v894_v27 = vpop.f32.mrf.mxu0 }
 0x2b2   :  { %v1123_v40 = vpack.c.bf16 %v894_v27, %v894_v27  ;;  %v2660_v27 = vunpack.c.l.bf16 %v1884_v49  ;;  %12264 = vst [vmem:[#allocation57_spill] sm:$0xff] %v10427_v50 }
 0x2b4   :  { %v2531_v18 = vunpack.c.l.bf16 %v1123_v40  ;;  %v1119_v40 = vpack.c.bf16 %v10367_v10, %v10367_v10 }
 0x2b6   :  { %v2787_v1 = vadd.f32 %v2659_v42, %v2531_v18  ;;  %v1830_v42 = vperm.slane %v10184_v9, %v9522_v20 }
 0x2b8   :  { %v10402_v44 = vpop.f32.mrf.mxu1 }
 0x2b9   :  { %12261 = vst [vmem:[#allocation54_spill] sm:$0xff] %v10402_v44  ;;  %v897_v5 = vpop.f32.mrf.mxu0  ;;  %v8455_v44 = vor.u32 %v8984_v47, %v8452_v63  ;;  %v1120_v63 = vpack.c.bf16 %v10376_v16, %v10376_v16  ;;  %v2530_v47 = vunpack.c.l.bf16 %v1122_v35  ;;  %v1839_v35 = vperm.slane %v10000_v30, %v9522_v20 }
 0x2ba   :  { %v1124_v57 = vpack.c.bf16 %v897_v5, %v897_v5  ;;  %v10413_v5 = vpop.f32.mrf.mxu2 }
 0x2bb   :  { %5209 = vmatmul.bf16.gmra.mxu3 %v7883_v53  ;;  %v2528_v11 = vunpack.c.l.bf16 %v1120_v63  ;;  %v2655_v63 = vunpack.c.l.bf16 %v1839_v35 }
 0x2bc   :  { %7687 = vmatmul.msk.bf16.gmra.mxu0 %vm516_vm0, %v8775_v39  ;;  %v2532_v53 = vunpack.c.l.bf16 %v1124_v57 }
 0x2bd   :  { %5130 = vmatmul.bf16.gmra.mxu2 %v8455_v44  ;;  %v1848_v44 = vperm.slane %v10139_v26, %v9522_v20  ;;  %v8776_v26 = vld [vmem:[%s12204_s1 + $0x140] sm:$0xff] }
 0x2be   :  { %v2788_v46 = vadd.f32 %v2660_v27, %v2532_v53  ;;  %v2786_v53 = vadd.f32 %v2658_v34, %v2530_v47  ;;  %v1906_v47 = vpop.permute.xlu2 %1905 }
 0x2bf   :  { %v2656_v27 = vunpack.c.l.bf16 %v1848_v44  ;;  %v2654_v44 = vunpack.c.l.bf16 %v1830_v42  ;;  %v1911_v35 = vperm.slane %v1906_v47, %v9522_v20 }
 0x2c0   :  { %v10415_v39 = vpop.f32.mrf.mxu1  ;;  %v3172_v10 = vmax.f32 %v2788_v46, 0.0  ;;  %v3170_v9 = vmax.f32 %v2786_v53, 0.0 }
 0x2c1   :  { %12263 = vst [vmem:[#allocation56_spill] sm:$0xff] %v10415_v39  ;;  %v899_v2 = vpop.f32.mrf.mxu0  ;;  %v7914_v39 = vld [vmem:[#allocation3 + $0x188] sm:$0xf] }
 0x2c2   :  { %v1125_v56 = vpack.c.bf16 %v899_v2, %v899_v2  ;;  %v7915_v16 = vor.u32 %v8853_v51, %v7914_v39  ;;  %v3171_v51 = vmax.f32 %v2787_v1, 0.0  ;;  %v2785_v39 = vadd.f32 %v2657_v58, %v2529_v23  ;;  %v10441_v33 = vpop.f32.mrf.mxu2  ;;  %v8992_v23 = vld [vmem:[#allocation3 + $0x604] sm:$0xf] }
 0x2c3   :  { %v8484_v58 = vld [vmem:[#allocation3 + $0x620] sm:$0xf0] }
 0x2c4   :  { %v2533_v57 = vunpack.c.l.bf16 %v1125_v56  ;;  %v1118_v56 = vpack.c.bf16 %v10358_v0, %v10358_v0 }
 0x2c6   :  { %v2789_v49 = vadd.f32 %v2661_v41, %v2533_v57  ;;  %v2527_v41 = vunpack.c.l.bf16 %v1119_v40  ;;  %v2526_v46 = vunpack.c.l.bf16 %v1118_v56  ;;  %v2784_v57 = vadd.f32 %v2656_v27, %v2528_v11 }
 0x2c7   :  { %v3268_v40 = vpack.c.bf16 %v3171_v51, %v3170_v9  ;;  %v10453_v9 = vpop.permute.xlu0 %2175 }
 0x2c8   :  { %v3173_v60 = vmax.f32 %v2789_v49, 0.0  ;;  %v4917_v2 = vpop.f32.mrf.mxu1  ;;  %v3169_v49 = vmax.f32 %v2785_v39, 0.0  ;;  %v2783_v1 = vadd.f32 %v2655_v63, %v2527_v41  ;;  %v3168_v11 = vmax.f32 %v2784_v57, 0.0  ;;  %v7946_v39 = vld [vmem:[#allocation3 + $0x1c8] sm:$0xf] }
 0x2c9   :  { %v902_v18 = vpop.f32.mrf.mxu0  ;;  %v10439_v30 = vadd.f32 %v10391_v52, %v4917_v2  ;;  %v1902_v52 = vperm.slane %v10272_v12, %v9522_v20  ;;  %v8861_v63 = vld [vmem:[#allocation3 + $0x1e4] sm:$0xf0] }
 0x2ca   :  { %v3269_v0 = vpack.c.bf16 %v3173_v60, %v3172_v10  ;;  %v1126_v34 = vpack.c.bf16 %v902_v18, %v902_v18  ;;  %v8487_v10 = vor.u32 %v8992_v23, %v8484_v58  ;;  %v10447_v60 = vpop.f32.mrf.mxu3  ;;  %v3267_v27 = vpack.c.bf16 %v3169_v49, %v3168_v11 }
 0x2cb   :  { %5214 = vmatmul.bf16.gmra.mxu3 %v7915_v16  ;;  %v2782_v16 = vadd.f32 %v2654_v44, %v2526_v46  ;;  %12265 = vst [vmem:[#allocation58_spill] sm:$0xff] %v10447_v60  ;;  %v2662_v2 = vunpack.c.l.bf16 %v1902_v52  ;;  %v3167_v42 = vmax.f32 %v2783_v1, 0.0  ;;  %v2663_v18 = vunpack.c.l.bf16 %v1911_v35  ;;  %v10451_v46 = vpop.permute.xlu2 %2166 }
 0x2cc   :  { %7688 = vmatmul.msk.bf16.gmra.mxu0 %vm516_vm0, %v8776_v26  ;;  %5345 = vmatpush.bf16.msrb.mxu1 %v3269_v0  ;;  %v2534_v56 = vunpack.c.l.bf16 %v1126_v34  ;;  %v7947_v44 = vor.u32 %v8861_v63, %v7946_v39  ;;  %v1920_v52 = vperm.slane %v10243_v54, %v9522_v20  ;;  %v7978_v39 = vld [vmem:[#allocation3 + $0x208] sm:$0xf] }
 0x2cd   :  { %5135 = vmatmul.bf16.gmra.mxu2 %v8487_v10  ;;  %v3166_v51 = vmax.f32 %v2782_v16, 0.0 }
 0x2ce   :  { %v2790_v41 = vadd.f32 %v2662_v2, %v2534_v56  ;;  %v2664_v11 = vunpack.c.l.bf16 %v1920_v52  ;;  %v8801_v52 = vld [vmem:[#allocation3 + $0xc] sm:$0xf] }
 0x2cf   :  { %v3266_v57 = vpack.c.bf16 %v3167_v42, %v3166_v51 }
 0x2d0   :  { %5346 = vmatpush.bf16.msrb.mxu1 %v3268_v40  ;;  %v10449_v26 = vpop.f32.mrf.mxu1  ;;  %v5096_v47 = vpop.f32.mrf.mxu2  ;;  %v8777_v40 = vld [vmem:[%s12204_s1 + $0x148] sm:$0xff]  ;;  %v3174_v1 = vmax.f32 %v2790_v41, 0.0 }
 0x2d1   :  { %v904_v53 = vpop.f32.mrf.mxu0 }
 0x2d2   :  { %v1127_v12 = vpack.c.bf16 %v904_v53, %v904_v53  ;;  %v10463_v16 = vpop.f32.mrf.mxu3 }
 0x2d3   :  { %12266 = vst [vmem:[#allocation59_spill] sm:$0xff] %v10463_v16  ;;  %v10471_v42 = vpop.permute.xlu2 %2157 }
 0x2d4   :  { %v2535_v0 = vunpack.c.l.bf16 %v1127_v12  ;;  %5347 = vmatpush.bf16.msrb.mxu1 %v3267_v27  ;;  %v9000_v12 = vld [vmem:[#allocation3 + $0x644] sm:$0xf] }
 0x2d5   :  { %v8516_v27 = vld [vmem:[#allocation3 + $0x660] sm:$0xf0] }
 0x2d6   :  { %v2791_v34 = vadd.f32 %v2663_v18, %v2535_v0  ;;  %v1929_v18 = vperm.slane %v10245_v45, %v9522_v20  ;;  %v10478_v0 = vpop.permute.xlu0 %2454 }
 0x2d7   :  { %12267 = vst [vmem:[#allocation60_spill] sm:$0xff] %v10478_v0 }
 0x2d8   :  { %5348 = vmatpush.bf16.msrb.mxu1 %v3266_v57  ;;  %v4922_v49 = vpop.f32.mrf.mxu1  ;;  %v3175_v23 = vmax.f32 %v2791_v34, 0.0  ;;  %v10469_v53 = vpop.f32.mrf.mxu2  ;;  %v2665_v63 = vunpack.c.l.bf16 %v1929_v18 }
 0x2d9   :  { %v907_v58 = vpop.f32.mrf.mxu0  ;;  %v10461_v10 = vadd.f32 %v10413_v5, %v4922_v49  ;;  %v8519_v5 = vor.u32 %v9000_v12, %v8516_v27 }
 0x2da   :  { %v1128_v35 = vpack.c.bf16 %v907_v58, %v907_v58  ;;  %v10465_v56 = vpack.c.bf16 %v3175_v23, %v3174_v1  ;;  %v10481_v34 = vpop.f32.mrf.mxu3  ;;  %v1938_v23 = vperm.slane %v10055_v4, %v9522_v20  ;;  %v8778_v58 = vld [vmem:[%s12204_s1 + $0x150] sm:$0xff] }
 0x2db   :  { %5219 = vmatmul.bf16.gmra.mxu3 %v7947_v44  ;;  %12268 = vst [vmem:[#allocation61_spill] sm:$0xff] %v10481_v34  ;;  %v8869_v44 = vld [vmem:[#allocation3 + $0x224] sm:$0xf0] }
 0x2dc   :  { %v2536_v54 = vunpack.c.l.bf16 %v1128_v35  ;;  %7689 = vmatmul.msk.bf16.gmra.mxu0 %vm516_vm0, %v8777_v40  ;;  %5349 = vmatpush.bf16.msrb.mxu1 %v10362_v17  ;;  %v7724_v40 = vld [vmem:[#allocation3 + $0x28] sm:$0xf0]  ;;  %v2666_v4 = vunpack.c.l.bf16 %v1938_v23 }
 0x2dd   :  { %5140 = vmatmul.bf16.gmra.mxu2 %v8519_v5  ;;  %v7727_v1 = vor.u32 %v8801_v52, %v7724_v40 }
 0x2de   :  { %v2792_v2 = vadd.f32 %v2664_v11, %v2536_v54  ;;  %v10489_v54 = vpop.permute.xlu2 %2130 }
 0x2e0   :  { %5350 = vmatpush.bf16.msrb.mxu1 %v10342_v19  ;;  %v10476_v41 = vpop.f32.mrf.mxu1  ;;  %v5101_v45 = vpop.f32.mrf.mxu2  ;;  %v7979_v19 = vor.u32 %v8869_v44, %v7978_v39  ;;  %v1947_v44 = vperm.slane %v10222_v36, %v9522_v20 }
 0x2e1   :  { %v909_v51 = vpop.f32.mrf.mxu0 }
 0x2e2   :  { %v1129_v17 = vpack.c.bf16 %v909_v51, %v909_v51  ;;  %v10495_v51 = vpop.permute.xlu0 %2139  ;;  %v2667_v23 = vunpack.c.l.bf16 %v1947_v44 }
 0x2e4   :  { %v2537_v57 = vunpack.c.l.bf16 %v1129_v17  ;;  %5351 = vmatpush.bf16.msrb.mxu1 %v10324_v8  ;;  %v3176_v8 = vmax.f32 %v2792_v2, 0.0 }
 0x2e6   :  { %v2793_v49 = vadd.f32 %v2665_v63, %v2537_v57  ;;  %v9008_v63 = vld [vmem:[#allocation3 + $0x684] sm:$0xf] }
 0x2e7   :  { %v8548_v57 = vld [vmem:[#allocation3 + $0x6a0] sm:$0xf0] }
 0x2e8   :  { %5352 = vmatpush.bf16.msrb.mxu1 %v10303_v21  ;;  %v4927_v35 = vpop.f32.mrf.mxu1  ;;  %v3177_v11 = vmax.f32 %v2793_v49, 0.0  ;;  %v10498_v17 = vpop.f32.mrf.mxu2 }
 0x2e9   :  { %v912_v12 = vpop.f32.mrf.mxu0  ;;  %v10491_v27 = vadd.f32 %v5096_v47, %v4927_v35  ;;  %v8551_v47 = vor.u32 %v9008_v63, %v8548_v57  ;;  %v8877_v35 = vld [vmem:[#allocation3 + $0x264] sm:$0xf0]  ;;  %v1956_v57 = vperm.slane %v9990_v15, %v9522_v20 }
 0x2ea   :  { %v1130_v5 = vpack.c.bf16 %v912_v12, %v912_v12  ;;  %v10493_v18 = vpack.c.bf16 %v3177_v11, %v3176_v8  ;;  %v8809_v8 = vld [vmem:[#allocation3 + $0x4c] sm:$0xf] }
 0x2eb   :  { %5224 = vmatmul.bf16.gmra.mxu3 %v7979_v19  ;;  %5353 = vmatmul.bf16.vlgmr.msrb.gmra.mxu1 %v7727_v1  ;;  %v10506_v19 = vpop.permute.xlu2 %2319  ;;  %v8010_v1 = vld [vmem:[#allocation3 + $0x248] sm:$0xf]  ;;  %v7756_v11 = vld [vmem:[#allocation3 + $0x68] sm:$0xf0] }
 0x2ec   :  { %v2538_v21 = vunpack.c.l.bf16 %v1130_v5  ;;  %7690 = vmatmul.msk.bf16.gmra.mxu0 %vm516_vm0, %v8778_v58  ;;  %12270 = vst [vmem:[#allocation63_spill] sm:$0xff] %v10506_v19  ;;  %v10510_v5 = vpop.permute.xlu0 %2436  ;;  %v7759_v63 = vor.u32 %v8809_v8, %v7756_v11  ;;  %v8580_v11 = vld [vmem:[#allocation3 + $0x6e0] sm:$0xf0] }
 0x2ed   :  { %5145 = vmatmul.bf16.gmra.mxu2 %v8551_v47  ;;  %12271 = vst [vmem:[#allocation64_spill] sm:$0xff] %v10510_v5  ;;  %v8779_v47 = vld [vmem:[%s12204_s1 + $0x158] sm:$0xff] }
 0x2ee   :  { %v2794_v2 = vadd.f32 %v2666_v4, %v2538_v21  ;;  %v10500_v39 = vpop.f32.mrf.mxu3  ;;  %v8011_v21 = vor.u32 %v8877_v35, %v8010_v1  ;;  %v2668_v1 = vunpack.c.l.bf16 %v1956_v57 }
 0x2ef   :  { %12269 = vst [vmem:[#allocation62_spill] sm:$0xff] %v10500_v39 }
 0x2f0   :  { %v10504_v52 = vpop.f32.mrf.mxu1  ;;  %v10508_v12 = vpop.f32.mrf.mxu2 }
 0x2f1   :  { %v914_v40 = vpop.f32.mrf.mxu0 }
 0x2f2   :  { %v1131_v49 = vpack.c.bf16 %v914_v40, %v914_v40  ;;  %v3178_v40 = vmax.f32 %v2794_v2, 0.0  ;;  %v9016_v2 = vld [vmem:[#allocation3 + $0x6c4] sm:$0xf] }
 0x2f4   :  { %v2539_v58 = vunpack.c.l.bf16 %v1131_v49 }
 0x2f6   :  { %v10512_v4 = vpop.f32.mrf.mxu3  ;;  %v2795_v36 = vadd.f32 %v2667_v23, %v2539_v58  ;;  %v10526_v58 = vpop.permute.xlu2 %2112 }
 0x2f7   :  { %12272 = vst [vmem:[#allocation65_spill] sm:$0xff] %v10512_v4 }
 0x2f8   :  { %v4932_v44 = vpop.f32.mrf.mxu1  ;;  %v3179_v49 = vmax.f32 %v2795_v36, 0.0  ;;  %v10524_v15 = vpop.f32.mrf.mxu2  ;;  %v1965_v36 = vperm.slane %v10200_v62, %v9522_v20  ;;  %v1974_v62 = vperm.slane %v9951_v7, %v9522_v20 }
 0x2f9   :  { %v917_v34 = vpop.f32.mrf.mxu0  ;;  %v10519_v60 = vadd.f32 %v5101_v45, %v4932_v44  ;;  %v10530_v45 = vpop.permute.xlu0 %2121  ;;  %v8885_v44 = vld [vmem:[#allocation3 + $0x2a4] sm:$0xf0] }
 0x2fa   :  { %v1132_v61 = vpack.c.bf16 %v917_v34, %v917_v34  ;;  %v10521_v39 = vpack.c.bf16 %v3179_v49, %v3178_v40  ;;  %v8583_v34 = vor.u32 %v9016_v2, %v8580_v11  ;;  %v2669_v57 = vunpack.c.l.bf16 %v1965_v36  ;;  %v8817_v40 = vld [vmem:[#allocation3 + $0x8c] sm:$0xf] }
 0x2fb   :  { %5229 = vmatmul.bf16.gmra.mxu3 %v8011_v21  ;;  %5358 = vmatmul.bf16.gmra.mxu1 %v7759_v63  ;;  %v8042_v63 = vld [vmem:[#allocation3 + $0x288] sm:$0xf]  ;;  %v7788_v49 = vld [vmem:[#allocation3 + $0xa8] sm:$0xf0] }
 0x2fc   :  { %v2540_v23 = vunpack.c.l.bf16 %v1132_v61  ;;  %7691 = vmatmul.msk.bf16.gmra.mxu0 %vm516_vm0, %v8779_v47  ;;  %v8043_v2 = vor.u32 %v8885_v44, %v8042_v63  ;;  %v7791_v11 = vor.u32 %v8817_v40, %v7788_v49  ;;  %v9024_v40 = vld [vmem:[#allocation3 + $0x704] sm:$0xf]  ;;  %v1983_v49 = vperm.slane %v10162_v38, %v9522_v20 }
 0x2fd   :  { %5150 = vmatmul.bf16.gmra.mxu2 %v8583_v34  ;;  %v8780_v34 = vld [vmem:[%s12204_s1 + $0x160] sm:$0xff] }
 0x2fe   :  { %v2796_v35 = vadd.f32 %v2668_v1, %v2540_v23  ;;  %v10528_v8 = vpop.f32.mrf.mxu3  ;;  %v10538_v4 = vpop.permute.xlu2 %2301 }
 0x2ff   :  { %12273 = vst [vmem:[#allocation66_spill] sm:$0xff] %v10528_v8 }
 0x300   :  { %v10534_v1 = vpop.f32.mrf.mxu2  ;;  %12275 = vst [vmem:[#allocation68_spill] sm:$0xff] %v10538_v4  ;;  %v3180_v36 = vmax.f32 %v2796_v35, 0.0  ;;  %v8612_v35 = vld [vmem:[#allocation3 + $0x720] sm:$0xf0] }
 0x301   :  { %v919_v21 = vpop.f32.mrf.mxu0 }
 0x302   :  { %v1133_v61 = vpack.c.bf16 %v919_v21, %v919_v21 }
 0x304   :  { %v2541_v47 = vunpack.c.l.bf16 %v1133_v61  ;;  %v10545_v61 = vpop.permute.xlu0 %2418 }
 0x305   :  { %12276 = vst [vmem:[#allocation69_spill] sm:$0xff] %v10545_v61  ;;  %v8833_v61 = vld [vmem:[#allocation3 + $0x10c] sm:$0xf] }
 0x306   :  { %v10536_v23 = vpop.f32.mrf.mxu3  ;;  %v2797_v8 = vadd.f32 %v2669_v57, %v2541_v47  ;;  %v2670_v57 = vunpack.c.l.bf16 %v1974_v62  ;;  %v2671_v62 = vunpack.c.l.bf16 %v1983_v49 }
 0x307   :  { %12274 = vst [vmem:[#allocation67_spill] sm:$0xff] %v10536_v23 }
 0x308   :  { %v3181_v21 = vmax.f32 %v2797_v8, 0.0  ;;  %v10550_v47 = vpop.f32.mrf.mxu2  ;;  %v8615_v8 = vor.u32 %v9024_v40, %v8612_v35 }
 0x309   :  { %v922_v16 = vpop.f32.mrf.mxu0  ;;  %12277 = vst [vmem:[#allocation70_spill] sm:$0xff] %v10550_v47 }
 0x30a   :  { %v1134_v43 = vpack.c.bf16 %v922_v16, %v922_v16  ;;  %v10547_v50 = vpack.c.bf16 %v3181_v21, %v3180_v36  ;;  %v10556_v16 = vpop.permute.xlu2 %2094  ;;  %v8893_v21 = vld [vmem:[#allocation3 + $0x2e4] sm:$0xf0] }
 0x30b   :  { %5234 = vmatmul.bf16.gmra.mxu3 %v8043_v2  ;;  %5363 = vmatmul.bf16.gmra.mxu1 %v7791_v11 }
 0x30c   :  { %v2542_v63 = vunpack.c.l.bf16 %v1134_v43  ;;  %7692 = vmatmul.msk.bf16.gmra.mxu0 %vm516_vm0, %v8780_v34  ;;  %v10558_v11 = vpop.permute.xlu0 %2103  ;;  %v8074_v43 = vld [vmem:[#allocation3 + $0x2c8] sm:$0xf] }
 0x30d   :  { %5155 = vmatmul.bf16.gmra.mxu2 %v8615_v8  ;;  %v8075_v35 = vor.u32 %v8893_v21, %v8074_v43  ;;  %v8781_v8 = vld [vmem:[%s12204_s1 + $0x168] sm:$0xff] }
 0x30e   :  { %v2798_v7 = vadd.f32 %v2670_v57, %v2542_v63  ;;  %v10552_v44 = vpop.f32.mrf.mxu3  ;;  %v8825_v57 = vld [vmem:[#allocation3 + $0xcc] sm:$0xf]  ;;  %v8644_v21 = vld [vmem:[#allocation3 + $0x760] sm:$0xf0] }
 0x30f   :  { %12278 = vst [vmem:[#allocation71_spill] sm:$0xff] %v10552_v44  ;;  %v7820_v63 = vld [vmem:[#allocation3 + $0xe8] sm:$0xf0] }
 0x310   :  { %v10560_v44 = vpop.f32.mrf.mxu2  ;;  %v7823_v38 = vor.u32 %v8825_v57, %v7820_v63  ;;  %v2001_v57 = vperm.slane %v10112_v22, %v9522_v20 }
 0x311   :  { %v924_v36 = vpop.f32.mrf.mxu0  ;;  %12279 = vst [vmem:[#allocation72_spill] sm:$0xff] %v10560_v44 }
 0x312   :  { %v1135_v2 = vpack.c.bf16 %v924_v36, %v924_v36  ;;  %v3182_v36 = vmax.f32 %v2798_v7, 0.0  ;;  %v10569_v49 = vpop.permute.xlu2 %2283  ;;  %v9032_v7 = vld [vmem:[#allocation3 + $0x744] sm:$0xf] }
 0x313   :  { %12281 = vst [vmem:[#allocation74_spill] sm:$0xff] %v10569_v49  ;;  %v8170_v49 = vld [vmem:[#allocation3 + $0x388] sm:$0xf] }
 0x314   :  { %v2543_v34 = vunpack.c.l.bf16 %v1135_v2  ;;  %v10574_v43 = vpop.permute.xlu0 %2400 }
 0x315   :  { %12283 = vst [vmem:[#allocation76_spill] sm:$0xff] %v10574_v43 }
 0x316   :  { %v10562_v23 = vpop.f32.mrf.mxu3  ;;  %v2799_v40 = vadd.f32 %v2671_v62, %v2543_v34  ;;  %v1992_v62 = vperm.slane %v9903_v28, %v9522_v20  ;;  %v7852_v28 = vld [vmem:[#allocation3 + $0x128] sm:$0xf0] }
 0x317   :  { %12280 = vst [vmem:[#allocation73_spill] sm:$0xff] %v10562_v23 }
 0x318   :  { %v3183_v0 = vmax.f32 %v2799_v40, 0.0  ;;  %v10572_v23 = vpop.f32.mrf.mxu2 }
 0x319   :  { %v927_v59 = vpop.f32.mrf.mxu0  ;;  %12282 = vst [vmem:[#allocation75_spill] sm:$0xff] %v10572_v23  ;;  %v8901_v23 = vld [vmem:[#allocation3 + $0x324] sm:$0xf0] }
 0x31a   :  { %v10567_v5 = vpack.c.bf16 %v3183_v0, %v3182_v36  ;;  %v1136_v2 = vpack.c.bf16 %v927_v59, %v927_v59  ;;  %v8647_v0 = vor.u32 %v9032_v7, %v8644_v21  ;;  %v2672_v59 = vunpack.c.l.bf16 %v1992_v62  ;;  %v8782_v62 = vld [vmem:[%s12204_s1 + $0x170] sm:$0xff] }
 0x31b   :  { %5239 = vmatmul.bf16.gmra.mxu3 %v8075_v35  ;;  %5368 = vmatmul.bf16.gmra.mxu1 %v7823_v38  ;;  %v8106_v38 = vld [vmem:[#allocation3 + $0x308] sm:$0xf] }
 0x31c   :  { %7693 = vmatmul.msk.bf16.gmra.mxu0 %vm516_vm0, %v8781_v8  ;;  %v2544_v63 = vunpack.c.l.bf16 %v1136_v2  ;;  %v2673_v8 = vunpack.c.l.bf16 %v2001_v57  ;;  %v10588_v22 = vpop.permute.xlu0 %2085  ;;  %v8107_v2 = vor.u32 %v8901_v23, %v8106_v38  ;;  %v9040_v23 = vld [vmem:[#allocation3 + $0x784] sm:$0xf] }
 0x31d   :  { %5160 = vmatmul.bf16.gmra.mxu2 %v8647_v0  ;;  %v7855_v0 = vor.u32 %v8833_v61, %v7852_v28  ;;  %v8676_v61 = vld [vmem:[#allocation3 + $0x7a0] sm:$0xf0] }
 0x31e   :  { %v10578_v34 = vpop.f32.mrf.mxu3  ;;  %v2800_v36 = vadd.f32 %v2672_v59, %v2544_v63  ;;  %v8679_v38 = vor.u32 %v9040_v23, %v8676_v61  ;;  %v8783_v23 = vld [vmem:[%s12204_s1 + $0x178] sm:$0xff] }
 0x31f   :  { %12284 = vst [vmem:[#allocation77_spill] sm:$0xff] %v10578_v34  ;;  %v10584_v34 = vpop.permute.xlu2 %2076 }
 0x320   :  { %v10582_v14 = vpop.f32.mrf.mxu2  ;;  %v3184_v57 = vmax.f32 %v2800_v36, 0.0 }
 0x321   :  { %v929_v40 = vpop.f32.mrf.mxu0  ;;  %12285 = vst [vmem:[#allocation78_spill] sm:$0xff] %v10582_v14 }
 0x322   :  { %v1137_v35 = vpack.c.bf16 %v929_v40, %v929_v40 }
 0x324   :  { %v2545_v31 = vunpack.c.l.bf16 %v1137_v35  ;;  %v10602_v28 = vpop.permute.xlu0 %2382 }
 0x325   :  { %12290 = vst [vmem:[#allocation83_spill] sm:$0xff] %v10602_v28  ;;  %v8708_v28 = vld [vmem:[#allocation3 + $0x7e0] sm:$0xf0] }
 0x326   :  { %v10586_v7 = vpop.f32.mrf.mxu3  ;;  %v2801_v21 = vadd.f32 %v2673_v8, %v2545_v31 }
 0x327   :  { %12286 = vst [vmem:[#allocation79_spill] sm:$0xff] %v10586_v7  ;;  %v10600_v8 = vpop.permute.xlu2 %2265 }
 0x328   :  { %v3185_v63 = vmax.f32 %v2801_v21, 0.0  ;;  %v10596_v35 = vpop.f32.mrf.mxu2  ;;  %12289 = vst [vmem:[#allocation82_spill] sm:$0xff] %v10600_v8  ;;  %v8138_v21 = vld [vmem:[#allocation3 + $0x348] sm:$0xf] }
 0x329   :  { %v932_v40 = vpop.f32.mrf.mxu0  ;;  %12287 = vst [vmem:[#allocation80_spill] sm:$0xff] %v10596_v35 }
 0x32a   :  { %v10593_v59 = vpack.c.bf16 %v3185_v63, %v3184_v57  ;;  %v8909_v57 = vld [vmem:[#allocation3 + $0x364] sm:$0xf0]  ;;  %v8841_v63 = vld [vmem:[#allocation3 + $0x14c] sm:$0xf] }
 0x32b   :  { %5244 = vmatmul.bf16.gmra.mxu3 %v8107_v2  ;;  %5373 = vmatmul.bf16.gmra.mxu1 %v7855_v0  ;;  %v7884_v2 = vld [vmem:[#allocation3 + $0x168] sm:$0xf0]  ;;  %v8139_v7 = vor.u32 %v8909_v57, %v8138_v21  ;;  %v2028_v21 = vperm.slane %v9822_v6, %v9522_v20 }
 0x32c   :  { %7694 = vmatmul.msk.bf16.gmra.mxu0 %vm516_vm0, %v8782_v62  ;;  %v7887_v35 = vor.u32 %v8841_v63, %v7884_v2  ;;  %v2037_v2 = vperm.slane %v10013_v55, %v9522_v20 }
 0x32d   :  { %5165 = vmatmul.bf16.gmra.mxu2 %v8679_v38  ;;  %v10615_v38 = vpop.permute.xlu0 %2067 }
 0x32e   :  { %v10598_v31 = vpop.f32.mrf.mxu3 }
 0x32f   :  { %12288 = vst [vmem:[#allocation81_spill] sm:$0xff] %v10598_v31  ;;  %v10608_v31 = vpop.permute.xlu1 %2148  ;;  %v10613_v61 = vpop.permute.xlu2 %2058 }
 0x330   :  { %v10604_v0 = vpop.f32.mrf.mxu2 }
 0x331   :  { %v934_v36 = vpop.f32.mrf.mxu0  ;;  %12291 = vst [vmem:[#allocation84_spill] sm:$0xff] %v10604_v0  ;;  %v2676_v0 = vunpack.c.l.bf16 %v2028_v21 }
 0x332   :  { %v1139_v57 = vpack.c.bf16 %v934_v36, %v934_v36 }
 0x334   :  { %v2547_v6 = vunpack.c.l.bf16 %v1139_v57 }
 0x335   :  { %v10636_v14 = vpop.permute.xlu0 %2364 }
 0x336   :  { %v10606_v62 = vpop.f32.mrf.mxu3  ;;  %12297 = vst [vmem:[#allocation90_spill] sm:$0xff] %v10636_v14 }
 0x337   :  { %12292 = vst [vmem:[#allocation85_spill] sm:$0xff] %v10606_v62  ;;  %v9048_v62 = vld [vmem:[#allocation3 + $0x7c4] sm:$0xf]  ;;  %v10630_v8 = vpop.permute.xlu1 %2463  ;;  %v10632_v55 = vpop.permute.xlu2 %2247 }
 0x338   :  { %v10618_v29 = vpop.f32.mrf.mxu2  ;;  %v8711_v13 = vor.u32 %v9048_v62, %v8708_v28  ;;  %12295 = vst [vmem:[#allocation88_spill] sm:$0xff] %v10630_v8  ;;  %v8849_v28 = vld [vmem:[#allocation3 + $0x18c] sm:$0xf] }
 0x339   :  { %v937_v25 = vpop.f32.mrf.mxu0  ;;  %12293 = vst [vmem:[#allocation86_spill] sm:$0xff] %v10618_v29  ;;  %v2010_v29 = vperm.slane %v9867_v24, %v9522_v20  ;;  %v7916_v62 = vld [vmem:[#allocation3 + $0x1a8] sm:$0xf0] }
 0x33a   :  { %v1140_v43 = vpack.c.bf16 %v937_v25, %v937_v25  ;;  %v7919_v8 = vor.u32 %v8849_v28, %v7916_v62 }
 0x33b   :  { %5249 = vmatmul.bf16.gmra.mxu3 %v8139_v7  ;;  %5378 = vmatmul.bf16.gmra.mxu1 %v7887_v35  ;;  %v2019_v7 = vperm.slane %v10059_v37, %v9522_v20  ;;  %v1138_v35 = vpack.c.bf16 %v932_v40, %v932_v40  ;;  %v2674_v24 = vunpack.c.l.bf16 %v2010_v29 }
 0x33c   :  { %7695 = vmatmul.msk.bf16.gmra.mxu0 %vm516_vm0, %v8783_v23  ;;  %v2548_v25 = vunpack.c.l.bf16 %v1140_v43  ;;  %v8917_v43 = vld [vmem:[#allocation3 + $0x3a4] sm:$0xf0] }
 0x33d   :  { %5170 = vmatmul.bf16.gmra.mxu2 %v8711_v13  ;;  %v2675_v4 = vunpack.c.l.bf16 %v2019_v7  ;;  %v2546_v19 = vunpack.c.l.bf16 %v1138_v35 }
 0x33e   :  { %v10622_v63 = vpop.f32.mrf.mxu3  ;;  %v2804_v37 = vadd.f32 %v2676_v0, %v2548_v25  ;;  %v8784_v0 = vld [vmem:[%s12204_s1 + $0x180] sm:$0xff] }
 0x33f   :  { %12294 = vst [vmem:[#allocation87_spill] sm:$0xff] %v10622_v63  ;;  %v2677_v63 = vunpack.c.l.bf16 %v2037_v2  ;;  %v2803_v2 = vadd.f32 %v2675_v4, %v2547_v6  ;;  %v2802_v44 = vadd.f32 %v2674_v24, %v2546_v19  ;;  %v2041_v19 = vpop.permute.xlu2 %2040 }
 0x340   :  { %v10634_v21 = vpop.f32.mrf.mxu2  ;;  %v3188_v7 = vmax.f32 %v2804_v37, 0.0 }
 0x341   :  { %v939_v23 = vpop.f32.mrf.mxu0  ;;  %12296 = vst [vmem:[#allocation89_spill] sm:$0xff] %v10634_v21  ;;  %v3187_v47 = vmax.f32 %v2803_v2, 0.0  ;;  %v3186_v29 = vmax.f32 %v2802_v44, 0.0 }
 0x342   :  { %v1141_v36 = vpack.c.bf16 %v939_v23, %v939_v23  ;;  %v8171_v23 = vor.u32 %v8917_v43, %v8170_v49  ;;  %v10646_v49 = vpop.permute.xlu1 %2310 }
 0x343   :  { %v3276_v37 = vpack.c.bf16 %v3187_v47, %v3186_v29 }
 0x344   :  { %v2549_v40 = vunpack.c.l.bf16 %v1141_v36 }
 0x346   :  { %v10638_v57 = vpop.f32.mrf.mxu3  ;;  %v2805_v13 = vadd.f32 %v2677_v63, %v2549_v40  ;;  %v2046_v63 = vperm.slane %v2041_v19, %v9522_v20  ;;  %v2050_v40 = vpop.permute.xlu0 %2049 }
 0x347   :  { %12298 = vst [vmem:[#allocation91_spill] sm:$0xff] %v10638_v57  ;;  %v2055_v43 = vperm.slane %v2050_v40, %v9522_v20 }
 0x348   :  { %v3189_v35 = vmax.f32 %v2805_v13, 0.0  ;;  %v10644_v4 = vpop.f32.mrf.mxu2  ;;  %v2678_v62 = vunpack.c.l.bf16 %v2046_v63  ;;  %v8202_v13 = vld [vmem:[#allocation3 + $0x3c8] sm:$0xf] }
 0x349   :  { %v942_v25 = vpop.f32.mrf.mxu0  ;;  %12299 = vst [vmem:[#allocation92_spill] sm:$0xff] %v10644_v4  ;;  %v2679_v44 = vunpack.c.l.bf16 %v2055_v43 }
 0x34a   :  { %v3277_v36 = vpack.c.bf16 %v3189_v35, %v3188_v7  ;;  %v1142_v14 = vpack.c.bf16 %v942_v25, %v942_v25  ;;  %v8857_v7 = vld [vmem:[#allocation3 + $0x1cc] sm:$0xf]  ;;  %v10657_v29 = vpop.permute.xlu1 %2445 }
 0x34b   :  { %5254 = vmatmul.bf16.gmra.mxu3 %v8171_v23  ;;  %5383 = vmatmul.bf16.gmra.mxu1 %v7919_v8  ;;  %v7948_v35 = vld [vmem:[#allocation3 + $0x1e8] sm:$0xf0]  ;;  %12303 = vst [vmem:[#allocation96_spill] sm:$0xff] %v10657_v29 }
 0x34c   :  { %7696 = vmatmul.msk.bf16.gmra.mxu0 %vm516_vm0, %v8784_v0  ;;  %5514 = vmatpush.bf16.msrb.mxu2 %v3277_v36  ;;  %v2550_v28 = vunpack.c.l.bf16 %v1142_v14  ;;  %v8925_v0 = vld [vmem:[#allocation3 + $0x3e4] sm:$0xf0]  ;;  %v7951_v19 = vor.u32 %v8857_v7, %v7948_v35 }
 0x34d   :  { %v8203_v14 = vor.u32 %v8925_v0, %v8202_v13  ;;  %v8234_v7 = vld [vmem:[#allocation3 + $0x408] sm:$0xf] }
 0x34e   :  { %v10649_v6 = vpop.f32.mrf.mxu3  ;;  %v2806_v2 = vadd.f32 %v2678_v62, %v2550_v28  ;;  %v2064_v62 = vperm.slane %v10613_v61, %v9522_v20  ;;  %v8933_v61 = vld [vmem:[#allocation3 + $0x424] sm:$0xf0] }
 0x34f   :  { %12300 = vst [vmem:[#allocation93_spill] sm:$0xff] %v10649_v6 }
 0x350   :  { %5515 = vmatpush.bf16.msrb.mxu2 %v3276_v37  ;;  %v10653_v25 = vpop.f32.mrf.mxu2  ;;  %v3190_v63 = vmax.f32 %v2806_v2, 0.0  ;;  %v2680_v0 = vunpack.c.l.bf16 %v2064_v62 }
 0x351   :  { %v944_v8 = vpop.f32.mrf.mxu0  ;;  %12301 = vst [vmem:[#allocation94_spill] sm:$0xff] %v10653_v25  ;;  %v7922_v25 = vld [vmem:[#allocation3 + $0x190] sm:$0xf] }
 0x352   :  { %v1143_v24 = vpack.c.bf16 %v944_v8, %v944_v8  ;;  %v10678_v2 = vpop.permute.xlu1 %2292 }
 0x354   :  { %v2551_v23 = vunpack.c.l.bf16 %v1143_v24  ;;  %5516 = vmatpush.bf16.msrb.mxu2 %v10593_v59  ;;  %v8785_v59 = vld [vmem:[%s12204_s1 + $0x188] sm:$0xff]  ;;  %v2073_v24 = vperm.slane %v10615_v38, %v9522_v20  ;;  %v7730_v38 = vld [vmem:[#allocation3 + $0x10] sm:$0xf] }
 0x356   :  { %v2807_v47 = vadd.f32 %v2679_v44, %v2551_v23  ;;  %v10655_v36 = vpop.f32.mrf.mxu3  ;;  %v10675_v44 = vpop.f32.mrf.mxu1  ;;  %v2681_v35 = vunpack.c.l.bf16 %v2073_v24 }
 0x357   :  { %12302 = vst [vmem:[#allocation95_spill] sm:$0xff] %v10655_v36 }
 0x358   :  { %v3191_v37 = vmax.f32 %v2807_v47, 0.0  ;;  %5517 = vmatpush.bf16.msrb.mxu2 %v10567_v5  ;;  %v10667_v8 = vpop.f32.mrf.mxu2 }
 0x359   :  { %v947_v40 = vpop.f32.mrf.mxu0  ;;  %12304 = vst [vmem:[#allocation97_spill] sm:$0xff] %v10667_v8 }
 0x35a   :  { %v10663_v43 = vpack.c.bf16 %v3191_v37, %v3190_v63  ;;  %v1144_v28 = vpack.c.bf16 %v947_v40, %v947_v40  ;;  %v7980_v63 = vld [vmem:[#allocation3 + $0x228] sm:$0xf0]  ;;  %v8806_v37 = vld [vmem:[#allocation3 + $0x2c] sm:$0xf0] }
 0x35b   :  { %5259 = vmatmul.bf16.gmra.mxu3 %v8203_v14  ;;  %5388 = vmatmul.bf16.gmra.mxu1 %v7951_v19  ;;  %v8865_v19 = vld [vmem:[#allocation3 + $0x20c] sm:$0xf]  ;;  %v7731_v24 = vor.u32 %v8806_v37, %v7730_v38  ;;  %v8266_v37 = vld [vmem:[#allocation3 + $0x448] sm:$0xf] }
 0x35c   :  { %7697 = vmatmul.msk.bf16.gmra.mxu0 %vm516_vm0, %v8785_v59  ;;  %5518 = vmatpush.bf16.msrb.mxu2 %v10547_v50  ;;  %v2552_v13 = vunpack.c.l.bf16 %v1144_v28  ;;  %v8235_v28 = vor.u32 %v8933_v61, %v8234_v7 }
 0x35e   :  { %v10671_v5 = vpop.f32.mrf.mxu3  ;;  %v2808_v47 = vadd.f32 %v2680_v0, %v2552_v13 }
 0x35f   :  { %12305 = vst [vmem:[#allocation98_spill] sm:$0xff] %v10671_v5  ;;  %v7983_v5 = vor.u32 %v8865_v19, %v7980_v63 }
 0x360   :  { %5519 = vmatpush.bf16.msrb.mxu2 %v10521_v39  ;;  %v10681_v59 = vpop.f32.mrf.mxu2  ;;  %v3192_v62 = vmax.f32 %v2808_v47, 0.0 }
 0x361   :  { %v949_v23 = vpop.f32.mrf.mxu0  ;;  %12306 = vst [vmem:[#allocation99_spill] sm:$0xff] %v10681_v59 }
 0x362   :  { %v1145_v50 = vpack.c.bf16 %v949_v23, %v949_v23 }
 0x364   :  { %v2553_v14 = vunpack.c.l.bf16 %v1145_v50  ;;  %5520 = vmatpush.bf16.msrb.mxu2 %v10493_v18  ;;  %v8786_v18 = vld [vmem:[%s12204_s1 + $0x190] sm:$0xff]  ;;  %v10693_v50 = vpop.permute.xlu1 %2427 }
 0x365   :  { %12309 = vst [vmem:[#allocation102_spill] sm:$0xff] %v10693_v50  ;;  %v8846_v50 = vld [vmem:[#allocation3 + $0x16c] sm:$0xf0] }
 0x366   :  { %v2809_v40 = vadd.f32 %v2681_v35, %v2553_v14  ;;  %v10683_v39 = vpop.f32.mrf.mxu3  ;;  %v2082_v35 = vperm.slane %v10584_v34, %v9522_v20  ;;  %v2091_v14 = vperm.slane %v10588_v22, %v9522_v20  ;;  %v8012_v34 = vld [vmem:[#allocation3 + $0x268] sm:$0xf0] }
 0x367   :  { %12307 = vst [vmem:[#allocation100_spill] sm:$0xff] %v10683_v39  ;;  %v8814_v39 = vld [vmem:[#allocation3 + $0x6c] sm:$0xf0] }
 0x368   :  { %v3193_v23 = vmax.f32 %v2809_v40, 0.0  ;;  %v10685_v36 = vpop.f32.mrf.mxu1  ;;  %5521 = vmatpush.bf16.msrb.mxu2 %v10465_v56  ;;  %v10700_v47 = vpop.f32.mrf.mxu2  ;;  %v2682_v38 = vunpack.c.l.bf16 %v2082_v35  ;;  %v2683_v40 = vunpack.c.l.bf16 %v2091_v14  ;;  %v8787_v14 = vld [vmem:[%s12204_s1 + $0x198] sm:$0xff] }
 0x369   :  { %12308 = vst [vmem:[#allocation101_spill] sm:$0xff] %v10685_v36  ;;  %v952_v13 = vpop.f32.mrf.mxu0 }
 0x36a   :  { %v10691_v0 = vpack.c.bf16 %v3193_v23, %v3192_v62  ;;  %v1146_v7 = vpack.c.bf16 %v952_v13, %v952_v13  ;;  %12311 = vst [vmem:[#allocation104_spill] sm:$0xff] %v10700_v47  ;;  %v8941_v23 = vld [vmem:[#allocation3 + $0x464] sm:$0xf0]  ;;  %v7762_v13 = vld [vmem:[#allocation3 + $0x50] sm:$0xf] }
 0x36b   :  { %5264 = vmatmul.bf16.gmra.mxu3 %v8235_v28  ;;  %5393 = vmatmul.bf16.gmra.mxu1 %v7983_v5  ;;  %v8267_v22 = vor.u32 %v8941_v23, %v8266_v37 }
 0x36c   :  { %5522 = vmatmul.bf16.vlgmr.msrb.gmra.mxu2 %v7731_v24  ;;  %7698 = vmatmul.msk.bf16.gmra.mxu0 %vm516_vm0, %v8786_v18  ;;  %v2554_v61 = vunpack.c.l.bf16 %v1146_v7  ;;  %v8873_v24 = vld [vmem:[#allocation3 + $0x24c] sm:$0xf]  ;;  %v10706_v18 = vpop.permute.xlu1 %2274 }
 0x36d   :  { %v8015_v7 = vor.u32 %v8873_v24, %v8012_v34  ;;  %v8298_v34 = vld [vmem:[#allocation3 + $0x488] sm:$0xf] }
 0x36e   :  { %v10698_v56 = vpop.f32.mrf.mxu3  ;;  %v2810_v28 = vadd.f32 %v2682_v38, %v2554_v61 }
 0x36f   :  { %12310 = vst [vmem:[#allocation103_spill] sm:$0xff] %v10698_v56 }
 0x370   :  { %v10704_v19 = vpop.f32.mrf.mxu1  ;;  %v3194_v56 = vmax.f32 %v2810_v28, 0.0  ;;  %v10715_v38 = vpop.f32.mrf.mxu2  ;;  %v2109_v28 = vperm.slane %v10558_v11, %v9522_v20 }
 0x371   :  { %12312 = vst [vmem:[#allocation105_spill] sm:$0xff] %v10704_v19  ;;  %v954_v63 = vpop.f32.mrf.mxu0 }
 0x372   :  { %v1147_v5 = vpack.c.bf16 %v954_v63, %v954_v63  ;;  %v7763_v63 = vor.u32 %v8814_v39, %v7762_v13  ;;  %12315 = vst [vmem:[#allocation108_spill] sm:$0xff] %v10715_v38 }
 0x374   :  { %v2555_v62 = vunpack.c.l.bf16 %v1147_v5  ;;  %v10724_v39 = vpop.permute.xlu1 %2409 }
 0x375   :  { %12317 = vst [vmem:[#allocation110_spill] sm:$0xff] %v10724_v39 }
 0x376   :  { %v2811_v6 = vadd.f32 %v2683_v40, %v2555_v62  ;;  %v10708_v57 = vpop.f32.mrf.mxu3 }
 0x377   :  { %12313 = vst [vmem:[#allocation106_spill] sm:$0xff] %v10708_v57  ;;  %v8822_v57 = vld [vmem:[#allocation3 + $0xac] sm:$0xf0] }
 0x378   :  { %v3195_v47 = vmax.f32 %v2811_v6, 0.0  ;;  %v10710_v35 = vpop.f32.mrf.mxu1  ;;  %v2100_v6 = vperm.slane %v10556_v16, %v9522_v20  ;;  %v10730_v13 = vpop.f32.mrf.mxu2  ;;  %v8949_v16 = vld [vmem:[#allocation3 + $0x4a4] sm:$0xf0] }
 0x379   :  { %12314 = vst [vmem:[#allocation107_spill] sm:$0xff] %v10710_v35  ;;  %v957_v61 = vpop.f32.mrf.mxu0  ;;  %v8299_v11 = vor.u32 %v8949_v16, %v8298_v34  ;;  %v8889_v16 = vld [vmem:[#allocation3 + $0x2cc] sm:$0xf] }
 0x37a   :  { %v10717_v5 = vpack.c.bf16 %v3195_v47, %v3194_v56  ;;  %v1148_v40 = vpack.c.bf16 %v957_v61, %v957_v61  ;;  %v2684_v47 = vunpack.c.l.bf16 %v2100_v6  ;;  %12319 = vst [vmem:[#allocation112_spill] sm:$0xff] %v10730_v13  ;;  %v8044_v61 = vld [vmem:[#allocation3 + $0x2a8] sm:$0xf0] }
 0x37b   :  { %5269 = vmatmul.bf16.gmra.mxu3 %v8267_v22  ;;  %5398 = vmatmul.bf16.gmra.mxu1 %v8015_v7  ;;  %v2685_v22 = vunpack.c.l.bf16 %v2109_v28  ;;  %v8788_v28 = vld [vmem:[%s12204_s1 + $0x1a0] sm:$0xff] }
 0x37c   :  { %5527 = vmatmul.bf16.gmra.mxu2 %v7763_v63  ;;  %7699 = vmatmul.msk.bf16.gmra.mxu0 %vm516_vm0, %v8787_v14  ;;  %v2556_v62 = vunpack.c.l.bf16 %v1148_v40  ;;  %v8881_v14 = vld [vmem:[#allocation3 + $0x28c] sm:$0xf] }
 0x37d   :  { %v8047_v40 = vor.u32 %v8881_v14, %v8044_v61  ;;  %v8830_v14 = vld [vmem:[#allocation3 + $0xec] sm:$0xf0] }
 0x37e   :  { %v10722_v37 = vpop.f32.mrf.mxu3  ;;  %v2812_v7 = vadd.f32 %v2684_v47, %v2556_v62  ;;  %v10739_v62 = vpop.permute.xlu1 %2256 }
 0x37f   :  { %12316 = vst [vmem:[#allocation109_spill] sm:$0xff] %v10722_v37  ;;  %v7794_v37 = vld [vmem:[#allocation3 + $0x90] sm:$0xf] }
 0x380   :  { %v10728_v23 = vpop.f32.mrf.mxu1  ;;  %12322 = vst [vmem:[#allocation115_spill] sm:$0xff] %v10739_v62  ;;  %v10746_v34 = vpop.f32.mrf.mxu2 }
 0x381   :  { %12318 = vst [vmem:[#allocation111_spill] sm:$0xff] %v10728_v23  ;;  %v959_v56 = vpop.f32.mrf.mxu0  ;;  %v3196_v23 = vmax.f32 %v2812_v7, 0.0  ;;  %v8330_v7 = vld [vmem:[#allocation3 + $0x4c8] sm:$0xf] }
 0x382   :  { %v1149_v24 = vpack.c.bf16 %v959_v56, %v959_v56  ;;  %v7795_v56 = vor.u32 %v8822_v57, %v7794_v37  ;;  %12323 = vst [vmem:[#allocation116_spill] sm:$0xff] %v10746_v34  ;;  %v10805_v34 = vpop.permute.xlu0 %2346 }
 0x383   :  { %12342 = vst [vmem:[#allocation135_spill] sm:$0xff] %v10805_v34 }
 0x384   :  { %v2557_v63 = vunpack.c.l.bf16 %v1149_v24 }
 0x386   :  { %v2813_v35 = vadd.f32 %v2685_v22, %v2557_v63  ;;  %v10732_v19 = vpop.f32.mrf.mxu3  ;;  %v10754_v22 = vpop.permute.xlu1 %2391  ;;  %v8957_v63 = vld [vmem:[#allocation3 + $0x4e4] sm:$0xf0] }
 0x387   :  { %12320 = vst [vmem:[#allocation113_spill] sm:$0xff] %v10732_v19 }
 0x388   :  { %v3197_v8 = vmax.f32 %v2813_v35, 0.0  ;;  %v10734_v6 = vpop.f32.mrf.mxu1  ;;  %12326 = vst [vmem:[#allocation119_spill] sm:$0xff] %v10754_v22 }
 0x389   :  { %12321 = vst [vmem:[#allocation114_spill] sm:$0xff] %v10734_v6  ;;  %v10741_v47 = vpop.f32.mrf.mxu0 }
 0x38a   :  { %v10743_v24 = vpack.c.bf16 %v3197_v8, %v3196_v23  ;;  %v8076_v8 = vld [vmem:[#allocation3 + $0x2e8] sm:$0xf0]  ;;  %v7826_v23 = vld [vmem:[#allocation3 + $0xd0] sm:$0xf] }
 0x38b   :  { %5274 = vmatmul.bf16.gmra.mxu3 %v8299_v11  ;;  %5403 = vmatmul.bf16.gmra.mxu1 %v8047_v40  ;;  %v8331_v11 = vor.u32 %v8957_v63, %v8330_v7  ;;  %v8079_v40 = vor.u32 %v8889_v16, %v8076_v8 }
 0x38c   :  { %5532 = vmatmul.bf16.gmra.mxu2 %v7795_v56  ;;  %7700 = vmatmul.msk.bf16.gmra.mxu0 %vm516_vm0, %v8788_v28  ;;  %v10758_v56 = vpop.f32.mrf.mxu2 }
 0x38d   :  { %12328 = vst [vmem:[#allocation121_spill] sm:$0xff] %v10758_v56  ;;  %v8108_v56 = vld [vmem:[#allocation3 + $0x328] sm:$0xf0] }
 0x38e   :  { %v10748_v35 = vpop.f32.mrf.mxu3  ;;  %v10768_v13 = vpop.permute.xlu1 %2238 }
 0x38f   :  { %12324 = vst [vmem:[#allocation117_spill] sm:$0xff] %v10748_v35  ;;  %v7827_v35 = vor.u32 %v8830_v14, %v7826_v23  ;;  %v8362_v23 = vld [vmem:[#allocation3 + $0x508] sm:$0xf] }
 0x390   :  { %v10750_v57 = vpop.f32.mrf.mxu1  ;;  %v8965_v14 = vld [vmem:[#allocation3 + $0x524] sm:$0xf0] }
 0x391   :  { %12325 = vst [vmem:[#allocation118_spill] sm:$0xff] %v10750_v57  ;;  %v10752_v37 = vpop.f32.mrf.mxu0  ;;  %v8789_v57 = vld [vmem:[%s12204_s1 + $0x1a8] sm:$0xff] }
 0x394   :  { %v10776_v8 = vpop.f32.mrf.mxu2 }
 0x395   :  { %12332 = vst [vmem:[#allocation125_spill] sm:$0xff] %v10776_v8 }
 0x396   :  { %v10756_v61 = vpop.f32.mrf.mxu3 }
 0x397   :  { %12327 = vst [vmem:[#allocation120_spill] sm:$0xff] %v10756_v61  ;;  %v8897_v61 = vld [vmem:[#allocation3 + $0x30c] sm:$0xf] }
 0x398   :  { %v10760_v28 = vpop.f32.mrf.mxu1  ;;  %v8111_v6 = vor.u32 %v8897_v61, %v8108_v56 }
 0x399   :  { %12329 = vst [vmem:[#allocation122_spill] sm:$0xff] %v10760_v28  ;;  %v10765_v19 = vpop.f32.mrf.mxu0  ;;  %v7858_v28 = vld [vmem:[#allocation3 + $0x110] sm:$0xf] }
 0x39b   :  { %5279 = vmatmul.bf16.gmra.mxu3 %v8331_v11  ;;  %5408 = vmatmul.bf16.gmra.mxu1 %v8079_v40  ;;  %v8838_v11 = vld [vmem:[#allocation3 + $0x12c] sm:$0xf0] }
 0x39c   :  { %5537 = vmatmul.bf16.gmra.mxu2 %v7827_v35  ;;  %7701 = vmatmul.msk.bf16.gmra.mxu0 %vm516_vm0, %v8789_v57  ;;  %v10780_v35 = vpop.permute.xlu1 %2373  ;;  %v8363_v57 = vor.u32 %v8965_v14, %v8362_v23  ;;  %v10787_v29 = vpop.f32.mrf.mxu2  ;;  %v8973_v23 = vld [vmem:[#allocation3 + $0x564] sm:$0xf0]  ;;  %v8905_v14 = vld [vmem:[#allocation3 + $0x34c] sm:$0xf] }
 0x39d   :  { %12334 = vst [vmem:[#allocation127_spill] sm:$0xff] %v10780_v35 }
 0x39e   :  { %v10770_v7 = vpop.f32.mrf.mxu3  ;;  %12336 = vst [vmem:[#allocation129_spill] sm:$0xff] %v10787_v29 }
 0x39f   :  { %12330 = vst [vmem:[#allocation123_spill] sm:$0xff] %v10770_v7  ;;  %v7859_v7 = vor.u32 %v8838_v11, %v7858_v28  ;;  %v8394_v28 = vld [vmem:[#allocation3 + $0x548] sm:$0xf]  ;;  %v8140_v11 = vld [vmem:[#allocation3 + $0x368] sm:$0xf0] }
 0x3a0   :  { %v10772_v63 = vpop.f32.mrf.mxu1  ;;  %v8143_v29 = vor.u32 %v8905_v14, %v8140_v11  ;;  %v2181_v14 = vperm.slane %v10453_v9, %v9522_v20  ;;  %v8426_v9 = vld [vmem:[#allocation3 + $0x588] sm:$0xf] }
 0x3a1   :  { %12331 = vst [vmem:[#allocation124_spill] sm:$0xff] %v10772_v63  ;;  %v10774_v16 = vpop.f32.mrf.mxu0  ;;  %v8790_v63 = vld [vmem:[%s12204_s1 + $0x1b0] sm:$0xff] }
 0x3a4   :  { %v10794_v61 = vpop.permute.xlu1 %2220 }
 0x3a6   :  { %v10778_v40 = vpop.f32.mrf.mxu3 }
 0x3a7   :  { %12333 = vst [vmem:[#allocation126_spill] sm:$0xff] %v10778_v40 }
 0x3a8   :  { %v10782_v36 = vpop.f32.mrf.mxu1 }
 0x3a9   :  { %12335 = vst [vmem:[#allocation128_spill] sm:$0xff] %v10782_v36  ;;  %v972_v4 = vpop.f32.mrf.mxu0  ;;  %v7890_v36 = vld [vmem:[#allocation3 + $0x150] sm:$0xf] }
 0x3ab   :  { %5284 = vmatmul.bf16.gmra.mxu3 %v8363_v57  ;;  %5413 = vmatmul.bf16.gmra.mxu1 %v8111_v6  ;;  %v10796_v57 = vpop.f32.mrf.mxu2 }
 0x3ac   :  { %5542 = vmatmul.bf16.gmra.mxu2 %v7859_v7  ;;  %7702 = vmatmul.msk.bf16.gmra.mxu0 %vm516_vm0, %v8790_v63  ;;  %12339 = vst [vmem:[#allocation132_spill] sm:$0xff] %v10796_v57  ;;  %v8395_v7 = vor.u32 %v8973_v23, %v8394_v28  ;;  %v10807_v38 = vpop.permute.xlu1 %2355  ;;  %v2172_v28 = vperm.slane %v10451_v46, %v9522_v20  ;;  %v8913_v57 = vld [vmem:[#allocation3 + $0x38c] sm:$0xf] }
 0x3ad   :  { %12343 = vst [vmem:[#allocation136_spill] sm:$0xff] %v10807_v38  ;;  %v2154_v46 = vperm.slane %v10608_v31, %v9522_v20  ;;  %v1152_v31 = vpack.c.bf16 %v10765_v19, %v10765_v19 }
 0x3ae   :  { %v10790_v40 = vpop.f32.mrf.mxu3 }
 0x3af   :  { %12337 = vst [vmem:[#allocation130_spill] sm:$0xff] %v10790_v40  ;;  %v7891_v40 = vor.u32 %v8846_v50, %v7890_v36 }
 0x3b0   :  { %v10792_v8 = vpop.f32.mrf.mxu1 }
 0x3b1   :  { %12338 = vst [vmem:[#allocation131_spill] sm:$0xff] %v10792_v8  ;;  %v974_v56 = vpop.f32.mrf.mxu0  ;;  %v8791_v8 = vld [vmem:[%s12204_s1 + $0x1b8] sm:$0xff] }
 0x3b2   :  { %v1155_v36 = vpack.c.bf16 %v974_v56, %v974_v56  ;;  %v1153_v56 = vpack.c.bf16 %v10774_v16, %v10774_v16  ;;  %v8854_v16 = vld [vmem:[#allocation3 + $0x1ac] sm:$0xf0] }
 0x3b3   :  { %v10814_v50 = vpop.f32.mrf.mxu2  ;;  %v7923_v62 = vor.u32 %v8854_v16, %v7922_v25 }
 0x3b4   :  { %12345 = vst [vmem:[#allocation138_spill] sm:$0xff] %v10814_v50  ;;  %v10830_v35 = vpop.permute.xlu1 %2328 }
 0x3b5   :  { %12347 = vst [vmem:[#allocation140_spill] sm:$0xff] %v10830_v35 }
 0x3b6   :  { %v10798_v6 = vpop.f32.mrf.mxu3 }
 0x3b7   :  { %12340 = vst [vmem:[#allocation133_spill] sm:$0xff] %v10798_v6 }
 0x3b8   :  { %v10800_v63 = vpop.f32.mrf.mxu1 }
 0x3b9   :  { %12341 = vst [vmem:[#allocation134_spill] sm:$0xff] %v10800_v63  ;;  %v977_v39 = vpop.f32.mrf.mxu0  ;;  %v2563_v63 = vunpack.c.l.bf16 %v1155_v36  ;;  %v2690_v36 = vunpack.c.l.bf16 %v2154_v46  ;;  %v1150_v46 = vpack.c.bf16 %v10741_v47, %v10741_v47 }
 0x3ba   :  { %v1156_v22 = vpack.c.bf16 %v977_v39, %v977_v39  ;;  %v1154_v39 = vpack.c.bf16 %v972_v4, %v972_v4  ;;  %v8981_v4 = vld [vmem:[#allocation3 + $0x5a4] sm:$0xf0] }
 0x3bb   :  { %5289 = vmatmul.bf16.gmra.mxu3 %v8395_v7  ;;  %5418 = vmatmul.bf16.gmra.mxu1 %v8143_v29  ;;  %v2163_v29 = vperm.slane %v10471_v42, %v9522_v20  ;;  %v8427_v38 = vor.u32 %v8981_v4, %v8426_v9 }
 0x3bc   :  { %5547 = vmatmul.bf16.gmra.mxu2 %v7891_v40  ;;  %7703 = vmatmul.msk.bf16.gmra.mxu0 %vm516_vm0, %v8791_v8  ;;  %v2564_v11 = vunpack.c.l.bf16 %v1156_v22  ;;  %v2692_v8 = vunpack.c.l.bf16 %v2172_v28  ;;  %v2693_v22 = vunpack.c.l.bf16 %v2181_v14  ;;  %v8172_v28 = vld [vmem:[#allocation3 + $0x3a8] sm:$0xf0]  ;;  %v2136_v14 = vperm.slane %v10489_v54, %v9522_v20  ;;  %v8792_v54 = vld [vmem:[%s12204_s1 + $0x1c0] sm:$0xff] }
 0x3bd   :  { %v2691_v59 = vunpack.c.l.bf16 %v2163_v29  ;;  %v8175_v21 = vor.u32 %v8913_v57, %v8172_v28  ;;  %v10849_v57 = vpop.f32.mrf.mxu2  ;;  %v2558_v28 = vunpack.c.l.bf16 %v1150_v46  ;;  %v10861_v46 = vpop.permute.xlu2 %2229 }
 0x3be   :  { %v10812_v23 = vpop.f32.mrf.mxu3  ;;  %v2820_v50 = vadd.f32 %v2692_v8, %v2564_v11  ;;  %v2688_v25 = vunpack.c.l.bf16 %v2136_v14 }
 0x3bf   :  { %12344 = vst [vmem:[#allocation137_spill] sm:$0xff] %v10812_v23  ;;  %v10824_v23 = vpop.permute.xlu0 %2211  ;;  %v2819_v29 = vadd.f32 %v2691_v59, %v2563_v63 }
 0x3c0   :  { %v10818_v6 = vpop.f32.mrf.mxu1  ;;  %v3204_v35 = vmax.f32 %v2820_v50, 0.0 }
 0x3c1   :  { %12346 = vst [vmem:[#allocation139_spill] sm:$0xff] %v10818_v6  ;;  %v979_v40 = vpop.f32.mrf.mxu0  ;;  %v2145_v6 = vperm.slane %v10495_v51, %v9522_v20  ;;  %v1151_v51 = vpack.c.bf16 %v10752_v37, %v10752_v37  ;;  %v2127_v37 = vperm.slane %v10530_v45, %v9522_v20 }
 0x3c2   :  { %v1157_v7 = vpack.c.bf16 %v979_v40, %v979_v40  ;;  %v2562_v40 = vunpack.c.l.bf16 %v1154_v39 }
 0x3c3   :  { %v2689_v34 = vunpack.c.l.bf16 %v2145_v6  ;;  %v2118_v6 = vperm.slane %v10526_v58, %v9522_v20  ;;  %v2559_v9 = vunpack.c.l.bf16 %v1151_v51  ;;  %v2687_v45 = vunpack.c.l.bf16 %v2127_v37 }
 0x3c4   :  { %v2565_v42 = vunpack.c.l.bf16 %v1157_v7  ;;  %v2561_v7 = vunpack.c.l.bf16 %v1153_v56  ;;  %v2560_v56 = vunpack.c.l.bf16 %v1152_v31  ;;  %v2818_v59 = vadd.f32 %v2690_v36, %v2562_v40  ;;  %v2194_v36 = vpop.permute.xlu1 %2193 }
 0x3c5   :  { %v2686_v16 = vunpack.c.l.bf16 %v2118_v6  ;;  %v2815_v14 = vadd.f32 %v2687_v45, %v2559_v9  ;;  %v8989_v9 = vld [vmem:[#allocation3 + $0x5e4] sm:$0xf0] }
 0x3c6   :  { %v2821_v11 = vadd.f32 %v2693_v22, %v2565_v42  ;;  %v10838_v8 = vpop.f32.mrf.mxu3  ;;  %v2817_v22 = vadd.f32 %v2689_v34, %v2561_v7  ;;  %v3203_v42 = vmax.f32 %v2819_v29, 0.0  ;;  %v2816_v31 = vadd.f32 %v2688_v25, %v2560_v56 }
 0x3c7   :  { %12348 = vst [vmem:[#allocation141_spill] sm:$0xff] %v10838_v8  ;;  %v2185_v47 = vpop.permute.xlu0 %2184  ;;  %v3202_v40 = vmax.f32 %v2818_v59, 0.0  ;;  %v2814_v7 = vadd.f32 %v2686_v16, %v2558_v28  ;;  %v3199_v56 = vmax.f32 %v2815_v14, 0.0  ;;  %v8862_v28 = vld [vmem:[#allocation3 + $0x1ec] sm:$0xf0] }
 0x3c8   :  { %v3205_v19 = vmax.f32 %v2821_v11, 0.0  ;;  %v10840_v39 = vpop.f32.mrf.mxu1  ;;  %v2190_v58 = vperm.slane %v2185_v47, %v9522_v20  ;;  %v3201_v34 = vmax.f32 %v2817_v22, 0.0  ;;  %v3200_v29 = vmax.f32 %v2816_v31, 0.0  ;;  %v8921_v22 = vld [vmem:[#allocation3 + $0x3cc] sm:$0xf] }
 0x3c9   :  { %12349 = vst [vmem:[#allocation142_spill] sm:$0xff] %v10840_v39  ;;  %v982_v63 = vpop.f32.mrf.mxu0  ;;  %v3198_v45 = vmax.f32 %v2814_v7, 0.0  ;;  %v7954_v47 = vld [vmem:[#allocation3 + $0x1d0] sm:$0xf] }
 0x3ca   :  { %v3285_v50 = vpack.c.bf16 %v3205_v19, %v3204_v35  ;;  %v1158_v4 = vpack.c.bf16 %v982_v63, %v982_v63  ;;  %v3283_v59 = vpack.c.bf16 %v3201_v34, %v3200_v29  ;;  %v10863_v63 = vpop.f32.mrf.mxu2  ;;  %v2203_v29 = vpop.permute.xlu2 %2202 }
 0x3cb   :  { %5294 = vmatmul.bf16.gmra.mxu3 %v8427_v38  ;;  %5423 = vmatmul.bf16.gmra.mxu1 %v8175_v21  ;;  %v3284_v21 = vpack.c.bf16 %v3203_v42, %v3202_v40  ;;  %12351 = vst [vmem:[#allocation144_spill] sm:$0xff] %v10863_v63  ;;  %v8204_v42 = vld [vmem:[#allocation3 + $0x3e8] sm:$0xf0] }
 0x3cc   :  { %5552 = vmatmul.bf16.gmra.mxu2 %v7923_v62  ;;  %7704 = vmatmul.msk.bf16.gmra.mxu0 %vm516_vm0, %v8792_v54  ;;  %v2199_v62 = vperm.slane %v2194_v36, %v9522_v20  ;;  %v2566_v51 = vunpack.c.l.bf16 %v1158_v4  ;;  %v2694_v54 = vunpack.c.l.bf16 %v2190_v58  ;;  %v5089_v4 = vadd.f32 %v10397_v48, %v10449_v26  ;;  %v8793_v48 = vld [vmem:[%s12204_s1 + $0x1c8] sm:$0xff] }
 0x3cd   :  { %5683 = vmatpush.bf16.msra.mxu3 %v3285_v50  ;;  %v3282_v58 = vpack.c.bf16 %v3199_v56, %v3198_v45  ;;  %v8207_v36 = vor.u32 %v8921_v22, %v8204_v42  ;;  %v8997_v45 = vld [vmem:[#allocation3 + $0x624] sm:$0xf0] }
 0x3ce   :  { %v5255_v35 = vpop.f32.mrf.mxu3  ;;  %v2695_v6 = vunpack.c.l.bf16 %v2199_v62  ;;  %v2822_v50 = vadd.f32 %v2694_v54, %v2566_v51  ;;  %v7955_v62 = vor.u32 %v8862_v28, %v7954_v47  ;;  %v2208_v54 = vperm.slane %v2203_v29, %v9522_v20  ;;  %v8929_v47 = vld [vmem:[#allocation3 + $0x40c] sm:$0xf] }
 0x3cf   :  { %v10856_v38 = vadd.f32 %v5255_v35, %v10439_v30  ;;  %v8458_v30 = vld [vmem:[#allocation3 + $0x5c8] sm:$0xf]  ;;  %v8236_v28 = vld [vmem:[#allocation3 + $0x428] sm:$0xf0]  ;;  %v2226_v29 = vperm.slane %v10794_v61, %v9522_v20 }
 0x3d0   :  { %v10859_v11 = vpop.f32.mrf.mxu1  ;;  %v8459_v35 = vor.u32 %v8989_v9, %v8458_v30  ;;  %v3206_v14 = vmax.f32 %v2822_v50, 0.0  ;;  %v9005_v61 = vld [vmem:[#allocation3 + $0x664] sm:$0xf0] }
 0x3d1   :  { %12350 = vst [vmem:[#allocation143_spill] sm:$0xff] %v10859_v11  ;;  %5684 = vmatpush.bf16.msra.mxu3 %v3284_v21  ;;  %v984_v19 = vpop.f32.mrf.mxu0 }
 0x3d2   :  { %v1159_v37 = vpack.c.bf16 %v984_v19, %v984_v19  ;;  %v10878_v19 = vpop.f32.mrf.mxu2 }
 0x3d4   :  { %v2567_v25 = vunpack.c.l.bf16 %v1159_v37 }
 0x3d5   :  { %5685 = vmatpush.bf16.msra.mxu3 %v3283_v59  ;;  %v2217_v59 = vperm.slane %v10824_v23, %v9522_v20  ;;  %v7986_v23 = vld [vmem:[#allocation3 + $0x210] sm:$0xf] }
 0x3d6   :  { %v2823_v31 = vadd.f32 %v2695_v6, %v2567_v25  ;;  %v5257_v40 = vpop.f32.mrf.mxu3  ;;  %v2696_v25 = vunpack.c.l.bf16 %v2208_v54 }
 0x3d7   :  { %v10867_v16 = vadd.f32 %v5257_v40, %v5089_v4  ;;  %v2697_v22 = vunpack.c.l.bf16 %v2217_v59 }
 0x3d8   :  { %v3207_v34 = vmax.f32 %v2823_v31, 0.0  ;;  %v10869_v21 = vpop.f32.mrf.mxu1  ;;  %v8870_v31 = vld [vmem:[#allocation3 + $0x22c] sm:$0xf0] }
 0x3d9   :  { %12352 = vst [vmem:[#allocation145_spill] sm:$0xff] %v10869_v21  ;;  %5686 = vmatpush.bf16.msra.mxu3 %v3282_v58  ;;  %v987_v26 = vpop.f32.mrf.mxu0  ;;  %v12380_v21 = vld [vmem:[#allocation78_spill] sm:$0xff] }
 0x3da   :  { %v10874_v51 = vpack.c.bf16 %v3207_v34, %v3206_v14  ;;  %v1160_v7 = vpack.c.bf16 %v987_v26, %v987_v26  ;;  %v8239_v14 = vor.u32 %v8929_v47, %v8236_v28  ;;  %v7987_v26 = vor.u32 %v8870_v31, %v7986_v23  ;;  %v8937_v47 = vld [vmem:[#allocation3 + $0x44c] sm:$0xf]  ;;  %v8878_v23 = vld [vmem:[#allocation3 + $0x26c] sm:$0xf0] }
 0x3db   :  { %5299 = vmatmul.bf16.gmra.mxu3 %v8459_v35  ;;  %5428 = vmatmul.bf16.gmra.mxu1 %v8207_v36  ;;  %v8268_v28 = vld [vmem:[#allocation3 + $0x468] sm:$0xf0] }
 0x3dc   :  { %5557 = vmatmul.bf16.gmra.mxu2 %v7955_v62  ;;  %7705 = vmatmul.msk.bf16.gmra.mxu0 %vm516_vm0, %v8793_v48  ;;  %v2568_v30 = vunpack.c.l.bf16 %v1160_v7 }
 0x3dd   :  { %5687 = vmatpush.bf16.msra.mxu3 %v10743_v24  ;;  %v8490_v24 = vld [vmem:[#allocation3 + $0x608] sm:$0xf] }
 0x3de   :  { %v5260_v37 = vpop.f32.mrf.mxu3  ;;  %v2824_v42 = vadd.f32 %v2696_v25, %v2568_v30  ;;  %v8491_v36 = vor.u32 %v8997_v45, %v8490_v24 }
 0x3df   :  { %v10882_v56 = vadd.f32 %v5260_v37, %v10461_v10  ;;  %v5094_v10 = vadd.f32 %v10441_v33, %v10476_v41  ;;  %v8794_v33 = vld [vmem:[%s12204_s1 + $0x1d0] sm:$0xff] }
 0x3e0   :  { %v10886_v6 = vpop.f32.mrf.mxu1  ;;  %v3208_v34 = vmax.f32 %v2824_v42, 0.0 }
 0x3e1   :  { %12353 = vst [vmem:[#allocation146_spill] sm:$0xff] %v10886_v6  ;;  %5688 = vmatpush.bf16.msra.mxu3 %v10717_v5  ;;  %v989_v50 = vpop.f32.mrf.mxu0  ;;  %v10892_v5 = vpop.f32.mrf.mxu2  ;;  %v12379_v6 = vld [vmem:[#allocation19_spill] sm:$0xff] }
 0x3e2   :  { %v1161_v9 = vpack.c.bf16 %v989_v50, %v989_v50  ;;  %12354 = vst [vmem:[#allocation147_spill] sm:$0xff] %v10892_v5  ;;  %v5122_v11 = vadd.f32 %v12380_v21, %v12379_v6 }
 0x3e4   :  { %v2569_v4 = vunpack.c.l.bf16 %v1161_v9  ;;  %v2698_v9 = vunpack.c.l.bf16 %v2226_v29  ;;  %v2244_v29 = vperm.slane %v10768_v13, %v9522_v20  ;;  %v9013_v13 = vld [vmem:[#allocation3 + $0x6a4] sm:$0xf0] }
 0x3e5   :  { %5689 = vmatpush.bf16.msra.mxu3 %v10691_v0 }
 0x3e6   :  { %v2825_v40 = vadd.f32 %v2697_v22, %v2569_v4  ;;  %v5262_v58 = vpop.f32.mrf.mxu3  ;;  %v8522_v22 = vld [vmem:[#allocation3 + $0x648] sm:$0xf] }
 0x3e7   :  { %v10894_v35 = vadd.f32 %v5262_v58, %v5094_v10  ;;  %v8018_v10 = vld [vmem:[#allocation3 + $0x250] sm:$0xf] }
 0x3e8   :  { %v3209_v62 = vmax.f32 %v2825_v40, 0.0  ;;  %v10896_v48 = vpop.f32.mrf.mxu1 }
 0x3e9   :  { %12355 = vst [vmem:[#allocation148_spill] sm:$0xff] %v10896_v48  ;;  %5690 = vmatpush.bf16.msra.mxu3 %v10663_v43  ;;  %v992_v41 = vpop.f32.mrf.mxu0  ;;  %v2235_v43 = vperm.slane %v10861_v46, %v9522_v20 }
 0x3ea   :  { %v10902_v0 = vpack.c.bf16 %v3209_v62, %v3208_v34  ;;  %v1162_v7 = vpack.c.bf16 %v992_v41, %v992_v41  ;;  %v8795_v41 = vld [vmem:[%s12204_s1 + $0x1d8] sm:$0xff] }
 0x3eb   :  { %5304 = vmatmul.bf16.gmra.mxu3 %v8491_v36  ;;  %5433 = vmatmul.bf16.gmra.mxu1 %v8239_v14  ;;  %v2699_v42 = vunpack.c.l.bf16 %v2235_v43  ;;  %v8523_v36 = vor.u32 %v9005_v61, %v8522_v22  ;;  %v8271_v14 = vor.u32 %v8937_v47, %v8268_v28 }
 0x3ec   :  { %5562 = vmatmul.bf16.gmra.mxu2 %v7987_v26  ;;  %7706 = vmatmul.msk.bf16.gmra.mxu0 %vm516_vm0, %v8794_v33  ;;  %v2570_v30 = vunpack.c.l.bf16 %v1162_v7  ;;  %v8019_v33 = vor.u32 %v8878_v23, %v8018_v10  ;;  %v8300_v10 = vld [vmem:[#allocation3 + $0x4a8] sm:$0xf0]  ;;  %v8050_v23 = vld [vmem:[#allocation3 + $0x290] sm:$0xf] }
 0x3ee   :  { %v5265_v54 = vpop.f32.mrf.mxu3  ;;  %v2826_v4 = vadd.f32 %v2698_v9, %v2570_v30 }
 0x3ef   :  { %v10908_v37 = vadd.f32 %v5265_v54, %v10491_v27  ;;  %v10910_v59 = vpop.f32.mrf.mxu2  ;;  %v5099_v27 = vadd.f32 %v10469_v53, %v10504_v52 }
 0x3f0   :  { %v10914_v50 = vpop.f32.mrf.mxu1  ;;  %v3210_v34 = vmax.f32 %v2826_v4, 0.0 }
 0x3f1   :  { %12356 = vst [vmem:[#allocation149_spill] sm:$0xff] %v10914_v50  ;;  %v994_v25 = vpop.f32.mrf.mxu0 }
 0x3f2   :  { %v1163_v24 = vpack.c.bf16 %v994_v25, %v994_v25  ;;  %v2253_v25 = vperm.slane %v10632_v55, %v9522_v20 }
 0x3f4   :  { %v2571_v45 = vunpack.c.l.bf16 %v1163_v24  ;;  %v2701_v61 = vunpack.c.l.bf16 %v2253_v25 }
 0x3f6   :  { %v2827_v31 = vadd.f32 %v2699_v42, %v2571_v45  ;;  %v5267_v46 = vpop.f32.mrf.mxu3  ;;  %v2700_v42 = vunpack.c.l.bf16 %v2244_v29  ;;  %v8554_v45 = vld [vmem:[#allocation3 + $0x688] sm:$0xf]  ;;  %v8796_v29 = vld [vmem:[%s12204_s1 + $0x1e0] sm:$0xff] }
 0x3f7   :  { %v10918_v40 = vadd.f32 %v5267_v46, %v5099_v27  ;;  %v10920_v58 = vpop.f32.mrf.mxu2  ;;  %v8945_v27 = vld [vmem:[#allocation3 + $0x48c] sm:$0xf] }
 0x3f8   :  { %v3211_v62 = vmax.f32 %v2827_v31, 0.0  ;;  %v10922_v26 = vpop.f32.mrf.mxu1  ;;  %v8886_v31 = vld [vmem:[#allocation3 + $0x2ac] sm:$0xf0] }
 0x3f9   :  { %12357 = vst [vmem:[#allocation150_spill] sm:$0xff] %v10922_v26  ;;  %v997_v53 = vpop.f32.mrf.mxu0  ;;  %v7716_v26 = vld [vmem:[#allocation3 + $0x20] sm:$0xf0] }
 0x3fa   :  { %v10927_v52 = vpack.c.bf16 %v3211_v62, %v3210_v34  ;;  %v1164_v7 = vpack.c.bf16 %v997_v53, %v997_v53  ;;  %v8555_v34 = vor.u32 %v9013_v13, %v8554_v45  ;;  %v8303_v62 = vor.u32 %v8945_v27, %v8300_v10  ;;  %v8586_v45 = vld [vmem:[#allocation3 + $0x6c8] sm:$0xf]  ;;  %v8082_v27 = vld [vmem:[#allocation3 + $0x2d0] sm:$0xf] }
 0x3fb   :  { %5309 = vmatmul.bf16.gmra.mxu3 %v8523_v36  ;;  %5438 = vmatmul.bf16.gmra.mxu1 %v8271_v14  ;;  %v5109_v13 = vadd.f32 %v10524_v15, %v10158_v32  ;;  %v8894_v10 = vld [vmem:[#allocation3 + $0x2ec] sm:$0xf0]  ;;  %v12366_v32 = vld [vmem:[#allocation11_spill] sm:$0xff] }
 0x3fc   :  { %5567 = vmatmul.bf16.gmra.mxu2 %v8019_v33  ;;  %7707 = vmatmul.msk.bf16.gmra.mxu0 %vm516_vm0, %v8795_v41  ;;  %v2572_v9 = vunpack.c.l.bf16 %v1164_v7  ;;  %v8051_v7 = vor.u32 %v8886_v31, %v8050_v23  ;;  %v5112_v15 = vadd.f32 %v10534_v1, %v12366_v32 }
 0x3fe   :  { %v5270_v54 = vpop.f32.mrf.mxu3  ;;  %v2828_v47 = vadd.f32 %v2700_v42, %v2572_v9 }
 0x3ff   :  { %v10933_v43 = vadd.f32 %v5270_v54, %v10519_v60  ;;  %v10935_v30 = vpop.f32.mrf.mxu2  ;;  %v5104_v60 = vadd.f32 %v10498_v17, %v10675_v44  ;;  %v5107_v54 = vadd.f32 %v10508_v12, %v10137_v3 }
 0x400   :  { %12358 = vst [vmem:[#allocation151_spill] sm:$0xff] %v10935_v30  ;;  %v10939_v24 = vpop.f32.mrf.mxu1  ;;  %v3212_v33 = vmax.f32 %v2828_v47, 0.0  ;;  %v8953_v47 = vld [vmem:[#allocation3 + $0x4cc] sm:$0xf] }
 0x401   :  { %12359 = vst [vmem:[#allocation152_spill] sm:$0xff] %v10939_v24  ;;  %v999_v22 = vpop.f32.mrf.mxu0 }
 0x402   :  { %v1165_v4 = vpack.c.bf16 %v999_v22, %v999_v22 }
 0x404   :  { %v2573_v28 = vunpack.c.l.bf16 %v1165_v4 }
 0x406   :  { %v2829_v46 = vadd.f32 %v2701_v61, %v2573_v28  ;;  %v5272_v55 = vpop.f32.mrf.mxu3  ;;  %v9021_v61 = vld [vmem:[#allocation3 + $0x6e4] sm:$0xf0]  ;;  %v8332_v28 = vld [vmem:[#allocation3 + $0x4e8] sm:$0xf0] }
 0x407   :  { %v10943_v36 = vadd.f32 %v5272_v55, %v5104_v60  ;;  %v10945_v14 = vpop.f32.mrf.mxu2  ;;  %v8587_v23 = vor.u32 %v9021_v61, %v8586_v45  ;;  %v8335_v31 = vor.u32 %v8953_v47, %v8332_v28  ;;  %v8083_v55 = vor.u32 %v8894_v10, %v8082_v27  ;;  %v9029_v45 = vld [vmem:[#allocation3 + $0x724] sm:$0xf0]  ;;  %v8961_v61 = vld [vmem:[#allocation3 + $0x50c] sm:$0xf]  ;;  %v12369_v28 = vld [vmem:[#allocation13_spill] sm:$0xff] }
 0x408   :  { %12360 = vst [vmem:[#allocation153_spill] sm:$0xff] %v10945_v14  ;;  %v3213_v41 = vmax.f32 %v2829_v46, 0.0  ;;  %v10947_v53 = vpop.f32.mrf.mxu1  ;;  %v8364_v47 = vld [vmem:[#allocation3 + $0x528] sm:$0xf0]  ;;  %v8114_v10 = vld [vmem:[#allocation3 + $0x310] sm:$0xf] }
 0x409   :  { %12361 = vst [vmem:[#allocation154_spill] sm:$0xff] %v10947_v53  ;;  %v10952_v17 = vpop.f32.mrf.mxu0  ;;  %v8977_v53 = vld [vmem:[#allocation3 + $0x58c] sm:$0xf] }
 0x40a   :  { %v10954_v44 = vpack.c.bf16 %v3213_v41, %v3212_v33 }
 0x40b   :  { %5314 = vmatmul.bf16.gmra.mxu3 %v8555_v34  ;;  %5443 = vmatmul.bf16.gmra.mxu1 %v8303_v62  ;;  %v8797_v34 = vld [vmem:[%s12204_s1 + $0x1e8] sm:$0xff] }
 0x40c   :  { %5572 = vmatmul.bf16.gmra.mxu2 %v8051_v7  ;;  %7708 = vmatmul.msk.bf16.gmra.mxu0 %vm516_vm0, %v8796_v29 }
 0x40e   :  { %v5275_v25 = vpop.f32.mrf.mxu3 }
 0x40f   :  { %v10959_v9 = vadd.f32 %v5275_v25, %v5107_v54  ;;  %v10961_v22 = vpop.f32.mrf.mxu2  ;;  %v8618_v25 = vld [vmem:[#allocation3 + $0x708] sm:$0xf] }
 0x410   :  { %12362 = vst [vmem:[#allocation155_spill] sm:$0xff] %v10961_v22  ;;  %v10963_v42 = vpop.f32.mrf.mxu1  ;;  %v12389_v22 = vld [vmem:[#allocation82_spill] sm:$0xff] }
 0x411   :  { %12363 = vst [vmem:[#allocation156_spill] sm:$0xff] %v10963_v42  ;;  %v10965_v4 = vpop.f32.mrf.mxu0 }
 0x416   :  { %v5277_v60 = vpop.f32.mrf.mxu3 }
 0x417   :  { %v10969_v3 = vadd.f32 %v5277_v60, %v5109_v13  ;;  %v10971_v12 = vpop.f32.mrf.mxu2  ;;  %v12370_v13 = vld [vmem:[#allocation70_spill] sm:$0xff]  ;;  %v8902_v60 = vld [vmem:[#allocation3 + $0x32c] sm:$0xf0] }
 0x418   :  { %12364 = vst [vmem:[#allocation157_spill] sm:$0xff] %v10971_v12  ;;  %v10973_v46 = vpop.f32.mrf.mxu1  ;;  %v5114_v27 = vadd.f32 %v12370_v13, %v12369_v28  ;;  %v12373_v28 = vld [vmem:[#allocation15_spill] sm:$0xff]  ;;  %v12374_v13 = vld [vmem:[#allocation72_spill] sm:$0xff] }
 0x419   :  { %12365 = vst [vmem:[#allocation158_spill] sm:$0xff] %v10973_v46  ;;  %v10978_v62 = vpop.f32.mrf.mxu0 }
 0x41b   :  { %5319 = vmatmul.bf16.gmra.mxu3 %v8587_v23  ;;  %5448 = vmatmul.bf16.gmra.mxu1 %v8335_v31 }
 0x41c   :  { %5577 = vmatmul.bf16.gmra.mxu2 %v8083_v55  ;;  %7709 = vmatmul.msk.bf16.gmra.mxu0 %vm516_vm0, %v8797_v34  ;;  %v8619_v55 = vor.u32 %v9029_v45, %v8618_v25  ;;  %v8367_v34 = vor.u32 %v8961_v61, %v8364_v47  ;;  %v8650_v47 = vld [vmem:[#allocation3 + $0x748] sm:$0xf] }
 0x41e   :  { %v5280_v33 = vpop.f32.mrf.mxu3 }
 0x41f   :  { %v10983_v41 = vadd.f32 %v5280_v33, %v5112_v15  ;;  %v10985_v7 = vpop.f32.mrf.mxu2  ;;  %v8115_v15 = vor.u32 %v8902_v60, %v8114_v10  ;;  %v8798_v33 = vld [vmem:[%s12204_s1 + $0x1f0] sm:$0xff]  ;;  %v9037_v10 = vld [vmem:[#allocation3 + $0x764] sm:$0xf0] }
 0x420   :  { %12367 = vst [vmem:[#allocation11_spill] sm:$0xff] %v10985_v7  ;;  %v10987_v29 = vpop.f32.mrf.mxu1  ;;  %v8969_v60 = vld [vmem:[#allocation3 + $0x54c] sm:$0xf]  ;;  %v8651_v46 = vor.u32 %v9037_v10, %v8650_v47 }
 0x421   :  { %12368 = vst [vmem:[#allocation159_spill] sm:$0xff] %v10987_v29  ;;  %v10989_v54 = vpop.f32.mrf.mxu0  ;;  %v12381_v10 = vld [vmem:[#allocation63_spill] sm:$0xff] }
 0x426   :  { %v5282_v23 = vpop.f32.mrf.mxu3 }
 0x427   :  { %v10993_v1 = vadd.f32 %v5282_v23, %v5114_v27  ;;  %v10995_v31 = vpop.f32.mrf.mxu2  ;;  %v5117_v27 = vadd.f32 %v12374_v13, %v12373_v28 }
 0x428   :  { %12371 = vst [vmem:[#allocation13_spill] sm:$0xff] %v10995_v31  ;;  %v10997_v32 = vpop.f32.mrf.mxu1 }
 0x429   :  { %12372 = vst [vmem:[#allocation70_spill] sm:$0xff] %v10997_v32  ;;  %v1012_v8 = vpop.f32.mrf.mxu0  ;;  %v8396_v32 = vld [vmem:[#allocation3 + $0x568] sm:$0xf0] }
 0x42a   :  { %v8399_v28 = vor.u32 %v8969_v60, %v8396_v32  ;;  %v2316_v32 = vperm.slane %v10646_v49, %v9522_v20  ;;  %v2325_v60 = vperm.slane %v12381_v10, %v9522_v20  ;;  %v12385_v49 = vld [vmem:[#allocation74_spill] sm:$0xff] }
 0x42b   :  { %5324 = vmatmul.bf16.gmra.mxu3 %v8619_v55  ;;  %5453 = vmatmul.bf16.gmra.mxu1 %v8367_v34  ;;  %v8146_v55 = vld [vmem:[#allocation3 + $0x350] sm:$0xf]  ;;  %v2289_v6 = vperm.slane %v12385_v49, %v9522_v20  ;;  %v8428_v49 = vld [vmem:[#allocation3 + $0x5a8] sm:$0xf0] }
 0x42c   :  { %5582 = vmatmul.bf16.gmra.mxu2 %v8115_v15  ;;  %7710 = vmatmul.msk.bf16.gmra.mxu0 %vm516_vm0, %v8798_v33  ;;  %v8910_v34 = vld [vmem:[#allocation3 + $0x36c] sm:$0xf0]  ;;  %v2708_v10 = vunpack.c.l.bf16 %v2316_v32  ;;  %v2709_v31 = vunpack.c.l.bf16 %v2325_v60  ;;  %v1168_v60 = vpack.c.bf16 %v10978_v62, %v10978_v62 }
 0x42d   :  { %v2705_v24 = vunpack.c.l.bf16 %v2289_v6 }
 0x42e   :  { %v5285_v23 = vpop.f32.mrf.mxu3  ;;  %v2576_v14 = vunpack.c.l.bf16 %v1168_v60 }
 0x42f   :  { %v11005_v29 = vadd.f32 %v5285_v23, %v5117_v27  ;;  %v11007_v25 = vpop.f32.mrf.mxu2  ;;  %v8147_v27 = vor.u32 %v8910_v34, %v8146_v55  ;;  %v8799_v23 = vld [vmem:[%s12204_s1 + $0x1f8] sm:$0xff]  ;;  %v2298_v55 = vperm.slane %v10678_v2, %v9522_v20 }
 0x430   :  { %12375 = vst [vmem:[#allocation15_spill] sm:$0xff] %v11007_v25  ;;  %v11009_v45 = vpop.f32.mrf.mxu1 }
 0x431   :  { %12376 = vst [vmem:[#allocation72_spill] sm:$0xff] %v11009_v45  ;;  %v1014_v61 = vpop.f32.mrf.mxu0  ;;  %v2706_v2 = vunpack.c.l.bf16 %v2298_v55  ;;  %v8918_v55 = vld [vmem:[#allocation3 + $0x3ac] sm:$0xf0] }
 0x432   :  { %v1171_v34 = vpack.c.bf16 %v1014_v61, %v1014_v61 }
 0x434   :  { %v2579_v61 = vunpack.c.l.bf16 %v1171_v34  ;;  %v8800_v34 = vld [vmem:[#allocation3 + $0x4] sm:$0xf] }
 0x436   :  { %v11011_v15 = vpop.f32.mrf.mxu3 }
 0x437   :  { %v11013_v33 = vpop.f32.mrf.mxu2 }
 0x438   :  { %12377 = vst [vmem:[#allocation160_spill] sm:$0xff] %v11013_v33  ;;  %v11015_v13 = vpop.f32.mrf.mxu1 }
 0x439   :  { %12378 = vst [vmem:[#allocation161_spill] sm:$0xff] %v11015_v13  ;;  %v1017_v45 = vpop.f32.mrf.mxu0  ;;  %v1170_v13 = vpack.c.bf16 %v1012_v8, %v1012_v8  ;;  %v8178_v8 = vld [vmem:[#allocation3 + $0x390] sm:$0xf] }
 0x43a   :  { %v1172_v42 = vpack.c.bf16 %v1017_v45, %v1017_v45  ;;  %v8179_v7 = vor.u32 %v8918_v55, %v8178_v8  ;;  %v12391_v8 = vld [vmem:[#allocation84_spill] sm:$0xff] }
 0x43b   :  { %5329 = vmatmul.bf16.gmra.mxu3 %v8651_v46  ;;  %5458 = vmatmul.bf16.gmra.mxu1 %v8399_v28  ;;  %v12383_v28 = vld [vmem:[#allocation68_spill] sm:$0xff] }
 0x43c   :  { %5587 = vmatmul.bf16.gmra.mxu2 %v8147_v27  ;;  %7711 = vmatmul.msk.bf16.gmra.mxu0 %vm516_vm0, %v8799_v23  ;;  %v2307_v27 = vperm.slane %v12383_v28, %v9522_v20  ;;  %v2580_v23 = vunpack.c.l.bf16 %v1172_v42  ;;  %v2280_v42 = vperm.slane %v10706_v18, %v9522_v20  ;;  %v1166_v18 = vpack.c.bf16 %v10952_v17, %v10952_v17 }
 0x43d   :  { %v2271_v17 = vperm.slane %v12389_v22, %v9522_v20 }
 0x43e   :  { %v5290_v47 = vpop.f32.mrf.mxu3  ;;  %v2707_v12 = vunpack.c.l.bf16 %v2307_v27  ;;  %v2836_v28 = vadd.f32 %v2708_v10, %v2580_v23  ;;  %v12387_v27 = vld [vmem:[#allocation140_spill] sm:$0xff] }
 0x43f   :  { %v11029_v46 = vadd.f32 %v5290_v47, %v5122_v11  ;;  %v11031_v45 = vpop.f32.mrf.mxu2  ;;  %v1169_v11 = vpack.c.bf16 %v10989_v54, %v10989_v54  ;;  %v8682_v47 = vld [vmem:[#allocation3 + $0x788] sm:$0xf]  ;;  %v2578_v54 = vunpack.c.l.bf16 %v1170_v13  ;;  %v2334_v50 = vperm.slane %v12387_v27, %v9522_v20 }
 0x440   :  { %12382 = vst [vmem:[#allocation19_spill] sm:$0xff] %v11031_v45  ;;  %v11035_v21 = vpop.f32.mrf.mxu1  ;;  %v9045_v45 = vld [vmem:[#allocation3 + $0x7a4] sm:$0xf0]  ;;  %v8431_v13 = vor.u32 %v8977_v53, %v8428_v49  ;;  %v3220_v5 = vmax.f32 %v2836_v28, 0.0  ;;  %v7719_v27 = vor.u32 %v8800_v34, %v7716_v26  ;;  %v2703_v22 = vunpack.c.l.bf16 %v2271_v17 }
 0x441   :  { %12384 = vst [vmem:[#allocation78_spill] sm:$0xff] %v11035_v21  ;;  %v1019_v39 = vpop.f32.mrf.mxu0  ;;  %v2577_v10 = vunpack.c.l.bf16 %v1169_v11  ;;  %v8683_v62 = vor.u32 %v9045_v45, %v8682_v47  ;;  %v2834_v30 = vadd.f32 %v2706_v2, %v2578_v54  ;;  %v2710_v26 = vunpack.c.l.bf16 %v2334_v50  ;;  %v12390_v2 = vld [vmem:[#allocation23_spill] sm:$0xff]  ;;  %v2338_v54 = vpop.permute.xlu2 %2337 }
 0x442   :  { %v1173_v33 = vpack.c.bf16 %v1019_v39, %v1019_v39  ;;  %v12386_v39 = vld [vmem:[#allocation115_spill] sm:$0xff] }
 0x443   :  { %v2262_v32 = vperm.slane %v12386_v39, %v9522_v20  ;;  %v2835_v39 = vadd.f32 %v2707_v12, %v2579_v61  ;;  %v2704_v61 = vunpack.c.l.bf16 %v2280_v42  ;;  %v2833_v53 = vadd.f32 %v2705_v24, %v2577_v10 }
 0x444   :  { %v2581_v21 = vunpack.c.l.bf16 %v1173_v33  ;;  %v1167_v33 = vpack.c.bf16 %v10965_v4, %v10965_v4  ;;  %v3218_v60 = vmax.f32 %v2834_v30, 0.0 }
 0x445   :  { %v3219_v47 = vmax.f32 %v2835_v39, 0.0  ;;  %v2702_v28 = vunpack.c.l.bf16 %v2262_v32  ;;  %v3217_v55 = vmax.f32 %v2833_v53, 0.0  ;;  %v7748_v53 = vld [vmem:[#allocation3 + $0x60] sm:$0xf0] }
 0x446   :  { %v2837_v23 = vadd.f32 %v2709_v31, %v2581_v21  ;;  %v11053_v6 = vpop.f32.mrf.mxu3  ;;  %v2574_v21 = vunpack.c.l.bf16 %v1166_v18  ;;  %v2575_v45 = vunpack.c.l.bf16 %v1167_v33 }
 0x447   :  { %v11055_v48 = vpop.f32.mrf.mxu2  ;;  %v3292_v50 = vpack.c.bf16 %v3219_v47, %v3218_v60 }
 0x448   :  { %12388 = vst [vmem:[#allocation63_spill] sm:$0xff] %v11055_v48  ;;  %v3221_v63 = vmax.f32 %v2837_v23, 0.0  ;;  %v5424_v25 = vpop.f32.mrf.mxu1  ;;  %v2831_v24 = vadd.f32 %v2703_v22, %v2575_v45  ;;  %v8808_v45 = vld [vmem:[#allocation3 + $0x44] sm:$0xf] }
 0x449   :  { %v11060_v4 = vadd.f32 %v5424_v25, %v10856_v38  ;;  %v1022_v31 = vpop.f32.mrf.mxu0  ;;  %v5127_v38 = vadd.f32 %v12391_v8, %v12390_v2  ;;  %v2832_v25 = vadd.f32 %v2704_v61, %v2576_v14  ;;  %v8926_v61 = vld [vmem:[#allocation3 + $0x3ec] sm:$0xf0] }
 0x44a   :  { %v3293_v12 = vpack.c.bf16 %v3221_v63, %v3220_v5  ;;  %v1174_v11 = vpack.c.bf16 %v1022_v31, %v1022_v31  ;;  %v2830_v63 = vadd.f32 %v2702_v28, %v2574_v21  ;;  %v3215_v39 = vmax.f32 %v2831_v24, 0.0  ;;  %v8985_v21 = vld [vmem:[#allocation3 + $0x5cc] sm:$0xf] }
 0x44b   :  { %5334 = vmatmul.bf16.gmra.mxu3 %v8683_v62  ;;  %5463 = vmatmul.bf16.gmra.mxu1 %v8431_v13  ;;  %v3216_v33 = vmax.f32 %v2832_v25, 0.0  ;;  %v8714_v13 = vld [vmem:[#allocation3 + $0x7c8] sm:$0xf] }
 0x44c   :  { %v2582_v49 = vunpack.c.l.bf16 %v1174_v11  ;;  %5592 = vmatmul.bf16.gmra.mxu2 %v8179_v7  ;;  %5015 = vmatmul.bf16.vlgmr.msrb.gmra.mxu0 %v7719_v27  ;;  %v2343_v7 = vperm.slane %v2338_v54, %v9522_v20  ;;  %v3214_v10 = vmax.f32 %v2830_v63, 0.0  ;;  %v9053_v27 = vld [vmem:[#allocation3 + $0x7e4] sm:$0xf0]  ;;  %v8210_v11 = vld [vmem:[#allocation3 + $0x3d0] sm:$0xf] }
 0x44d   :  { %5852 = vmatpush.bf16.msra.mxu1 %v3293_v12  ;;  %v3291_v62 = vpack.c.bf16 %v3217_v55, %v3216_v33  ;;  %v8460_v12 = vld [vmem:[#allocation3 + $0x5e8] sm:$0xf0]  ;;  %v8715_v2 = vor.u32 %v9053_v27, %v8714_v13  ;;  %v8211_v63 = vor.u32 %v8926_v61, %v8210_v11 }
 0x44e   :  { %v2838_v5 = vadd.f32 %v2710_v26, %v2582_v49  ;;  %v5295_v42 = vpop.f32.mrf.mxu3  ;;  %v2711_v17 = vunpack.c.l.bf16 %v2343_v7  ;;  %v12393_v28 = vld [vmem:[#allocation135_spill] sm:$0xff]  ;;  %v3290_v22 = vpack.c.bf16 %v3215_v39, %v3214_v10  ;;  %v8463_v8 = vor.u32 %v8985_v21, %v8460_v12 }
 0x44f   :  { %v11064_v34 = vadd.f32 %v5295_v42, %v5127_v38  ;;  %v11066_v32 = vpop.f32.mrf.mxu2  ;;  %v2352_v26 = vperm.slane %v12393_v28, %v9522_v20  ;;  %v7751_v42 = vor.u32 %v8808_v45, %v7748_v53  ;;  %v12395_v33 = vld [vmem:[#allocation27_spill] sm:$0xff]  ;;  %v8242_v45 = vld [vmem:[#allocation3 + $0x410] sm:$0xf]  ;;  %v8802_v53 = vld [vmem:[#allocation3 + $0x14] sm:$0xf] }
 0x450   :  { %12392 = vst [vmem:[#allocation68_spill] sm:$0xff] %v11066_v32  ;;  %v5426_v18 = vpop.f32.mrf.mxu1  ;;  %v3222_v38 = vmax.f32 %v2838_v5, 0.0  ;;  %v12396_v5 = vld [vmem:[#allocation89_spill] sm:$0xff]  ;;  %v8993_v12 = vld [vmem:[#allocation3 + $0x60c] sm:$0xf] }
 0x451   :  { %v11070_v23 = vadd.f32 %v5426_v18, %v10867_v16  ;;  %5853 = vmatpush.bf16.msra.mxu1 %v3292_v50  ;;  %v1024_v30 = vpop.f32.mrf.mxu0  ;;  %v2712_v7 = vunpack.c.l.bf16 %v2352_v26  ;;  %v8492_v11 = vld [vmem:[#allocation3 + $0x628] sm:$0xf0]  ;;  %v8934_v28 = vld [vmem:[#allocation3 + $0x42c] sm:$0xf0]  ;;  %v8816_v26 = vld [vmem:[#allocation3 + $0x84] sm:$0xf] }
 0x452   :  { %v1175_v14 = vpack.c.bf16 %v1024_v30, %v1024_v30  ;;  %v5132_v30 = vadd.f32 %v12396_v5, %v12395_v33 }
 0x454   :  { %v2583_v31 = vunpack.c.l.bf16 %v1175_v14 }
 0x455   :  { %5854 = vmatpush.bf16.msra.mxu1 %v3291_v62  ;;  %v12398_v62 = vld [vmem:[#allocation136_spill] sm:$0xff] }
 0x456   :  { %v2839_v47 = vadd.f32 %v2711_v17, %v2583_v31  ;;  %v11072_v16 = vpop.f32.mrf.mxu3  ;;  %v2361_v13 = vperm.slane %v12398_v62, %v9522_v20  ;;  %v12402_v62 = vld [vmem:[#allocation94_spill] sm:$0xff] }
 0x457   :  { %v11076_v49 = vpop.f32.mrf.mxu2 }
 0x458   :  { %12394 = vst [vmem:[#allocation74_spill] sm:$0xff] %v11076_v49  ;;  %v3223_v25 = vmax.f32 %v2839_v47, 0.0  ;;  %v5429_v60 = vpop.f32.mrf.mxu1  ;;  %v7732_v47 = vld [vmem:[#allocation3 + $0x30] sm:$0xf0] }
 0x459   :  { %v11079_v54 = vadd.f32 %v5429_v60, %v10882_v56  ;;  %5855 = vmatpush.bf16.msra.mxu1 %v3290_v22  ;;  %v1027_v24 = vpop.f32.mrf.mxu0  ;;  %v7780_v22 = vld [vmem:[#allocation3 + $0xa0] sm:$0xf0]  ;;  %v7735_v60 = vor.u32 %v8802_v53, %v7732_v47  ;;  %v9001_v53 = vld [vmem:[#allocation3 + $0x64c] sm:$0xf] }
 0x45a   :  { %v1176_v55 = vpack.c.bf16 %v1027_v24, %v1027_v24  ;;  %v11081_v50 = vpack.c.bf16 %v3223_v25, %v3222_v38  ;;  %v8495_v25 = vor.u32 %v8993_v12, %v8492_v11  ;;  %v8524_v47 = vld [vmem:[#allocation3 + $0x668] sm:$0xf0] }
 0x45b   :  { %5339 = vmatmul.bf16.gmra.mxu3 %v8715_v2  ;;  %5468 = vmatmul.bf16.gmra.mxu1 %v8463_v8 }
 0x45c   :  { %v2584_v18 = vunpack.c.l.bf16 %v1176_v55  ;;  %5597 = vmatmul.bf16.gmra.mxu2 %v8211_v63  ;;  %5020 = vmatmul.bf16.gmra.mxu0 %v7751_v42  ;;  %v8243_v55 = vor.u32 %v8934_v28, %v8242_v45 }
 0x45d   :  { %5856 = vmatpush.bf16.msra.mxu1 %v10954_v44  ;;  %v2713_v44 = vunpack.c.l.bf16 %v2361_v13 }
 0x45e   :  { %v2840_v14 = vadd.f32 %v2712_v7, %v2584_v18  ;;  %v5300_v10 = vpop.f32.mrf.mxu3  ;;  %v7783_v7 = vor.u32 %v8816_v26, %v7780_v22  ;;  %v8274_v22 = vld [vmem:[#allocation3 + $0x450] sm:$0xf] }
 0x45f   :  { %v11086_v56 = vadd.f32 %v5300_v10, %v5132_v30  ;;  %v11088_v39 = vpop.f32.mrf.mxu2 }
 0x460   :  { %12397 = vst [vmem:[#allocation115_spill] sm:$0xff] %v11088_v39  ;;  %v5431_v27 = vpop.f32.mrf.mxu1  ;;  %v3224_v63 = vmax.f32 %v2840_v14, 0.0  ;;  %v12401_v14 = vld [vmem:[#allocation31_spill] sm:$0xff] }
 0x461   :  { %v11093_v17 = vadd.f32 %v5431_v27, %v10894_v35  ;;  %5857 = vmatpush.bf16.msra.mxu1 %v10927_v52  ;;  %v1029_v31 = vpop.f32.mrf.mxu0  ;;  %v12399_v35 = vld [vmem:[#allocation90_spill] sm:$0xff]  ;;  %v5137_v13 = vadd.f32 %v12402_v62, %v12401_v14 }
 0x462   :  { %v1177_v21 = vpack.c.bf16 %v1029_v31, %v1029_v31  ;;  %v2370_v52 = vperm.slane %v12399_v35, %v9522_v20  ;;  %v7764_v35 = vld [vmem:[#allocation3 + $0x70] sm:$0xf0] }
 0x464   :  { %v2585_v61 = vunpack.c.l.bf16 %v1177_v21  ;;  %v2714_v30 = vunpack.c.l.bf16 %v2370_v52  ;;  %v8942_v52 = vld [vmem:[#allocation3 + $0x46c] sm:$0xf0] }
 0x465   :  { %5858 = vmatpush.bf16.msra.mxu1 %v10902_v0  ;;  %v8275_v14 = vor.u32 %v8942_v52, %v8274_v22 }
 0x466   :  { %v2841_v2 = vadd.f32 %v2713_v44, %v2585_v61  ;;  %v11097_v8 = vpop.f32.mrf.mxu3 }
 0x467   :  { %v11101_v38 = vpop.f32.mrf.mxu2 }
 0x468   :  { %12400 = vst [vmem:[#allocation140_spill] sm:$0xff] %v11101_v38  ;;  %v3225_v42 = vmax.f32 %v2841_v2, 0.0  ;;  %v5434_v24 = vpop.f32.mrf.mxu1  ;;  %v8810_v2 = vld [vmem:[#allocation3 + $0x54] sm:$0xf] }
 0x469   :  { %v11104_v0 = vadd.f32 %v5434_v24, %v10908_v37  ;;  %5859 = vmatpush.bf16.msra.mxu1 %v10874_v51  ;;  %v1032_v18 = vpop.f32.mrf.mxu0  ;;  %v12404_v51 = vld [vmem:[#allocation127_spill] sm:$0xff] }
 0x46a   :  { %v1178_v33 = vpack.c.bf16 %v1032_v18, %v1032_v18  ;;  %v11107_v5 = vpack.c.bf16 %v3225_v42, %v3224_v63  ;;  %v2379_v12 = vperm.slane %v12404_v51, %v9522_v20  ;;  %v12405_v24 = vld [vmem:[#allocation83_spill] sm:$0xff]  ;;  %v7767_v18 = vor.u32 %v8810_v2, %v7764_v35 }
 0x46b   :  { %5473 = vmatmul.bf16.gmra.mxu1 %v8495_v25  ;;  %5691 = vmatmul.bf16.vlgmr.msra.gmra.mxu3 %v7735_v60  ;;  %v8824_v25 = vld [vmem:[#allocation3 + $0xc4] sm:$0xf] }
 0x46c   :  { %v2586_v10 = vunpack.c.l.bf16 %v1178_v33  ;;  %5602 = vmatmul.bf16.gmra.mxu2 %v8243_v55  ;;  %5025 = vmatmul.bf16.gmra.mxu0 %v7783_v7  ;;  %v2715_v28 = vunpack.c.l.bf16 %v2379_v12  ;;  %v7812_v60 = vld [vmem:[#allocation3 + $0xe0] sm:$0xf0]  ;;  %v2388_v55 = vperm.slane %v12405_v24, %v9522_v20  ;;  %v8527_v7 = vor.u32 %v9001_v53, %v8524_v47  ;;  %v12408_v53 = vld [vmem:[#allocation99_spill] sm:$0xff] }
 0x46d   :  { %v7815_v62 = vor.u32 %v8824_v25, %v7812_v60  ;;  %v8556_v24 = vld [vmem:[#allocation3 + $0x6a8] sm:$0xf0] }
 0x46e   :  { %v2842_v27 = vadd.f32 %v2714_v30, %v2586_v10  ;;  %v5305_v31 = vpop.f32.mrf.mxu3 }
 0x46f   :  { %v11111_v21 = vadd.f32 %v5305_v31, %v5137_v13  ;;  %v11113_v37 = vpop.f32.mrf.mxu2 }
 0x470   :  { %12403 = vst [vmem:[#allocation82_spill] sm:$0xff] %v11113_v37  ;;  %v5436_v11 = vpop.f32.mrf.mxu1  ;;  %v3226_v33 = vmax.f32 %v2842_v27, 0.0 }
 0x471   :  { %v11118_v44 = vadd.f32 %v5436_v11, %v10918_v40  ;;  %v1034_v61 = vpop.f32.mrf.mxu0  ;;  %v2716_v11 = vunpack.c.l.bf16 %v2388_v55 }
 0x472   :  { %v1179_v45 = vpack.c.bf16 %v1034_v61, %v1034_v61 }
 0x474   :  { %v2587_v26 = vunpack.c.l.bf16 %v1179_v45  ;;  %v12407_v45 = vld [vmem:[#allocation35_spill] sm:$0xff] }
 0x475   :  { %v5142_v27 = vadd.f32 %v12408_v53, %v12407_v45 }
 0x476   :  { %v2843_v63 = vadd.f32 %v2715_v28, %v2587_v26  ;;  %v11120_v42 = vpop.f32.mrf.mxu3 }
 0x477   :  { %v11124_v40 = vpop.f32.mrf.mxu2 }
 0x478   :  { %12406 = vst [vmem:[#allocation23_spill] sm:$0xff] %v11124_v40  ;;  %v3227_v30 = vmax.f32 %v2843_v63, 0.0  ;;  %v5439_v10 = vpop.f32.mrf.mxu1  ;;  %v9009_v63 = vld [vmem:[#allocation3 + $0x68c] sm:$0xf] }
 0x479   :  { %v11127_v13 = vadd.f32 %v5439_v10, %v10933_v43  ;;  %v1037_v31 = vpop.f32.mrf.mxu0  ;;  %v12410_v43 = vld [vmem:[#allocation119_spill] sm:$0xff]  ;;  %v8950_v10 = vld [vmem:[#allocation3 + $0x4ac] sm:$0xf0]  ;;  %v8559_v45 = vor.u32 %v9009_v63, %v8556_v24 }
 0x47a   :  { %v1180_v51 = vpack.c.bf16 %v1037_v31, %v1037_v31  ;;  %v11129_v12 = vpack.c.bf16 %v3227_v30, %v3226_v33  ;;  %v2397_v2 = vperm.slane %v12410_v43, %v9522_v20  ;;  %v8818_v33 = vld [vmem:[#allocation3 + $0x94] sm:$0xf]  ;;  %v12413_v63 = vld [vmem:[#allocation39_spill] sm:$0xff] }
 0x47b   :  { %5478 = vmatmul.bf16.gmra.mxu1 %v8527_v7  ;;  %5696 = vmatmul.bf16.gmra.mxu3 %v7767_v18  ;;  %v8306_v18 = vld [vmem:[#allocation3 + $0x490] sm:$0xf]  ;;  %v7796_v30 = vld [vmem:[#allocation3 + $0xb0] sm:$0xf0] }
 0x47c   :  { %v2588_v61 = vunpack.c.l.bf16 %v1180_v51  ;;  %5607 = vmatmul.bf16.gmra.mxu2 %v8275_v14  ;;  %5030 = vmatmul.bf16.gmra.mxu0 %v7815_v62  ;;  %v2717_v55 = vunpack.c.l.bf16 %v2397_v2  ;;  %v8832_v14 = vld [vmem:[#allocation3 + $0x104] sm:$0xf]  ;;  %v7799_v53 = vor.u32 %v8818_v33, %v7796_v30  ;;  %v8307_v2 = vor.u32 %v8950_v10, %v8306_v18  ;;  %v12414_v24 = vld [vmem:[#allocation108_spill] sm:$0xff] }
 0x47d   :  { %v7844_v62 = vld [vmem:[#allocation3 + $0x120] sm:$0xf0] }
 0x47e   :  { %v2844_v47 = vadd.f32 %v2716_v11, %v2588_v61  ;;  %v5310_v28 = vpop.f32.mrf.mxu3  ;;  %v12411_v11 = vld [vmem:[#allocation76_spill] sm:$0xff] }
 0x47f   :  { %v11133_v26 = vadd.f32 %v5310_v28, %v5142_v27  ;;  %v11135_v22 = vpop.f32.mrf.mxu2  ;;  %v2406_v61 = vperm.slane %v12411_v11, %v9522_v20 }
 0x480   :  { %12409 = vst [vmem:[#allocation84_spill] sm:$0xff] %v11135_v22  ;;  %v5441_v35 = vpop.f32.mrf.mxu1  ;;  %v3228_v27 = vmax.f32 %v2844_v47, 0.0  ;;  %v5147_v47 = vadd.f32 %v12414_v24, %v12413_v63 }
 0x481   :  { %v11140_v52 = vadd.f32 %v5441_v35, %v10943_v36  ;;  %v1039_v25 = vpop.f32.mrf.mxu0  ;;  %v7847_v35 = vor.u32 %v8832_v14, %v7844_v62 }
 0x482   :  { %v1181_v60 = vpack.c.bf16 %v1039_v25, %v1039_v25 }
 0x484   :  { %v2589_v7 = vunpack.c.l.bf16 %v1181_v60 }
 0x486   :  { %v2845_v31 = vadd.f32 %v2717_v55, %v2589_v7  ;;  %v11142_v51 = vpop.f32.mrf.mxu3  ;;  %v2718_v7 = vunpack.c.l.bf16 %v2406_v61 }
 0x487   :  { %v11146_v36 = vpop.f32.mrf.mxu2 }
 0x488   :  { %12412 = vst [vmem:[#allocation135_spill] sm:$0xff] %v11146_v36  ;;  %v3229_v28 = vmax.f32 %v2845_v31, 0.0  ;;  %v5444_v43 = vpop.f32.mrf.mxu1 }
 0x489   :  { %v11149_v25 = vadd.f32 %v5444_v43, %v10959_v9  ;;  %v1042_v60 = vpop.f32.mrf.mxu0  ;;  %v12416_v9 = vld [vmem:[#allocation110_spill] sm:$0xff]  ;;  %v8338_v43 = vld [vmem:[#allocation3 + $0x4d0] sm:$0xf] }
 0x48a   :  { %v1182_v38 = vpack.c.bf16 %v1042_v60, %v1042_v60  ;;  %v11151_v55 = vpack.c.bf16 %v3229_v28, %v3228_v27  ;;  %v2415_v14 = vperm.slane %v12416_v9, %v9522_v20  ;;  %v8958_v60 = vld [vmem:[#allocation3 + $0x4ec] sm:$0xf0] }
 0x48b   :  { %5483 = vmatmul.bf16.gmra.mxu1 %v8559_v45  ;;  %5701 = vmatmul.bf16.gmra.mxu3 %v7799_v53  ;;  %v9017_v45 = vld [vmem:[#allocation3 + $0x6cc] sm:$0xf]  ;;  %v8339_v39 = vor.u32 %v8958_v60, %v8338_v43 }
 0x48c   :  { %v2590_v11 = vunpack.c.l.bf16 %v1182_v38  ;;  %5612 = vmatmul.bf16.gmra.mxu2 %v8307_v2  ;;  %5035 = vmatmul.bf16.gmra.mxu0 %v7847_v35  ;;  %v8588_v53 = vld [vmem:[#allocation3 + $0x6e8] sm:$0xf0]  ;;  %v2719_v27 = vunpack.c.l.bf16 %v2415_v14  ;;  %v8826_v2 = vld [vmem:[#allocation3 + $0xd4] sm:$0xf] }
 0x48d   :  { %v7828_v35 = vld [vmem:[#allocation3 + $0xf0] sm:$0xf0] }
 0x48e   :  { %v2846_v33 = vadd.f32 %v2718_v7, %v2590_v11  ;;  %v5315_v30 = vpop.f32.mrf.mxu3  ;;  %v8840_v7 = vld [vmem:[#allocation3 + $0x144] sm:$0xf] }
 0x48f   :  { %v11155_v18 = vadd.f32 %v5315_v30, %v5147_v47  ;;  %v11157_v10 = vpop.f32.mrf.mxu2  ;;  %v7876_v11 = vld [vmem:[#allocation3 + $0x160] sm:$0xf0]  ;;  %v8591_v30 = vor.u32 %v9017_v45, %v8588_v53 }
 0x490   :  { %12415 = vst [vmem:[#allocation27_spill] sm:$0xff] %v11157_v10  ;;  %v5446_v62 = vpop.f32.mrf.mxu1  ;;  %v3230_v9 = vmax.f32 %v2846_v33, 0.0  ;;  %v7879_v49 = vor.u32 %v8840_v7, %v7876_v11  ;;  %v12420_v33 = vld [vmem:[#allocation69_spill] sm:$0xff] }
 0x491   :  { %v11162_v31 = vadd.f32 %v5446_v62, %v10969_v3  ;;  %v1044_v61 = vpop.f32.mrf.mxu0  ;;  %v7831_v3 = vor.u32 %v8826_v2, %v7828_v35  ;;  %v2424_v53 = vperm.slane %v12420_v33, %v9522_v20  ;;  %v8966_v33 = vld [vmem:[#allocation3 + $0x52c] sm:$0xf0] }
 0x492   :  { %v1183_v38 = vpack.c.bf16 %v1044_v61, %v1044_v61 }
 0x494   :  { %v2591_v28 = vunpack.c.l.bf16 %v1183_v38 }
 0x496   :  { %v2847_v63 = vadd.f32 %v2719_v27, %v2591_v28  ;;  %v11164_v24 = vpop.f32.mrf.mxu3  ;;  %v12418_v28 = vld [vmem:[#allocation44_spill] sm:$0xff] }
 0x497   :  { %v11166_v47 = vpop.f32.mrf.mxu2 }
 0x498   :  { %12417 = vst [vmem:[#allocation89_spill] sm:$0xff] %v11166_v47  ;;  %v3231_v62 = vmax.f32 %v2847_v63, 0.0  ;;  %v5449_v61 = vpop.f32.mrf.mxu1  ;;  %v12419_v47 = vld [vmem:[#allocation116_spill] sm:$0xff] }
 0x499   :  { %v11169_v14 = vadd.f32 %v5449_v61, %v10983_v41  ;;  %v1047_v38 = vpop.f32.mrf.mxu0  ;;  %v5152_v45 = vadd.f32 %v12419_v47, %v12418_v28  ;;  %v12422_v41 = vld [vmem:[#allocation102_spill] sm:$0xff]  ;;  %v9025_v47 = vld [vmem:[#allocation3 + $0x70c] sm:$0xf]  ;;  %v8834_v28 = vld [vmem:[#allocation3 + $0x114] sm:$0xf] }
 0x49a   :  { %v11171_v32 = vpack.c.bf16 %v3231_v62, %v3230_v9  ;;  %v1184_v27 = vpack.c.bf16 %v1047_v38, %v1047_v38  ;;  %v2433_v60 = vperm.slane %v12422_v41, %v9522_v20  ;;  %v8370_v38 = vld [vmem:[#allocation3 + $0x510] sm:$0xf] }
 0x49b   :  { %5488 = vmatmul.bf16.gmra.mxu1 %v8591_v30  ;;  %5706 = vmatmul.bf16.gmra.mxu3 %v7831_v3  ;;  %v8620_v3 = vld [vmem:[#allocation3 + $0x728] sm:$0xf0]  ;;  %v8371_v36 = vor.u32 %v8966_v33, %v8370_v38  ;;  %v12428_v38 = vld [vmem:[#allocation64_spill] sm:$0xff] }
 0x49c   :  { %5617 = vmatmul.bf16.gmra.mxu2 %v8339_v39  ;;  %5040 = vmatmul.bf16.gmra.mxu0 %v7879_v49  ;;  %v2592_v7 = vunpack.c.l.bf16 %v1184_v27  ;;  %v2720_v39 = vunpack.c.l.bf16 %v2424_v53  ;;  %v2721_v9 = vunpack.c.l.bf16 %v2433_v60 }
 0x49e   :  { %v5320_v2 = vpop.f32.mrf.mxu3  ;;  %v2848_v62 = vadd.f32 %v2720_v39, %v2592_v7 }
 0x49f   :  { %v11177_v43 = vadd.f32 %v5320_v2, %v5152_v45  ;;  %v11179_v35 = vpop.f32.mrf.mxu2  ;;  %v7860_v45 = vld [vmem:[#allocation3 + $0x130] sm:$0xf0]  ;;  %v8848_v2 = vld [vmem:[#allocation3 + $0x184] sm:$0xf] }
 0x4a0   :  { %12421 = vst [vmem:[#allocation136_spill] sm:$0xff] %v11179_v35  ;;  %v5451_v11 = vpop.f32.mrf.mxu1  ;;  %v7908_v35 = vld [vmem:[#allocation3 + $0x1a0] sm:$0xf0]  ;;  %v3232_v53 = vmax.f32 %v2848_v62, 0.0  ;;  %v12427_v62 = vld [vmem:[#allocation125_spill] sm:$0xff] }
 0x4a1   :  { %v11184_v63 = vadd.f32 %v5451_v11, %v10993_v1  ;;  %v1049_v49 = vpop.f32.mrf.mxu0  ;;  %v8623_v1 = vor.u32 %v9025_v47, %v8620_v3  ;;  %v7863_v11 = vor.u32 %v8834_v28, %v7860_v45  ;;  %v7911_v60 = vor.u32 %v8848_v2, %v7908_v35  ;;  %v12426_v3 = vld [vmem:[#allocation48_spill] sm:$0xff] }
 0x4a2   :  { %v1185_v30 = vpack.c.bf16 %v1049_v49, %v1049_v49  ;;  %v5157_v28 = vadd.f32 %v12427_v62, %v12426_v3  ;;  %v2442_v35 = vperm.slane %v12428_v38, %v9522_v20  ;;  %v12430_v2 = vld [vmem:[#allocation96_spill] sm:$0xff] }
 0x4a3   :  { %v8974_v38 = vld [vmem:[#allocation3 + $0x56c] sm:$0xf0] }
 0x4a4   :  { %v2593_v61 = vunpack.c.l.bf16 %v1185_v30 }
 0x4a6   :  { %v2849_v41 = vadd.f32 %v2721_v9, %v2593_v61  ;;  %v11186_v27 = vpop.f32.mrf.mxu3  ;;  %v12424_v61 = vld [vmem:[#allocation17_spill] sm:$0xff] }
 0x4a7   :  { %v11188_v48 = vpop.f32.mrf.mxu2 }
 0x4a8   :  { %12423 = vst [vmem:[#allocation90_spill] sm:$0xff] %v11188_v48  ;;  %v3233_v49 = vmax.f32 %v2849_v41, 0.0  ;;  %v5454_v10 = vpop.f32.mrf.mxu1  ;;  %v12425_v48 = vld [vmem:[#allocation75_spill] sm:$0xff] }
 0x4a9   :  { %v11191_v7 = vadd.f32 %v5454_v10, %v11005_v29  ;;  %v1052_v39 = vpop.f32.mrf.mxu0  ;;  %v5119_v47 = vadd.f32 %v12425_v48, %v12424_v61 }
 0x4aa   :  { %v11193_v30 = vpack.c.bf16 %v3233_v49, %v3232_v53  ;;  %v1186_v9 = vpack.c.bf16 %v1052_v39, %v1052_v39  ;;  %v2722_v53 = vunpack.c.l.bf16 %v2442_v35  ;;  %v8652_v39 = vld [vmem:[#allocation3 + $0x768] sm:$0xf0] }
 0x4ab   :  { %5493 = vmatmul.bf16.gmra.mxu1 %v8623_v1  ;;  %5711 = vmatmul.bf16.gmra.mxu3 %v7863_v11  ;;  %v5288_v29 = vadd.f32 %v11011_v15, %v5119_v47  ;;  %v8402_v15 = vld [vmem:[#allocation3 + $0x550] sm:$0xf]  ;;  %v8842_v47 = vld [vmem:[#allocation3 + $0x154] sm:$0xf] }
 0x4ac   :  { %5622 = vmatmul.bf16.gmra.mxu2 %v8371_v36  ;;  %5045 = vmatmul.bf16.gmra.mxu0 %v7911_v60  ;;  %v2451_v36 = vperm.slane %v12430_v2, %v9522_v20  ;;  %v2594_v41 = vunpack.c.l.bf16 %v1186_v9  ;;  %v9033_v60 = vld [vmem:[#allocation3 + $0x74c] sm:$0xf]  ;;  %v8403_v37 = vor.u32 %v8974_v38, %v8402_v15 }
 0x4ae   :  { %v5325_v45 = vpop.f32.mrf.mxu3  ;;  %v2723_v61 = vunpack.c.l.bf16 %v2451_v36  ;;  %v2850_v3 = vadd.f32 %v2722_v53, %v2594_v41 }
 0x4af   :  { %v11202_v10 = vadd.f32 %v5325_v45, %v5157_v28  ;;  %v11204_v33 = vpop.f32.mrf.mxu2  ;;  %v7892_v28 = vld [vmem:[#allocation3 + $0x170] sm:$0xf0]  ;;  %v8856_v45 = vld [vmem:[#allocation3 + $0x1c4] sm:$0xf] }
 0x4b0   :  { %12429 = vst [vmem:[#allocation31_spill] sm:$0xff] %v11204_v33  ;;  %v5456_v1 = vpop.f32.mrf.mxu1  ;;  %v7940_v33 = vld [vmem:[#allocation3 + $0x1e0] sm:$0xf0]  ;;  %v3234_v35 = vmax.f32 %v2850_v3, 0.0 }
 0x4b1   :  { %v11208_v11 = vadd.f32 %v5456_v1, %v5288_v29  ;;  %v1054_v48 = vpop.f32.mrf.mxu0  ;;  %v8655_v29 = vor.u32 %v9033_v60, %v8652_v39  ;;  %v7895_v1 = vor.u32 %v8842_v47, %v7892_v28  ;;  %v7943_v36 = vor.u32 %v8856_v45, %v7940_v33  ;;  %v12436_v60 = vld [vmem:[#allocation53_spill] sm:$0xff]  ;;  %v12437_v39 = vld [vmem:[#allocation132_spill] sm:$0xff] }
 0x4b2   :  { %v1187_v49 = vpack.c.bf16 %v1054_v48, %v1054_v48  ;;  %v5162_v3 = vadd.f32 %v12437_v39, %v12436_v60  ;;  %v12440_v28 = vld [vmem:[#allocation88_spill] sm:$0xff] }
 0x4b3   :  { %12431 = vst [vmem:[#allocation94_spill] sm:$0xff] %v11208_v11  ;;  %v7924_v39 = vld [vmem:[#allocation3 + $0x1b0] sm:$0xf0] }
 0x4b4   :  { %v2595_v62 = vunpack.c.l.bf16 %v1187_v49 }
 0x4b6   :  { %v2851_v22 = vadd.f32 %v2723_v61, %v2595_v62  ;;  %v11210_v2 = vpop.f32.mrf.mxu3  ;;  %v12434_v61 = vld [vmem:[#allocation21_spill] sm:$0xff]  ;;  %v12435_v62 = vld [vmem:[#allocation80_spill] sm:$0xff] }
 0x4b7   :  { %v11212_v9 = vpop.f32.mrf.mxu2 }
 0x4b8   :  { %12432 = vst [vmem:[#allocation127_spill] sm:$0xff] %v11212_v9  ;;  %v3235_v48 = vmax.f32 %v2851_v22, 0.0  ;;  %v5459_v40 = vpop.f32.mrf.mxu1  ;;  %v5124_v9 = vadd.f32 %v12435_v62, %v12434_v61  ;;  %v12438_v22 = vld [vmem:[#allocation60_spill] sm:$0xff] }
 0x4b9   :  { %v11215_v41 = vadd.f32 %v5459_v40, %v11029_v46  ;;  %v1057_v53 = vpop.f32.mrf.mxu0  ;;  %v2460_v15 = vperm.slane %v12438_v22, %v9522_v20  ;;  %v8864_v22 = vld [vmem:[#allocation3 + $0x204] sm:$0xf] }
 0x4ba   :  { %v3300_v49 = vpack.c.bf16 %v3235_v48, %v3234_v35  ;;  %v1188_v11 = vpack.c.bf16 %v1057_v53, %v1057_v53  ;;  %v5293_v46 = vadd.f32 %v11053_v6, %v5124_v9  ;;  %v8684_v53 = vld [vmem:[#allocation3 + $0x7a8] sm:$0xf0]  ;;  %v8434_v6 = vld [vmem:[#allocation3 + $0x590] sm:$0xf]  ;;  %v8850_v9 = vld [vmem:[#allocation3 + $0x194] sm:$0xf] }
 0x4bb   :  { %12433 = vst [vmem:[#allocation83_spill] sm:$0xff] %v11215_v41  ;;  %5498 = vmatmul.bf16.gmra.mxu1 %v8655_v29  ;;  %5716 = vmatmul.bf16.gmra.mxu3 %v7895_v1  ;;  %v2724_v35 = vunpack.c.l.bf16 %v2460_v15 }
 0x4bc   :  { %5627 = vmatmul.bf16.gmra.mxu2 %v8403_v37  ;;  %5050 = vmatmul.bf16.gmra.mxu0 %v7943_v36  ;;  %v2469_v37 = vperm.slane %v12440_v28, %v9522_v20  ;;  %v2596_v38 = vunpack.c.l.bf16 %v1188_v11  ;;  %v9041_v36 = vld [vmem:[#allocation3 + $0x78c] sm:$0xf] }
 0x4be   :  { %v5330_v33 = vpop.f32.mrf.mxu3  ;;  %v2725_v61 = vunpack.c.l.bf16 %v2469_v37  ;;  %v2852_v62 = vadd.f32 %v2724_v35, %v2596_v38 }
 0x4bf   :  { %v11224_v40 = vadd.f32 %v5330_v33, %v5162_v3  ;;  %v11226_v47 = vpop.f32.mrf.mxu2  ;;  %v8982_v3 = vld [vmem:[#allocation3 + $0x5ac] sm:$0xf0]  ;;  %v7972_v33 = vld [vmem:[#allocation3 + $0x220] sm:$0xf0] }
 0x4c0   :  { %12439 = vst [vmem:[#allocation35_spill] sm:$0xff] %v11226_v47  ;;  %v5461_v45 = vpop.f32.mrf.mxu1  ;;  %v3236_v15 = vmax.f32 %v2852_v62, 0.0  ;;  %v7975_v37 = vor.u32 %v8864_v22, %v7972_v33  ;;  %v8466_v22 = vld [vmem:[#allocation3 + $0x5d0] sm:$0xf]  ;;  %v8858_v33 = vld [vmem:[#allocation3 + $0x1d4] sm:$0xf] }
 0x4c1   :  { %v11230_v29 = vadd.f32 %v5461_v45, %v5293_v46  ;;  %v1059_v1 = vpop.f32.mrf.mxu0  ;;  %v8687_v46 = vor.u32 %v9041_v36, %v8684_v53  ;;  %v7927_v45 = vor.u32 %v8850_v9, %v7924_v39  ;;  %v9049_v39 = vld [vmem:[#allocation3 + $0x7cc] sm:$0xf] }
 0x4c2   :  { %v1189_v48 = vpack.c.bf16 %v1059_v1, %v1059_v1 }
 0x4c3   :  { %12441 = vst [vmem:[#allocation99_spill] sm:$0xff] %v11230_v29  ;;  %v8435_v29 = vor.u32 %v8982_v3, %v8434_v6  ;;  %v8716_v3 = vld [vmem:[#allocation3 + $0x7e8] sm:$0xf0] }
 0x4c4   :  { %v2597_v60 = vunpack.c.l.bf16 %v1189_v48 }
 0x4c6   :  { %v2853_v47 = vadd.f32 %v2725_v61, %v2597_v60  ;;  %v11232_v28 = vpop.f32.mrf.mxu3  ;;  %v12443_v61 = vld [vmem:[#allocation25_spill] sm:$0xff]  ;;  %v12444_v60 = vld [vmem:[#allocation86_spill] sm:$0xff] }
 0x4c7   :  { %v11234_v11 = vpop.f32.mrf.mxu2  ;;  %v5129_v41 = vadd.f32 %v12444_v60, %v12443_v61  ;;  %v12446_v60 = vld [vmem:[#allocation29_spill] sm:$0xff] }
 0x4c8   :  { %12442 = vst [vmem:[#allocation119_spill] sm:$0xff] %v11234_v11  ;;  %v3237_v1 = vmax.f32 %v2853_v47, 0.0  ;;  %v5464_v20 = vpop.f32.mrf.mxu1  ;;  %v12445_v11 = vld [vmem:[#allocation57_spill] sm:$0xff] }
 0x4c9   :  { %v11237_v38 = vadd.f32 %v5464_v20, %v11064_v34  ;;  %v5016_v35 = vpop.f32.mrf.mxu0  ;;  %v5167_v36 = vadd.f32 %v10849_v57, %v12445_v11  ;;  %v5298_v53 = vadd.f32 %v11072_v16, %v5129_v41  ;;  %v7956_v57 = vld [vmem:[#allocation3 + $0x1f0] sm:$0xf0]  ;;  %v8990_v11 = vld [vmem:[#allocation3 + $0x5ec] sm:$0xf0]  ;;  %v8872_v16 = vld [vmem:[#allocation3 + $0x244] sm:$0xf] }
 0x4ca   :  { %v3301_v48 = vpack.c.bf16 %v3237_v1, %v3236_v15  ;;  %v8004_v41 = vld [vmem:[#allocation3 + $0x260] sm:$0xf0]  ;;  %v7959_v15 = vor.u32 %v8858_v33, %v7956_v57 }
 0x4cb   :  { %5503 = vmatmul.bf16.gmra.mxu1 %v8687_v46  ;;  %5721 = vmatmul.bf16.gmra.mxu3 %v7927_v45 }
 0x4cc   :  { %5632 = vmatmul.bf16.gmra.mxu2 %v8435_v29  ;;  %5055 = vmatmul.bf16.gmra.mxu0 %v7975_v37  ;;  %v8467_v37 = vor.u32 %v8990_v11, %v8466_v22  ;;  %v12450_v22 = vld [vmem:[#allocation7_spill] sm:$0xff] }
 0x4cd   :  { %6021 = vmatpush.bf16.msra.mxu2 %v3301_v48  ;;  %v8007_v48 = vor.u32 %v8872_v16, %v8004_v41  ;;  %v5017_v33 = vadd.f32 %v5016_v35, %v12450_v22  ;;  %v8866_v16 = vld [vmem:[#allocation3 + $0x214] sm:$0xf]  ;;  %v7738_v41 = vld [vmem:[#allocation3 + $0x18] sm:$0xf] }
 0x4ce   :  { %v5335_v47 = vpop.f32.mrf.mxu3  ;;  %v12455_v22 = vld [vmem:[#allocation33_spill] sm:$0xff] }
 0x4cf   :  { %v11244_v62 = vadd.f32 %v5335_v47, %v5167_v36  ;;  %v5593_v20 = vpop.f32.mrf.mxu2  ;;  %v12447_v36 = vld [vmem:[#allocation92_spill] sm:$0xff] }
 0x4d0   :  { %v11247_v34 = vadd.f32 %v5593_v20, %v11060_v4  ;;  %v5466_v6 = vpop.f32.mrf.mxu1  ;;  %v8719_v4 = vor.u32 %v9049_v39, %v8716_v3  ;;  %v5134_v47 = vadd.f32 %v12447_v36, %v12446_v60 }
 0x4d1   :  { %v11249_v9 = vadd.f32 %v5466_v6, %v5298_v53  ;;  %6022 = vmatpush.bf16.msra.mxu2 %v3300_v49  ;;  %v5018_v29 = vpop.f32.mrf.mxu0  ;;  %v12448_v53 = vld [vmem:[#allocation59_spill] sm:$0xff] }
 0x4d2   :  { %v5303_v6 = vadd.f32 %v11097_v8, %v5134_v47  ;;  %v12451_v8 = vld [vmem:[#allocation62_spill] sm:$0xff] }
 0x4d5   :  { %6023 = vmatpush.bf16.msra.mxu2 %v11193_v30 }
 0x4d6   :  { %v11252_v46 = vpop.f32.mrf.mxu3 }
 0x4d7   :  { %v5595_v45 = vpop.f32.mrf.mxu2 }
 0x4d8   :  { %v11255_v1 = vadd.f32 %v5595_v45, %v11070_v23  ;;  %v5469_v49 = vpop.f32.mrf.mxu1  ;;  %v5172_v23 = vadd.f32 %v10878_v19, %v12448_v53  ;;  %v8498_v19 = vld [vmem:[#allocation3 + $0x610] sm:$0xf]  ;;  %v8807_v45 = vld [vmem:[#allocation3 + $0x34] sm:$0xf0] }
 0x4d9   :  { %v11258_v61 = vadd.f32 %v5469_v49, %v11086_v56  ;;  %6024 = vmatpush.bf16.msra.mxu2 %v11171_v32  ;;  %v5021_v30 = vpop.f32.mrf.mxu0  ;;  %v8036_v49 = vld [vmem:[#allocation3 + $0x2a0] sm:$0xf0]  ;;  %v7739_v60 = vor.u32 %v8807_v45, %v7738_v41 }
 0x4db   :  { %5508 = vmatmul.bf16.gmra.mxu1 %v8719_v4  ;;  %5726 = vmatmul.bf16.gmra.mxu3 %v7959_v15  ;;  %v5186_v4 = vadd.f32 %v12451_v8, %v5017_v33  ;;  %v8998_v15 = vld [vmem:[#allocation3 + $0x62c] sm:$0xf0] }
 0x4dc   :  { %5637 = vmatmul.bf16.gmra.mxu2 %v8467_v37  ;;  %5060 = vmatmul.bf16.gmra.mxu0 %v8007_v48  ;;  %v8499_v47 = vor.u32 %v8998_v15, %v8498_v19 }
 0x4dd   :  { %6025 = vmatpush.bf16.msra.mxu2 %v11151_v55  ;;  %v7988_v55 = vld [vmem:[#allocation3 + $0x230] sm:$0xf0] }
 0x4de   :  { %v5340_v20 = vpop.f32.mrf.mxu3  ;;  %v7991_v48 = vor.u32 %v8866_v16, %v7988_v55  ;;  %v12457_v16 = vld [vmem:[#allocation65_spill] sm:$0xff] }
 0x4df   :  { %v11267_v56 = vadd.f32 %v5340_v20, %v5172_v23  ;;  %v5598_v39 = vpop.f32.mrf.mxu2  ;;  %v12453_v23 = vld [vmem:[#allocation8_spill] sm:$0xff] }
 0x4e0   :  { %v11270_v32 = vadd.f32 %v5598_v39, %v11079_v54  ;;  %v5471_v3 = vpop.f32.mrf.mxu1  ;;  %v8880_v54 = vld [vmem:[#allocation3 + $0x284] sm:$0xf]  ;;  %v5019_v20 = vadd.f32 %v5018_v29, %v12453_v23  ;;  %v12454_v39 = vld [vmem:[#allocation101_spill] sm:$0xff] }
 0x4e1   :  { %v11273_v57 = vadd.f32 %v5471_v3, %v5303_v6  ;;  %6026 = vmatpush.bf16.msra.mxu2 %v11129_v12  ;;  %v5023_v11 = vpop.f32.mrf.mxu0  ;;  %v8039_v53 = vor.u32 %v8880_v54, %v8036_v49  ;;  %v5355_v3 = vadd.f32 %v12454_v39, %v5186_v4  ;;  %v12459_v4 = vld [vmem:[#allocation9_spill] sm:$0xff]  ;;  %v8888_v39 = vld [vmem:[#allocation3 + $0x2c4] sm:$0xf] }
 0x4e2   :  { %12449 = vst [vmem:[#allocation76_spill] sm:$0xff] %v11270_v32  ;;  %v5188_v19 = vadd.f32 %v12457_v16, %v5019_v20  ;;  %v5022_v15 = vadd.f32 %v5021_v30, %v12459_v4 }
 0x4e3   :  { %v5524_v55 = vadd.f32 %v10910_v59, %v5355_v3  ;;  %v8874_v59 = vld [vmem:[#allocation3 + $0x254] sm:$0xf]  ;;  %v8068_v3 = vld [vmem:[#allocation3 + $0x2e0] sm:$0xf0] }
 0x4e5   :  { %6027 = vmatpush.bf16.msra.mxu2 %v11107_v5 }
 0x4e6   :  { %v11278_v37 = vpop.f32.mrf.mxu3 }
 0x4e7   :  { %v5600_v35 = vpop.f32.mrf.mxu2 }
 0x4e8   :  { %v11281_v12 = vadd.f32 %v5600_v35, %v11093_v17  ;;  %v5474_v36 = vpop.f32.mrf.mxu1  ;;  %v12456_v17 = vld [vmem:[#allocation97_spill] sm:$0xff] }
 0x4e9   :  { %v11285_v6 = vadd.f32 %v5474_v36, %v11111_v21  ;;  %6028 = vmatpush.bf16.msra.mxu2 %v11081_v50  ;;  %v5026_v5 = vpop.f32.mrf.mxu0  ;;  %v5139_v33 = vadd.f32 %v12456_v17, %v12455_v22  ;;  %v12460_v35 = vld [vmem:[#allocation105_spill] sm:$0xff]  ;;  %v8020_v36 = vld [vmem:[#allocation3 + $0x270] sm:$0xf0] }
 0x4ea   :  { %12452 = vst [vmem:[#allocation39_spill] sm:$0xff] %v11281_v12 }
 0x4eb   :  { %5731 = vmatmul.bf16.gmra.mxu3 %v7991_v48  ;;  %5860 = vmatmul.bf16.vlgmr.msra.gmra.mxu1 %v7739_v60  ;;  %v5308_v21 = vadd.f32 %v11120_v42, %v5139_v33  ;;  %v5357_v48 = vadd.f32 %v12460_v35, %v5188_v19  ;;  %v8530_v60 = vld [vmem:[#allocation3 + $0x650] sm:$0xf]  ;;  %v8815_v42 = vld [vmem:[#allocation3 + $0x74] sm:$0xf0]  ;;  %v8023_v33 = vor.u32 %v8874_v59, %v8020_v36 }
 0x4ec   :  { %5642 = vmatmul.bf16.gmra.mxu2 %v8499_v47  ;;  %5065 = vmatmul.bf16.gmra.mxu0 %v8039_v53  ;;  %v7770_v47 = vld [vmem:[#allocation3 + $0x58] sm:$0xf]  ;;  %v12461_v53 = vld [vmem:[#allocation66_spill] sm:$0xff]  ;;  %v12466_v59 = vld [vmem:[#allocation104_spill] sm:$0xff] }
 0x4ed   :  { %v5191_v23 = vadd.f32 %v12461_v53, %v5022_v15  ;;  %v5526_v20 = vadd.f32 %v10920_v58, %v5357_v48  ;;  %v7771_v16 = vor.u32 %v8815_v42, %v7770_v47  ;;  %v12464_v15 = vld [vmem:[#allocation107_spill] sm:$0xff]  ;;  %v12465_v48 = vld [vmem:[#allocation37_spill] sm:$0xff] }
 0x4ee   :  { %v5692_v29 = vpop.f32.mrf.mxu3  ;;  %v5144_v36 = vadd.f32 %v12466_v59, %v12465_v48  ;;  %v12468_v42 = vld [vmem:[#allocation151_spill] sm:$0xff]  ;;  %v8896_v59 = vld [vmem:[#allocation3 + $0x304] sm:$0xf] }
 0x4ef   :  { %v5603_v41 = vpop.f32.mrf.mxu2  ;;  %v11294_v45 = vadd.f32 %v5692_v29, %v5524_v55  ;;  %v5360_v35 = vadd.f32 %v12464_v15, %v5191_v23 }
 0x4f0   :  { %v11297_v50 = vadd.f32 %v5603_v41, %v11104_v0  ;;  %v5476_v8 = vpop.f32.mrf.mxu1  ;;  %v9006_v0 = vld [vmem:[#allocation3 + $0x66c] sm:$0xf0]  ;;  %v12463_v41 = vld [vmem:[#allocation10_spill] sm:$0xff] }
 0x4f1   :  { %v11300_v54 = vadd.f32 %v5476_v8, %v5308_v21  ;;  %v11302_v49 = vpop.f32.mrf.mxu0  ;;  %v8531_v29 = vor.u32 %v9006_v0, %v8530_v60  ;;  %v8071_v21 = vor.u32 %v8888_v39, %v8068_v3  ;;  %v5024_v8 = vadd.f32 %v5023_v11, %v12463_v41  ;;  %v12470_v39 = vld [vmem:[#allocation12_spill] sm:$0xff]  ;;  %v7802_v41 = vld [vmem:[#allocation3 + $0x98] sm:$0xf] }
 0x4f2   :  { %12458 = vst [vmem:[#allocation108_spill] sm:$0xff] %v11297_v50  ;;  %v5529_v60 = vadd.f32 %v12468_v42, %v5360_v35  ;;  %v5313_v11 = vadd.f32 %v11142_v51, %v5144_v36  ;;  %v5027_v3 = vadd.f32 %v5026_v5, %v12470_v39  ;;  %v8823_v51 = vld [vmem:[#allocation3 + $0xb4] sm:$0xf0]  ;;  %v8100_v36 = vld [vmem:[#allocation3 + $0x320] sm:$0xf0] }
 0x4f3   :  { %v12473_v35 = vld [vmem:[#allocation153_spill] sm:$0xff] }
 0x4f6   :  { %v5694_v22 = vpop.f32.mrf.mxu3 }
 0x4f7   :  { %v5605_v30 = vpop.f32.mrf.mxu2  ;;  %v11307_v17 = vadd.f32 %v5694_v22, %v5526_v20 }
 0x4f8   :  { %v11310_v19 = vadd.f32 %v5605_v30, %v11118_v44  ;;  %v5479_v55 = vpop.f32.mrf.mxu1  ;;  %v12467_v44 = vld [vmem:[#allocation67_spill] sm:$0xff] }
 0x4f9   :  { %v11314_v4 = vadd.f32 %v5479_v55, %v11133_v26  ;;  %v5031_v58 = vpop.f32.mrf.mxu0  ;;  %v5193_v47 = vadd.f32 %v12467_v44, %v5024_v8  ;;  %v8562_v55 = vld [vmem:[#allocation3 + $0x690] sm:$0xf]  ;;  %v12472_v8 = vld [vmem:[#allocation71_spill] sm:$0xff] }
 0x4fa   :  { %12462 = vst [vmem:[#allocation110_spill] sm:$0xff] %v11310_v19  ;;  %v5196_v15 = vadd.f32 %v12472_v8, %v5027_v3  ;;  %v12476_v8 = vld [vmem:[#allocation41_spill] sm:$0xff] }
 0x4fb   :  { %5736 = vmatmul.bf16.gmra.mxu3 %v8023_v33  ;;  %5865 = vmatmul.bf16.gmra.mxu1 %v7771_v16  ;;  %v12471_v33 = vld [vmem:[#allocation111_spill] sm:$0xff] }
 0x4fc   :  { %5647 = vmatmul.bf16.gmra.mxu2 %v8531_v29  ;;  %5070 = vmatmul.bf16.gmra.mxu0 %v8071_v21  ;;  %v5362_v16 = vadd.f32 %v12471_v33, %v5193_v47  ;;  %v8882_v29 = vld [vmem:[#allocation3 + $0x294] sm:$0xf]  ;;  %v12475_v33 = vld [vmem:[#allocation114_spill] sm:$0xff] }
 0x4fd   :  { %v8052_v21 = vld [vmem:[#allocation3 + $0x2b0] sm:$0xf0] }
 0x4fe   :  { %v5697_v53 = vpop.f32.mrf.mxu3  ;;  %v5531_v48 = vadd.f32 %v12473_v35, %v5362_v16  ;;  %v5365_v16 = vadd.f32 %v12475_v33, %v5196_v15  ;;  %v12477_v35 = vld [vmem:[#allocation112_spill] sm:$0xff] }
 0x4ff   :  { %v5608_v20 = vpop.f32.mrf.mxu2  ;;  %v11322_v26 = vadd.f32 %v5697_v53, %v5529_v60  ;;  %v8055_v60 = vor.u32 %v8882_v29, %v8052_v21  ;;  %v7803_v53 = vor.u32 %v8823_v51, %v7802_v41  ;;  %v5149_v29 = vadd.f32 %v12477_v35, %v12476_v8  ;;  %v12478_v21 = vld [vmem:[#allocation155_spill] sm:$0xff]  ;;  %v12480_v15 = vld [vmem:[#allocation16_spill] sm:$0xff]  ;;  %v8132_v8 = vld [vmem:[#allocation3 + $0x360] sm:$0xf0] }
 0x500   :  { %v11325_v0 = vadd.f32 %v5608_v20, %v11127_v13  ;;  %v5481_v23 = vpop.f32.mrf.mxu1  ;;  %v9014_v13 = vld [vmem:[#allocation3 + $0x6ac] sm:$0xf0]  ;;  %v5534_v41 = vadd.f32 %v12478_v21, %v5365_v16  ;;  %v8904_v16 = vld [vmem:[#allocation3 + $0x344] sm:$0xf] }
 0x501   :  { %v11328_v22 = vadd.f32 %v5481_v23, %v5313_v11  ;;  %v11330_v30 = vpop.f32.mrf.mxu0  ;;  %v8563_v20 = vor.u32 %v9014_v13, %v8562_v55  ;;  %v8103_v23 = vor.u32 %v8896_v59, %v8100_v36  ;;  %v5318_v51 = vadd.f32 %v11164_v24, %v5149_v29  ;;  %v9022_v33 = vld [vmem:[#allocation3 + $0x6ec] sm:$0xf0] }
 0x502   :  { %12469 = vst [vmem:[#allocation44_spill] sm:$0xff] %v11325_v0  ;;  %v5032_v59 = vadd.f32 %v5031_v58, %v12480_v15 }
 0x506   :  { %v5699_v44 = vpop.f32.mrf.mxu3 }
 0x507   :  { %v5610_v5 = vpop.f32.mrf.mxu2  ;;  %v11335_v42 = vadd.f32 %v5699_v44, %v5531_v48 }
 0x508   :  { %v11338_v47 = vadd.f32 %v5610_v5, %v11140_v52  ;;  %v5484_v11 = vpop.f32.mrf.mxu1  ;;  %v8594_v5 = vld [vmem:[#allocation3 + $0x6d0] sm:$0xf] }
 0x509   :  { %v11341_v39 = vadd.f32 %v5484_v11, %v11155_v18  ;;  %v5036_v3 = vpop.f32.mrf.mxu0  ;;  %v7834_v11 = vld [vmem:[#allocation3 + $0xd8] sm:$0xf] }
 0x50a   :  { %12474 = vst [vmem:[#allocation116_spill] sm:$0xff] %v11338_v47  ;;  %v12505_v47 = vld [vmem:[#allocation144_spill] sm:$0xff] }
 0x50b   :  { %5741 = vmatmul.bf16.gmra.mxu3 %v8055_v60  ;;  %5870 = vmatmul.bf16.gmra.mxu1 %v7803_v53  ;;  %v8890_v60 = vld [vmem:[#allocation3 + $0x2d4] sm:$0xf] }
 0x50c   :  { %5652 = vmatmul.bf16.gmra.mxu2 %v8563_v20  ;;  %5075 = vmatmul.bf16.gmra.mxu0 %v8103_v23  ;;  %v8084_v53 = vld [vmem:[#allocation3 + $0x2f0] sm:$0xf0]  ;;  %v8831_v20 = vld [vmem:[#allocation3 + $0xf4] sm:$0xf0] }
 0x50d   :  { %v12481_v23 = vld [vmem:[#allocation77_spill] sm:$0xff]  ;;  %v8087_v29 = vor.u32 %v8890_v60, %v8084_v53  ;;  %v7835_v21 = vor.u32 %v8831_v20, %v7834_v11  ;;  %v12486_v11 = vld [vmem:[#allocation11_spill] sm:$0xff] }
 0x50e   :  { %v5702_v52 = vpop.f32.mrf.mxu3  ;;  %v5201_v24 = vadd.f32 %v12481_v23, %v5032_v59  ;;  %v12484_v23 = vld [vmem:[#allocation46_spill] sm:$0xff]  ;;  %v12485_v60 = vld [vmem:[#allocation121_spill] sm:$0xff] }
 0x50f   :  { %v5613_v55 = vpop.f32.mrf.mxu2  ;;  %v11348_v48 = vadd.f32 %v5702_v52, %v5534_v41  ;;  %v8595_v52 = vor.u32 %v9022_v33, %v8594_v5  ;;  %v5154_v53 = vadd.f32 %v12485_v60, %v12484_v23  ;;  %v9030_v60 = vld [vmem:[#allocation3 + $0x72c] sm:$0xf0] }
 0x510   :  { %v11351_v18 = vadd.f32 %v5613_v55, %v11149_v25  ;;  %v5486_v13 = vpop.f32.mrf.mxu1 }
 0x511   :  { %v11354_v36 = vadd.f32 %v5486_v13, %v5318_v51  ;;  %v11356_v44 = vpop.f32.mrf.mxu0  ;;  %v8135_v51 = vor.u32 %v8904_v16, %v8132_v8  ;;  %v12483_v13 = vld [vmem:[#allocation122_spill] sm:$0xff]  ;;  %v5323_v5 = vadd.f32 %v11186_v27, %v5154_v53  ;;  %v12488_v8 = vld [vmem:[#allocation20_spill] sm:$0xff] }
 0x512   :  { %12479 = vst [vmem:[#allocation69_spill] sm:$0xff] %v11351_v18  ;;  %v5370_v15 = vadd.f32 %v12483_v13, %v5201_v24  ;;  %v8839_v13 = vld [vmem:[#allocation3 + $0x134] sm:$0xf0]  ;;  %v8626_v27 = vld [vmem:[#allocation3 + $0x710] sm:$0xf] }
 0x516   :  { %v11359_v35 = vpop.f32.mrf.mxu3 }
 0x517   :  { %v5615_v25 = vpop.f32.mrf.mxu2 }
 0x518   :  { %v11362_v58 = vadd.f32 %v5615_v25, %v11162_v31  ;;  %v5489_v41 = vpop.f32.mrf.mxu1  ;;  %v5539_v31 = vadd.f32 %v12486_v11, %v5370_v15  ;;  %v5037_v25 = vadd.f32 %v5036_v3, %v12488_v8  ;;  %v12489_v15 = vld [vmem:[#allocation81_spill] sm:$0xff] }
 0x519   :  { %v11365_v55 = vadd.f32 %v5489_v41, %v11177_v43  ;;  %v11368_v59 = vpop.f32.mrf.mxu0 }
 0x51a   :  { %12482 = vst [vmem:[#allocation102_spill] sm:$0xff] %v11362_v58  ;;  %v5206_v23 = vadd.f32 %v12489_v15, %v5037_v25  ;;  %v12492_v25 = vld [vmem:[#allocation50_spill] sm:$0xff]  ;;  %v12493_v15 = vld [vmem:[#allocation129_spill] sm:$0xff]  ;;  %v12494_v58 = vld [vmem:[#allocation15_spill] sm:$0xff] }
 0x51b   :  { %5746 = vmatmul.bf16.gmra.mxu3 %v8087_v29  ;;  %5875 = vmatmul.bf16.gmra.mxu1 %v7835_v21  ;;  %v8898_v21 = vld [vmem:[#allocation3 + $0x314] sm:$0xf] }
 0x51c   :  { %5657 = vmatmul.bf16.gmra.mxu2 %v8595_v52  ;;  %5080 = vmatmul.bf16.gmra.mxu0 %v8135_v51  ;;  %v8116_v52 = vld [vmem:[#allocation3 + $0x330] sm:$0xf0]  ;;  %v7866_v51 = vld [vmem:[#allocation3 + $0x118] sm:$0xf] }
 0x51e   :  { %v5707_v20 = vpop.f32.mrf.mxu3 }
 0x51f   :  { %v5618_v33 = vpop.f32.mrf.mxu2  ;;  %v11374_v16 = vadd.f32 %v5707_v20, %v5539_v31  ;;  %v7867_v31 = vor.u32 %v8839_v13, %v7866_v51 }
 0x520   :  { %v11377_v43 = vadd.f32 %v5618_v33, %v11169_v14  ;;  %v5491_v24 = vpop.f32.mrf.mxu1  ;;  %v8119_v14 = vor.u32 %v8898_v21, %v8116_v52 }
 0x521   :  { %v11380_v29 = vadd.f32 %v5491_v24, %v5323_v5  ;;  %v11382_v41 = vpop.f32.mrf.mxu0  ;;  %v8627_v5 = vor.u32 %v9030_v60, %v8626_v27  ;;  %v12491_v24 = vld [vmem:[#allocation128_spill] sm:$0xff] }
 0x522   :  { %12487 = vst [vmem:[#allocation17_spill] sm:$0xff] %v11377_v43  ;;  %v5375_v8 = vadd.f32 %v12491_v24, %v5206_v23  ;;  %v5159_v43 = vadd.f32 %v12493_v15, %v12492_v25  ;;  %v8906_v60 = vld [vmem:[#allocation3 + $0x354] sm:$0xf] }
 0x524   :  { %v5544_v18 = vadd.f32 %v12494_v58, %v5375_v8  ;;  %v9038_v58 = vld [vmem:[#allocation3 + $0x76c] sm:$0xf0] }
 0x526   :  { %v11385_v53 = vpop.f32.mrf.mxu3 }
 0x527   :  { %v5620_v11 = vpop.f32.mrf.mxu2 }
 0x528   :  { %v11388_v20 = vadd.f32 %v5620_v11, %v11184_v63  ;;  %v5494_v3 = vpop.f32.mrf.mxu1  ;;  %v5328_v63 = vadd.f32 %v11210_v2, %v5159_v43  ;;  %v8148_v11 = vld [vmem:[#allocation3 + $0x370] sm:$0xf0] }
 0x529   :  { %v11391_v33 = vadd.f32 %v5494_v3, %v11202_v10  ;;  %v11397_v21 = vpop.f32.mrf.mxu0  ;;  %v8658_v3 = vld [vmem:[#allocation3 + $0x750] sm:$0xf]  ;;  %v8151_v8 = vor.u32 %v8906_v60, %v8148_v11 }
 0x52a   :  { %12490 = vst [vmem:[#allocation75_spill] sm:$0xff] %v11388_v20  ;;  %v8659_v15 = vor.u32 %v9038_v58, %v8658_v3  ;;  %v8180_v58 = vld [vmem:[#allocation3 + $0x3b0] sm:$0xf0] }
 0x52b   :  { %5751 = vmatmul.bf16.gmra.mxu3 %v8119_v14  ;;  %5880 = vmatmul.bf16.gmra.mxu1 %v7867_v31  ;;  %v7898_v14 = vld [vmem:[#allocation3 + $0x158] sm:$0xf] }
 0x52c   :  { %5662 = vmatmul.bf16.gmra.mxu2 %v8627_v5  ;;  %v8847_v31 = vld [vmem:[#allocation3 + $0x174] sm:$0xf0] }
 0x52d   :  { %v7899_v2 = vor.u32 %v8847_v31, %v7898_v14  ;;  %v12500_v14 = vld [vmem:[#allocation83_spill] sm:$0xff] }
 0x52e   :  { %v5712_v52 = vpop.f32.mrf.mxu3 }
 0x52f   :  { %v5623_v51 = vpop.f32.mrf.mxu2  ;;  %v11400_v13 = vadd.f32 %v5712_v52, %v5544_v18  ;;  %v12496_v18 = vld [vmem:[#allocation94_spill] sm:$0xff] }
 0x530   :  { %v11403_v10 = vadd.f32 %v5623_v51, %v11191_v7  ;;  %v5496_v23 = vpop.f32.mrf.mxu1  ;;  %v12499_v51 = vld [vmem:[#allocation138_spill] sm:$0xff] }
 0x531   :  { %v11405_v27 = vadd.f32 %v5496_v23, %v5328_v63  ;;  %v11409_v43 = vpop.f32.mrf.mxu0  ;;  %v12498_v63 = vld [vmem:[#allocation55_spill] sm:$0xff] }
 0x532   :  { %12495 = vst [vmem:[#allocation48_spill] sm:$0xff] %v11403_v10  ;;  %v5164_v23 = vadd.f32 %v12499_v51, %v12498_v63 }
 0x534   :  { %v5333_v60 = vadd.f32 %v11232_v28, %v5164_v23  ;;  %v12502_v23 = vld [vmem:[#allocation99_spill] sm:$0xff] }
 0x536   :  { %v11407_v5 = vpop.f32.mrf.mxu3 }
 0x537   :  { %v5625_v24 = vpop.f32.mrf.mxu2 }
 0x538   :  { %v11412_v25 = vadd.f32 %v5625_v24, %v12496_v18  ;;  %v5499_v7 = vpop.f32.mrf.mxu1 }
 0x539   :  { %v11415_v52 = vadd.f32 %v5499_v7, %v11224_v40  ;;  %v11427_v3 = vpop.f32.mrf.mxu0  ;;  %v8914_v40 = vld [vmem:[#allocation3 + $0x394] sm:$0xf]  ;;  %v8690_v7 = vld [vmem:[#allocation3 + $0x790] sm:$0xf] }
 0x53a   :  { %12497 = vst [vmem:[#allocation125_spill] sm:$0xff] %v11412_v25  ;;  %v8183_v25 = vor.u32 %v8914_v40, %v8180_v58 }
 0x53b   :  { %5756 = vmatmul.bf16.gmra.mxu3 %v8151_v8  ;;  %5885 = vmatmul.bf16.gmra.mxu1 %v7899_v2  ;;  %v7930_v8 = vld [vmem:[#allocation3 + $0x198] sm:$0xf] }
 0x53c   :  { %5667 = vmatmul.bf16.gmra.mxu2 %v8659_v15  ;;  %v8855_v2 = vld [vmem:[#allocation3 + $0x1b4] sm:$0xf0]  ;;  %v9046_v15 = vld [vmem:[#allocation3 + $0x7ac] sm:$0xf0] }
 0x53d   :  { %v7931_v28 = vor.u32 %v8855_v2, %v7930_v8 }
 0x53e   :  { %v11419_v10 = vpop.f32.mrf.mxu3 }
 0x53f   :  { %v5628_v11 = vpop.f32.mrf.mxu2 }
 0x540   :  { %v11423_v31 = vadd.f32 %v5628_v11, %v12500_v14  ;;  %v5501_v24 = vpop.f32.mrf.mxu1  ;;  %v8691_v14 = vor.u32 %v9046_v15, %v8690_v7  ;;  %v7962_v15 = vld [vmem:[#allocation3 + $0x1d8] sm:$0xf] }
 0x541   :  { %v11425_v18 = vadd.f32 %v5501_v24, %v5333_v60  ;;  %v11437_v24 = vpop.f32.mrf.mxu0 }
 0x542   :  { %12501 = vst [vmem:[#allocation64_spill] sm:$0xff] %v11423_v31  ;;  %v12504_v31 = vld [vmem:[#allocation58_spill] sm:$0xff] }
 0x543   :  { %v5169_v0 = vadd.f32 %v12505_v47, %v12504_v31 }
 0x545   :  { %v5338_v40 = vadd.f32 %v11252_v46, %v5169_v0 }
 0x546   :  { %v11429_v63 = vpop.f32.mrf.mxu3 }
 0x547   :  { %v5630_v51 = vpop.f32.mrf.mxu2 }
 0x548   :  { %v11432_v20 = vadd.f32 %v5630_v51, %v12502_v23  ;;  %v5504_v11 = vpop.f32.mrf.mxu1  ;;  %v8863_v51 = vld [vmem:[#allocation3 + $0x1f4] sm:$0xf0]  ;;  %v9054_v23 = vld [vmem:[#allocation3 + $0x7ec] sm:$0xf0] }
 0x549   :  { %v11435_v60 = vadd.f32 %v5504_v11, %v11244_v62  ;;  %v8922_v62 = vld [vmem:[#allocation3 + $0x3d4] sm:$0xf]  ;;  %v5056_v11 = vpop.f32.mrf.mxu0 }
 0x54a   :  { %12503 = vst [vmem:[#allocation96_spill] sm:$0xff] %v11432_v20  ;;  %v7963_v20 = vor.u32 %v8863_v51, %v7962_v15  ;;  %v12512_v51 = vld [vmem:[#allocation36_spill] sm:$0xff] }
 0x54b   :  { %5761 = vmatmul.bf16.gmra.mxu3 %v8183_v25  ;;  %5890 = vmatmul.bf16.gmra.mxu1 %v7931_v28  ;;  %v8212_v25 = vld [vmem:[#allocation3 + $0x3f0] sm:$0xf0]  ;;  %v8722_v28 = vld [vmem:[#allocation3 + $0x7d0] sm:$0xf] }
 0x54c   :  { %5672 = vmatmul.bf16.gmra.mxu2 %v8691_v14  ;;  %v8215_v31 = vor.u32 %v8922_v62, %v8212_v25  ;;  %v8723_v0 = vor.u32 %v9054_v23, %v8722_v28  ;;  %v5057_v28 = vadd.f32 %v5056_v11, %v12512_v51  ;;  %v8930_v23 = vld [vmem:[#allocation3 + $0x414] sm:$0xf] }
 0x54e   :  { %v11441_v19 = vpop.f32.mrf.mxu3 }
 0x54f   :  { %v5633_v58 = vpop.f32.mrf.mxu2 }
 0x550   :  { %v11445_v8 = vadd.f32 %v5633_v58, %v11237_v38  ;;  %v5506_v2 = vpop.f32.mrf.mxu1  ;;  %v12509_v58 = vld [vmem:[#allocation61_spill] sm:$0xff] }
 0x551   :  { %v11447_v7 = vadd.f32 %v5506_v2, %v5338_v40  ;;  %v12510_v2 = vld [vmem:[#allocation147_spill] sm:$0xff]  ;;  %v5058_v25 = vpop.f32.mrf.mxu0 }
 0x552   :  { %12506 = vst [vmem:[#allocation21_spill] sm:$0xff] %v11445_v8  ;;  %v5174_v8 = vadd.f32 %v12510_v2, %v12509_v58  ;;  %v8803_v58 = vld [vmem:[#allocation3 + $0x1c] sm:$0xf] }
 0x553   :  { %v7740_v2 = vld [vmem:[#allocation3 + $0x38] sm:$0xf0] }
 0x554   :  { %v5343_v12 = vadd.f32 %v11278_v37, %v5174_v8  ;;  %v7743_v11 = vor.u32 %v8803_v58, %v7740_v2 }
 0x556   :  { %v11449_v14 = vpop.f32.mrf.mxu3 }
 0x557   :  { %v5635_v47 = vpop.f32.mrf.mxu2 }
 0x558   :  { %v11452_v46 = vadd.f32 %v5635_v47, %v11249_v9  ;;  %v5509_v38 = vpop.f32.mrf.mxu1  ;;  %v7994_v47 = vld [vmem:[#allocation3 + $0x218] sm:$0xf] }
 0x559   :  { %v11455_v40 = vadd.f32 %v5509_v38, %v11267_v56  ;;  %v12514_v38 = vld [vmem:[#allocation103_spill] sm:$0xff] }
 0x55a   :  { %12507 = vst [vmem:[#allocation80_spill] sm:$0xff] %v11452_v46 }
 0x55b   :  { %12508 = vst [vmem:[#allocation53_spill] sm:$0xff] %v11455_v40  ;;  %5766 = vmatmul.bf16.gmra.mxu3 %v8215_v31  ;;  %5895 = vmatmul.bf16.gmra.mxu1 %v7963_v20  ;;  %v8244_v20 = vld [vmem:[#allocation3 + $0x430] sm:$0xf0]  ;;  %v8871_v31 = vld [vmem:[#allocation3 + $0x234] sm:$0xf0] }
 0x55c   :  { %5677 = vmatmul.bf16.gmra.mxu2 %v8723_v0  ;;  %v5226_v0 = vadd.f32 %v12514_v38, %v5057_v28  ;;  %v8247_v8 = vor.u32 %v8930_v23, %v8244_v20  ;;  %v7995_v40 = vor.u32 %v8871_v31, %v7994_v47  ;;  %v5061_v28 = vpop.f32.mrf.mxu0  ;;  %v12518_v38 = vld [vmem:[#allocation106_spill] sm:$0xff] }
 0x55d   :  { %v12519_v23 = vld [vmem:[#allocation82_spill] sm:$0xff] }
 0x55e   :  { %v11459_v50 = vpop.f32.mrf.mxu3 }
 0x55f   :  { %v5638_v62 = vpop.f32.mrf.mxu2 }
 0x560   :  { %v11463_v9 = vadd.f32 %v5638_v62, %v11258_v61  ;;  %v5511_v15 = vpop.f32.mrf.mxu1 }
 0x561   :  { %v11466_v56 = vadd.f32 %v5511_v15, %v5343_v12  ;;  %v12516_v12 = vld [vmem:[#allocation38_spill] sm:$0xff] }
 0x562   :  { %12511 = vst [vmem:[#allocation132_spill] sm:$0xff] %v11463_v9  ;;  %v5059_v15 = vadd.f32 %v5058_v25, %v12516_v12  ;;  %v12517_v9 = vld [vmem:[#allocation148_spill] sm:$0xff]  ;;  %v12524_v12 = vld [vmem:[#allocation109_spill] sm:$0xff] }
 0x563   :  { %12513 = vst [vmem:[#allocation60_spill] sm:$0xff] %v11466_v56  ;;  %v5395_v56 = vadd.f32 %v12517_v9, %v5226_v0 }
 0x564   :  { %v5228_v32 = vadd.f32 %v12518_v38, %v5059_v15  ;;  %v12525_v38 = vld [vmem:[#allocation23_spill] sm:$0xff] }
 0x565   :  { %v5564_v20 = vadd.f32 %v12519_v23, %v5395_v56  ;;  %v8879_v56 = vld [vmem:[#allocation3 + $0x274] sm:$0xf0] }
 0x566   :  { %v11469_v46 = vpop.f32.mrf.mxu3 }
 0x567   :  { %v5640_v37 = vpop.f32.mrf.mxu2 }
 0x568   :  { %v11472_v61 = vadd.f32 %v5640_v37, %v11273_v57  ;;  %v5861_v62 = vpop.f32.mrf.mxu1  ;;  %v12522_v37 = vld [vmem:[#allocation40_spill] sm:$0xff] }
 0x569   :  { %v11476_v51 = vadd.f32 %v5861_v62, %v11294_v45  ;;  %v12521_v45 = vld [vmem:[#allocation149_spill] sm:$0xff]  ;;  %v5062_v9 = vadd.f32 %v5061_v28, %v12522_v37  ;;  %v8276_v62 = vld [vmem:[#allocation3 + $0x470] sm:$0xf0]  ;;  %v12527_v37 = vld [vmem:[#allocation42_spill] sm:$0xff] }
 0x56a   :  { %12515 = vst [vmem:[#allocation88_spill] sm:$0xff] %v11472_v61  ;;  %v5397_v2 = vadd.f32 %v12521_v45, %v5228_v32 }
 0x56b   :  { %5771 = vmatmul.bf16.gmra.mxu3 %v8247_v8  ;;  %5900 = vmatmul.bf16.gmra.mxu1 %v7995_v40  ;;  %v8938_v40 = vld [vmem:[#allocation3 + $0x454] sm:$0xf]  ;;  %v5063_v8 = vpop.f32.mrf.mxu0  ;;  %v5231_v15 = vadd.f32 %v12524_v12, %v5062_v9  ;;  %v12528_v9 = vld [vmem:[#allocation150_spill] sm:$0xff]  ;;  %v12529_v12 = vld [vmem:[#allocation113_spill] sm:$0xff] }
 0x56c   :  { %6029 = vmatmul.bf16.vlgmr.msra.gmra.mxu2 %v7743_v11  ;;  %v8026_v11 = vld [vmem:[#allocation3 + $0x258] sm:$0xf]  ;;  %v5566_v23 = vadd.f32 %v12525_v38, %v5397_v2  ;;  %v8279_v32 = vor.u32 %v8938_v40, %v8276_v62 }
 0x56d   :  { %v8027_v28 = vor.u32 %v8879_v56, %v8026_v11  ;;  %v5400_v2 = vadd.f32 %v12528_v9, %v5231_v15  ;;  %v12533_v15 = vld [vmem:[#allocation152_spill] sm:$0xff]  ;;  %v12535_v9 = vld [vmem:[#allocation73_spill] sm:$0xff] }
 0x56e   :  { %v5732_v47 = vpop.f32.mrf.mxu3 }
 0x56f   :  { %v5643_v57 = vpop.f32.mrf.mxu2  ;;  %v11481_v31 = vadd.f32 %v5732_v47, %v5564_v20  ;;  %v8811_v20 = vld [vmem:[#allocation3 + $0x5c] sm:$0xf] }
 0x570   :  { %v11484_v58 = vadd.f32 %v5643_v57, %v11285_v6  ;;  %v5863_v25 = vpop.f32.mrf.mxu1  ;;  %v7772_v6 = vld [vmem:[#allocation3 + $0x78] sm:$0xf0] }
 0x571   :  { %v11489_v0 = vadd.f32 %v5863_v25, %v11307_v17  ;;  %v7775_v45 = vor.u32 %v8811_v20, %v7772_v6 }
 0x572   :  { %12520 = vst [vmem:[#allocation25_spill] sm:$0xff] %v11484_v58  ;;  %v5064_v58 = vadd.f32 %v5063_v8, %v12527_v37  ;;  %v8887_v37 = vld [vmem:[#allocation3 + $0x2b4] sm:$0xf0] }
 0x573   :  { %12523 = vst [vmem:[#allocation86_spill] sm:$0xff] %v11489_v0  ;;  %v5066_v62 = vpop.f32.mrf.mxu0 }
 0x574   :  { %v5233_v38 = vadd.f32 %v12529_v12, %v5064_v58  ;;  %v12536_v12 = vld [vmem:[#allocation117_spill] sm:$0xff] }
 0x576   :  { %v5734_v47 = vpop.f32.mrf.mxu3 }
 0x577   :  { %v5645_v57 = vpop.f32.mrf.mxu2  ;;  %v11493_v61 = vadd.f32 %v5734_v47, %v5566_v23  ;;  %v12530_v23 = vld [vmem:[#allocation84_spill] sm:$0xff]  ;;  %v5402_v47 = vadd.f32 %v12533_v15, %v5233_v38 }
 0x578   :  { %v11496_v17 = vadd.f32 %v5645_v57, %v11300_v54  ;;  %v5866_v25 = vpop.f32.mrf.mxu1  ;;  %v5569_v40 = vadd.f32 %v12530_v23, %v5400_v2  ;;  %v12534_v57 = vld [vmem:[#allocation43_spill] sm:$0xff] }
 0x579   :  { %v11500_v0 = vadd.f32 %v5866_v25, %v11322_v26  ;;  %v12532_v26 = vld [vmem:[#allocation14_spill] sm:$0xff]  ;;  %v8308_v25 = vld [vmem:[#allocation3 + $0x4b0] sm:$0xf0]  ;;  %v12537_v23 = vld [vmem:[#allocation135_spill] sm:$0xff] }
 0x57a   :  { %12526 = vst [vmem:[#allocation57_spill] sm:$0xff] %v11496_v17  ;;  %v5029_v6 = vadd.f32 %v11302_v49, %v12532_v26 }
 0x57b   :  { %5776 = vmatmul.bf16.gmra.mxu3 %v8279_v32  ;;  %5905 = vmatmul.bf16.gmra.mxu1 %v8027_v28  ;;  %v5067_v32 = vadd.f32 %v5066_v62, %v12534_v57  ;;  %v8946_v28 = vld [vmem:[#allocation3 + $0x494] sm:$0xf] }
 0x57c   :  { %6034 = vmatmul.bf16.gmra.mxu2 %v7775_v45  ;;  %v8058_v45 = vld [vmem:[#allocation3 + $0x298] sm:$0xf]  ;;  %v5198_v2 = vadd.f32 %v12535_v9, %v5029_v6  ;;  %v8311_v62 = vor.u32 %v8946_v28, %v8308_v25 }
 0x57d   :  { %v8059_v15 = vor.u32 %v8887_v37, %v8058_v45  ;;  %v12540_v9 = vld [vmem:[#allocation157_spill] sm:$0xff] }
 0x57e   :  { %v5737_v11 = vpop.f32.mrf.mxu3 }
 0x57f   :  { %v5648_v54 = vpop.f32.mrf.mxu2  ;;  %v11505_v56 = vadd.f32 %v5737_v11, %v5569_v40  ;;  %v5571_v40 = vadd.f32 %v12537_v23, %v5402_v47  ;;  %v8819_v11 = vld [vmem:[#allocation3 + $0x9c] sm:$0xf]  ;;  %v12541_v23 = vld [vmem:[#allocation27_spill] sm:$0xff] }
 0x580   :  { %v11508_v20 = vadd.f32 %v5648_v54, %v11314_v4  ;;  %v5868_v8 = vpop.f32.mrf.mxu1  ;;  %v5236_v4 = vadd.f32 %v12536_v12, %v5067_v32  ;;  %v7804_v54 = vld [vmem:[#allocation3 + $0xb8] sm:$0xf0]  ;;  %v12539_v32 = vld [vmem:[#allocation154_spill] sm:$0xff] }
 0x581   :  { %v11515_v58 = vadd.f32 %v5868_v8, %v11335_v42  ;;  %v7807_v57 = vor.u32 %v8819_v11, %v7804_v54  ;;  %v8954_v11 = vld [vmem:[#allocation3 + $0x4d4] sm:$0xf] }
 0x582   :  { %12531 = vst [vmem:[#allocation29_spill] sm:$0xff] %v11508_v20  ;;  %v12538_v20 = vld [vmem:[#allocation118_spill] sm:$0xff]  ;;  %v5405_v47 = vadd.f32 %v12539_v32, %v5236_v4  ;;  %v8340_v54 = vld [vmem:[#allocation3 + $0x4f0] sm:$0xf0] }
 0x583   :  { %v5367_v17 = vadd.f32 %v12538_v20, %v5198_v2  ;;  %v12542_v2 = vld [vmem:[#allocation18_spill] sm:$0xff]  ;;  %v8343_v32 = vor.u32 %v8954_v11, %v8340_v54 }
 0x584   :  { %v5574_v28 = vadd.f32 %v12541_v23, %v5405_v47  ;;  %v5034_v4 = vadd.f32 %v11330_v30, %v12542_v2  ;;  %v12548_v11 = vld [vmem:[#allocation22_spill] sm:$0xff] }
 0x585   :  { %v5536_v12 = vadd.f32 %v12540_v9, %v5367_v17  ;;  %v8090_v17 = vld [vmem:[#allocation3 + $0x2d8] sm:$0xf]  ;;  %v5039_v54 = vadd.f32 %v11356_v44, %v12548_v11 }
 0x586   :  { %v5739_v49 = vpop.f32.mrf.mxu3 }
 0x587   :  { %v5650_v26 = vpop.f32.mrf.mxu2  ;;  %v11520_v38 = vadd.f32 %v5739_v49, %v5571_v40  ;;  %v8895_v49 = vld [vmem:[#allocation3 + $0x2f4] sm:$0xf0] }
 0x588   :  { %v11523_v42 = vadd.f32 %v5650_v26, %v11328_v22  ;;  %v5871_v8 = vpop.f32.mrf.mxu1  ;;  %v5705_v22 = vadd.f32 %v11359_v35, %v5536_v12  ;;  %v12543_v26 = vld [vmem:[#allocation79_spill] sm:$0xff]  ;;  %v7836_v35 = vld [vmem:[#allocation3 + $0xf8] sm:$0xf0]  ;;  %v12545_v12 = vld [vmem:[#allocation124_spill] sm:$0xff] }
 0x589   :  { %v11527_v6 = vadd.f32 %v5871_v8, %v11348_v48 }
 0x58b   :  { %5781 = vmatmul.bf16.gmra.mxu3 %v8311_v62  ;;  %5910 = vmatmul.bf16.gmra.mxu1 %v8059_v15  ;;  %v5203_v62 = vadd.f32 %v12543_v26, %v5034_v4  ;;  %v8827_v15 = vld [vmem:[#allocation3 + $0xdc] sm:$0xf]  ;;  %v8122_v26 = vld [vmem:[#allocation3 + $0x318] sm:$0xf] }
 0x58c   :  { %6039 = vmatmul.bf16.gmra.mxu2 %v7807_v57  ;;  %v7839_v30 = vor.u32 %v8827_v15, %v7836_v35  ;;  %v12549_v15 = vld [vmem:[#allocation85_spill] sm:$0xff] }
 0x58d   :  { %v5372_v23 = vadd.f32 %v12545_v12, %v5203_v62  ;;  %v8903_v62 = vld [vmem:[#allocation3 + $0x334] sm:$0xf0]  ;;  %v5208_v35 = vadd.f32 %v12549_v15, %v5039_v54  ;;  %v12554_v54 = vld [vmem:[#allocation160_spill] sm:$0xff] }
 0x58e   :  { %v5742_v25 = vpop.f32.mrf.mxu3 }
 0x58f   :  { %v5653_v45 = vpop.f32.mrf.mxu2  ;;  %v11533_v37 = vadd.f32 %v5742_v25, %v5574_v28  ;;  %v12546_v25 = vld [vmem:[#allocation13_spill] sm:$0xff] }
 0x590   :  { %v11536_v20 = vadd.f32 %v5653_v45, %v11341_v39  ;;  %v5873_v48 = vpop.f32.mrf.mxu1  ;;  %v8091_v39 = vor.u32 %v8895_v49, %v8090_v17  ;;  %v8372_v49 = vld [vmem:[#allocation3 + $0x530] sm:$0xf0] }
 0x591   :  { %v11540_v40 = vadd.f32 %v5873_v48, %v5705_v22  ;;  %v5541_v22 = vadd.f32 %v12546_v25, %v5372_v23  ;;  %v12551_v23 = vld [vmem:[#allocation131_spill] sm:$0xff] }
 0x592   :  { %v5377_v25 = vadd.f32 %v12551_v23, %v5208_v35  ;;  %v12557_v35 = vld [vmem:[#allocation134_spill] sm:$0xff] }
 0x593   :  { %v5710_v48 = vadd.f32 %v11385_v53, %v5541_v22  ;;  %v12552_v22 = vld [vmem:[#allocation24_spill] sm:$0xff] }
 0x596   :  { %v11543_v8 = vpop.f32.mrf.mxu3 }
 0x597   :  { %v5655_v57 = vpop.f32.mrf.mxu2 }
 0x598   :  { %v11546_v47 = vadd.f32 %v5655_v57, %v11354_v36  ;;  %v5876_v9 = vpop.f32.mrf.mxu1  ;;  %v8835_v57 = vld [vmem:[#allocation3 + $0x11c] sm:$0xf] }
 0x599   :  { %v11550_v28 = vadd.f32 %v5876_v9, %v11374_v16  ;;  %v8962_v16 = vld [vmem:[#allocation3 + $0x514] sm:$0xf] }
 0x59a   :  { %12544 = vst [vmem:[#allocation92_spill] sm:$0xff] %v11546_v47  ;;  %v8375_v9 = vor.u32 %v8962_v16, %v8372_v49  ;;  %v5546_v16 = vadd.f32 %v12554_v54, %v5377_v25  ;;  %v12559_v25 = vld [vmem:[#allocation19_spill] sm:$0xff] }
 0x59b   :  { %5786 = vmatmul.bf16.gmra.mxu3 %v8343_v32  ;;  %5915 = vmatmul.bf16.gmra.mxu1 %v8091_v39  ;;  %v7868_v32 = vld [vmem:[#allocation3 + $0x138] sm:$0xf0] }
 0x59c   :  { %6044 = vmatmul.bf16.gmra.mxu2 %v7839_v30  ;;  %v7871_v44 = vor.u32 %v8835_v57, %v7868_v32 }
 0x59e   :  { %v11553_v45 = vpop.f32.mrf.mxu3 }
 0x59f   :  { %v5658_v2 = vpop.f32.mrf.mxu2 }
 0x5a0   :  { %v11557_v36 = vadd.f32 %v5658_v2, %v11365_v55  ;;  %v5878_v4 = vpop.f32.mrf.mxu1  ;;  %v8123_v55 = vor.u32 %v8903_v62, %v8122_v26 }
 0x5a1   :  { %v11561_v17 = vadd.f32 %v5878_v4, %v5710_v48  ;;  %v5042_v48 = vadd.f32 %v11368_v59, %v12552_v22  ;;  %v12553_v4 = vld [vmem:[#allocation87_spill] sm:$0xff]  ;;  %v12556_v59 = vld [vmem:[#allocation26_spill] sm:$0xff]  ;;  %v8843_v22 = vld [vmem:[#allocation3 + $0x15c] sm:$0xf] }
 0x5a2   :  { %12547 = vst [vmem:[#allocation59_spill] sm:$0xff] %v11557_v36  ;;  %v12599_v36 = vld [vmem:[#allocation47_spill] sm:$0xff] }
 0x5a3   :  { %v5211_v11 = vadd.f32 %v12553_v4, %v5042_v48  ;;  %v7900_v48 = vld [vmem:[#allocation3 + $0x178] sm:$0xf0] }
 0x5a5   :  { %v5380_v57 = vadd.f32 %v12557_v35, %v5211_v11  ;;  %v12562_v35 = vld [vmem:[#allocation28_spill] sm:$0xff] }
 0x5a6   :  { %v11564_v39 = vpop.f32.mrf.mxu3 }
 0x5a7   :  { %v5660_v53 = vpop.f32.mrf.mxu2 }
 0x5a8   :  { %v11567_v30 = vadd.f32 %v5660_v53, %v11380_v29  ;;  %v5881_v12 = vpop.f32.mrf.mxu1  ;;  %v5715_v29 = vadd.f32 %v11407_v5, %v5546_v16  ;;  %v8970_v53 = vld [vmem:[#allocation3 + $0x554] sm:$0xf]  ;;  %v5549_v5 = vadd.f32 %v12559_v25, %v5380_v57  ;;  %v12564_v25 = vld [vmem:[#allocation63_spill] sm:$0xff] }
 0x5a9   :  { %v11573_v2 = vadd.f32 %v5881_v12, %v11400_v13  ;;  %v5044_v13 = vadd.f32 %v11382_v41, %v12556_v59  ;;  %v8911_v12 = vld [vmem:[#allocation3 + $0x374] sm:$0xf0] }
 0x5aa   :  { %12550 = vst [vmem:[#allocation7_spill] sm:$0xff] %v11567_v30  ;;  %v5718_v4 = vadd.f32 %v11419_v10, %v5549_v5  ;;  %v12566_v5 = vld [vmem:[#allocation30_spill] sm:$0xff] }
 0x5ab   :  { %5791 = vmatmul.bf16.gmra.mxu3 %v8375_v9  ;;  %5920 = vmatmul.bf16.gmra.mxu1 %v8123_v55  ;;  %v8404_v9 = vld [vmem:[#allocation3 + $0x570] sm:$0xf0]  ;;  %v8154_v55 = vld [vmem:[#allocation3 + $0x358] sm:$0xf] }
 0x5ac   :  { %6049 = vmatmul.bf16.gmra.mxu2 %v7871_v44  ;;  %v12558_v44 = vld [vmem:[#allocation91_spill] sm:$0xff]  ;;  %v8407_v41 = vor.u32 %v8970_v53, %v8404_v9  ;;  %v8155_v16 = vor.u32 %v8911_v12, %v8154_v55 }
 0x5ad   :  { %v5213_v23 = vadd.f32 %v12558_v44, %v5044_v13  ;;  %v5047_v13 = vadd.f32 %v11397_v21, %v12562_v35  ;;  %v12563_v44 = vld [vmem:[#allocation93_spill] sm:$0xff]  ;;  %v5049_v21 = vadd.f32 %v11409_v43, %v12566_v5 }
 0x5ae   :  { %v11577_v49 = vpop.f32.mrf.mxu3  ;;  %v8851_v35 = vld [vmem:[#allocation3 + $0x19c] sm:$0xf] }
 0x5af   :  { %v5663_v26 = vpop.f32.mrf.mxu2  ;;  %v5216_v10 = vadd.f32 %v12563_v44, %v5047_v13  ;;  %v7932_v13 = vld [vmem:[#allocation3 + $0x1b8] sm:$0xf0] }
 0x5b0   :  { %v11581_v62 = vadd.f32 %v5663_v26, %v11391_v33  ;;  %v5883_v15 = vpop.f32.mrf.mxu1  ;;  %v7903_v26 = vor.u32 %v8843_v22, %v7900_v48  ;;  %v12567_v22 = vld [vmem:[#allocation142_spill] sm:$0xff] }
 0x5b1   :  { %v11586_v32 = vadd.f32 %v5883_v15, %v5715_v29  ;;  %v12561_v15 = vld [vmem:[#allocation139_spill] sm:$0xff]  ;;  %v5385_v48 = vadd.f32 %v12567_v22, %v5216_v10  ;;  %v12572_v22 = vld [vmem:[#allocation32_spill] sm:$0xff] }
 0x5b2   :  { %12555 = vst [vmem:[#allocation62_spill] sm:$0xff] %v11581_v62  ;;  %v5382_v59 = vadd.f32 %v12561_v15, %v5213_v23 }
 0x5b4   :  { %v5551_v53 = vadd.f32 %v12564_v25, %v5382_v59  ;;  %v12569_v59 = vld [vmem:[#allocation68_spill] sm:$0xff] }
 0x5b6   :  { %v11590_v33 = vpop.f32.mrf.mxu3 }
 0x5b7   :  { %v5665_v54 = vpop.f32.mrf.mxu2 }
 0x5b8   :  { %v11594_v11 = vadd.f32 %v5665_v54, %v11405_v27  ;;  %v5886_v29 = vpop.f32.mrf.mxu1  ;;  %v5720_v27 = vadd.f32 %v11429_v63, %v5551_v53  ;;  %v8978_v54 = vld [vmem:[#allocation3 + $0x594] sm:$0xf]  ;;  %v5554_v63 = vadd.f32 %v12569_v59, %v5385_v48  ;;  %v12574_v59 = vld [vmem:[#allocation74_spill] sm:$0xff] }
 0x5b9   :  { %v11599_v57 = vadd.f32 %v5886_v29, %v5718_v4  ;;  %v8919_v29 = vld [vmem:[#allocation3 + $0x3b4] sm:$0xf0] }
 0x5ba   :  { %12560 = vst [vmem:[#allocation8_spill] sm:$0xff] %v11594_v11  ;;  %v5723_v44 = vadd.f32 %v11441_v19, %v5554_v63  ;;  %v12576_v63 = vld [vmem:[#allocation34_spill] sm:$0xff] }
 0x5bb   :  { %5796 = vmatmul.bf16.gmra.mxu3 %v8407_v41  ;;  %5925 = vmatmul.bf16.gmra.mxu1 %v8155_v16  ;;  %v8436_v41 = vld [vmem:[#allocation3 + $0x5b0] sm:$0xf0]  ;;  %v8186_v16 = vld [vmem:[#allocation3 + $0x398] sm:$0xf] }
 0x5bc   :  { %6054 = vmatmul.bf16.gmra.mxu2 %v7903_v26  ;;  %v12568_v26 = vld [vmem:[#allocation95_spill] sm:$0xff]  ;;  %v8439_v43 = vor.u32 %v8978_v54, %v8436_v41  ;;  %v8187_v53 = vor.u32 %v8919_v29, %v8186_v16 }
 0x5bd   :  { %v5218_v15 = vadd.f32 %v12568_v26, %v5049_v21  ;;  %v5052_v21 = vadd.f32 %v11427_v3, %v12572_v22  ;;  %v12573_v26 = vld [vmem:[#allocation98_spill] sm:$0xff]  ;;  %v8859_v22 = vld [vmem:[#allocation3 + $0x1dc] sm:$0xf] }
 0x5be   :  { %v11603_v9 = vpop.f32.mrf.mxu3 }
 0x5bf   :  { %v5668_v55 = vpop.f32.mrf.mxu2  ;;  %v5221_v19 = vadd.f32 %v12573_v26, %v5052_v21  ;;  %v7964_v21 = vld [vmem:[#allocation3 + $0x1f8] sm:$0xf0] }
 0x5c0   :  { %v11607_v12 = vadd.f32 %v5668_v55, %v11415_v52  ;;  %v5888_v23 = vpop.f32.mrf.mxu1  ;;  %v7935_v55 = vor.u32 %v8851_v35, %v7932_v13  ;;  %v5054_v35 = vadd.f32 %v11437_v24, %v12576_v63  ;;  %v12577_v13 = vld [vmem:[#allocation145_spill] sm:$0xff] }
 0x5c1   :  { %v11612_v4 = vadd.f32 %v5888_v23, %v5720_v27  ;;  %v12571_v23 = vld [vmem:[#allocation143_spill] sm:$0xff] }
 0x5c2   :  { %12565 = vst [vmem:[#allocation101_spill] sm:$0xff] %v11607_v12  ;;  %v5387_v5 = vadd.f32 %v12571_v23, %v5218_v15 }
 0x5c4   :  { %v5556_v54 = vadd.f32 %v12574_v59, %v5387_v5  ;;  %v12579_v5 = vld [vmem:[#allocation115_spill] sm:$0xff] }
 0x5c6   :  { %v11616_v52 = vpop.f32.mrf.mxu3 }
 0x5c7   :  { %v5670_v25 = vpop.f32.mrf.mxu2 }
 0x5c8   :  { %v11620_v10 = vadd.f32 %v5670_v25, %v11425_v18  ;;  %v5891_v27 = vpop.f32.mrf.mxu1  ;;  %v5725_v18 = vadd.f32 %v11449_v14, %v5556_v54  ;;  %v12578_v14 = vld [vmem:[#allocation100_spill] sm:$0xff] }
 0x5c9   :  { %v11625_v48 = vadd.f32 %v5891_v27, %v5723_v44  ;;  %v5390_v44 = vadd.f32 %v12577_v13, %v5221_v19  ;;  %v8218_v27 = vld [vmem:[#allocation3 + $0x3d8] sm:$0xf]  ;;  %v5223_v23 = vadd.f32 %v12578_v14, %v5054_v35  ;;  %v12582_v13 = vld [vmem:[#allocation140_spill] sm:$0xff] }
 0x5ca   :  { %12570 = vst [vmem:[#allocation33_spill] sm:$0xff] %v11620_v10 }
 0x5cb   :  { %5801 = vmatmul.bf16.gmra.mxu3 %v8439_v43  ;;  %5930 = vmatmul.bf16.gmra.mxu1 %v8187_v53  ;;  %v8986_v43 = vld [vmem:[#allocation3 + $0x5d4] sm:$0xf] }
 0x5cc   :  { %6059 = vmatmul.bf16.gmra.mxu2 %v7935_v55  ;;  %v8468_v53 = vld [vmem:[#allocation3 + $0x5f0] sm:$0xf0]  ;;  %v8927_v55 = vld [vmem:[#allocation3 + $0x3f4] sm:$0xf0] }
 0x5cd   :  { %v8471_v19 = vor.u32 %v8986_v43, %v8468_v53  ;;  %v8219_v54 = vor.u32 %v8927_v55, %v8218_v27  ;;  %v12583_v43 = vld [vmem:[#allocation76_spill] sm:$0xff] }
 0x5ce   :  { %v5762_v41 = vpop.f32.mrf.mxu3 }
 0x5cf   :  { %v5673_v16 = vpop.f32.mrf.mxu2  ;;  %v11631_v29 = vadd.f32 %v5762_v41, %v11247_v34  ;;  %v5559_v34 = vadd.f32 %v12579_v5, %v5390_v44 }
 0x5d0   :  { %v11634_v15 = vadd.f32 %v5673_v16, %v11435_v60  ;;  %v5893_v3 = vpop.f32.mrf.mxu1  ;;  %v7967_v16 = vor.u32 %v8859_v22, %v7964_v21  ;;  %v8250_v22 = vld [vmem:[#allocation3 + $0x418] sm:$0xf] }
 0x5d1   :  { %v11639_v25 = vadd.f32 %v5893_v3, %v5725_v18  ;;  %v5728_v26 = vadd.f32 %v11459_v50, %v5559_v34  ;;  %v12581_v3 = vld [vmem:[#allocation146_spill] sm:$0xff]  ;;  %v8500_v34 = vld [vmem:[#allocation3 + $0x630] sm:$0xf0]  ;;  %v8935_v21 = vld [vmem:[#allocation3 + $0x434] sm:$0xf0] }
 0x5d2   :  { %12575 = vst [vmem:[#allocation97_spill] sm:$0xff] %v11634_v15  ;;  %v5392_v63 = vadd.f32 %v12581_v3, %v5223_v23  ;;  %v8994_v23 = vld [vmem:[#allocation3 + $0x614] sm:$0xf] }
 0x5d3   :  { %v12587_v3 = vld [vmem:[#allocation60_spill] sm:$0xff] }
 0x5d4   :  { %v5561_v50 = vadd.f32 %v12582_v13, %v5392_v63 }
 0x5d6   :  { %v5764_v60 = vpop.f32.mrf.mxu3 }
 0x5d7   :  { %v5675_v59 = vpop.f32.mrf.mxu2  ;;  %v11645_v24 = vadd.f32 %v5764_v60, %v11255_v1  ;;  %v5730_v1 = vadd.f32 %v11469_v46, %v5561_v50  ;;  %v8867_v60 = vld [vmem:[#allocation3 + $0x21c] sm:$0xf] }
 0x5d8   :  { %v11648_v41 = vadd.f32 %v5675_v59, %v11447_v7  ;;  %v5896_v18 = vpop.f32.mrf.mxu1  ;;  %v12584_v7 = vld [vmem:[#allocation53_spill] sm:$0xff] }
 0x5d9   :  { %v11651_v35 = vadd.f32 %v5896_v18, %v5728_v26  ;;  %v7996_v26 = vld [vmem:[#allocation3 + $0x238] sm:$0xf0]  ;;  %v8503_v18 = vor.u32 %v8994_v23, %v8500_v34 }
 0x5da   :  { %12580 = vst [vmem:[#allocation65_spill] sm:$0xff] %v11648_v41  ;;  %v7999_v50 = vor.u32 %v8867_v60, %v7996_v26  ;;  %v5068_v60 = vpop.f32.mrf.mxu0  ;;  %v9002_v26 = vld [vmem:[#allocation3 + $0x654] sm:$0xf] }
 0x5db   :  { %5806 = vmatmul.bf16.gmra.mxu3 %v8471_v19  ;;  %5935 = vmatmul.bf16.gmra.mxu1 %v8219_v54  ;;  %v12586_v54 = vld [vmem:[#allocation39_spill] sm:$0xff] }
 0x5dc   :  { %6064 = vmatmul.bf16.gmra.mxu2 %v7967_v16  ;;  %v8251_v16 = vor.u32 %v8935_v21, %v8250_v22 }
 0x5de   :  { %v5767_v44 = vpop.f32.mrf.mxu3 }
 0x5df   :  { %v5678_v14 = vpop.f32.mrf.mxu2  ;;  %v11656_v53 = vadd.f32 %v5767_v44, %v12583_v43  ;;  %v12589_v43 = vld [vmem:[#allocation108_spill] sm:$0xff] }
 0x5e0   :  { %v11659_v27 = vadd.f32 %v5678_v14, %v12584_v7  ;;  %v5898_v55 = vpop.f32.mrf.mxu1  ;;  %v6321_v14 = vpop.permute.xlu2 %6320 }
 0x5e1   :  { %v11661_v5 = vadd.f32 %v5898_v55, %v5730_v1 }
 0x5e2   :  { %12585 = vst [vmem:[#allocation9_spill] sm:$0xff] %v11659_v27 }
 0x5e6   :  { %v5769_v59 = vpop.f32.mrf.mxu3 }
 0x5e7   :  { %v5680_v19 = vpop.f32.mrf.mxu2  ;;  %v11664_v46 = vadd.f32 %v5769_v59, %v12586_v54  ;;  %v12590_v59 = vld [vmem:[#allocation6_spill] sm:$0xff] }
 0x5e8   :  { %v11667_v63 = vadd.f32 %v5680_v19, %v12587_v3  ;;  %v5901_v13 = vpop.f32.mrf.mxu1  ;;  %v6326_v23 = vperm.slane %v6321_v14, %v12590_v59  ;;  %v8943_v3 = vld [vmem:[#allocation3 + $0x474] sm:$0xf0]  ;;  %v12591_v14 = vld [vmem:[#allocation110_spill] sm:$0xff] }
 0x5e9   :  { %v11670_v44 = vadd.f32 %v5901_v13, %v11481_v31  ;;  %v8875_v13 = vld [vmem:[#allocation3 + $0x25c] sm:$0xf] }
 0x5ea   :  { %12588 = vst [vmem:[#allocation105_spill] sm:$0xff] %v11667_v63  ;;  %v6958_v19 = vunpack.c.l.bf16 %v6326_v23  ;;  %v6330_v63 = vpop.permute.xlu0 %6329 }
 0x5eb   :  { %5811 = vmatmul.bf16.gmra.mxu3 %v8503_v18  ;;  %5940 = vmatmul.bf16.gmra.mxu1 %v8251_v16  ;;  %v8532_v18 = vld [vmem:[#allocation3 + $0x670] sm:$0xf0]  ;;  %v8282_v16 = vld [vmem:[#allocation3 + $0x458] sm:$0xf] }
 0x5ec   :  { %6069 = vmatmul.bf16.gmra.mxu2 %v7999_v50  ;;  %v8028_v50 = vld [vmem:[#allocation3 + $0x278] sm:$0xf0] }
 0x5ee   :  { %v5772_v1 = vpop.f32.mrf.mxu3 }
 0x5ef   :  { %v11673_v7 = vadd.f32 %v5772_v1, %v12589_v43  ;;  %v6030_v55 = vpop.f32.mrf.mxu2 }
 0x5f0   :  { %v6031_v34 = vadd.f32 %v6030_v55, %v11476_v51  ;;  %v5903_v22 = vpop.f32.mrf.mxu1  ;;  %v8535_v55 = vor.u32 %v9002_v26, %v8532_v18  ;;  %v12593_v26 = vld [vmem:[#allocation44_spill] sm:$0xff] }
 0x5f1   :  { %v11678_v21 = vadd.f32 %v5903_v22, %v11493_v61  ;;  %v8283_v61 = vor.u32 %v8943_v3, %v8282_v16  ;;  %v6335_v22 = vperm.slane %v6330_v63, %v12590_v59 }
 0x5f2   :  { %v6190_v31 = vpack.c.bf16 %v6031_v34, %v6031_v34  ;;  %v12592_v34 = vld [vmem:[#allocation86_spill] sm:$0xff] }
 0x5f4   :  { %v6894_v54 = vunpack.c.l.bf16 %v6190_v31  ;;  %v8031_v31 = vor.u32 %v8875_v13, %v8028_v50 }
 0x5f6   :  { %v7022_v1 = vadd.f32 %v6958_v19, %v6894_v54  ;;  %v5774_v43 = vpop.f32.mrf.mxu3  ;;  %v6959_v19 = vunpack.c.l.bf16 %v6335_v22  ;;  %v5071_v54 = vpop.f32.mrf.mxu0  ;;  %v8314_v22 = vld [vmem:[#allocation3 + $0x498] sm:$0xf] }
 0x5f7   :  { %v11681_v27 = vadd.f32 %v5774_v43, %v12591_v14  ;;  %v6032_v51 = vpop.f32.mrf.mxu2 }
 0x5f8   :  { %v6033_v41 = vadd.f32 %v6032_v51, %v12592_v34  ;;  %v5906_v23 = vpop.f32.mrf.mxu1  ;;  %v7214_v16 = vmax.f32 %v7022_v1, 0.0  ;;  %v8951_v34 = vld [vmem:[#allocation3 + $0x4b4] sm:$0xf0]  ;;  %v8883_v1 = vld [vmem:[#allocation3 + $0x29c] sm:$0xf] }
 0x5f9   :  { %v11686_v15 = vadd.f32 %v5906_v23, %v11505_v56  ;;  %v12594_v56 = vld [vmem:[#allocation45_spill] sm:$0xff]  ;;  %v6339_v23 = vpop.permute.xlu1 %6338 }
 0x5fa   :  { %v6191_v10 = vpack.c.bf16 %v6033_v41, %v6033_v41  ;;  %v5069_v51 = vadd.f32 %v5068_v60, %v12594_v56  ;;  %v6348_v60 = vpop.permute.xlu2 %6347 }
 0x5fb   :  { %5816 = vmatmul.bf16.gmra.mxu3 %v8535_v55  ;;  %5945 = vmatmul.bf16.gmra.mxu1 %v8283_v61 }
 0x5fc   :  { %v6895_v12 = vunpack.c.l.bf16 %v6191_v10  ;;  %6074 = vmatmul.bf16.gmra.mxu2 %v8031_v31  ;;  %v9010_v10 = vld [vmem:[#allocation3 + $0x694] sm:$0xf] }
 0x5fd   :  { %v12596_v31 = vld [vmem:[#allocation120_spill] sm:$0xff] }
 0x5fe   :  { %v7023_v43 = vadd.f32 %v6959_v19, %v6895_v12  ;;  %v5777_v14 = vpop.f32.mrf.mxu3  ;;  %v8564_v12 = vld [vmem:[#allocation3 + $0x6b0] sm:$0xf0]  ;;  %v5238_v19 = vadd.f32 %v12596_v31, %v5069_v51 }
 0x5ff   :  { %v11689_v18 = vadd.f32 %v5777_v14, %v12593_v26  ;;  %v6035_v63 = vpop.f32.mrf.mxu2  ;;  %v5073_v14 = vpop.f32.mrf.mxu0  ;;  %v12598_v31 = vld [vmem:[#allocation156_spill] sm:$0xff] }
 0x600   :  { %v7215_v3 = vmax.f32 %v7023_v43, 0.0  ;;  %v6036_v13 = vadd.f32 %v6035_v63, %v11500_v0  ;;  %v5908_v50 = vpop.f32.mrf.mxu1  ;;  %v8060_v43 = vld [vmem:[#allocation3 + $0x2b8] sm:$0xf0]  ;;  %v6344_v0 = vperm.slane %v6339_v23, %v12590_v59  ;;  %v12597_v63 = vld [vmem:[#allocation116_spill] sm:$0xff]  ;;  %v5407_v30 = vadd.f32 %v12598_v31, %v5238_v19 }
 0x601   :  { %v11694_v41 = vadd.f32 %v5908_v50, %v11520_v38  ;;  %v8315_v50 = vor.u32 %v8951_v34, %v8314_v22  ;;  %v8063_v51 = vor.u32 %v8883_v1, %v8060_v43  ;;  %v5072_v23 = vadd.f32 %v5071_v54, %v12599_v36  ;;  %v12602_v36 = vld [vmem:[#allocation69_spill] sm:$0xff]  ;;  %v8596_v31 = vld [vmem:[#allocation3 + $0x6f0] sm:$0xf0] }
 0x602   :  { %v11696_v55 = vpack.c.bf16 %v7215_v3, %v7214_v16  ;;  %v6192_v61 = vpack.c.bf16 %v6036_v13, %v6036_v13  ;;  %v8567_v3 = vor.u32 %v9010_v10, %v8564_v12  ;;  %v6353_v13 = vperm.slane %v6348_v60, %v12590_v59 }
 0x604   :  { %12595 = vst [vmem:[#allocation66_spill] sm:$0xff] %v11696_v55  ;;  %v6896_v56 = vunpack.c.l.bf16 %v6192_v61  ;;  %v6960_v55 = vunpack.c.l.bf16 %v6344_v0  ;;  %v6961_v10 = vunpack.c.l.bf16 %v6353_v13  ;;  %v12600_v61 = vld [vmem:[#allocation123_spill] sm:$0xff] }
 0x605   :  { %v5241_v34 = vadd.f32 %v12600_v61, %v5072_v23  ;;  %v8346_v23 = vld [vmem:[#allocation3 + $0x4d8] sm:$0xf]  ;;  %v12607_v61 = vld [vmem:[#allocation136_spill] sm:$0xff] }
 0x606   :  { %v5779_v26 = vpop.f32.mrf.mxu3  ;;  %v7024_v12 = vadd.f32 %v6960_v55, %v6896_v56 }
 0x607   :  { %v11701_v38 = vadd.f32 %v5779_v26, %v12597_v63  ;;  %v6037_v16 = vpop.f32.mrf.mxu2 }
 0x608   :  { %v6038_v11 = vadd.f32 %v6037_v16, %v11515_v58  ;;  %v5911_v62 = vpop.f32.mrf.mxu1  ;;  %v12601_v58 = vld [vmem:[#allocation89_spill] sm:$0xff] }
 0x609   :  { %v11708_v47 = vadd.f32 %v5911_v62, %v11533_v37  ;;  %v5576_v60 = vadd.f32 %v12601_v58, %v5407_v30  ;;  %v5076_v62 = vpop.f32.mrf.mxu0  ;;  %v12603_v16 = vld [vmem:[#allocation49_spill] sm:$0xff] }
 0x60a   :  { %v6193_v26 = vpack.c.bf16 %v6038_v11, %v6038_v11  ;;  %v7216_v11 = vmax.f32 %v7024_v12, 0.0 }
 0x60b   :  { %5821 = vmatmul.bf16.gmra.mxu3 %v8567_v3  ;;  %5950 = vmatmul.bf16.gmra.mxu1 %v8315_v50  ;;  %v5745_v19 = vadd.f32 %v11543_v8, %v5576_v60  ;;  %v5074_v3 = vadd.f32 %v5073_v14, %v12603_v16  ;;  %v12604_v50 = vld [vmem:[#allocation158_spill] sm:$0xff]  ;;  %v8092_v60 = vld [vmem:[#allocation3 + $0x2f8] sm:$0xf0] }
 0x60c   :  { %v6897_v22 = vunpack.c.l.bf16 %v6193_v26  ;;  %6079 = vmatmul.bf16.gmra.mxu2 %v8063_v51  ;;  %v5410_v13 = vadd.f32 %v12604_v50, %v5241_v34  ;;  %v9018_v51 = vld [vmem:[#allocation3 + $0x6d4] sm:$0xf]  ;;  %v8959_v26 = vld [vmem:[#allocation3 + $0x4f4] sm:$0xf0]  ;;  %v6366_v34 = vpop.permute.xlu1 %6365 }
 0x60e   :  { %v7025_v1 = vadd.f32 %v6961_v10, %v6897_v22  ;;  %v5782_v43 = vpop.f32.mrf.mxu3  ;;  %v6357_v10 = vpop.permute.xlu0 %6356  ;;  %v12606_v22 = vld [vmem:[#allocation126_spill] sm:$0xff]  ;;  %v5579_v58 = vadd.f32 %v12607_v61, %v5410_v13  ;;  %v12609_v13 = vld [vmem:[#allocation159_spill] sm:$0xff] }
 0x60f   :  { %v11714_v54 = vadd.f32 %v5782_v43, %v12602_v36  ;;  %v6040_v37 = vpop.f32.mrf.mxu2  ;;  %v5243_v12 = vadd.f32 %v12606_v22, %v5074_v3  ;;  %v6362_v14 = vperm.slane %v6357_v10, %v12590_v59  ;;  %v12610_v10 = vld [vmem:[#allocation51_spill] sm:$0xff] }
 0x610   :  { %v7217_v0 = vmax.f32 %v7025_v1, 0.0  ;;  %v6041_v63 = vadd.f32 %v6040_v37, %v11527_v6  ;;  %v5913_v55 = vpop.f32.mrf.mxu1  ;;  %v8891_v6 = vld [vmem:[#allocation3 + $0x2dc] sm:$0xf]  ;;  %v5748_v43 = vadd.f32 %v11553_v45, %v5579_v58  ;;  %v5077_v61 = vadd.f32 %v5076_v62, %v12610_v10 }
 0x611   :  { %v11719_v56 = vadd.f32 %v5913_v55, %v5745_v19  ;;  %v12608_v19 = vld [vmem:[#allocation102_spill] sm:$0xff]  ;;  %v8095_v50 = vor.u32 %v8891_v6, %v8092_v60  ;;  %v5412_v22 = vadd.f32 %v12609_v13, %v5243_v12  ;;  %v6962_v45 = vunpack.c.l.bf16 %v6362_v14  ;;  %v5078_v58 = vpop.f32.mrf.mxu0  ;;  %v12613_v62 = vld [vmem:[#allocation17_spill] sm:$0xff] }
 0x612   :  { %v11721_v30 = vpack.c.bf16 %v7217_v0, %v7216_v11  ;;  %v6194_v8 = vpack.c.bf16 %v6041_v63, %v6041_v63  ;;  %v8599_v11 = vor.u32 %v9018_v51, %v8596_v31  ;;  %v8347_v0 = vor.u32 %v8959_v26, %v8346_v23 }
 0x613   :  { %12605 = vst [vmem:[#allocation10_spill] sm:$0xff] %v11719_v56  ;;  %v6371_v63 = vperm.slane %v6366_v34, %v12590_v59 }
 0x614   :  { %v6898_v55 = vunpack.c.l.bf16 %v6194_v8  ;;  %v12611_v8 = vld [vmem:[#allocation130_spill] sm:$0xff] }
 0x615   :  { %v6963_v51 = vunpack.c.l.bf16 %v6371_v63  ;;  %v5246_v26 = vadd.f32 %v12611_v8, %v5077_v61  ;;  %v12614_v63 = vld [vmem:[#allocation52_spill] sm:$0xff]  ;;  %v12618_v8 = vld [vmem:[#allocation31_spill] sm:$0xff] }
 0x616   :  { %v5784_v1 = vpop.f32.mrf.mxu3  ;;  %v7026_v31 = vadd.f32 %v6962_v45, %v6898_v55  ;;  %v5079_v55 = vadd.f32 %v5078_v58, %v12614_v63  ;;  %v8628_v61 = vld [vmem:[#allocation3 + $0x730] sm:$0xf0]  ;;  %v8378_v45 = vld [vmem:[#allocation3 + $0x518] sm:$0xf] }
 0x617   :  { %v11728_v36 = vadd.f32 %v5784_v1, %v12608_v19  ;;  %v6042_v37 = vpop.f32.mrf.mxu2 }
 0x618   :  { %v6043_v16 = vadd.f32 %v6042_v37, %v11540_v40  ;;  %v5916_v3 = vpop.f32.mrf.mxu1  ;;  %v12612_v40 = vld [vmem:[#allocation90_spill] sm:$0xff]  ;;  %v7218_v19 = vmax.f32 %v7026_v31, 0.0  ;;  %v12617_v31 = vld [vmem:[#allocation133_spill] sm:$0xff] }
 0x619   :  { %v11734_v56 = vadd.f32 %v5916_v3, %v5748_v43  ;;  %v5581_v34 = vadd.f32 %v12612_v40, %v5412_v22  ;;  %v9026_v22 = vld [vmem:[#allocation3 + $0x714] sm:$0xf]  ;;  %v5081_v10 = vpop.f32.mrf.mxu0  ;;  %v8899_v40 = vld [vmem:[#allocation3 + $0x31c] sm:$0xf] }
 0x61a   :  { %v6195_v1 = vpack.c.bf16 %v6043_v16, %v6043_v16  ;;  %v12615_v16 = vld [vmem:[#allocation70_spill] sm:$0xff] }
 0x61b   :  { %5826 = vmatmul.bf16.gmra.mxu3 %v8599_v11  ;;  %5955 = vmatmul.bf16.gmra.mxu1 %v8347_v0  ;;  %v5750_v12 = vadd.f32 %v11564_v39, %v5581_v34  ;;  %v5415_v3 = vadd.f32 %v12615_v16, %v5246_v26  ;;  %v8124_v34 = vld [vmem:[#allocation3 + $0x338] sm:$0xf0] }
 0x61c   :  { %v6899_v23 = vunpack.c.l.bf16 %v6195_v1  ;;  %6084 = vmatmul.bf16.gmra.mxu2 %v8095_v50  ;;  %v8967_v1 = vld [vmem:[#allocation3 + $0x534] sm:$0xf0]  ;;  %v8127_v16 = vor.u32 %v8899_v40, %v8124_v34 }
 0x61e   :  { %v7027_v6 = vadd.f32 %v6963_v51, %v6899_v23  ;;  %v5787_v60 = vpop.f32.mrf.mxu3  ;;  %v6375_v51 = vpop.permute.xlu2 %6374  ;;  %v5248_v23 = vadd.f32 %v12617_v31, %v5079_v55 }
 0x61f   :  { %v11740_v43 = vadd.f32 %v5787_v60, %v12613_v62  ;;  %v6045_v14 = vpop.f32.mrf.mxu2  ;;  %v6380_v58 = vperm.slane %v6375_v51, %v12590_v59  ;;  %v12621_v51 = vld [vmem:[#allocation54_spill] sm:$0xff] }
 0x620   :  { %v7219_v37 = vmax.f32 %v7027_v6, 0.0  ;;  %v6046_v11 = vadd.f32 %v6045_v14, %v11550_v28  ;;  %v5918_v0 = vpop.f32.mrf.mxu1  ;;  %v5584_v28 = vadd.f32 %v12618_v8, %v5415_v3  ;;  %v6384_v6 = vpop.permute.xlu0 %6383  ;;  %v12620_v3 = vld [vmem:[#allocation72_spill] sm:$0xff]  ;;  %v5082_v8 = vadd.f32 %v5081_v10, %v12621_v51 }
 0x621   :  { %v11745_v50 = vadd.f32 %v5918_v0, %v5750_v12  ;;  %v12619_v12 = vld [vmem:[#allocation75_spill] sm:$0xff]  ;;  %v5417_v31 = vadd.f32 %v12620_v3, %v5248_v23  ;;  %v12624_v10 = vld [vmem:[#allocation48_spill] sm:$0xff] }
 0x622   :  { %v11747_v13 = vpack.c.bf16 %v7219_v37, %v7218_v19  ;;  %v6196_v39 = vpack.c.bf16 %v6046_v11, %v6046_v11  ;;  %v5753_v60 = vadd.f32 %v11577_v49, %v5584_v28  ;;  %v8631_v19 = vor.u32 %v9026_v22, %v8628_v61 }
 0x623   :  { %12616 = vst [vmem:[#allocation107_spill] sm:$0xff] %v11745_v50  ;;  %v8379_v37 = vor.u32 %v8967_v1, %v8378_v45  ;;  %v6389_v11 = vperm.slane %v6384_v6, %v12590_v59  ;;  %v6964_v49 = vunpack.c.l.bf16 %v6380_v58  ;;  %v12622_v45 = vld [vmem:[#allocation137_spill] sm:$0xff]  ;;  %v12623_v1 = vld [vmem:[#allocation127_spill] sm:$0xff]  ;;  %v5083_v6 = vpop.f32.mrf.mxu0 }
 0x624   :  { %v6900_v0 = vunpack.c.l.bf16 %v6196_v39  ;;  %v5251_v39 = vadd.f32 %v12622_v45, %v5082_v8  ;;  %v8410_v8 = vld [vmem:[#allocation3 + $0x558] sm:$0xf] }
 0x626   :  { %v5789_v26 = vpop.f32.mrf.mxu3  ;;  %v7028_v22 = vadd.f32 %v6964_v49, %v6900_v0  ;;  %v8975_v49 = vld [vmem:[#allocation3 + $0x574] sm:$0xf0] }
 0x627   :  { %v11754_v62 = vadd.f32 %v5789_v26, %v12619_v12  ;;  %v6047_v14 = vpop.f32.mrf.mxu2  ;;  %v6965_v26 = vunpack.c.l.bf16 %v6389_v11  ;;  %v12625_v11 = vld [vmem:[#allocation56_spill] sm:$0xff] }
 0x628   :  { %v6048_v63 = vadd.f32 %v6047_v14, %v11561_v17  ;;  %v5921_v55 = vpop.f32.mrf.mxu1  ;;  %v5586_v17 = vadd.f32 %v12623_v1, %v5417_v31  ;;  %v7220_v12 = vmax.f32 %v7028_v22, 0.0  ;;  %v5084_v0 = vadd.f32 %v5083_v6, %v12625_v11  ;;  %v9034_v31 = vld [vmem:[#allocation3 + $0x754] sm:$0xf]  ;;  %v8156_v1 = vld [vmem:[#allocation3 + $0x378] sm:$0xf0]  ;;  %v12629_v11 = vld [vmem:[#allocation78_spill] sm:$0xff] }
 0x629   :  { %v11760_v50 = vadd.f32 %v5921_v55, %v5753_v60 }
 0x62a   :  { %v6197_v28 = vpack.c.bf16 %v6048_v63, %v6048_v63  ;;  %v5755_v23 = vadd.f32 %v11590_v33, %v5586_v17  ;;  %v12626_v63 = vld [vmem:[#allocation161_spill] sm:$0xff]  ;;  %v8660_v33 = vld [vmem:[#allocation3 + $0x770] sm:$0xf0] }
 0x62b   :  { %5831 = vmatmul.bf16.gmra.mxu3 %v8631_v19  ;;  %5960 = vmatmul.bf16.gmra.mxu1 %v8379_v37  ;;  %v5420_v55 = vadd.f32 %v12626_v63, %v5251_v39  ;;  %v6402_v39 = vpop.permute.xlu2 %6401 }
 0x62c   :  { %v6901_v61 = vunpack.c.l.bf16 %v6197_v28  ;;  %6089 = vmatmul.bf16.gmra.mxu2 %v8127_v16  ;;  %v6393_v28 = vpop.permute.xlu1 %6392 }
 0x62d   :  { %v6398_v17 = vperm.slane %v6393_v28, %v12590_v59 }
 0x62e   :  { %v7029_v40 = vadd.f32 %v6965_v26, %v6901_v61  ;;  %v5792_v34 = vpop.f32.mrf.mxu3  ;;  %v12627_v26 = vld [vmem:[#allocation141_spill] sm:$0xff]  ;;  %v12628_v61 = vld [vmem:[#allocation35_spill] sm:$0xff] }
 0x62f   :  { %v11766_v60 = vadd.f32 %v5792_v34, %v12624_v10  ;;  %v6050_v58 = vpop.f32.mrf.mxu2  ;;  %v5253_v22 = vadd.f32 %v12627_v26, %v5084_v0  ;;  %v5589_v45 = vadd.f32 %v12628_v61, %v5420_v55  ;;  %v8411_v10 = vor.u32 %v8975_v49, %v8410_v8 }
 0x630   :  { %v7221_v14 = vmax.f32 %v7029_v40, 0.0  ;;  %v6051_v19 = vadd.f32 %v6050_v58, %v11573_v2  ;;  %v5923_v37 = vpop.f32.mrf.mxu1  ;;  %v8907_v2 = vld [vmem:[#allocation3 + $0x35c] sm:$0xf]  ;;  %v6407_v58 = vperm.slane %v6402_v39, %v12590_v59  ;;  %v6966_v55 = vunpack.c.l.bf16 %v6398_v17 }
 0x631   :  { %v11771_v16 = vadd.f32 %v5923_v37, %v5755_v23  ;;  %v5758_v40 = vadd.f32 %v11603_v9, %v5589_v45  ;;  %v8663_v23 = vor.u32 %v9034_v31, %v8660_v33  ;;  %v8159_v37 = vor.u32 %v8907_v2, %v8156_v1  ;;  %v12630_v31 = vld [vmem:[#allocation119_spill] sm:$0xff] }
 0x632   :  { %v11773_v3 = vpack.c.bf16 %v7221_v14, %v7220_v12  ;;  %v6198_v51 = vpack.c.bf16 %v6051_v19, %v6051_v19  ;;  %v5422_v0 = vadd.f32 %v12629_v11, %v5253_v22  ;;  %v6967_v26 = vunpack.c.l.bf16 %v6407_v58  ;;  %v8983_v58 = vld [vmem:[#allocation3 + $0x5b4] sm:$0xf0] }
 0x634   :  { %v6902_v12 = vunpack.c.l.bf16 %v6198_v51  ;;  %v5591_v33 = vadd.f32 %v12630_v31, %v5422_v0  ;;  %v6420_v11 = vpop.permute.xlu1 %6419 }
 0x636   :  { %v11778_v6 = vpop.f32.mrf.mxu3  ;;  %v7030_v9 = vadd.f32 %v6966_v55, %v6902_v12  ;;  %v6411_v12 = vpop.permute.xlu0 %6410 }
 0x637   :  { %v6052_v34 = vpop.f32.mrf.mxu2 }
 0x638   :  { %v6053_v14 = vadd.f32 %v6052_v34, %v11586_v32  ;;  %v5926_v19 = vpop.f32.mrf.mxu1  ;;  %v5760_v32 = vadd.f32 %v11616_v52, %v5591_v33  ;;  %v7222_v45 = vmax.f32 %v7030_v9, 0.0  ;;  %v6416_v52 = vperm.slane %v6411_v12, %v12590_v59  ;;  %v9050_v12 = vld [vmem:[#allocation3 + $0x7d4] sm:$0xf] }
 0x639   :  { %v11784_v63 = vadd.f32 %v5926_v19, %v5758_v40  ;;  %v9042_v40 = vld [vmem:[#allocation3 + $0x794] sm:$0xf]  ;;  %v8188_v19 = vld [vmem:[#allocation3 + $0x3b8] sm:$0xf0] }
 0x63a   :  { %v6199_v28 = vpack.c.bf16 %v6053_v14, %v6053_v14  ;;  %v8915_v14 = vld [vmem:[#allocation3 + $0x39c] sm:$0xf] }
 0x63b   :  { %5836 = vmatmul.bf16.gmra.mxu3 %v8663_v23  ;;  %5965 = vmatmul.bf16.gmra.mxu1 %v8411_v10  ;;  %v8692_v23 = vld [vmem:[#allocation3 + $0x7b0] sm:$0xf0]  ;;  %v8442_v10 = vld [vmem:[#allocation3 + $0x598] sm:$0xf]  ;;  %v8191_v31 = vor.u32 %v8915_v14, %v8188_v19 }
 0x63c   :  { %v6903_v61 = vunpack.c.l.bf16 %v6199_v28  ;;  %6094 = vmatmul.bf16.gmra.mxu2 %v8159_v37  ;;  %v8443_v55 = vor.u32 %v8983_v58, %v8442_v10  ;;  %v6425_v28 = vperm.slane %v6420_v11, %v12590_v59  ;;  %v8724_v19 = vld [vmem:[#allocation3 + $0x7f0] sm:$0xf0]  ;;  %v8991_v11 = vld [vmem:[#allocation3 + $0x5f4] sm:$0xf0] }
 0x63e   :  { %v7031_v8 = vadd.f32 %v6967_v26, %v6903_v61  ;;  %v11787_v51 = vpop.f32.mrf.mxu3 }
 0x63f   :  { %v6055_v49 = vpop.f32.mrf.mxu2 }
 0x640   :  { %v7223_v22 = vmax.f32 %v7031_v8, 0.0  ;;  %v6056_v2 = vadd.f32 %v6055_v49, %v11599_v57  ;;  %v5928_v1 = vpop.f32.mrf.mxu1  ;;  %v8695_v57 = vor.u32 %v9042_v40, %v8692_v23  ;;  %v6968_v8 = vunpack.c.l.bf16 %v6416_v52  ;;  %v8474_v52 = vld [vmem:[#allocation3 + $0x5d8] sm:$0xf] }
 0x641   :  { %v11791_v17 = vadd.f32 %v5928_v1, %v5760_v32  ;;  %v6969_v49 = vunpack.c.l.bf16 %v6425_v28  ;;  %v8220_v28 = vld [vmem:[#allocation3 + $0x3f8] sm:$0xf0] }
 0x642   :  { %v11793_v39 = vpack.c.bf16 %v7223_v22, %v7222_v45  ;;  %v6200_v34 = vpack.c.bf16 %v6056_v2, %v6056_v2 }
 0x644   :  { %v6904_v26 = vunpack.c.l.bf16 %v6200_v34 }
 0x646   :  { %v11796_v37 = vpop.f32.mrf.mxu3  ;;  %v7032_v45 = vadd.f32 %v6968_v8, %v6904_v26 }
 0x647   :  { %v6057_v0 = vpop.f32.mrf.mxu2 }
 0x648   :  { %v6058_v9 = vadd.f32 %v6057_v0, %v11612_v4  ;;  %v5931_v61 = vpop.f32.mrf.mxu1  ;;  %v7224_v34 = vmax.f32 %v7032_v45, 0.0  ;;  %v6438_v0 = vpop.permute.xlu0 %6437 }
 0x649   :  { %v11801_v33 = vadd.f32 %v5931_v61, %v11631_v29  ;;  %v8727_v61 = vor.u32 %v9050_v12, %v8724_v19  ;;  %v6447_v19 = vpop.permute.xlu1 %6446 }
 0x64a   :  { %v6201_v32 = vpack.c.bf16 %v6058_v9, %v6058_v9 }
 0x64b   :  { %5841 = vmatmul.bf16.gmra.mxu3 %v8695_v57  ;;  %5970 = vmatmul.bf16.gmra.mxu1 %v8443_v55  ;;  %v6429_v57 = vpop.permute.xlu2 %6428  ;;  %v8923_v55 = vld [vmem:[#allocation3 + $0x3dc] sm:$0xf] }
 0x64c   :  { %v6905_v22 = vunpack.c.l.bf16 %v6201_v32  ;;  %6099 = vmatmul.bf16.gmra.mxu2 %v8191_v31  ;;  %v6434_v26 = vperm.slane %v6429_v57, %v12590_v59  ;;  %v8475_v31 = vor.u32 %v8991_v11, %v8474_v52  ;;  %v8223_v45 = vor.u32 %v8923_v55, %v8220_v28  ;;  %v8506_v28 = vld [vmem:[#allocation3 + $0x618] sm:$0xf] }
 0x64e   :  { %v7033_v2 = vadd.f32 %v6969_v49, %v6905_v22  ;;  %v11803_v1 = vpop.f32.mrf.mxu3 }
 0x64f   :  { %v6060_v40 = vpop.f32.mrf.mxu2 }
 0x650   :  { %v7225_v23 = vmax.f32 %v7033_v2, 0.0  ;;  %v6061_v4 = vadd.f32 %v6060_v40, %v11625_v48  ;;  %v5933_v10 = vpop.f32.mrf.mxu1  ;;  %v6970_v2 = vunpack.c.l.bf16 %v6434_v26  ;;  %v8999_v26 = vld [vmem:[#allocation3 + $0x634] sm:$0xf0] }
 0x651   :  { %v11807_v29 = vadd.f32 %v5933_v10, %v11645_v24  ;;  %v6443_v24 = vperm.slane %v6438_v0, %v12590_v59 }
 0x652   :  { %v11809_v58 = vpack.c.bf16 %v7225_v23, %v7224_v34  ;;  %v6202_v14 = vpack.c.bf16 %v6061_v4, %v6061_v4 }
 0x653   :  { %v6971_v34 = vunpack.c.l.bf16 %v6443_v24  ;;  %v6456_v24 = vpop.permute.xlu2 %6455 }
 0x654   :  { %v6906_v8 = vunpack.c.l.bf16 %v6202_v14 }
 0x656   :  { %v11812_v9 = vpop.f32.mrf.mxu3  ;;  %v7034_v23 = vadd.f32 %v6970_v2, %v6906_v8 }
 0x657   :  { %12631 = vst [vmem:[#allocation37_spill] sm:$0xff] %v11812_v9  ;;  %v6062_v48 = vpop.f32.mrf.mxu2 }
 0x658   :  { %v6063_v32 = vadd.f32 %v6062_v48, %v11639_v25  ;;  %v5936_v49 = vpop.f32.mrf.mxu1  ;;  %v7226_v52 = vmax.f32 %v7034_v23, 0.0  ;;  %v8931_v48 = vld [vmem:[#allocation3 + $0x41c] sm:$0xf]  ;;  %v6474_v23 = vpop.permute.xlu1 %6473 }
 0x659   :  { %v11817_v22 = vadd.f32 %v5936_v49, %v11656_v53 }
 0x65a   :  { %v6203_v40 = vpack.c.bf16 %v6063_v32, %v6063_v32  ;;  %v6465_v32 = vpop.permute.xlu0 %6464 }
 0x65b   :  { %5846 = vmatmul.bf16.gmra.mxu3 %v8727_v61  ;;  %5975 = vmatmul.bf16.gmra.mxu1 %v8475_v31  ;;  %v8252_v61 = vld [vmem:[#allocation3 + $0x438] sm:$0xf0]  ;;  %v6452_v31 = vperm.slane %v6447_v19, %v12590_v59 }
 0x65c   :  { %v6907_v4 = vunpack.c.l.bf16 %v6203_v40  ;;  %6104 = vmatmul.bf16.gmra.mxu2 %v8223_v45  ;;  %v8507_v45 = vor.u32 %v8999_v26, %v8506_v28  ;;  %v12634_v28 = vld [vmem:[#allocation25_spill] sm:$0xff] }
 0x65e   :  { %v7035_v10 = vadd.f32 %v6971_v34, %v6907_v4  ;;  %v11819_v12 = vpop.f32.mrf.mxu3  ;;  %v8255_v34 = vor.u32 %v8931_v48, %v8252_v61 }
 0x65f   :  { %12632 = vst [vmem:[#allocation104_spill] sm:$0xff] %v11819_v12  ;;  %v6065_v14 = vpop.f32.mrf.mxu2 }
 0x660   :  { %v7227_v25 = vmax.f32 %v7035_v10, 0.0  ;;  %v6066_v11 = vadd.f32 %v6065_v14, %v11651_v35  ;;  %v5938_v0 = vpop.f32.mrf.mxu1  ;;  %v6461_v35 = vperm.slane %v6456_v24, %v12590_v59  ;;  %v6972_v10 = vunpack.c.l.bf16 %v6452_v31 }
 0x661   :  { %v11823_v53 = vadd.f32 %v5938_v0, %v11664_v46 }
 0x662   :  { %v7284_v57 = vpack.c.bf16 %v7227_v25, %v7226_v52  ;;  %v6204_v55 = vpack.c.bf16 %v6066_v11, %v6066_v11  ;;  %v6973_v19 = vunpack.c.l.bf16 %v6461_v35 }
 0x664   :  { %v6908_v2 = vunpack.c.l.bf16 %v6204_v55 }
 0x666   :  { %v11826_v8 = vpop.f32.mrf.mxu3  ;;  %v7036_v52 = vadd.f32 %v6972_v10, %v6908_v2  ;;  %v8538_v2 = vld [vmem:[#allocation3 + $0x658] sm:$0xf]  ;;  %v6470_v10 = vperm.slane %v6465_v32, %v12590_v59 }
 0x667   :  { %12633 = vst [vmem:[#allocation67_spill] sm:$0xff] %v11826_v8  ;;  %v6067_v49 = vpop.f32.mrf.mxu2 }
 0x668   :  { %v6068_v46 = vadd.f32 %v6067_v49, %v11661_v5  ;;  %v5941_v40 = vpop.f32.mrf.mxu1  ;;  %v7228_v5 = vmax.f32 %v7036_v52, 0.0 }
 0x669   :  { %v11831_v4 = vadd.f32 %v5941_v40, %v11673_v7  ;;  %v11837_v7 = vpop.permute.xlu0 %6491  ;;  %v8939_v40 = vld [vmem:[#allocation3 + $0x45c] sm:$0xf] }
 0x66a   :  { %v6205_v14 = vpack.c.bf16 %v6068_v46, %v6068_v46  ;;  %v9007_v46 = vld [vmem:[#allocation3 + $0x674] sm:$0xf0] }
 0x66b   :  { %5980 = vmatmul.bf16.gmra.mxu1 %v8507_v45  ;;  %v11842_v45 = vpop.permute.xlu1 %6500 }
 0x66c   :  { %v6909_v25 = vunpack.c.l.bf16 %v6205_v14  ;;  %6109 = vmatmul.bf16.gmra.mxu2 %v8255_v34  ;;  %v8284_v34 = vld [vmem:[#allocation3 + $0x478] sm:$0xf0] }
 0x66e   :  { %v7037_v11 = vadd.f32 %v6973_v19, %v6909_v25  ;;  %v5812_v0 = vpop.f32.mrf.mxu3  ;;  %v12635_v19 = vld [vmem:[#allocation57_spill] sm:$0xff]  ;;  %v8539_v25 = vor.u32 %v9007_v46, %v8538_v2 }
 0x66f   :  { %v11834_v26 = vadd.f32 %v5812_v0, %v12634_v28  ;;  %v6070_v55 = vpop.f32.mrf.mxu2 }
 0x670   :  { %v7229_v24 = vmax.f32 %v7037_v11, 0.0  ;;  %v6071_v48 = vadd.f32 %v6070_v55, %v11670_v44  ;;  %v5943_v61 = vpop.f32.mrf.mxu1  ;;  %v8287_v55 = vor.u32 %v8939_v40, %v8284_v34 }
 0x671   :  { %v11840_v31 = vadd.f32 %v5943_v61, %v11681_v27  ;;  %v6479_v27 = vperm.slane %v6474_v23, %v12590_v59  ;;  %v11853_v32 = vpop.permute.xlu0 %6518 }
 0x672   :  { %v7285_v49 = vpack.c.bf16 %v7229_v24, %v7228_v5  ;;  %v6206_v35 = vpack.c.bf16 %v6071_v48, %v6071_v48  ;;  %v6974_v24 = vunpack.c.l.bf16 %v6470_v10 }
 0x673   :  { %v6975_v61 = vunpack.c.l.bf16 %v6479_v27  ;;  %v11856_v23 = vpop.permute.xlu1 %6527  ;;  %v9015_v27 = vld [vmem:[#allocation3 + $0x6b4] sm:$0xf0] }
 0x674   :  { %7326 = vmatpush.bf16.msrb.mxu3 %v7285_v49  ;;  %v6910_v11 = vunpack.c.l.bf16 %v6206_v35  ;;  %v12636_v35 = vld [vmem:[#allocation29_spill] sm:$0xff] }
 0x676   :  { %v5814_v14 = vpop.f32.mrf.mxu3  ;;  %v7038_v49 = vadd.f32 %v6974_v24, %v6910_v11  ;;  %v6483_v11 = vpop.permute.xlu2 %6482 }
 0x677   :  { %v11846_v44 = vadd.f32 %v5814_v14, %v12635_v19  ;;  %v6072_v52 = vpop.f32.mrf.mxu2 }
 0x678   :  { %v6073_v0 = vadd.f32 %v6072_v52, %v11678_v21  ;;  %7327 = vmatpush.bf16.msrb.mxu3 %v7284_v57  ;;  %v5946_v28 = vpop.f32.mrf.mxu1  ;;  %v7230_v46 = vmax.f32 %v7038_v49, 0.0 }
 0x679   :  { %v11851_v5 = vadd.f32 %v5946_v28, %v11689_v18  ;;  %v8947_v28 = vld [vmem:[#allocation3 + $0x49c] sm:$0xf] }
 0x67a   :  { %v6207_v48 = vpack.c.bf16 %v6073_v0, %v6073_v0  ;;  %v11869_v0 = vpop.permute.xlu0 %6545 }
 0x67b   :  { %5985 = vmatmul.bf16.gmra.mxu1 %v8539_v25  ;;  %v8570_v25 = vld [vmem:[#allocation3 + $0x698] sm:$0xf] }
 0x67c   :  { %v6911_v14 = vunpack.c.l.bf16 %v6207_v48  ;;  %6114 = vmatmul.bf16.gmra.mxu2 %v8287_v55  ;;  %7328 = vmatpush.bf16.msrb.mxu3 %v11809_v58  ;;  %v8316_v55 = vld [vmem:[#allocation3 + $0x4b8] sm:$0xf0] }
 0x67e   :  { %v7039_v21 = vadd.f32 %v6975_v61, %v6911_v14  ;;  %v5817_v57 = vpop.f32.mrf.mxu3  ;;  %v8571_v61 = vor.u32 %v9015_v27, %v8570_v25 }
 0x67f   :  { %v11859_v2 = vadd.f32 %v5817_v57, %v12636_v35  ;;  %v6075_v18 = vpop.f32.mrf.mxu2  ;;  %v8319_v57 = vor.u32 %v8947_v28, %v8316_v55 }
 0x680   :  { %v7231_v40 = vmax.f32 %v7039_v21, 0.0  ;;  %v6076_v34 = vadd.f32 %v6075_v18, %v11686_v15  ;;  %7329 = vmatpush.bf16.msrb.mxu3 %v11793_v39  ;;  %v5948_v10 = vpop.f32.mrf.mxu1  ;;  %v6488_v15 = vperm.slane %v6483_v11, %v12590_v59  ;;  %v11872_v39 = vpop.permute.xlu1 %6554  ;;  %v12637_v11 = vld [vmem:[#allocation66_spill] sm:$0xff] }
 0x681   :  { %v11864_v19 = vadd.f32 %v5948_v10, %v11701_v38 }
 0x682   :  { %v11866_v52 = vpack.c.bf16 %v7231_v40, %v7230_v46  ;;  %v6208_v58 = vpack.c.bf16 %v6076_v34, %v6076_v34  ;;  %v6976_v18 = vunpack.c.l.bf16 %v6488_v15 }
 0x684   :  { %7330 = vmatpush.bf16.msrb.mxu3 %v11773_v3  ;;  %v6497_v3 = vperm.slane %v11837_v7, %v12590_v59  ;;  %v6912_v49 = vunpack.c.l.bf16 %v6208_v58  ;;  %v11885_v58 = vpop.permute.xlu0 %6599 }
 0x686   :  { %v5819_v24 = vpop.f32.mrf.mxu3  ;;  %v7040_v40 = vadd.f32 %v6976_v18, %v6912_v49  ;;  %v8348_v49 = vld [vmem:[#allocation3 + $0x4f8] sm:$0xf0] }
 0x687   :  { %v11875_v38 = vadd.f32 %v5819_v24, %v11523_v42  ;;  %v6077_v48 = vpop.f32.mrf.mxu2  ;;  %v6977_v42 = vunpack.c.l.bf16 %v6497_v3  ;;  %v8955_v3 = vld [vmem:[#allocation3 + $0x4dc] sm:$0xf] }
 0x688   :  { %v6078_v14 = vadd.f32 %v6077_v48, %v11694_v41  ;;  %7331 = vmatpush.bf16.msrb.mxu3 %v11747_v13  ;;  %v5951_v21 = vpop.f32.mrf.mxu1  ;;  %v7232_v25 = vmax.f32 %v7040_v40, 0.0  ;;  %v11892_v55 = vpop.permute.xlu1 %6572  ;;  %v8602_v48 = vld [vmem:[#allocation3 + $0x6d8] sm:$0xf]  ;;  %v12639_v40 = vld [vmem:[#allocation10_spill] sm:$0xff] }
 0x689   :  { %v11882_v35 = vadd.f32 %v5951_v21, %v11714_v54  ;;  %v12638_v21 = vld [vmem:[#allocation92_spill] sm:$0xff] }
 0x68a   :  { %v6209_v46 = vpack.c.bf16 %v6078_v14, %v6078_v14  ;;  %v6506_v14 = vperm.slane %v11842_v45, %v12590_v59 }
 0x68b   :  { %5990 = vmatmul.bf16.gmra.mxu1 %v8571_v61  ;;  %v9023_v61 = vld [vmem:[#allocation3 + $0x6f4] sm:$0xf0] }
 0x68c   :  { %v6913_v34 = vunpack.c.l.bf16 %v6209_v46  ;;  %6119 = vmatmul.bf16.gmra.mxu2 %v8319_v57  ;;  %7332 = vmatpush.bf16.msrb.mxu3 %v11721_v30  ;;  %v8603_v46 = vor.u32 %v9023_v61, %v8602_v48 }
 0x68e   :  { %v7041_v7 = vadd.f32 %v6977_v42, %v6913_v34  ;;  %v5822_v10 = vpop.f32.mrf.mxu3 }
 0x68f   :  { %v11888_v41 = vadd.f32 %v5822_v10, %v11536_v20  ;;  %v6080_v13 = vpop.f32.mrf.mxu2  ;;  %v6510_v20 = vpop.permute.xlu2 %6509  ;;  %v8351_v10 = vor.u32 %v8955_v3, %v8348_v49 }
 0x690   :  { %v7233_v54 = vmax.f32 %v7041_v7, 0.0  ;;  %v6081_v27 = vadd.f32 %v6080_v13, %v11708_v47  ;;  %7333 = vmatpush.bf16.msrb.mxu3 %v12637_v11  ;;  %v5953_v28 = vpop.f32.mrf.mxu1  ;;  %v11906_v13 = vpop.permute.xlu0 %6563 }
 0x691   :  { %v11895_v15 = vadd.f32 %v5953_v28, %v11728_v36  ;;  %v6515_v36 = vperm.slane %v6510_v20, %v12590_v59 }
 0x692   :  { %v11897_v30 = vpack.c.bf16 %v7233_v54, %v7232_v25  ;;  %v6210_v24 = vpack.c.bf16 %v6081_v27, %v6081_v27  ;;  %v6978_v54 = vunpack.c.l.bf16 %v6506_v14  ;;  %v11911_v27 = vpop.permute.xlu1 %6734 }
 0x693   :  { %12640 = vst [vmem:[#allocation151_spill] sm:$0xff] %v11911_v27  ;;  %v6979_v11 = vunpack.c.l.bf16 %v6515_v36 }
 0x694   :  { %v6914_v42 = vunpack.c.l.bf16 %v6210_v24 }
 0x696   :  { %v5824_v47 = vpop.f32.mrf.mxu3  ;;  %v7042_v28 = vadd.f32 %v6978_v54, %v6914_v42  ;;  %v8963_v54 = vld [vmem:[#allocation3 + $0x51c] sm:$0xf] }
 0x697   :  { %v11902_v57 = vadd.f32 %v5824_v47, %v12638_v21  ;;  %v6082_v18 = vpop.f32.mrf.mxu2  ;;  %v6537_v20 = vpop.permute.xlu2 %6536  ;;  %v12641_v47 = vld [vmem:[#allocation59_spill] sm:$0xff] }
 0x698   :  { %v6083_v34 = vadd.f32 %v6082_v18, %v12639_v40  ;;  %v5956_v7 = vpop.f32.mrf.mxu1  ;;  %v7234_v49 = vmax.f32 %v7042_v28, 0.0  ;;  %v11922_v36 = vpop.permute.xlu0 %6716 }
 0x699   :  { %v11909_v25 = vadd.f32 %v5956_v7, %v11740_v43  ;;  %12642 = vst [vmem:[#allocation12_spill] sm:$0xff] %v11922_v36  ;;  %v9031_v7 = vld [vmem:[#allocation3 + $0x734] sm:$0xf0] }
 0x69a   :  { %v6211_v45 = vpack.c.bf16 %v6083_v34, %v6083_v34  ;;  %v8634_v34 = vld [vmem:[#allocation3 + $0x718] sm:$0xf] }
 0x69b   :  { %5995 = vmatmul.bf16.gmra.mxu1 %v8603_v46 }
 0x69c   :  { %v6915_v48 = vunpack.c.l.bf16 %v6211_v45  ;;  %6124 = vmatmul.bf16.gmra.mxu2 %v8351_v10  ;;  %v11924_v10 = vpop.permute.xlu1 %6725  ;;  %v8380_v45 = vld [vmem:[#allocation3 + $0x538] sm:$0xf0] }
 0x69d   :  { %12643 = vst [vmem:[#allocation111_spill] sm:$0xff] %v11924_v10 }
 0x69e   :  { %v7043_v61 = vadd.f32 %v6979_v11, %v6915_v48  ;;  %v5827_v24 = vpop.f32.mrf.mxu3  ;;  %v6524_v11 = vperm.slane %v11853_v32, %v12590_v59 }
 0x69f   :  { %v11914_v21 = vadd.f32 %v5827_v24, %v12641_v47  ;;  %v6085_v3 = vpop.f32.mrf.mxu2  ;;  %v6533_v24 = vperm.slane %v11856_v23, %v12590_v59 }
 0x6a0   :  { %v7235_v18 = vmax.f32 %v7043_v61, 0.0  ;;  %v6086_v43 = vadd.f32 %v6085_v3, %v11734_v56  ;;  %v5958_v14 = vpop.f32.mrf.mxu1  ;;  %v12644_v56 = vld [vmem:[#allocation7_spill] sm:$0xff]  ;;  %v8635_v61 = vor.u32 %v9031_v7, %v8634_v34  ;;  %v6980_v32 = vunpack.c.l.bf16 %v6524_v11  ;;  %v11939_v34 = vpop.permute.xlu0 %6887 }
 0x6a1   :  { %v11918_v40 = vadd.f32 %v5958_v14, %v11754_v62  ;;  %v12645_v3 = vld [vmem:[#allocation107_spill] sm:$0xff]  ;;  %v11934_v14 = vpop.permute.xlu2 %6590  ;;  %12646 = vst [vmem:[#allocation71_spill] sm:$0xff] %v11939_v34 }
 0x6a2   :  { %v11920_v46 = vpack.c.bf16 %v7235_v18, %v7234_v49  ;;  %v6212_v42 = vpack.c.bf16 %v6086_v43, %v6086_v43  ;;  %v8383_v43 = vor.u32 %v8963_v54, %v8380_v45 }
 0x6a4   :  { %v6916_v47 = vunpack.c.l.bf16 %v6212_v42  ;;  %v11941_v7 = vpop.permute.xlu1 %6698 }
 0x6a6   :  { %v5829_v28 = vpop.f32.mrf.mxu3 }
 0x6a7   :  { %v11929_v48 = vadd.f32 %v5829_v28, %v12644_v56  ;;  %v6087_v62 = vpop.f32.mrf.mxu2  ;;  %v6981_v28 = vunpack.c.l.bf16 %v6533_v24  ;;  %v7044_v56 = vadd.f32 %v6980_v32, %v6916_v47  ;;  %v8666_v47 = vld [vmem:[#allocation3 + $0x758] sm:$0xf]  ;;  %v6542_v32 = vperm.slane %v6537_v20, %v12590_v59 }
 0x6a8   :  { %v6088_v49 = vadd.f32 %v6087_v62, %v12645_v3  ;;  %v5961_v18 = vpop.f32.mrf.mxu1  ;;  %v12647_v62 = vld [vmem:[#allocation62_spill] sm:$0xff] }
 0x6a9   :  { %v11937_v27 = vadd.f32 %v5961_v18, %v11766_v60  ;;  %v7236_v3 = vmax.f32 %v7044_v56, 0.0  ;;  %v8971_v18 = vld [vmem:[#allocation3 + $0x55c] sm:$0xf] }
 0x6aa   :  { %v6213_v8 = vpack.c.bf16 %v6088_v49, %v6088_v49 }
 0x6ab   :  { %6000 = vmatmul.bf16.gmra.mxu1 %v8635_v61 }
 0x6ac   :  { %v6917_v12 = vunpack.c.l.bf16 %v6213_v8  ;;  %6129 = vmatmul.bf16.gmra.mxu2 %v8383_v43  ;;  %v11951_v8 = vpop.permute.xlu2 %6581  ;;  %v8412_v43 = vld [vmem:[#allocation3 + $0x578] sm:$0xf0] }
 0x6ae   :  { %v7045_v23 = vadd.f32 %v6981_v28, %v6917_v12  ;;  %v5832_v42 = vpop.f32.mrf.mxu3  ;;  %v9039_v12 = vld [vmem:[#allocation3 + $0x774] sm:$0xf0]  ;;  %v11954_v28 = vpop.permute.xlu0 %6860 }
 0x6af   :  { %v11944_v54 = vadd.f32 %v5832_v42, %v12647_v62  ;;  %v6090_v45 = vpop.f32.mrf.mxu2  ;;  %12648 = vst [vmem:[#allocation153_spill] sm:$0xff] %v11954_v28  ;;  %v8667_v56 = vor.u32 %v9039_v12, %v8666_v47 }
 0x6b0   :  { %v7237_v60 = vmax.f32 %v7045_v23, 0.0  ;;  %v6091_v11 = vadd.f32 %v6090_v45, %v11760_v50  ;;  %v11947_v49 = vpop.f32.mrf.mxu1  ;;  %v6551_v50 = vperm.slane %v11869_v0, %v12590_v59 }
 0x6b2   :  { %v11949_v61 = vpack.c.bf16 %v7237_v60, %v7236_v3  ;;  %v6214_v24 = vpack.c.bf16 %v6091_v11, %v6091_v11  ;;  %v8415_v3 = vor.u32 %v8971_v18, %v8412_v43  ;;  %v11961_v60 = vpop.permute.xlu1 %6869  ;;  %v6982_v11 = vunpack.c.l.bf16 %v6542_v32 }
 0x6b3   :  { %12649 = vst [vmem:[#allocation114_spill] sm:$0xff] %v11961_v60  ;;  %v6983_v10 = vunpack.c.l.bf16 %v6551_v50  ;;  %v8698_v50 = vld [vmem:[#allocation3 + $0x798] sm:$0xf] }
 0x6b4   :  { %v6918_v23 = vunpack.c.l.bf16 %v6214_v24  ;;  %v11963_v28 = vpop.permute.xlu2 %6743 }
 0x6b5   :  { %12650 = vst [vmem:[#allocation41_spill] sm:$0xff] %v11963_v28 }
 0x6b6   :  { %v7046_v20 = vadd.f32 %v6982_v11, %v6918_v23  ;;  %v11968_v18 = vpop.permute.xlu0 %6689  ;;  %v8979_v23 = vld [vmem:[#allocation3 + $0x59c] sm:$0xf]  ;;  %v6569_v11 = vperm.slane %v11906_v13, %v12590_v59 }
 0x6b7   :  { %v6092_v42 = vpop.f32.mrf.mxu2 }
 0x6b8   :  { %v6093_v62 = vadd.f32 %v6092_v42, %v11771_v16  ;;  %v11959_v45 = vpop.f32.mrf.mxu1  ;;  %v7238_v0 = vmax.f32 %v7046_v20, 0.0 }
 0x6ba   :  { %v6215_v34 = vpack.c.bf16 %v6093_v62, %v6093_v62  ;;  %v11972_v32 = vpop.permute.xlu1 %6842  ;;  %v8444_v62 = vld [vmem:[#allocation3 + $0x5b8] sm:$0xf0] }
 0x6bb   :  { %6005 = vmatmul.bf16.gmra.mxu1 %v8667_v56  ;;  %12651 = vst [vmem:[#allocation112_spill] sm:$0xff] %v11972_v32  ;;  %v6985_v32 = vunpack.c.l.bf16 %v6569_v11  ;;  %v9055_v11 = vld [vmem:[#allocation3 + $0x7f4] sm:$0xf0] }
 0x6bc   :  { %v6919_v36 = vunpack.c.l.bf16 %v6215_v34  ;;  %6134 = vmatmul.bf16.gmra.mxu2 %v8415_v3  ;;  %v9047_v34 = vld [vmem:[#allocation3 + $0x7b4] sm:$0xf0] }
 0x6be   :  { %v7047_v47 = vadd.f32 %v6983_v10, %v6919_v36  ;;  %v6560_v36 = vperm.slane %v11872_v39, %v12590_v59  ;;  %v11976_v10 = vpop.permute.xlu2 %6878  ;;  %v11983_v60 = vpop.permute.xlu0 %6662 }
 0x6bf   :  { %v6095_v12 = vpop.f32.mrf.mxu2  ;;  %12652 = vst [vmem:[#allocation155_spill] sm:$0xff] %v11976_v10 }
 0x6c0   :  { %v7239_v24 = vmax.f32 %v7047_v47, 0.0  ;;  %v6096_v16 = vadd.f32 %v6095_v12, %v11784_v63  ;;  %v11966_v42 = vpop.f32.mrf.mxu1  ;;  %v8699_v63 = vor.u32 %v9047_v34, %v8698_v50 }
 0x6c2   :  { %v11970_v43 = vpack.c.bf16 %v7239_v24, %v7238_v0  ;;  %v6216_v56 = vpack.c.bf16 %v6096_v16, %v6096_v16  ;;  %v8447_v0 = vor.u32 %v8979_v23, %v8444_v62  ;;  %v6984_v24 = vunpack.c.l.bf16 %v6560_v36  ;;  %v11985_v10 = vpop.permute.xlu1 %6671 }
 0x6c4   :  { %v6920_v20 = vunpack.c.l.bf16 %v6216_v56 }
 0x6c6   :  { %v7048_v39 = vadd.f32 %v6984_v24, %v6920_v20  ;;  %v11990_v23 = vpop.permute.xlu2 %6707  ;;  %v11994_v20 = vpop.permute.xlu0 %6833 }
 0x6c7   :  { %v6097_v3 = vpop.f32.mrf.mxu2  ;;  %12655 = vst [vmem:[#allocation122_spill] sm:$0xff] %v11994_v20 }
 0x6c8   :  { %v6098_v47 = vadd.f32 %v6097_v3, %v11791_v17  ;;  %v11981_v12 = vpop.f32.mrf.mxu1  ;;  %v7240_v13 = vmax.f32 %v7048_v39, 0.0 }
 0x6c9   :  { %12653 = vst [vmem:[#allocation16_spill] sm:$0xff] %v11981_v12 }
 0x6ca   :  { %v6217_v16 = vpack.c.bf16 %v6098_v47, %v6098_v47  ;;  %v8987_v47 = vld [vmem:[#allocation3 + $0x5dc] sm:$0xf] }
 0x6cb   :  { %6010 = vmatmul.bf16.gmra.mxu1 %v8699_v63  ;;  %v8730_v63 = vld [vmem:[#allocation3 + $0x7d8] sm:$0xf] }
 0x6cc   :  { %v6921_v28 = vunpack.c.l.bf16 %v6217_v16  ;;  %6139 = vmatmul.bf16.gmra.mxu2 %v8447_v0  ;;  %v8476_v0 = vld [vmem:[#allocation3 + $0x5f8] sm:$0xf0]  ;;  %v6587_v16 = vperm.slane %v11951_v8, %v12590_v59 }
 0x6ce   :  { %v7049_v50 = vadd.f32 %v6985_v32, %v6921_v28  ;;  %v6578_v28 = vperm.slane %v11892_v55, %v12590_v59  ;;  %v11998_v32 = vpop.permute.xlu1 %6644  ;;  %v12005_v20 = vpop.permute.xlu2 %6680 }
 0x6cf   :  { %v6100_v34 = vpop.f32.mrf.mxu2 }
 0x6d0   :  { %v7241_v56 = vmax.f32 %v7049_v50, 0.0  ;;  %v6101_v17 = vadd.f32 %v6100_v34, %v11801_v33  ;;  %v11988_v3 = vpop.f32.mrf.mxu1  ;;  %v8731_v33 = vor.u32 %v9055_v11, %v8730_v63  ;;  %v12007_v63 = vpop.permute.xlu0 %6806 }
 0x6d1   :  { %12654 = vst [vmem:[#allocation77_spill] sm:$0xff] %v11988_v3  ;;  %v6987_v3 = vunpack.c.l.bf16 %v6587_v16  ;;  %v8508_v16 = vld [vmem:[#allocation3 + $0x638] sm:$0xf0] }
 0x6d2   :  { %v11992_v62 = vpack.c.bf16 %v7241_v56, %v7240_v13  ;;  %v6218_v36 = vpack.c.bf16 %v6101_v17, %v6101_v17  ;;  %v8479_v13 = vor.u32 %v8987_v47, %v8476_v0  ;;  %v6986_v56 = vunpack.c.l.bf16 %v6578_v28 }
 0x6d4   :  { %v6922_v39 = vunpack.c.l.bf16 %v6218_v36 }
 0x6d6   :  { %v7050_v55 = vadd.f32 %v6986_v56, %v6922_v39  ;;  %v12012_v47 = vpop.permute.xlu1 %6815  ;;  %v6605_v39 = vperm.slane %v11885_v58, %v12590_v59 }
 0x6d7   :  { %v6102_v24 = vpop.f32.mrf.mxu2  ;;  %12656 = vst [vmem:[#allocation46_spill] sm:$0xff] %v12012_v47 }
 0x6d8   :  { %v6103_v50 = vadd.f32 %v6102_v24, %v11807_v29  ;;  %v12003_v34 = vpop.f32.mrf.mxu1  ;;  %v7242_v8 = vmax.f32 %v7050_v55, 0.0 }
 0x6da   :  { %v6219_v17 = vpack.c.bf16 %v6103_v50, %v6103_v50  ;;  %v12014_v50 = vpop.permute.xlu2 %6851 }
 0x6db   :  { %6015 = vmatmul.bf16.gmra.mxu1 %v8731_v33  ;;  %12657 = vst [vmem:[#allocation121_spill] sm:$0xff] %v12014_v50  ;;  %v8995_v33 = vld [vmem:[#allocation3 + $0x61c] sm:$0xf] }
 0x6dc   :  { %v6923_v9 = vunpack.c.l.bf16 %v6219_v17  ;;  %6144 = vmatmul.bf16.gmra.mxu2 %v8479_v13  ;;  %v8511_v56 = vor.u32 %v8995_v33, %v8508_v16  ;;  %v12021_v17 = vpop.permute.xlu0 %6635 }
 0x6de   :  { %v7051_v12 = vadd.f32 %v6987_v3, %v6923_v9  ;;  %v6596_v9 = vperm.slane %v11934_v14, %v12590_v59 }
 0x6df   :  { %v6105_v11 = vpop.f32.mrf.mxu2 }
 0x6e0   :  { %v7243_v36 = vmax.f32 %v7051_v12, 0.0  ;;  %v6106_v29 = vadd.f32 %v6105_v11, %v11817_v22  ;;  %v12010_v24 = vpop.f32.mrf.mxu1  ;;  %v6988_v11 = vunpack.c.l.bf16 %v6596_v9 }
 0x6e2   :  { %v7292_v0 = vpack.c.bf16 %v7243_v36, %v7242_v8  ;;  %v6220_v28 = vpack.c.bf16 %v6106_v29, %v6106_v29  ;;  %v12026_v36 = vpop.permute.xlu1 %6788  ;;  %v6989_v29 = vunpack.c.l.bf16 %v6605_v39  ;;  %v12028_v58 = vpop.permute.xlu2 %6824 }
 0x6e3   :  { %12658 = vst [vmem:[#allocation11_spill] sm:$0xff] %v12028_v58 }
 0x6e4   :  { %v6924_v12 = vunpack.c.l.bf16 %v6220_v28 }
 0x6e6   :  { %v7052_v14 = vadd.f32 %v6988_v11, %v6924_v12  ;;  %v9003_v12 = vld [vmem:[#allocation3 + $0x65c] sm:$0xf] }
 0x6e7   :  { %v6107_v3 = vpop.f32.mrf.mxu2  ;;  %v8540_v11 = vld [vmem:[#allocation3 + $0x678] sm:$0xf0] }
 0x6e8   :  { %v6108_v22 = vadd.f32 %v6107_v3, %v11823_v53  ;;  %v5981_v13 = vpop.f32.mrf.mxu1  ;;  %v7244_v53 = vmax.f32 %v7052_v14, 0.0  ;;  %v8543_v14 = vor.u32 %v9003_v12, %v8540_v11 }
 0x6e9   :  { %v12024_v55 = vadd.f32 %v5981_v13, %v11834_v26 }
 0x6ea   :  { %v6221_v8 = vpack.c.bf16 %v6108_v22, %v6108_v22  ;;  %v6609_v22 = vpop.permute.xlu0 %6608  ;;  %v6618_v39 = vpop.permute.xlu1 %6617 }
 0x6ec   :  { %v6925_v50 = vunpack.c.l.bf16 %v6221_v8  ;;  %6149 = vmatmul.bf16.gmra.mxu2 %v8511_v56  ;;  %v6623_v8 = vperm.slane %v6618_v39, %v12590_v59 }
 0x6ee   :  { %v7053_v47 = vadd.f32 %v6989_v29, %v6925_v50  ;;  %v6614_v50 = vperm.slane %v6609_v22, %v12590_v59 }
 0x6ef   :  { %v6110_v28 = vpop.f32.mrf.mxu2 }
 0x6f0   :  { %v7245_v3 = vmax.f32 %v7053_v47, 0.0  ;;  %v6111_v33 = vadd.f32 %v6110_v28, %v11831_v4  ;;  %v5983_v16 = vpop.f32.mrf.mxu1 }
 0x6f1   :  { %v12032_v26 = vadd.f32 %v5983_v16, %v11846_v44  ;;  %v6654_v44 = vpop.permute.xlu2 %6653 }
 0x6f2   :  { %v7293_v9 = vpack.c.bf16 %v7245_v3, %v7244_v53  ;;  %v6222_v13 = vpack.c.bf16 %v6111_v33, %v6111_v33  ;;  %v6990_v53 = vunpack.c.l.bf16 %v6614_v50  ;;  %v6991_v33 = vunpack.c.l.bf16 %v6623_v8 }
 0x6f4   :  { %7339 = vmatpush.bf16.msra.mxu0 %v7293_v9  ;;  %v6926_v29 = vunpack.c.l.bf16 %v6222_v13 }
 0x6f6   :  { %v7054_v16 = vadd.f32 %v6990_v53, %v6926_v29 }
 0x6f7   :  { %v6112_v56 = vpop.f32.mrf.mxu2 }
 0x6f8   :  { %v6113_v47 = vadd.f32 %v6112_v56, %v11840_v31  ;;  %7340 = vmatpush.bf16.msra.mxu0 %v7292_v0  ;;  %v5986_v4 = vpop.f32.mrf.mxu1  ;;  %v7246_v13 = vmax.f32 %v7054_v16, 0.0  ;;  %v9011_v56 = vld [vmem:[#allocation3 + $0x69c] sm:$0xf] }
 0x6f9   :  { %v12038_v28 = vadd.f32 %v5986_v4, %v11859_v2  ;;  %v6627_v11 = vpop.permute.xlu2 %6626 }
 0x6fa   :  { %v6223_v3 = vpack.c.bf16 %v6113_v47, %v6113_v47  ;;  %v6632_v8 = vperm.slane %v6627_v11, %v12590_v59 }
 0x6fc   :  { %v6927_v9 = vunpack.c.l.bf16 %v6223_v3  ;;  %6154 = vmatmul.bf16.gmra.mxu2 %v8543_v14  ;;  %7341 = vmatpush.bf16.msra.mxu0 %v11992_v62  ;;  %v8572_v62 = vld [vmem:[#allocation3 + $0x6b8] sm:$0xf0]  ;;  %v6992_v14 = vunpack.c.l.bf16 %v6632_v8 }
 0x6fe   :  { %v7055_v22 = vadd.f32 %v6991_v33, %v6927_v9 }
 0x6ff   :  { %v6115_v39 = vpop.f32.mrf.mxu2 }
 0x700   :  { %v7247_v58 = vmax.f32 %v7055_v22, 0.0  ;;  %v6116_v31 = vadd.f32 %v6115_v39, %v11851_v5  ;;  %7342 = vmatpush.bf16.msra.mxu0 %v11970_v43  ;;  %v5988_v0 = vpop.f32.mrf.mxu1  ;;  %v6641_v5 = vperm.slane %v12021_v17, %v12590_v59 }
 0x701   :  { %v12044_v2 = vadd.f32 %v5988_v0, %v11875_v38  ;;  %v8604_v0 = vld [vmem:[#allocation3 + $0x6f8] sm:$0xf0] }
 0x702   :  { %v12046_v12 = vpack.c.bf16 %v7247_v58, %v7246_v13  ;;  %v6224_v50 = vpack.c.bf16 %v6116_v31, %v6116_v31  ;;  %v8575_v58 = vor.u32 %v9011_v56, %v8572_v62  ;;  %v6993_v53 = vunpack.c.l.bf16 %v6641_v5  ;;  %v9019_v31 = vld [vmem:[#allocation3 + $0x6dc] sm:$0xf] }
 0x704   :  { %7343 = vmatpush.bf16.msra.mxu0 %v11949_v61  ;;  %v6928_v47 = vunpack.c.l.bf16 %v6224_v50  ;;  %v6659_v50 = vperm.slane %v6654_v44, %v12590_v59 }
 0x706   :  { %v7056_v3 = vadd.f32 %v6992_v14, %v6928_v47  ;;  %v6995_v5 = vunpack.c.l.bf16 %v6659_v50 }
 0x707   :  { %v6117_v29 = vpop.f32.mrf.mxu2 }
 0x708   :  { %v6118_v43 = vadd.f32 %v6117_v29, %v11864_v19  ;;  %7344 = vmatpush.bf16.msra.mxu0 %v11920_v46  ;;  %v5991_v38 = vpop.f32.mrf.mxu1  ;;  %v7248_v9 = vmax.f32 %v7056_v3, 0.0  ;;  %v9027_v3 = vld [vmem:[#allocation3 + $0x71c] sm:$0xf] }
 0x709   :  { %v12055_v4 = vadd.f32 %v5991_v38, %v11888_v41 }
 0x70a   :  { %v6225_v61 = vpack.c.bf16 %v6118_v43, %v6118_v43 }
 0x70c   :  { %v6929_v33 = vunpack.c.l.bf16 %v6225_v61  ;;  %6159 = vmatmul.bf16.gmra.mxu2 %v8575_v58  ;;  %7345 = vmatpush.bf16.msra.mxu0 %v11897_v30  ;;  %v6650_v30 = vperm.slane %v11998_v32, %v12590_v59 }
 0x70e   :  { %v7057_v16 = vadd.f32 %v6993_v53, %v6929_v33  ;;  %v8636_v33 = vld [vmem:[#allocation3 + $0x738] sm:$0xf0] }
 0x70f   :  { %v6120_v17 = vpop.f32.mrf.mxu2 }
 0x710   :  { %v7249_v22 = vmax.f32 %v7057_v16, 0.0  ;;  %v6121_v19 = vadd.f32 %v6120_v17, %v11882_v35  ;;  %7346 = vmatpush.bf16.msra.mxu0 %v11866_v52  ;;  %v5993_v46 = vpop.f32.mrf.mxu1  ;;  %v8607_v52 = vor.u32 %v9019_v31, %v8604_v0  ;;  %v6668_v16 = vperm.slane %v11983_v60, %v12590_v59 }
 0x711   :  { %v12061_v41 = vadd.f32 %v5993_v46, %v11902_v57  ;;  %v6994_v57 = vunpack.c.l.bf16 %v6650_v30  ;;  %v8639_v46 = vor.u32 %v9027_v3, %v8636_v33 }
 0x712   :  { %v12063_v39 = vpack.c.bf16 %v7249_v22, %v7248_v9  ;;  %v6226_v13 = vpack.c.bf16 %v6121_v19, %v6121_v19  ;;  %v6677_v9 = vperm.slane %v11985_v10, %v12590_v59 }
 0x714   :  { %v6930_v56 = vunpack.c.l.bf16 %v6226_v13  ;;  %v6996_v13 = vunpack.c.l.bf16 %v6668_v16  ;;  %v6997_v0 = vunpack.c.l.bf16 %v6677_v9 }
 0x716   :  { %v7058_v47 = vadd.f32 %v6994_v57, %v6930_v56 }
 0x717   :  { %v6122_v11 = vpop.f32.mrf.mxu2 }
 0x718   :  { %v6123_v35 = vadd.f32 %v6122_v11, %v11895_v15  ;;  %v5996_v62 = vpop.f32.mrf.mxu1  ;;  %v7250_v32 = vmax.f32 %v7058_v47, 0.0 }
 0x719   :  { %v12070_v8 = vadd.f32 %v5996_v62, %v11914_v21 }
 0x71a   :  { %v6227_v29 = vpack.c.bf16 %v6123_v35, %v6123_v35 }
 0x71c   :  { %v6931_v43 = vunpack.c.l.bf16 %v6227_v29  ;;  %6164 = vmatmul.bf16.gmra.mxu2 %v8607_v52  ;;  %v8668_v29 = vld [vmem:[#allocation3 + $0x778] sm:$0xf0] }
 0x71e   :  { %v7059_v38 = vadd.f32 %v6995_v5, %v6931_v43  ;;  %v6686_v5 = vperm.slane %v12005_v20, %v12590_v59 }
 0x71f   :  { %v6125_v58 = vpop.f32.mrf.mxu2 }
 0x720   :  { %v7251_v14 = vmax.f32 %v7059_v38, 0.0  ;;  %v6126_v44 = vadd.f32 %v6125_v58, %v11909_v25  ;;  %v5998_v61 = vpop.f32.mrf.mxu1  ;;  %v6695_v38 = vperm.slane %v11968_v18, %v12590_v59 }
 0x721   :  { %v12074_v15 = vadd.f32 %v5998_v61, %v11929_v48 }
 0x722   :  { %v12076_v53 = vpack.c.bf16 %v7251_v14, %v7250_v32  ;;  %v6228_v21 = vpack.c.bf16 %v6126_v44, %v6126_v44  ;;  %v6998_v14 = vunpack.c.l.bf16 %v6686_v5  ;;  %v6999_v61 = vunpack.c.l.bf16 %v6695_v38  ;;  %v12664_v38 = vld [vmem:[#allocation80_spill] sm:$0xff] }
 0x724   :  { %v6932_v22 = vunpack.c.l.bf16 %v6228_v21  ;;  %v12660_v21 = vld [vmem:[#allocation64_spill] sm:$0xff] }
 0x726   :  { %v7060_v30 = vadd.f32 %v6996_v13, %v6932_v22  ;;  %v9043_v13 = vld [vmem:[#allocation3 + $0x79c] sm:$0xf] }
 0x727   :  { %v6127_v17 = vpop.f32.mrf.mxu2 }
 0x728   :  { %v6128_v19 = vadd.f32 %v6127_v17, %v11918_v40  ;;  %v6001_v25 = vpop.f32.mrf.mxu1  ;;  %v7252_v56 = vmax.f32 %v7060_v30, 0.0  ;;  %v12659_v40 = vld [vmem:[#allocation125_spill] sm:$0xff] }
 0x729   :  { %v12084_v48 = vadd.f32 %v6001_v25, %v11944_v54  ;;  %v5795_v52 = vadd.f32 %v11778_v6, %v12659_v40  ;;  %v9035_v54 = vld [vmem:[#allocation3 + $0x75c] sm:$0xf]  ;;  %v5798_v6 = vadd.f32 %v11787_v51, %v12660_v21  ;;  %v6704_v51 = vperm.slane %v11941_v7, %v12590_v59 }
 0x72a   :  { %v6229_v31 = vpack.c.bf16 %v6128_v19, %v6128_v19  ;;  %v12661_v19 = vld [vmem:[#allocation96_spill] sm:$0xff]  ;;  %v12662_v40 = vld [vmem:[#allocation21_spill] sm:$0xff] }
 0x72b   :  { %v5964_v47 = vadd.f32 %v11947_v49, %v5795_v52  ;;  %v5967_v20 = vadd.f32 %v11959_v45, %v5798_v6  ;;  %v5800_v25 = vadd.f32 %v11796_v37, %v12661_v19  ;;  %v6713_v45 = vperm.slane %v11990_v23, %v12590_v59  ;;  %v12667_v21 = vld [vmem:[#allocation77_spill] sm:$0xff] }
 0x72c   :  { %v6933_v11 = vunpack.c.l.bf16 %v6229_v31  ;;  %6169 = vmatmul.bf16.gmra.mxu2 %v8639_v46  ;;  %v8700_v31 = vld [vmem:[#allocation3 + $0x7b8] sm:$0xf0]  ;;  %v5803_v37 = vadd.f32 %v11803_v1, %v12662_v40  ;;  %v12672_v40 = vld [vmem:[#allocation67_spill] sm:$0xff] }
 0x72e   :  { %v7061_v50 = vadd.f32 %v6997_v0, %v6933_v11  ;;  %v5969_v0 = vadd.f32 %v11966_v42, %v5800_v25  ;;  %v12669_v25 = vld [vmem:[#allocation132_spill] sm:$0xff] }
 0x72f   :  { %v6130_v60 = vpop.f32.mrf.mxu2 }
 0x730   :  { %v7253_v35 = vmax.f32 %v7061_v50, 0.0  ;;  %v6131_v10 = vadd.f32 %v6130_v60, %v11937_v27  ;;  %v8671_v27 = vor.u32 %v9035_v54, %v8668_v29  ;;  %v8703_v60 = vor.u32 %v9043_v13, %v8700_v31  ;;  %v12663_v54 = vld [vmem:[#allocation16_spill] sm:$0xff] }
 0x731   :  { %v5972_v7 = vadd.f32 %v12663_v54, %v5803_v37 }
 0x732   :  { %v12087_v62 = vpack.c.bf16 %v7253_v35, %v7252_v56  ;;  %v6230_v57 = vpack.c.bf16 %v6131_v10, %v6131_v10  ;;  %v7000_v56 = vunpack.c.l.bf16 %v6704_v51  ;;  %v7001_v10 = vunpack.c.l.bf16 %v6713_v45 }
 0x734   :  { %v6934_v58 = vunpack.c.l.bf16 %v6230_v57 }
 0x736   :  { %v7062_v3 = vadd.f32 %v6998_v14, %v6934_v58  ;;  %v12665_v58 = vld [vmem:[#allocation37_spill] sm:$0xff] }
 0x737   :  { %v6132_v43 = vpop.f32.mrf.mxu2  ;;  %v9051_v14 = vld [vmem:[#allocation3 + $0x7dc] sm:$0xf] }
 0x738   :  { %v6133_v32 = vadd.f32 %v6132_v43, %v5964_v47  ;;  %v7254_v17 = vmax.f32 %v7062_v3, 0.0 }
 0x73a   :  { %v6231_v44 = vpack.c.bf16 %v6133_v32, %v6133_v32  ;;  %v5805_v32 = vadd.f32 %v12665_v58, %v12664_v38 }
 0x73c   :  { %v6935_v33 = vunpack.c.l.bf16 %v6231_v44  ;;  %6174 = vmatmul.bf16.gmra.mxu2 %v8671_v27  ;;  %v8732_v44 = vld [vmem:[#allocation3 + $0x7f8] sm:$0xf0]  ;;  %v5974_v6 = vadd.f32 %v12667_v21, %v5805_v32 }
 0x73e   :  { %v7063_v16 = vadd.f32 %v6999_v61, %v6935_v33  ;;  %v12666_v61 = vld [vmem:[#allocation12_spill] sm:$0xff]  ;;  %v12668_v33 = vld [vmem:[#allocation111_spill] sm:$0xff] }
 0x73f   :  { %v6135_v49 = vpop.f32.mrf.mxu2  ;;  %v6722_v1 = vperm.slane %v12666_v61, %v12590_v59 }
 0x740   :  { %v7255_v9 = vmax.f32 %v7063_v16, 0.0  ;;  %v6136_v22 = vadd.f32 %v6135_v49, %v5967_v20  ;;  %v6731_v20 = vperm.slane %v12668_v33, %v12590_v59 }
 0x742   :  { %v12099_v18 = vpack.c.bf16 %v7255_v9, %v7254_v17  ;;  %v6232_v46 = vpack.c.bf16 %v6136_v22, %v6136_v22  ;;  %v8735_v17 = vor.u32 %v9051_v14, %v8732_v44  ;;  %v7002_v9 = vunpack.c.l.bf16 %v6722_v1 }
 0x743   :  { %v7003_v19 = vunpack.c.l.bf16 %v6731_v20 }
 0x744   :  { %v6936_v11 = vunpack.c.l.bf16 %v6232_v46  ;;  %v12670_v46 = vld [vmem:[#allocation104_spill] sm:$0xff] }
 0x745   :  { %v5808_v13 = vadd.f32 %v12670_v46, %v12669_v25 }
 0x746   :  { %v7064_v52 = vadd.f32 %v7000_v56, %v6936_v11  ;;  %v12121_v56 = vpop.permute.xlu2 %6797 }
 0x747   :  { %v6137_v30 = vpop.f32.mrf.mxu2 }
 0x748   :  { %v6138_v50 = vadd.f32 %v6137_v30, %v5969_v0  ;;  %v7256_v5 = vmax.f32 %v7064_v52, 0.0  ;;  %v5977_v0 = vadd.f32 %v12003_v34, %v5808_v13  ;;  %v12674_v34 = vld [vmem:[#allocation41_spill] sm:$0xff] }
 0x74a   :  { %v6233_v35 = vpack.c.bf16 %v6138_v50, %v6138_v50 }
 0x74c   :  { %v6937_v57 = vunpack.c.l.bf16 %v6233_v35  ;;  %6179 = vmatmul.bf16.gmra.mxu2 %v8703_v60 }
 0x74e   :  { %v7065_v29 = vadd.f32 %v7001_v10, %v6937_v57  ;;  %v12671_v10 = vld [vmem:[#allocation88_spill] sm:$0xff]  ;;  %v12673_v57 = vld [vmem:[#allocation151_spill] sm:$0xff]  ;;  %v6771_v58 = vpop.permute.xlu2 %6770 }
 0x74f   :  { %v6140_v42 = vpop.f32.mrf.mxu2  ;;  %v5810_v37 = vadd.f32 %v12672_v40, %v12671_v10  ;;  %v6740_v54 = vperm.slane %v12673_v57, %v12590_v59 }
 0x750   :  { %v7257_v47 = vmax.f32 %v7065_v29, 0.0  ;;  %v6141_v43 = vadd.f32 %v6140_v42, %v5972_v7  ;;  %v6749_v42 = vperm.slane %v12674_v34, %v12590_v59 }
 0x751   :  { %v5979_v7 = vadd.f32 %v12010_v24, %v5810_v37  ;;  %v6753_v24 = vpop.permute.xlu1 %6752 }
 0x752   :  { %v7299_v23 = vpack.c.bf16 %v7257_v47, %v7256_v5  ;;  %v6234_v27 = vpack.c.bf16 %v6141_v43, %v6141_v43  ;;  %v7004_v43 = vunpack.c.l.bf16 %v6740_v54  ;;  %v7005_v32 = vunpack.c.l.bf16 %v6749_v42 }
 0x754   :  { %v6938_v16 = vunpack.c.l.bf16 %v6234_v27 }
 0x756   :  { %v7066_v31 = vadd.f32 %v7002_v9, %v6938_v16  ;;  %v6762_v20 = vpop.permute.xlu2 %6761  ;;  %v6758_v16 = vperm.slane %v6753_v24, %v12590_v59 }
 0x757   :  { %v6142_v3 = vpop.f32.mrf.mxu2 }
 0x758   :  { %v6143_v49 = vadd.f32 %v6142_v3, %v5974_v6  ;;  %v7258_v11 = vmax.f32 %v7066_v31, 0.0 }
 0x75a   :  { %v6235_v22 = vpack.c.bf16 %v6143_v49, %v6143_v49 }
 0x75c   :  { %v6939_v51 = vunpack.c.l.bf16 %v6235_v22  ;;  %6184 = vmatmul.bf16.gmra.mxu2 %v8735_v17  ;;  %v6767_v17 = vperm.slane %v6762_v20, %v12590_v59 }
 0x75e   :  { %v7067_v30 = vadd.f32 %v7003_v19, %v6939_v51  ;;  %v7006_v19 = vunpack.c.l.bf16 %v6758_v16  ;;  %v7007_v46 = vunpack.c.l.bf16 %v6767_v17  ;;  %v12675_v16 = vld [vmem:[#allocation46_spill] sm:$0xff] }
 0x75f   :  { %v6145_v45 = vpop.f32.mrf.mxu2 }
 0x760   :  { %v7259_v50 = vmax.f32 %v7067_v30, 0.0  ;;  %v6146_v60 = vadd.f32 %v6145_v45, %v5977_v0 }
 0x762   :  { %v7300_v35 = vpack.c.bf16 %v7259_v50, %v7258_v11  ;;  %v6236_v52 = vpack.c.bf16 %v6146_v60, %v6146_v60  ;;  %v6776_v60 = vperm.slane %v6771_v58, %v12590_v59 }
 0x764   :  { %v6940_v5 = vunpack.c.l.bf16 %v6236_v52  ;;  %v7008_v37 = vunpack.c.l.bf16 %v6776_v60 }
 0x766   :  { %v7068_v27 = vadd.f32 %v7004_v43, %v6940_v5 }
 0x767   :  { %v6147_v29 = vpop.f32.mrf.mxu2 }
 0x768   :  { %v6148_v47 = vadd.f32 %v6147_v29, %v5979_v7  ;;  %v7260_v1 = vmax.f32 %v7068_v27, 0.0  ;;  %v6794_v7 = vperm.slane %v12026_v36, %v12590_v59 }
 0x76a   :  { %v6237_v38 = vpack.c.bf16 %v6148_v47, %v6148_v47  ;;  %v7010_v5 = vunpack.c.l.bf16 %v6794_v7 }
 0x76c   :  { %v6941_v14 = vunpack.c.l.bf16 %v6237_v38 }
 0x76e   :  { %v7069_v44 = vadd.f32 %v7005_v32, %v6941_v14 }
 0x76f   :  { %v6150_v61 = vpop.f32.mrf.mxu2 }
 0x770   :  { %v7261_v21 = vmax.f32 %v7069_v44, 0.0  ;;  %v6151_v6 = vadd.f32 %v6150_v61, %v12024_v55 }
 0x772   :  { %v7301_v3 = vpack.c.bf16 %v7261_v21, %v7260_v1  ;;  %v6238_v33 = vpack.c.bf16 %v6151_v6, %v6151_v6 }
 0x774   :  { %7352 = vmatpush.bf16.msra.mxu3 %v7301_v3  ;;  %v6942_v9 = vunpack.c.l.bf16 %v6238_v33 }
 0x776   :  { %v7070_v13 = vadd.f32 %v7006_v19, %v6942_v9 }
 0x777   :  { %v6152_v49 = vpop.f32.mrf.mxu2 }
 0x778   :  { %v6153_v22 = vadd.f32 %v6152_v49, %v12032_v26  ;;  %7353 = vmatpush.bf16.msra.mxu3 %v7300_v35  ;;  %v7262_v0 = vmax.f32 %v7070_v13, 0.0  ;;  %v6780_v26 = vpop.permute.xlu0 %6779  ;;  %v6821_v49 = vperm.slane %v12675_v16, %v12590_v59 }
 0x779   :  { %v6785_v10 = vperm.slane %v6780_v26, %v12590_v59  ;;  %v12677_v26 = vld [vmem:[#allocation8_spill] sm:$0xff] }
 0x77a   :  { %v6239_v25 = vpack.c.bf16 %v6153_v22, %v6153_v22 }
 0x77b   :  { %v7009_v52 = vunpack.c.l.bf16 %v6785_v10 }
 0x77c   :  { %v6943_v31 = vunpack.c.l.bf16 %v6239_v25  ;;  %7354 = vmatpush.bf16.msra.mxu3 %v7299_v23 }
 0x77e   :  { %v7071_v55 = vadd.f32 %v7007_v46, %v6943_v31  ;;  %v12676_v46 = vld [vmem:[#allocation11_spill] sm:$0xff] }
 0x77f   :  { %v6155_v51 = vpop.f32.mrf.mxu2  ;;  %v6830_v13 = vperm.slane %v12676_v46, %v12590_v59 }
 0x780   :  { %v7263_v30 = vmax.f32 %v7071_v55, 0.0  ;;  %v6156_v45 = vadd.f32 %v6155_v51, %v12038_v28  ;;  %7355 = vmatpush.bf16.msra.mxu3 %v12099_v18 }
 0x782   :  { %v12136_v11 = vpack.c.bf16 %v7263_v30, %v7262_v0  ;;  %v6240_v50 = vpack.c.bf16 %v6156_v45, %v6156_v45 }
 0x784   :  { %7356 = vmatpush.bf16.msra.mxu3 %v12087_v62  ;;  %v6944_v23 = vunpack.c.l.bf16 %v6240_v50  ;;  %v7014_v50 = vunpack.c.l.bf16 %v6830_v13 }
 0x786   :  { %v7072_v18 = vadd.f32 %v7008_v37, %v6944_v23 }
 0x787   :  { %v6157_v35 = vpop.f32.mrf.mxu2 }
 0x788   :  { %v6158_v40 = vadd.f32 %v6157_v35, %v12044_v2  ;;  %7357 = vmatpush.bf16.msra.mxu3 %v12076_v53  ;;  %v7264_v29 = vmax.f32 %v7072_v18, 0.0 }
 0x78a   :  { %v6241_v28 = vpack.c.bf16 %v6158_v40, %v6158_v40  ;;  %v12678_v40 = vld [vmem:[#allocation122_spill] sm:$0xff] }
 0x78b   :  { %v6839_v37 = vperm.slane %v12678_v40, %v12590_v59 }
 0x78c   :  { %v6945_v57 = vunpack.c.l.bf16 %v6241_v28  ;;  %7358 = vmatpush.bf16.msra.mxu3 %v12063_v39  ;;  %v6803_v39 = vperm.slane %v12121_v56, %v12590_v59  ;;  %v5834_v56 = vpop.f32.mrf.mxu3 }
 0x78e   :  { %v7073_v54 = vadd.f32 %v7009_v52, %v6945_v57  ;;  %v7011_v36 = vunpack.c.l.bf16 %v6803_v39 }
 0x78f   :  { %v6160_v62 = vpop.f32.mrf.mxu2 }
 0x790   :  { %v7265_v34 = vmax.f32 %v7073_v54, 0.0  ;;  %v6161_v42 = vadd.f32 %v6160_v62, %v12055_v4  ;;  %7359 = vmatpush.bf16.msra.mxu3 %v12046_v12  ;;  %v6812_v12 = vperm.slane %v12007_v63, %v12590_v59  ;;  %v7013_v63 = vunpack.c.l.bf16 %v6821_v49 }
 0x791   :  { %v7015_v54 = vunpack.c.l.bf16 %v6839_v37  ;;  %v7310_v37 = vld [vmem:[%s12208_s5] sm:$0xff] }
 0x792   :  { %v6242_v2 = vpack.c.bf16 %v6161_v42, %v6161_v42  ;;  %v12148_v53 = vpack.c.bf16 %v7265_v34, %v7264_v29  ;;  %v7012_v3 = vunpack.c.l.bf16 %v6812_v12 }
 0x794   :  { %v6946_v47 = vunpack.c.l.bf16 %v6242_v2  ;;  %v5837_v25 = vpop.f32.mrf.mxu3  ;;  %v12680_v2 = vld [vmem:[#allocation112_spill] sm:$0xff] }
 0x796   :  { %v7074_v43 = vadd.f32 %v7010_v5, %v6946_v47  ;;  %v6848_v5 = vperm.slane %v12680_v2, %v12590_v59 }
 0x797   :  { %v6162_v38 = vpop.f32.mrf.mxu2 }
 0x798   :  { %v6163_v58 = vadd.f32 %v6162_v38, %v12061_v41  ;;  %v7266_v4 = vmax.f32 %v7074_v43, 0.0  ;;  %v6003_v41 = vpop.f32.mrf.mxu1 }
 0x79a   :  { %v6243_v32 = vpack.c.bf16 %v6163_v58, %v6163_v58 }
 0x79c   :  { %v6947_v27 = vunpack.c.l.bf16 %v6243_v32  ;;  %v5839_v52 = vpop.f32.mrf.mxu3 }
 0x79e   :  { %v7075_v14 = vadd.f32 %v7011_v36, %v6947_v27  ;;  %v7016_v36 = vunpack.c.l.bf16 %v6848_v5  ;;  %v12681_v27 = vld [vmem:[#allocation33_spill] sm:$0xff] }
 0x79f   :  { %v6165_v44 = vpop.f32.mrf.mxu2 }
 0x7a0   :  { %v7267_v61 = vmax.f32 %v7075_v14, 0.0  ;;  %v6166_v1 = vadd.f32 %v6165_v44, %v12070_v8  ;;  %v6006_v0 = vpop.f32.mrf.mxu1  ;;  %v5840_v14 = vadd.f32 %v5839_v52, %v12681_v27  ;;  %v7314_v52 = vunpack.c.l.b16 %v7310_v37 }
 0x7a2   :  { %v6244_v21 = vpack.c.bf16 %v6166_v1, %v6166_v1  ;;  %v12156_v6 = vpack.c.bf16 %v7267_v61, %v7266_v4 }
 0x7a4   :  { %v6948_v24 = vunpack.c.l.bf16 %v6244_v21  ;;  %v5842_v32 = vpop.f32.mrf.mxu3  ;;  %v12682_v21 = vld [vmem:[#allocation121_spill] sm:$0xff] }
 0x7a6   :  { %v7076_v33 = vadd.f32 %v7012_v3, %v6948_v24  ;;  %v6857_v3 = vperm.slane %v12682_v21, %v12590_v59 }
 0x7a7   :  { %v6167_v20 = vpop.f32.mrf.mxu2 }
 0x7a8   :  { %v6168_v17 = vadd.f32 %v6167_v20, %v12074_v15  ;;  %v7268_v31 = vmax.f32 %v7076_v33, 0.0  ;;  %v5835_v15 = vadd.f32 %v5834_v56, %v12677_v26  ;;  %v6008_v57 = vpop.f32.mrf.mxu1  ;;  %v7017_v33 = vunpack.c.l.bf16 %v6857_v3 }
 0x7a9   :  { %v6009_v4 = vadd.f32 %v6008_v57, %v5840_v14  ;;  %v7318_v57 = vpack.c.b16 %v7314_v52, %v7314_v52 }
 0x7aa   :  { %v6245_v9 = vpack.c.bf16 %v6168_v17, %v6168_v17  ;;  %v6004_v35 = vadd.f32 %v6003_v41, %v5835_v15  ;;  %v12683_v41 = vld [vmem:[#allocation97_spill] sm:$0xff] }
 0x7ab   :  { %v5843_v20 = vadd.f32 %v5842_v32, %v12683_v41  ;;  %7334 = vmatmul.bf16.vlgmr.msrb.gmra.mxu3 %v7318_v57 }
 0x7ac   :  { %v6949_v22 = vunpack.c.l.bf16 %v6245_v9  ;;  %v5844_v49 = vpop.f32.mrf.mxu3 }
 0x7ae   :  { %v7077_v19 = vadd.f32 %v7013_v63, %v6949_v22 }
 0x7af   :  { %v6170_v8 = vpop.f32.mrf.mxu2 }
 0x7b0   :  { %v7269_v55 = vmax.f32 %v7077_v19, 0.0  ;;  %v6171_v51 = vadd.f32 %v6170_v8, %v12084_v48  ;;  %v12679_v48 = vld [vmem:[#allocation101_spill] sm:$0xff]  ;;  %v6011_v12 = vpop.f32.mrf.mxu1 }
 0x7b1   :  { %v5838_v62 = vadd.f32 %v5837_v25, %v12679_v48  ;;  %v6012_v17 = vadd.f32 %v6011_v12, %v5843_v20  ;;  %v12684_v19 = vld [vmem:[#allocation153_spill] sm:$0xff]  ;;  %v7311_v20 = vld [vmem:[%s12208_s5 + $0x8] sm:$0xff] }
 0x7b2   :  { %v6246_v30 = vpack.c.bf16 %v6171_v51, %v6171_v51  ;;  %v12164_v45 = vpack.c.bf16 %v7269_v55, %v7268_v31  ;;  %v6866_v25 = vperm.slane %v12684_v19, %v12590_v59  ;;  %v12687_v48 = vld [vmem:[#allocation9_spill] sm:$0xff] }
 0x7b3   :  { %v6007_v29 = vadd.f32 %v6006_v0, %v5838_v62  ;;  %v12685_v0 = vld [vmem:[#allocation65_spill] sm:$0xff] }
 0x7b4   :  { %v6950_v60 = vunpack.c.l.bf16 %v6246_v30  ;;  %v7018_v51 = vunpack.c.l.bf16 %v6866_v25  ;;  %v5845_v30 = vadd.f32 %v5844_v49, %v12685_v0 }
 0x7b6   :  { %v7078_v10 = vadd.f32 %v7014_v50, %v6950_v60  ;;  %v5847_v60 = vpop.f32.mrf.mxu3 }
 0x7b7   :  { %v6172_v23 = vpop.f32.mrf.mxu2  ;;  %v5848_v62 = vadd.f32 %v5847_v60, %v12687_v48 }
 0x7b8   :  { %v6173_v28 = vadd.f32 %v6172_v23, %v6004_v35  ;;  %v7270_v47 = vmax.f32 %v7078_v10, 0.0  ;;  %v6013_v63 = vpop.f32.mrf.mxu1  ;;  %v12686_v10 = vld [vmem:[#allocation114_spill] sm:$0xff] }
 0x7b9   :  { %v6014_v26 = vadd.f32 %v6013_v63, %v5845_v30  ;;  %v6875_v23 = vperm.slane %v12686_v10, %v12590_v59 }
 0x7ba   :  { %v6247_v18 = vpack.c.bf16 %v6173_v28, %v6173_v28 }
 0x7bc   :  { %v6951_v7 = vunpack.c.l.bf16 %v6247_v18 }
 0x7be   :  { %v7079_v34 = vadd.f32 %v7015_v54, %v6951_v7  ;;  %v7019_v54 = vunpack.c.l.bf16 %v6875_v23  ;;  %v5849_v32 = vpop.f32.mrf.mxu3 }
 0x7bf   :  { %v6175_v42 = vpop.f32.mrf.mxu2 }
 0x7c0   :  { %v7271_v43 = vmax.f32 %v7079_v34, 0.0  ;;  %v6176_v38 = vadd.f32 %v6175_v42, %v6007_v29  ;;  %v6016_v28 = vpop.f32.mrf.mxu1  ;;  %v12688_v42 = vld [vmem:[#allocation155_spill] sm:$0xff] }
 0x7c1   :  { %v6017_v29 = vadd.f32 %v6016_v28, %v5848_v62  ;;  %v6884_v2 = vperm.slane %v12688_v42, %v12590_v59 }
 0x7c2   :  { %v6248_v39 = vpack.c.bf16 %v6176_v38, %v6176_v38  ;;  %v12172_v58 = vpack.c.bf16 %v7271_v43, %v7270_v47 }
 0x7c3   :  { %v7020_v12 = vunpack.c.l.bf16 %v6884_v2 }
 0x7c4   :  { %v6952_v44 = vunpack.c.l.bf16 %v6248_v39  ;;  %v7315_v39 = vunpack.c.h.b16 %v7310_v37 }
 0x7c6   :  { %v7080_v61 = vadd.f32 %v7016_v36, %v6952_v44  ;;  %v7319_v14 = vpack.c.b16 %v7315_v39, %v7315_v39 }
 0x7c7   :  { %v6177_v1 = vpop.f32.mrf.mxu2 }
 0x7c8   :  { %v6178_v24 = vadd.f32 %v6177_v1, %v6009_v4  ;;  %v7272_v8 = vmax.f32 %v7080_v61, 0.0  ;;  %v6018_v44 = vpop.f32.mrf.mxu1  ;;  %v12689_v4 = vld [vmem:[#allocation105_spill] sm:$0xff]  ;;  %7347 = vmatmul.bf16.vlgmr.msra.gmra.mxu0 %v7319_v14 }
 0x7c9   :  { %v5850_v61 = vadd.f32 %v5849_v32, %v12689_v4 }
 0x7ca   :  { %v6249_v56 = vpack.c.bf16 %v6178_v24, %v6178_v24 }
 0x7cb   :  { %v6019_v21 = vadd.f32 %v6018_v44, %v5850_v61 }
 0x7cc   :  { %v6953_v16 = vunpack.c.l.bf16 %v6249_v56  ;;  %v12690_v56 = vld [vmem:[#allocation71_spill] sm:$0xff] }
 0x7ce   :  { %v7081_v9 = vadd.f32 %v7017_v33, %v6953_v16  ;;  %v6893_v33 = vperm.slane %v12690_v56, %v12590_v59  ;;  %v7316_v16 = vunpack.c.l.b16 %v7311_v20  ;;  %v7317_v59 = vunpack.c.h.b16 %v7311_v20 }
 0x7cf   :  { %v6180_v22 = vpop.f32.mrf.mxu2 }
 0x7d0   :  { %v7273_v46 = vmax.f32 %v7081_v9, 0.0  ;;  %v6181_v13 = vadd.f32 %v6180_v22, %v6012_v17  ;;  %v7320_v17 = vpack.c.b16 %v7316_v16, %v7316_v16  ;;  %v7021_v9 = vunpack.c.l.bf16 %v6893_v33 }
 0x7d2   :  { %v6250_v31 = vpack.c.bf16 %v6181_v13, %v6181_v13  ;;  %v7307_v55 = vpack.c.bf16 %v7273_v46, %v7272_v8  ;;  %7360 = vmatmul.bf16.vlgmr.msra.gmra.mxu3 %v7320_v17  ;;  %v7321_v46 = vpack.c.b16 %v7317_v59, %v7317_v59 }
 0x7d4   :  { %v6954_v50 = vunpack.c.l.bf16 %v6250_v31 }
 0x7d6   :  { %v7082_v15 = vadd.f32 %v7018_v51, %v6954_v50 }
 0x7d7   :  { %v6182_v35 = vpop.f32.mrf.mxu2 }
 0x7d8   :  { %v6183_v40 = vadd.f32 %v6182_v35, %v6014_v26  ;;  %v7274_v47 = vmax.f32 %v7082_v15, 0.0  ;;  %v7382_v26 = vpop.permute.xlu0 %7381 }
 0x7da   :  { %v6251_v18 = vpack.c.bf16 %v6183_v40, %v6183_v40 }
 0x7dc   :  { %v6955_v7 = vunpack.c.l.bf16 %v6251_v18 }
 0x7de   :  { %v7083_v34 = vadd.f32 %v7019_v54, %v6955_v7 }
 0x7df   :  { %v6185_v5 = vpop.f32.mrf.mxu2 }
 0x7e0   :  { %v7275_v43 = vmax.f32 %v7083_v34, 0.0  ;;  %v6186_v38 = vadd.f32 %v6185_v5, %v6017_v29 }
 0x7e2   :  { %v6252_v36 = vpack.c.bf16 %v6186_v38, %v6186_v38  ;;  %v7308_v27 = vpack.c.bf16 %v7275_v43, %v7274_v47 }
 0x7e4   :  { %v6956_v1 = vunpack.c.l.bf16 %v6252_v36 }
 0x7e6   :  { %v7084_v3 = vadd.f32 %v7020_v12, %v6956_v1 }
 0x7e7   :  { %v6187_v24 = vpop.f32.mrf.mxu2 }
 0x7e8   :  { %v6188_v41 = vadd.f32 %v6187_v24, %v6019_v21  ;;  %v7276_v19 = vmax.f32 %v7084_v3, 0.0 }
 0x7ea   :  { %v6253_v49 = vpack.c.bf16 %v6188_v41, %v6188_v41 }
 0x7ec   :  { %v6957_v63 = vunpack.c.l.bf16 %v6253_v49 }
 0x7ee   :  { %v7085_v22 = vadd.f32 %v7021_v9, %v6957_v63 }
 0x7f0   :  { %v7277_v25 = vmax.f32 %v7085_v22, 0.0 }
 0x7f2   :  { %v7309_v8 = vpack.c.bf16 %v7277_v25, %v7276_v19 }
 0x7f4   :  { %7365 = vmatpush.bf16.msrb.mxu0 %v7309_v8 }
 0x7f8   :  { %7366 = vmatpush.bf16.msrb.mxu0 %v7308_v27 }
 0x7fc   :  { %7367 = vmatpush.bf16.msrb.mxu0 %v7307_v55 }
 0x800   :  { %7368 = vmatpush.bf16.msrb.mxu0 %v12172_v58 }
 0x804   :  { %7369 = vmatpush.bf16.msrb.mxu0 %v12164_v45  ;;  %v7384_v45 = vperm.slane %v7382_v26, 0 }
 0x808   :  { %7370 = vmatpush.bf16.msrb.mxu0 %v12156_v6 }
 0x80c   :  { %7371 = vmatpush.bf16.msrb.mxu0 %v12148_v53 }
 0x810   :  { %7372 = vmatpush.bf16.msrb.mxu0 %v12136_v11 }
 0x813   :  { %7373 = vmatmul.bf16.vlgmr.msrb.gmra.mxu0 %v7321_v46 }
 0x82e   :  { %v7335_v13 = vpop.f32.mrf.mxu3 }
 0x836   :  { %v7337_v51 = vpop.f32.mrf.mxu3 }
 0x845   :  { %v7348_v31 = vpop.f32.mrf.mxu0 }
 0x846   :  { %v7349_v55 = vadd.f32 %v7348_v31, %v7335_v13 }
 0x84d   :  { %v7350_v0 = vpop.f32.mrf.mxu0 }
 0x855   :  { %v7361_v30 = vpop.f32.mrf.mxu3 }
 0x856   :  { %v7362_v58 = vadd.f32 %v7361_v30, %v7349_v55 }
 0x85d   :  { %v7363_v50 = vpop.f32.mrf.mxu3 }
 0x890   :  { %v7374_v15 = vpop.f32.mrf.mxu0 }
 0x891   :  { %v7375_v60 = vadd.f32 %v7374_v15, %v7362_v58 }
 0x893   :  { %v7385_v6 = vadd.f32 %v7384_v45, %v7375_v60 }
 0x895   :  { %7386 = vst [vmem:[%s12210_s7] sm:$0x1] %v7385_v6 }
 0x898   :  { %v7376_v53 = vpop.f32.mrf.mxu0 }
 0x899   :  { %7391 = vsyncpa [#allocation4], 1 }

</bundles_post_ra>
